<compile_context>
chip_gen: v5e
topology: v5e:2x2
jax: 0.10.0
libtpu: 0.0.40
codegen_flags: <defaults>
</compile_context>

<pallas_src>
import numpy as np
import jax
import jax.numpy as jnp
from jax.experimental import pallas as pl
from jax.experimental.pallas import tpu as pltpu

# ---------------- configuration (small, consistent with the module) ----------
DIM = 32                     # C
H = W = 8                    # input_resolution
WINDOW = 4                   # window_size
SHIFT = 2                    # shift_size (exercises the SW-MSA mask path)
NUM_HEADS = 4
HEAD_DIM = DIM // NUM_HEADS
MLP_RATIO = 4.0
HIDDEN = int(DIM * MLP_RATIO)
B = 2
L = H * W
N = WINDOW * WINDOW          # tokens per window
NW = (H // WINDOW) * (W // WINDOW)   # windows per image
BW = B * NW                  # windows total
TOK = B * L                  # tokens total (128)
GROUPS = NUM_HEADS * BW      # (head, image, window) groups for batched attention
SCALE = HEAD_DIM ** -0.5
EPS = 1e-5
WA_COLS = NUM_HEADS * DIM + HIDDEN + 3 * DIM   # 128 + 128 + 96 = 352


# ---------------- glue: window partition / reverse (np & jnp) ----------------
def window_partition(x, ws):
    b, h, w, c = x.shape
    x = x.reshape(b, h // ws, ws, w // ws, ws, c)
    return x.transpose(0, 1, 3, 2, 4, 5).reshape(-1, ws, ws, c)


def window_reverse(windows, ws, h, w):
    b = windows.shape[0] // ((h // ws) * (w // ws))
    x = windows.reshape(b, h // ws, w // ws, ws, ws, -1)
    return x.transpose(0, 1, 3, 2, 4, 5).reshape(b, h, w, -1)


# ---------------- fused pallas kernel -----------------------------------------
def swin_cross_block_kernel(xy_ref, bias_ref, wa_ref, w2_ref, cvec_ref, o_ref):
    """Single step, everything resident in VMEM:
       norm1(x,y) -> one QKV matmul (M=256) -> batched window-cross attention
       over all (head, window) groups -> residual -> MLP -> norm2 -> residual."""
    xy = xy_ref[...]                          # (2*TOK, DIM) f32, rows 0:TOK = x, TOK: = y
    cp = cvec_ref[...]                        # (4, 128) packed small params (f32)

    g1 = cp[0:1, 0:DIM]
    b1 = cp[0:1, DIM:2 * DIM]
    g2 = cp[0:1, 2 * DIM:3 * DIM]
    b2 = cp[0:1, 3 * DIM:4 * DIM]
    bproj = cp[1:2, 0:DIM]
    fb2 = cp[1:2, DIM:2 * DIM]
    bqkv = cp[2:3, 0:3 * DIM]
    fb1 = cp[3:4, :]

    wa = wa_ref[...]                          # (DIM, 352) bf16: [Wp_blockdiag | W1 | Wqkv]
    wp_bd = wa[:, 0:NUM_HEADS * DIM]          # (32, 128)
    w1 = wa[:, NUM_HEADS * DIM:NUM_HEADS * DIM + HIDDEN]                   # (32, 128)
    wqkv = wa[:, NUM_HEADS * DIM + HIDDEN:NUM_HEADS * DIM + HIDDEN + 3 * DIM]  # (32, 96)

    def layernorm(t, g, b):
        mu = jnp.mean(t, axis=-1, keepdims=True)
        var = jnp.mean((t - mu) ** 2, axis=-1, keepdims=True)
        return (t - mu) * jax.lax.rsqrt(var + EPS) * g + b

    # norm1 on the whole x|y slab at once (token-wise, f32)
    xyn = layernorm(xy, g1, b1)               # (256, 32)

    # --- ONE QKV projection for both images & both streams (M=256, bf16 MXU) --
    qkv = jnp.dot(xyn.astype(jnp.bfloat16), wqkv,
                  preferred_element_type=jnp.float32) + bqkv      # (256, 96) f32

    qkv_x = qkv[0:TOK, :]                     # (128, 96)
    qkv_y = qkv[TOK:2 * TOK, :]               # (128, 96)

    q_all = qkv_x[:, 0:DIM] * SCALE           # (128, 32)  q from x
    k_all = qkv_y[:, DIM:2 * DIM]             # (128, 32)  k from y
    v_all = qkv_y[:, 2 * DIM:3 * DIM]         # (128, 32)  v from y

    # fold output projection into V with the block-diagonal weight:
    # column block h of vp_all == V_h @ Wproj[h*hd:(h+1)*hd, :]
    vp_all = jnp.dot(v_all.astype(jnp.bfloat16), wp_bd,
                     preferred_element_type=jnp.float32)          # (128, 128) lane-dense

    q3 = q_all.reshape(BW, N, DIM)            # (8, 16, 32)
    k3 = k_all.reshape(BW, N, DIM)
    vp3 = vp_all.reshape(BW, N, NUM_HEADS * DIM)                  # (8, 16, 128)

    # regroup heads into the batch dim: group g = h*BW + (b*NW + w)
    q_g = jnp.concatenate(
        [q3[:, :, h * HEAD_DIM:(h + 1) * HEAD_DIM] for h in range(NUM_HEADS)], axis=0)
    k_g = jnp.concatenate(
        [k3[:, :, h * HEAD_DIM:(h + 1) * HEAD_DIM] for h in range(NUM_HEADS)], axis=0)
    vp_g = jnp.concatenate(
        [vp3[:, :, h * DIM:(h + 1) * DIM] for h in range(NUM_HEADS)], axis=0)
    # q_g/k_g: (GROUPS, N, HEAD_DIM); vp_g: (GROUPS, N, DIM)

    # --- single batched score + bias + softmax + AV over all 32 groups --------
    s = jnp.einsum("gnd,gmd->gnm", q_g.astype(jnp.bfloat16), k_g.astype(jnp.bfloat16),
                   preferred_element_type=jnp.float32)            # (32, 16, 16)
    s = s + bias_ref[...]                                         # rel-pos bias + shift mask
    s = s - jnp.max(s, axis=-1, keepdims=True)
    p = jnp.exp(s)
    p = p * pl.reciprocal(jnp.sum(p, axis=-1, keepdims=True), approx=True)

    ctx = jnp.einsum("gnm,gmd->gnd", p.astype(jnp.bfloat16), vp_g.astype(jnp.bfloat16),
                     preferred_element_type=jnp.float32)          # (32, 16, 32)

    # sum the (already projected) per-head contributions
    attn_out = (ctx[0:BW] + ctx[BW:2 * BW] + ctx[2 * BW:3 * BW]
                + ctx[3 * BW:4 * BW]).reshape(TOK, DIM)

    # residual 1 (shortcut = un-normalized windowed x; proj bias added once)
    x1 = xy[0:TOK, :] + attn_out + bproj

    # --- MLP + norm2 + residual (lane-dense bf16 matmuls on the full slab) ----
    hmid = jnp.dot(x1.astype(jnp.bfloat16), w1,
                   preferred_element_type=jnp.float32) + fb1
    hmid = jax.nn.gelu(hmid, approximate=True)
    m = jnp.dot(hmid.astype(jnp.bfloat16), w2_ref[...],
                preferred_element_type=jnp.float32) + fb2
    m = layernorm(m, g2, b2)
    o_ref[...] = (x1 + m).astype(o_ref.dtype)


# ---------------- pallas_call wrapper -----------------------------------------
def fused_block_pallas(xy, bias_g, wa, w2, cvec):
    return pl.pallas_call(
        swin_cross_block_kernel,
        out_shape=jax.ShapeDtypeStruct((TOK, DIM), jnp.float32),
        grid=(1,),
        in_specs=[
            pl.BlockSpec((2 * TOK, DIM), lambda i: (0, 0)),
            pl.BlockSpec((GROUPS, N, N), lambda i: (0, 0, 0)),
            pl.BlockSpec((DIM, WA_COLS), lambda i: (0, 0)),
            pl.BlockSpec((HIDDEN, DIM), lambda i: (0, 0)),
            pl.BlockSpec((4, 128), lambda i: (0, 0)),
        ],
        out_specs=pl.BlockSpec((TOK, DIM), lambda i: (0, 0)),
        compiler_params=pltpu.CompilerParams(dimension_semantics=("arbitrary",)),
    )(xy, bias_g, wa, w2, cvec)


# ---------------- parameter / buffer construction -----------------------------
def init_params(key):
    ks = jax.random.split(key, 8)
    t = lambda k, s: 0.02 * jax.random.normal(k, s, jnp.float32)
    return {
        "g1": jnp.ones((1, DIM), jnp.float32),
        "b1": jnp.zeros((1, DIM), jnp.float32),
        "wqkv": t(ks[0], (DIM, 3 * DIM)),
        "bqkv": t(ks[1], (1, 3 * DIM)),
        "wproj": t(ks[2], (DIM, DIM)),
        "bproj": t(ks[3], (1, DIM)),
        "rel_table": t(ks[4], ((2 * WINDOW - 1) ** 2, NUM_HEADS)),
        "w1": t(ks[5], (DIM, HIDDEN)),
        "fb1": t(ks[6], (1, HIDDEN)),
        "w2": t(ks[7], (HIDDEN, DIM)),
        "fb2": jnp.zeros((1, DIM), jnp.float32),
        "g2": jnp.ones((1, DIM), jnp.float32),
        "b2": jnp.zeros((1, DIM), jnp.float32),
    }


def relative_position_index(ws):
    coords = np.stack(np.meshgrid(np.arange(ws), np.arange(ws), indexing="ij"))
    flat = coords.reshape(2, -1)
    rel = flat[:, :, None] - flat[:, None, :]
    rel = rel.transpose(1, 2, 0).copy()
    rel[:, :, 0] += ws - 1
    rel[:, :, 1] += ws - 1
    rel[:, :, 0] *= 2 * ws - 1
    return rel.sum(-1)                                   # (N, N) int


def build_attn_mask():
    if SHIFT == 0:
        return np.zeros((NW, N, N), np.float32)
    img_mask = np.zeros((1, H, W, 1), np.float32)
    slices = (slice(0, -WINDOW), slice(-WINDOW, -SHIFT), slice(-SHIFT, None))
    cnt = 0
    for hs in slices:
        for ws_ in slices:
            img_mask[:, hs, ws_, :] = cnt
            cnt += 1
    mw = window_partition(img_mask, WINDOW).reshape(-1, N)
    am = mw[:, None, :] - mw[:, :, None]
    return np.where(am != 0, -100.0, 0.0).astype(np.float32)   # (nW, N, N)


def build_bias(params):
    """(NW, nH, N, N) rel-pos bias + shift mask (reference layout, not tiled by B)."""
    rpi = relative_position_index(WINDOW)
    rel = params["rel_table"][rpi.reshape(-1)].reshape(N, N, NUM_HEADS)
    rel = jnp.transpose(rel, (2, 0, 1))                  # (nH, N, N)
    mask = jnp.asarray(build_attn_mask())                # (nW, N, N)
    return rel[None, :, :, :] + mask[:, None, :, :]      # (nW, nH, N, N)


def bias_to_groups(bias_wh):
    """(NW, nH, N, N) -> (GROUPS, N, N) ordered g = h*B*NW + b*NW + w."""
    bias_hw = jnp.transpose(bias_wh, (1, 0, 2, 3))       # (nH, NW, N, N)
    bias_g = jnp.broadcast_to(bias_hw[:, None], (NUM_HEADS, B, NW, N, N))
    return bias_g.reshape(GROUPS, N, N)


def build_blockdiag_proj(wproj):
    """(DIM, DIM) -> block-diagonal (DIM, nH*DIM) so V_all @ Wbd gives per-head V_h @ Wp_h."""
    wbd = jnp.zeros((DIM, NUM_HEADS * DIM), jnp.float32)
    for h in range(NUM_HEADS):
        wbd = wbd.at[h * HEAD_DIM:(h + 1) * HEAD_DIM, h * DIM:(h + 1) * DIM].set(
            wproj[h * HEAD_DIM:(h + 1) * HEAD_DIM, :])
    return wbd


def pack_const_params(params):
    """Pack the 8 small vectors into one (4, 128) f32 slab (single DMA)."""
    cv = jnp.zeros((4, 128), jnp.float32)
    cv = cv.at[0, 0:DIM].set(params["g1"][0])
    cv = cv.at[0, DIM:2 * DIM].set(params["b1"][0])
    cv = cv.at[0, 2 * DIM:3 * DIM].set(params["g2"][0])
    cv = cv.at[0, 3 * DIM:4 * DIM].set(params["b2"][0])
    cv = cv.at[1, 0:DIM].set(params["bproj"][0])
    cv = cv.at[1, DIM:2 * DIM].set(params["fb2"][0])
    cv = cv.at[2, 0:3 * DIM].set(params["bqkv"][0])
    cv = cv.at[3, :].set(params["fb1"][0])
    return cv


def build_token_perm():
    """Combined shift-roll + window-partition as ONE static token permutation."""
    idx = np.arange(L).reshape(H, W)
    if SHIFT > 0:
        idx = np.roll(idx, (-SHIFT, -SHIFT), axis=(0, 1))
    idx = idx.reshape(H // WINDOW, WINDOW, W // WINDOW, WINDOW)
    perm = idx.transpose(0, 2, 1, 3).reshape(-1)         # windowed[i] = flat[perm[i]]
    inv = np.argsort(perm)
    return perm, inv


# ---------------- full forward -------------------------------------------------
def swin_block_cross_forward(x, y, params, bias_wh):
    b, l, c = x.shape
    assert b == B and l == L and c == DIM
    perm, inv_perm = build_token_perm()

    # one gather per tensor replaces roll + window_partition
    xw = x[:, perm, :].reshape(TOK, c)
    yw = y[:, perm, :].reshape(TOK, c)
    xy = jnp.concatenate([xw, yw], axis=0)               # (2*TOK, C), single input DMA

    wa = jnp.concatenate(
        [build_blockdiag_proj(params["wproj"]), params["w1"], params["wqkv"]],
        axis=1).astype(jnp.bfloat16)                     # (32, 352) packed bf16 weights
    w2 = params["w2"].astype(jnp.bfloat16)               # (128, 32)
    cvec = pack_const_params(params)                     # (4, 128)
    bias_g = bias_to_groups(bias_wh)                     # (GROUPS, N, N)

    outw = fused_block_pallas(xy, bias_g, wa, w2, cvec)  # (TOK, C) windowed order
    # single gather replaces window_reverse + reverse roll
    return outw.reshape(b, l, c)[:, inv_perm, :]


# ---------------- pure-JAX reference (for a sanity check) ---------------------
def reference_forward(x, y, params, bias):
    hp = jax.lax.Precision.HIGHEST
    c = DIM

    def ln(t, g, bb):
        mu = jnp.mean(t, -1, keepdims=True)
        var = jnp.mean((t - mu) ** 2, -1, keepdims=True)
        return (t - mu) / jnp.sqrt(var + EPS) * g + bb

    shortcut = x
    xn = ln(x, params["g1"][0], params["b1"][0]).reshape(B, H, W, c)
    yn = ln(y, params["g1"][0], params["b1"][0]).reshape(B, H, W, c)
    if SHIFT > 0:
        xn = jnp.roll(xn, (-SHIFT, -SHIFT), (1, 2))
        yn = jnp.roll(yn, (-SHIFT, -SHIFT), (1, 2))
    xw = window_partition(xn, WINDOW).reshape(-1, N, c)
    yw = window_partition(yn, WINDOW).reshape(-1, N, c)
    qkv_x = jnp.dot(xw, params["wqkv"], precision=hp) + params["bqkv"][0]
    qkv_y = jnp.dot(yw, params["wqkv"], precision=hp) + params["bqkv"][0]
    nw_tot = xw.shape[0]
    rs = lambda t: t.reshape(nw_tot, N, NUM_HEADS, HEAD_DIM).transpose(0, 2, 1, 3)
    q, k, v = rs(qkv_x[..., :c]), rs(qkv_y[..., c:2 * c]), rs(qkv_y[..., 2 * c:])
    attn = jnp.einsum("whnd,whmd->whnm", q * SCALE, k, precision=hp)
    attn = attn + jnp.tile(bias, (B, 1, 1, 1))           # bias is (nW, nH, N, N)
    attn = jax.nn.softmax(attn, axis=-1)
    o = jnp.einsum("whnm,whmd->whnd", attn, v, precision=hp)
    o = o.transpose(0, 2, 1, 3).reshape(nw_tot, N, c)
    o = jnp.dot(o, params["wproj"], precision=hp) + params["bproj"][0]
    o = window_reverse(o.reshape(-1, WINDOW, WINDOW, c), WINDOW, H, W)
    if SHIFT > 0:
        o = jnp.roll(o, (SHIFT, SHIFT), (1, 2))
    x1 = shortcut + o.reshape(B, L, c)
    hdd = jax.nn.gelu(jnp.dot(x1, params["w1"], precision=hp) + params["fb1"][0],
                      approximate=True)
    m = jnp.dot(hdd, params["w2"], precision=hp) + params["fb2"][0]
    m = ln(m, params["g2"][0], params["b2"][0])
    return x1 + m


# ---------------- main ----------------------------------------------------------
if __name__ == "__main__":
    key = jax.random.PRNGKey(0)
    kx, ky, kp = jax.random.split(key, 3)
    params = init_params(kp)
    bias_wh = build_bias(params)

    x = jax.random.normal(kx, (B, L, DIM), jnp.float32)
    y = jax.random.normal(ky, (B, L, DIM), jnp.float32)

    out = jax.block_until_ready(swin_block_cross_forward(x, y, params, bias_wh))
    ref = jax.block_until_ready(reference_forward(x, y, params, bias_wh))

    assert out.shape == (B, L, DIM)
    # tolerance accounts for bf16 MXU operands (f32 accumulation) + approx reciprocal
    np.testing.assert_allclose(np.asarray(out), np.asarray(ref),
                               rtol=2e-2, atol=2e-2)
    print("KERNEL_OK")
</pallas_src>

<mosaic_0001>
module attributes {stable_mosaic.version = 11 : i64} {
  func.func @swin_cross_block_kernel(%arg0: i32, %arg1: memref<256x32xf32, #tpu.memory_space<vmem>>, %arg2: memref<32x16x16xf32, #tpu.memory_space<vmem>>, %arg3: memref<32x352xbf16, #tpu.memory_space<vmem>>, %arg4: memref<128x32xbf16, #tpu.memory_space<vmem>>, %arg5: memref<4x128xf32, #tpu.memory_space<vmem>>, %arg6: memref<128x32xf32, #tpu.memory_space<vmem>>) attributes {dimension_semantics = [#tpu.dimension_semantics<arbitrary>], iteration_bounds = array<i64: 1>, scalar_prefetch = 0 : i64, scratch_operands = 0 : i64, tpu.core_type = #tpu.core_type<tc>, window_params = [{pipeline_mode = #tpu.pipeline_mode<synchronous>, transform_indices = @transform_0, window_bounds = array<i64: 256, 32>}, {pipeline_mode = #tpu.pipeline_mode<synchronous>, transform_indices = @transform_1, window_bounds = array<i64: 32, 16, 16>}, {pipeline_mode = #tpu.pipeline_mode<synchronous>, transform_indices = @transform_2, window_bounds = array<i64: 32, 352>}, {pipeline_mode = #tpu.pipeline_mode<synchronous>, transform_indices = @transform_3, window_bounds = array<i64: 128, 32>}, {pipeline_mode = #tpu.pipeline_mode<synchronous>, transform_indices = @transform_4, window_bounds = array<i64: 4, 128>}, {pipeline_mode = #tpu.pipeline_mode<synchronous>, transform_indices = @transform_5, window_bounds = array<i64: 128, 32>}]} {
    %c0 = arith.constant 0 : index
    %c0_0 = arith.constant 0 : index
    %0 = vector.load %arg1[%c0, %c0_0] : memref<256x32xf32, #tpu.memory_space<vmem>>, vector<256x32xf32>
    %c0_1 = arith.constant 0 : index
    %c0_2 = arith.constant 0 : index
    %1 = vector.load %arg5[%c0_1, %c0_2] : memref<4x128xf32, #tpu.memory_space<vmem>>, vector<4x128xf32>
    %2 = vector.extract_strided_slice %1 {offsets = [0, 0], sizes = [1, 32], strides = [1, 1]} : vector<4x128xf32> to vector<1x32xf32>
    %3 = vector.extract_strided_slice %1 {offsets = [0, 32], sizes = [1, 32], strides = [1, 1]} : vector<4x128xf32> to vector<1x32xf32>
    %4 = vector.extract_strided_slice %1 {offsets = [0, 64], sizes = [1, 32], strides = [1, 1]} : vector<4x128xf32> to vector<1x32xf32>
    %5 = vector.extract_strided_slice %1 {offsets = [0, 96], sizes = [1, 32], strides = [1, 1]} : vector<4x128xf32> to vector<1x32xf32>
    %6 = vector.extract_strided_slice %1 {offsets = [1, 0], sizes = [1, 32], strides = [1, 1]} : vector<4x128xf32> to vector<1x32xf32>
    %7 = vector.extract_strided_slice %1 {offsets = [1, 32], sizes = [1, 32], strides = [1, 1]} : vector<4x128xf32> to vector<1x32xf32>
    %8 = vector.extract_strided_slice %1 {offsets = [2, 0], sizes = [1, 96], strides = [1, 1]} : vector<4x128xf32> to vector<1x96xf32>
    %9 = vector.extract_strided_slice %1 {offsets = [3, 0], sizes = [1, 128], strides = [1, 1]} : vector<4x128xf32> to vector<1x128xf32>
    %c0_3 = arith.constant 0 : index
    %c0_4 = arith.constant 0 : index
    %10 = vector.load %arg3[%c0_3, %c0_4] : memref<32x352xbf16, #tpu.memory_space<vmem>>, vector<32x352xbf16>
    %11 = vector.extract_strided_slice %10 {offsets = [0, 0], sizes = [32, 128], strides = [1, 1]} : vector<32x352xbf16> to vector<32x128xbf16>
    %12 = vector.extract_strided_slice %10 {offsets = [0, 128], sizes = [32, 128], strides = [1, 1]} : vector<32x352xbf16> to vector<32x128xbf16>
    %13 = vector.extract_strided_slice %10 {offsets = [0, 256], sizes = [32, 96], strides = [1, 1]} : vector<32x352xbf16> to vector<32x96xbf16>
    %cst = arith.constant dense<0.000000e+00> : vector<256xf32>
    %14 = vector.multi_reduction <add>, %0, %cst [1] : vector<256x32xf32> to vector<256xf32>
    %15 = vector.shape_cast %14 : vector<256xf32> to vector<256x1xf32>
    %cst_5 = arith.constant 3.200000e+01 : f32
    %16 = vector.broadcast %cst_5 : f32 to vector<256x1xf32>
    %17 = arith.divf %15, %16 : vector<256x1xf32>
    %18 = vector.broadcast %17 : vector<256x1xf32> to vector<256x32xf32>
    %19 = arith.subf %0, %18 : vector<256x32xf32>
    %20 = arith.mulf %19, %19 : vector<256x32xf32>
    %cst_6 = arith.constant dense<0.000000e+00> : vector<256xf32>
    %21 = vector.multi_reduction <add>, %20, %cst_6 [1] : vector<256x32xf32> to vector<256xf32>
    %22 = vector.shape_cast %21 : vector<256xf32> to vector<256x1xf32>
    %cst_7 = arith.constant 3.200000e+01 : f32
    %23 = vector.broadcast %cst_7 : f32 to vector<256x1xf32>
    %24 = arith.divf %22, %23 : vector<256x1xf32>
    %25 = vector.broadcast %17 : vector<256x1xf32> to vector<256x32xf32>
    %26 = arith.subf %0, %25 : vector<256x32xf32>
    %cst_8 = arith.constant 9.99999974E-6 : f32
    %27 = vector.broadcast %cst_8 : f32 to vector<256x1xf32>
    %28 = arith.addf %24, %27 : vector<256x1xf32>
    %29 = math.rsqrt %28 : vector<256x1xf32>
    %30 = vector.broadcast %29 : vector<256x1xf32> to vector<256x32xf32>
    %31 = arith.mulf %26, %30 : vector<256x32xf32>
    %32 = vector.broadcast %2 : vector<1x32xf32> to vector<256x32xf32>
    %33 = arith.mulf %31, %32 : vector<256x32xf32>
    %34 = vector.broadcast %3 : vector<1x32xf32> to vector<256x32xf32>
    %35 = arith.addf %33, %34 : vector<256x32xf32>
    %36 = arith.truncf %35 : vector<256x32xf32> to vector<256x32xbf16>
    %cst_9 = arith.constant dense<0.000000e+00> : vector<256x96xf32>
    %37 = tpu.matmul %36, %13, %cst_9 {dimension_numbers = #tpu.dot_dimension_numbers<[1], [0], [0], [1], [0, 0, 1, 1], [], []>} : vector<256x32xbf16>, vector<32x96xbf16>, vector<256x96xf32> -> vector<256x96xf32>
    %38 = vector.broadcast %8 : vector<1x96xf32> to vector<256x96xf32>
    %39 = arith.addf %37, %38 : vector<256x96xf32>
    %40 = vector.extract_strided_slice %39 {offsets = [0, 0], sizes = [128, 96], strides = [1, 1]} : vector<256x96xf32> to vector<128x96xf32>
    %41 = vector.extract_strided_slice %39 {offsets = [128, 0], sizes = [128, 96], strides = [1, 1]} : vector<256x96xf32> to vector<128x96xf32>
    %42 = vector.extract_strided_slice %40 {offsets = [0, 0], sizes = [128, 32], strides = [1, 1]} : vector<128x96xf32> to vector<128x32xf32>
    %cst_10 = arith.constant 0.353553385 : f32
    %43 = vector.broadcast %cst_10 : f32 to vector<128x32xf32>
    %44 = arith.mulf %42, %43 : vector<128x32xf32>
    %45 = vector.extract_strided_slice %41 {offsets = [0, 32], sizes = [128, 32], strides = [1, 1]} : vector<128x96xf32> to vector<128x32xf32>
    %46 = vector.extract_strided_slice %41 {offsets = [0, 64], sizes = [128, 32], strides = [1, 1]} : vector<128x96xf32> to vector<128x32xf32>
    %47 = arith.truncf %46 : vector<128x32xf32> to vector<128x32xbf16>
    %cst_11 = arith.constant dense<0.000000e+00> : vector<128x128xf32>
    %48 = tpu.matmul %47, %11, %cst_11 {dimension_numbers = #tpu.dot_dimension_numbers<[1], [0], [0], [1], [0, 0, 1, 1], [], []>} : vector<128x32xbf16>, vector<32x128xbf16>, vector<128x128xf32> -> vector<128x128xf32>
    %49 = vector.shape_cast %44 : vector<128x32xf32> to vector<8x16x32xf32>
    %50 = vector.shape_cast %45 : vector<128x32xf32> to vector<8x16x32xf32>
    %51 = vector.shape_cast %48 : vector<128x128xf32> to vector<8x16x128xf32>
    %52 = vector.extract_strided_slice %49 {offsets = [0, 0, 0], sizes = [8, 16, 8], strides = [1, 1, 1]} : vector<8x16x32xf32> to vector<8x16x8xf32>
    %53 = vector.extract_strided_slice %49 {offsets = [0, 0, 8], sizes = [8, 16, 8], strides = [1, 1, 1]} : vector<8x16x32xf32> to vector<8x16x8xf32>
    %54 = vector.extract_strided_slice %49 {offsets = [0, 0, 16], sizes = [8, 16, 8], strides = [1, 1, 1]} : vector<8x16x32xf32> to vector<8x16x8xf32>
    %55 = vector.extract_strided_slice %49 {offsets = [0, 0, 24], sizes = [8, 16, 8], strides = [1, 1, 1]} : vector<8x16x32xf32> to vector<8x16x8xf32>
    %56 = tpu.concatenate %52, %53, %54, %55 in 0 : vector<8x16x8xf32>, vector<8x16x8xf32>, vector<8x16x8xf32>, vector<8x16x8xf32> -> vector<32x16x8xf32>
    %57 = vector.extract_strided_slice %50 {offsets = [0, 0, 0], sizes = [8, 16, 8], strides = [1, 1, 1]} : vector<8x16x32xf32> to vector<8x16x8xf32>
    %58 = vector.extract_strided_slice %50 {offsets = [0, 0, 8], sizes = [8, 16, 8], strides = [1, 1, 1]} : vector<8x16x32xf32> to vector<8x16x8xf32>
    %59 = vector.extract_strided_slice %50 {offsets = [0, 0, 16], sizes = [8, 16, 8], strides = [1, 1, 1]} : vector<8x16x32xf32> to vector<8x16x8xf32>
    %60 = vector.extract_strided_slice %50 {offsets = [0, 0, 24], sizes = [8, 16, 8], strides = [1, 1, 1]} : vector<8x16x32xf32> to vector<8x16x8xf32>
    %61 = tpu.concatenate %57, %58, %59, %60 in 0 : vector<8x16x8xf32>, vector<8x16x8xf32>, vector<8x16x8xf32>, vector<8x16x8xf32> -> vector<32x16x8xf32>
    %62 = vector.extract_strided_slice %51 {offsets = [0, 0, 0], sizes = [8, 16, 32], strides = [1, 1, 1]} : vector<8x16x128xf32> to vector<8x16x32xf32>
    %63 = vector.extract_strided_slice %51 {offsets = [0, 0, 32], sizes = [8, 16, 32], strides = [1, 1, 1]} : vector<8x16x128xf32> to vector<8x16x32xf32>
    %64 = vector.extract_strided_slice %51 {offsets = [0, 0, 64], sizes = [8, 16, 32], strides = [1, 1, 1]} : vector<8x16x128xf32> to vector<8x16x32xf32>
    %65 = vector.extract_strided_slice %51 {offsets = [0, 0, 96], sizes = [8, 16, 32], strides = [1, 1, 1]} : vector<8x16x128xf32> to vector<8x16x32xf32>
    %66 = tpu.concatenate %62, %63, %64, %65 in 0 : vector<8x16x32xf32>, vector<8x16x32xf32>, vector<8x16x32xf32>, vector<8x16x32xf32> -> vector<32x16x32xf32>
    %67 = arith.truncf %56 : vector<32x16x8xf32> to vector<32x16x8xbf16>
    %68 = arith.truncf %61 : vector<32x16x8xf32> to vector<32x16x8xbf16>
    "tpu.trace_start"() <{level = 10 : i32, message = "gnd,gmd->gnm"}> : () -> ()
    %cst_12 = arith.constant dense<0.000000e+00> : vector<32x16x16xf32>
    %69 = tpu.matmul %67, %68, %cst_12 {dimension_numbers = #tpu.dot_dimension_numbers<[2], [2], [1], [1], [0, 0, 0, 1, 1, 1], [0], [0]>} : vector<32x16x8xbf16>, vector<32x16x8xbf16>, vector<32x16x16xf32> -> vector<32x16x16xf32>
    "tpu.trace_stop"() : () -> ()
    %c0_13 = arith.constant 0 : index
    %c0_14 = arith.constant 0 : index
    %c0_15 = arith.constant 0 : index
    %70 = vector.load %arg2[%c0_13, %c0_14, %c0_15] : memref<32x16x16xf32, #tpu.memory_space<vmem>>, vector<32x16x16xf32>
    %71 = arith.addf %69, %70 : vector<32x16x16xf32>
    %cst_16 = arith.constant dense<0xFF800000> : vector<32x16xf32>
    %72 = vector.multi_reduction <maximumf>, %71, %cst_16 [2] : vector<32x16x16xf32> to vector<32x16xf32>
    %73 = vector.shape_cast %72 : vector<32x16xf32> to vector<32x16x1xf32>
    %74 = vector.broadcast %73 : vector<32x16x1xf32> to vector<32x16x16xf32>
    %75 = arith.subf %71, %74 : vector<32x16x16xf32>
    %76 = math.exp %75 : vector<32x16x16xf32>
    %cst_17 = arith.constant dense<0.000000e+00> : vector<32x16xf32>
    %77 = vector.multi_reduction <add>, %76, %cst_17 [2] : vector<32x16x16xf32> to vector<32x16xf32>
    %78 = vector.shape_cast %77 : vector<32x16xf32> to vector<32x16x1xf32>
    %79 = tpu.reciprocal %78 {approx = true} : vector<32x16x1xf32> -> vector<32x16x1xf32>
    %80 = vector.broadcast %79 : vector<32x16x1xf32> to vector<32x16x16xf32>
    %81 = arith.mulf %76, %80 : vector<32x16x16xf32>
    %82 = arith.truncf %81 : vector<32x16x16xf32> to vector<32x16x16xbf16>
    %83 = arith.truncf %66 : vector<32x16x32xf32> to vector<32x16x32xbf16>
    "tpu.trace_start"() <{level = 10 : i32, message = "gnm,gmd->gnd"}> : () -> ()
    %cst_18 = arith.constant dense<0.000000e+00> : vector<32x16x32xf32>
    %84 = tpu.matmul %82, %83, %cst_18 {dimension_numbers = #tpu.dot_dimension_numbers<[2], [1], [1], [2], [0, 0, 0, 1, 1, 2], [0], [0]>} : vector<32x16x16xbf16>, vector<32x16x32xbf16>, vector<32x16x32xf32> -> vector<32x16x32xf32>
    "tpu.trace_stop"() : () -> ()
    %85 = vector.extract_strided_slice %84 {offsets = [0, 0, 0], sizes = [8, 16, 32], strides = [1, 1, 1]} : vector<32x16x32xf32> to vector<8x16x32xf32>
    %86 = vector.extract_strided_slice %84 {offsets = [8, 0, 0], sizes = [8, 16, 32], strides = [1, 1, 1]} : vector<32x16x32xf32> to vector<8x16x32xf32>
    %87 = arith.addf %85, %86 : vector<8x16x32xf32>
    %88 = vector.extract_strided_slice %84 {offsets = [16, 0, 0], sizes = [8, 16, 32], strides = [1, 1, 1]} : vector<32x16x32xf32> to vector<8x16x32xf32>
    %89 = arith.addf %87, %88 : vector<8x16x32xf32>
    %90 = vector.extract_strided_slice %84 {offsets = [24, 0, 0], sizes = [8, 16, 32], strides = [1, 1, 1]} : vector<32x16x32xf32> to vector<8x16x32xf32>
    %91 = arith.addf %89, %90 : vector<8x16x32xf32>
    %92 = vector.shape_cast %91 : vector<8x16x32xf32> to vector<128x32xf32>
    %93 = vector.extract_strided_slice %0 {offsets = [0, 0], sizes = [128, 32], strides = [1, 1]} : vector<256x32xf32> to vector<128x32xf32>
    %94 = arith.addf %93, %92 : vector<128x32xf32>
    %95 = vector.broadcast %6 : vector<1x32xf32> to vector<128x32xf32>
    %96 = arith.addf %94, %95 : vector<128x32xf32>
    %97 = arith.truncf %96 : vector<128x32xf32> to vector<128x32xbf16>
    %cst_19 = arith.constant dense<0.000000e+00> : vector<128x128xf32>
    %98 = tpu.matmul %97, %12, %cst_19 {dimension_numbers = #tpu.dot_dimension_numbers<[1], [0], [0], [1], [0, 0, 1, 1], [], []>} : vector<128x32xbf16>, vector<32x128xbf16>, vector<128x128xf32> -> vector<128x128xf32>
    %99 = vector.broadcast %9 : vector<1x128xf32> to vector<128x128xf32>
    %100 = arith.addf %98, %99 : vector<128x128xf32>
    %101 = arith.mulf %100, %100 : vector<128x128xf32>
    %102 = arith.mulf %100, %101 : vector<128x128xf32>
    %cst_20 = arith.constant 4.471500e-02 : f32
    %103 = vector.broadcast %cst_20 : f32 to vector<128x128xf32>
    %104 = arith.mulf %103, %102 : vector<128x128xf32>
    %105 = arith.addf %100, %104 : vector<128x128xf32>
    %cst_21 = arith.constant 0.797884583 : f32
    %106 = vector.broadcast %cst_21 : f32 to vector<128x128xf32>
    %107 = arith.mulf %106, %105 : vector<128x128xf32>
    %108 = math.tanh %107 : vector<128x128xf32>
    %cst_22 = arith.constant 1.000000e+00 : f32
    %109 = vector.broadcast %cst_22 : f32 to vector<128x128xf32>
    %110 = arith.addf %109, %108 : vector<128x128xf32>
    %cst_23 = arith.constant 5.000000e-01 : f32
    %111 = vector.broadcast %cst_23 : f32 to vector<128x128xf32>
    %112 = arith.mulf %111, %110 : vector<128x128xf32>
    %113 = arith.mulf %100, %112 : vector<128x128xf32>
    %114 = arith.truncf %113 : vector<128x128xf32> to vector<128x128xbf16>
    %c0_24 = arith.constant 0 : index
    %c0_25 = arith.constant 0 : index
    %115 = vector.load %arg4[%c0_24, %c0_25] : memref<128x32xbf16, #tpu.memory_space<vmem>>, vector<128x32xbf16>
    %cst_26 = arith.constant dense<0.000000e+00> : vector<128x32xf32>
    %116 = tpu.matmul %114, %115, %cst_26 {dimension_numbers = #tpu.dot_dimension_numbers<[1], [0], [0], [1], [0, 0, 1, 1], [], []>} : vector<128x128xbf16>, vector<128x32xbf16>, vector<128x32xf32> -> vector<128x32xf32>
    %117 = vector.broadcast %7 : vector<1x32xf32> to vector<128x32xf32>
    %118 = arith.addf %116, %117 : vector<128x32xf32>
    %cst_27 = arith.constant dense<0.000000e+00> : vector<128xf32>
    %119 = vector.multi_reduction <add>, %118, %cst_27 [1] : vector<128x32xf32> to vector<128xf32>
    %120 = vector.shape_cast %119 : vector<128xf32> to vector<128x1xf32>
    %cst_28 = arith.constant 3.200000e+01 : f32
    %121 = vector.broadcast %cst_28 : f32 to vector<128x1xf32>
    %122 = arith.divf %120, %121 : vector<128x1xf32>
    %123 = vector.broadcast %122 : vector<128x1xf32> to vector<128x32xf32>
    %124 = arith.subf %118, %123 : vector<128x32xf32>
    %125 = arith.mulf %124, %124 : vector<128x32xf32>
    %cst_29 = arith.constant dense<0.000000e+00> : vector<128xf32>
    %126 = vector.multi_reduction <add>, %125, %cst_29 [1] : vector<128x32xf32> to vector<128xf32>
    %127 = vector.shape_cast %126 : vector<128xf32> to vector<128x1xf32>
    %cst_30 = arith.constant 3.200000e+01 : f32
    %128 = vector.broadcast %cst_30 : f32 to vector<128x1xf32>
    %129 = arith.divf %127, %128 : vector<128x1xf32>
    %130 = vector.broadcast %122 : vector<128x1xf32> to vector<128x32xf32>
    %131 = arith.subf %118, %130 : vector<128x32xf32>
    %cst_31 = arith.constant 9.99999974E-6 : f32
    %132 = vector.broadcast %cst_31 : f32 to vector<128x1xf32>
    %133 = arith.addf %129, %132 : vector<128x1xf32>
    %134 = math.rsqrt %133 : vector<128x1xf32>
    %135 = vector.broadcast %134 : vector<128x1xf32> to vector<128x32xf32>
    %136 = arith.mulf %131, %135 : vector<128x32xf32>
    %137 = vector.broadcast %4 : vector<1x32xf32> to vector<128x32xf32>
    %138 = arith.mulf %136, %137 : vector<128x32xf32>
    %139 = vector.broadcast %5 : vector<1x32xf32> to vector<128x32xf32>
    %140 = arith.addf %138, %139 : vector<128x32xf32>
    %141 = arith.addf %96, %140 : vector<128x32xf32>
    %c0_32 = arith.constant 0 : index
    %c0_33 = arith.constant 0 : index
    %142 = vector.load %arg6[%c0_32, %c0_33] : memref<128x32xf32, #tpu.memory_space<vmem>>, vector<128x32xf32>
    tpu.vector_store %arg6[%c0_32, %c0_33], %141 {strides = array<i32>} : memref<128x32xf32, #tpu.memory_space<vmem>>, vector<128x32xf32>,
    return
  }
  func.func @transform_0(%arg0: i32) -> (i32, i32) {
    %c0_i32 = arith.constant 0 : i32
    %c0_i32_0 = arith.constant 0 : i32
    %c0_i32_1 = arith.constant 0 : i32
    return %c0_i32, %c0_i32_0 : i32, i32
  }
  func.func @transform_1(%arg0: i32) -> (i32, i32, i32) {
    %c0_i32 = arith.constant 0 : i32
    %c0_i32_0 = arith.constant 0 : i32
    %c0_i32_1 = arith.constant 0 : i32
    %c0_i32_2 = arith.constant 0 : i32
    return %c0_i32, %c0_i32_0, %c0_i32_1 : i32, i32, i32
  }
  func.func @transform_2(%arg0: i32) -> (i32, i32) {
    %c0_i32 = arith.constant 0 : i32
    %c0_i32_0 = arith.constant 0 : i32
    %c0_i32_1 = arith.constant 0 : i32
    return %c0_i32, %c0_i32_0 : i32, i32
  }
  func.func @transform_3(%arg0: i32) -> (i32, i32) {
    %c0_i32 = arith.constant 0 : i32
    %c0_i32_0 = arith.constant 0 : i32
    %c0_i32_1 = arith.constant 0 : i32
    return %c0_i32, %c0_i32_0 : i32, i32
  }
  func.func @transform_4(%arg0: i32) -> (i32, i32) {
    %c0_i32 = arith.constant 0 : i32
    %c0_i32_0 = arith.constant 0 : i32
    %c0_i32_1 = arith.constant 0 : i32
    return %c0_i32, %c0_i32_0 : i32, i32
  }
  func.func @transform_5(%arg0: i32) -> (i32, i32) {
    %c0_i32 = arith.constant 0 : i32
    %c0_i32_0 = arith.constant 0 : i32
    %c0_i32_1 = arith.constant 0 : i32
    return %c0_i32, %c0_i32_0 : i32, i32
  }
}

</mosaic_0001>

<bundles_post_ra>
// kernel: tpu_custom_call.1
= control target key start
LH: loop header
LB: loop body
LE: loop exit
PB: predicated region body
PF: predicated region fallthrough
CT: control target
= control target key end

     0   :  { %vm62_vm0 = vcmask 261120   ;;  %s6374_s9 = smov 96   ;;  %v6375_v16 = vmov 32.0   ;;  %s6376_s20 = smov 112   ;;  %s10013_s0 = inlined_call_operand.vmem [shape: f32[256,32], index: 0, kind: input, shape index: {}]   ;;  %s10014_s4 = inlined_call_operand.vmem [shape: f32[4,128], index: 4, kind: input, shape index: {}]   ;;  %s10015_s2 = inlined_call_operand.vmem [shape: bf16[32,352], index: 2, kind: input, shape index: {}]   ;;  %s10016_s1 = inlined_call_operand.vmem [shape: f32[32,16,16], index: 1, kind: input, shape index: {}]   ;;  %s10017_s3 = inlined_call_operand.vmem [shape: bf16[128,32], index: 3, kind: input, shape index: {}]   ;;  %s10018_s5 = inlined_call_operand.vmem [shape: f32[128,32], index: 5, kind: output, shape index: {}]  }
   0x1   :  { %v23_v0 = vld [vmem:[%s10013_s0 + $0x10] sm:$0xff]  ;;  %v21_v1 = vld [vmem:[%s10013_s0] sm:$0xff]  ;;  %v24_v6 = vld [vmem:[%s10013_s0 + $0x18] sm:$0xff]  ;;  %5971 = vrcp.f32 %v6375_v16  ;;  %s6377_s21 = smov 120   ;;  %s6378_s22 = smov 104  }
   0x2   :  { %v69_v2 = vsel %vm62_vm0, %v23_v0, 0.0  ;;  %v63_v3 = vsel %vm62_vm0, %v21_v1, 0.0  ;;  %v6422_v4 = vld [vmem:[%s10013_s0 + $0x20] sm:$0xff]  ;;  %v22_v7 = vld [vmem:[%s10013_s0 + $0x8] sm:$0xff]  ;;  %v72_v9 = vsel %vm62_vm0, %v24_v6, 0.0  ;;  %v6444_v12 = vld [vmem:[%s10013_s0 + $0x30] sm:$0xff] }
   0x3   :  { %70 = vadd.xlane.f32.xlu1 %v69_v2  ;;  %64 = vadd.xlane.f32.xlu0 %v63_v3  ;;  %v75_v5 = vsel %vm62_vm0, %v6422_v4, 0.0  ;;  %v6435_v8 = vld [vmem:[%s10013_s0 + $0x28] sm:$0xff]  ;;  %v66_v10 = vsel %vm62_vm0, %v22_v7, 0.0  ;;  %v81_v13 = vsel %vm62_vm0, %v6444_v12, 0.0  ;;  %v6451_v14 = vld [vmem:[%s10014_s4] sm:$0xf] }
   0x4   :  { %76 = vadd.xlane.f32.xlu2 %v75_v5  ;;  %v78_v11 = vsel %vm62_vm0, %v6435_v8, 0.0  ;;  %v6454_v15 = vperm.slane %v6451_v14, 0  ;;  %v6472_v34 = vld [vmem:[%s10013_s0 + $0x38] sm:$0xff]  ;;  %v6491_v44 = vld [vmem:[%s10013_s0 + $0x40] sm:$0xff]  ;;  %v6510_v53 = vld [vmem:[%s10013_s0 + $0x50] sm:$0xff]  ;;  %s6379_s23 = smov 64  }
   0x5   :  { %v84_v38 = vsel %vm62_vm0, %v6472_v34, 0.0  ;;  %v87_v46 = vsel %vm62_vm0, %v6491_v44, 0.0  ;;  %v6501_v49 = vld [vmem:[%s10013_s0 + $0x60] sm:$0xff]  ;;  %v6515_v54 = vld [vmem:[%s10013_s0 + $0x48] sm:$0xff]  ;;  %v93_v56 = vsel %vm62_vm0, %v6510_v53, 0.0  ;;  %v6542_v2 = vld [vmem:[%s10013_s0 + $0x58] sm:$0xff] }
   0x6   :  { %10097 = vst [vmem:[#allocation2_spill] sm:$0xff] %v6454_v15  ;;  %v99_v51 = vsel %vm62_vm0, %v6501_v49, 0.0  ;;  %v90_v58 = vsel %vm62_vm0, %v6515_v54, 0.0  ;;  %v96_v5 = vsel %vm62_vm0, %v6542_v2, 0.0  ;;  %v5440_v16 = vld [vmem:[%s10015_s2 + $0x20] sm:$0xf] }
   0x7   :  { %v5972_v17 = vpop.eup %5971  ;;  %s6380_s7 = smov 32  }
   0x8   :  { %v160_v18 = vmul.f32 32.0, %v5972_v17  ;;  %vm164_vm1 = vweird.f32 %v5972_v17 }
   0xa   :  { %v161_v19 = vsub.f32 1.0, %v160_v18 }
   0xb   :  { %73 = vadd.xlane.f32.xlu1 %v72_v9  ;;  %67 = vadd.xlane.f32.xlu0 %v66_v10  ;;  %v6564_v10 = vld [vmem:[%s10013_s0 + $0x88] sm:$0xff] }
   0xc   :  { %79 = vadd.xlane.f32.xlu2 %v78_v11  ;;  %v162_v20 = vmul.f32 %v5972_v17, %v161_v19  ;;  %v114_v11 = vsel %vm62_vm0, %v6564_v10, 0.0  ;;  %v6584_v19 = vld [vmem:[%s10013_s0 + $0xa8] sm:$0xff] }
   0xe   :  { %v163_v21 = vadd.f32 %v5972_v17, %v162_v20 }
  0x10   :  { %v6458_v22 = vsel %vm164_vm1, %v5972_v17, %v163_v21  ;;  %v5591_v17 = vld [vmem:[%s10015_s2 + $0x28] sm:$0xf0] }
  0x11   :  { %10098 = vst [vmem:[#allocation3_spill] sm:$0xff] %v6458_v22  ;;  %v5441_v18 = vor.u32 %v5591_v17, %v5440_v16 }
  0x13   :  { %926 = vmatpush.bf16.msra.mxu0 %v5441_v18  ;;  %5600 = vmatpush.bf16.msra.mxu3 %v5441_v18 }
  0x14   :  { %82 = vadd.xlane.f32.xlu2 %v81_v13 }
  0x2c   :  { %808 = vrot.lane.b32.xlu2 %v6454_v15, %s6374_s9 }
  0x76   :  { %v71_v23 = vpop.xlane.xlu1 %70  ;;  %v65_v24 = vpop.xlane.xlu0 %64 }
  0x77   :  { %v166_v25 = vmul.f32 %v6458_v22, %v65_v24  ;;  %v168_v33 = vmul.f32 %v6458_v22, %v71_v23  ;;  %v77_v40 = vpop.xlane.xlu2 %76  ;;  %v126_v23 = vsel %vm62_vm0, %v6584_v19, 0.0 }
  0x78   :  { %v170_v50 = vmul.f32 %v6458_v22, %v77_v40 }
  0x79   :  { %v6461_v26 = vsub.f32 %v21_v1, %v166_v25  ;;  %v6484_v41 = vsub.f32 %v23_v0, %v168_v33  ;;  %v6537_v1 = vld [vmem:[%s10013_s0 + $0x68] sm:$0xff] }
  0x7a   :  { %v6518_v55 = vsub.f32 %v6422_v4, %v170_v50  ;;  %v102_v4 = vsel %vm62_vm0, %v6537_v1, 0.0  ;;  %v5436_v25 = vld [vmem:[%s10015_s2 + $0x8] sm:$0xf] }
  0x7b   :  { %v230_v27 = vmul.f32 %v6461_v26, %v6461_v26  ;;  %v232_v45 = vmul.f32 %v6484_v41, %v6484_v41 }
  0x7c   :  { %v234_v59 = vmul.f32 %v6518_v55, %v6518_v55 }
  0x7d   :  { %v262_v28 = vsel %vm62_vm0, %v230_v27, 0.0  ;;  %v268_v47 = vsel %vm62_vm0, %v232_v45, 0.0  ;;  %v5588_v27 = vld [vmem:[%s10015_s2 + $0x10] sm:$0xf0] }
  0x7e   :  { %v74_v29 = vpop.xlane.xlu1 %73  ;;  %263 = vadd.xlane.f32.xlu0 %v262_v28  ;;  %v68_v30 = vpop.xlane.xlu0 %67  ;;  %v274_v61 = vsel %vm62_vm0, %v234_v59, 0.0 }
  0x7f   :  { %v169_v31 = vmul.f32 %v6458_v22, %v74_v29  ;;  %v167_v32 = vmul.f32 %v6458_v22, %v68_v30  ;;  %v80_v48 = vpop.xlane.xlu2 %79  ;;  %v5437_v29 = vor.u32 %v5588_v27, %v5436_v25  ;;  %v6600_v30 = vld [vmem:[%s10013_s0 + $0xb0] sm:$0xff] }
  0x80   :  { %v171_v52 = vmul.f32 %v6458_v22, %v80_v48  ;;  %v129_v33 = vsel %vm62_vm0, %v6600_v30, 0.0 }
  0x81   :  { %v6474_v35 = vsub.f32 %v24_v6, %v169_v31  ;;  %v6476_v36 = vsub.f32 %v22_v7, %v167_v32  ;;  %927 = vmatpush.bf16.msra.mxu0 %v5437_v29  ;;  %5601 = vmatpush.bf16.msra.mxu3 %v5437_v29 }
  0x82   :  { %v6523_v57 = vsub.f32 %v6435_v8, %v171_v52  ;;  %v6557_v8 = vld [vmem:[%s10013_s0 + $0x78] sm:$0xff] }
  0x83   :  { %v233_v37 = vmul.f32 %v6474_v35, %v6474_v35  ;;  %v231_v39 = vmul.f32 %v6476_v36, %v6476_v36  ;;  %v108_v9 = vsel %vm62_vm0, %v6557_v8, 0.0 }
  0x84   :  { %v235_v60 = vmul.f32 %v6523_v57, %v6523_v57 }
  0x85   :  { %v271_v42 = vsel %vm62_vm0, %v233_v37, 0.0  ;;  %v265_v43 = vsel %vm62_vm0, %v231_v39, 0.0 }
  0x86   :  { %272 = vadd.xlane.f32.xlu2 %v271_v42  ;;  %85 = vadd.xlane.f32.xlu0 %v84_v38  ;;  %v277_v62 = vsel %vm62_vm0, %v235_v60, 0.0 }
  0x87   :  { %266 = vadd.xlane.f32.xlu1 %v265_v43  ;;  %v83_v63 = vpop.xlane.xlu2 %82 }
  0x88   :  { %v172_v0 = vmul.f32 %v6458_v22, %v83_v63 }
  0x8a   :  { %v6545_v3 = vsub.f32 %v6444_v12, %v172_v0  ;;  %v6571_v12 = vld [vmem:[%s10013_s0 + $0x90] sm:$0xff] }
  0x8b   :  { %v117_v13 = vsel %vm62_vm0, %v6571_v12, 0.0 }
  0x8c   :  { %v236_v6 = vmul.f32 %v6545_v3, %v6545_v3 }
  0x8e   :  { %88 = vadd.xlane.f32.xlu0 %v87_v46  ;;  %100 = vadd.xlane.f32.xlu2 %v99_v51  ;;  %v280_v7 = vsel %vm62_vm0, %v236_v6, 0.0 }
  0x8f   :  { %269 = vadd.xlane.f32.xlu1 %v268_v47  ;;  %v6586_v20 = vpop.permute.xlu2 %808 }
  0x96   :  { %94 = vadd.xlane.f32.xlu0 %v93_v56  ;;  %127 = vadd.xlane.f32.xlu2 %v126_v23 }
  0x97   :  { %91 = vadd.xlane.f32.xlu1 %v90_v58 }
  0x9e   :  { %275 = vadd.xlane.f32.xlu0 %v274_v61  ;;  %130 = vadd.xlane.f32.xlu2 %v129_v33 }
  0x9f   :  { %278 = vadd.xlane.f32.xlu1 %v277_v62 }
  0xa6   :  { %103 = vadd.xlane.f32.xlu0 %v102_v4 }
  0xa7   :  { %97 = vadd.xlane.f32.xlu1 %v96_v5 }
  0xae   :  { %281 = vadd.xlane.f32.xlu0 %v280_v7 }
  0xb6   :  { %109 = vadd.xlane.f32.xlu0 %v108_v9 }
  0xbe   :  { %115 = vadd.xlane.f32.xlu0 %v114_v11 }
  0xc6   :  { %118 = vadd.xlane.f32.xlu0 %v117_v13 }
  0xf1   :  { %v264_v21 = vpop.xlane.xlu0 %263 }
  0xf2   :  { %v358_v24 = vmul.f32 %v264_v21, %v6458_v22 }
  0xf4   :  { %v390_v28 = vadd.f32 1e-05, %v358_v24 }
  0xf6   :  { %5973 = vrsqrt.f32 %v390_v28  ;;  %vm428_vm3 = vweird.f32 %v390_v28 }
  0xf9   :  { %v273_v31 = vpop.xlane.xlu2 %272  ;;  %v86_v32 = vpop.xlane.xlu0 %85 }
  0xfa   :  { %v361_v37 = vmul.f32 %v273_v31, %v6458_v22  ;;  %v267_v38 = vpop.xlane.xlu1 %266  ;;  %v173_v39 = vmul.f32 %v6458_v22, %v86_v32 }
  0xfb   :  { %v359_v40 = vmul.f32 %v267_v38, %v6458_v22 }
  0xfc   :  { %v5974_v42 = vpop.eup %5973  ;;  %v6607_v43 = vadd.f32 1e-05, %v361_v37  ;;  %v6610_v45 = vsub.f32 %v6472_v34, %v173_v39  ;;  %v6620_v34 = vld [vmem:[%s10013_s0 + $0x70] sm:$0xff] }
  0xfd   :  { %v423_v46 = vmul.f32 %v5974_v42, %v390_v28  ;;  %v391_v47 = vadd.f32 1e-05, %v359_v40  ;;  %v105_v5 = vsel %vm62_vm0, %v6620_v34, 0.0  ;;  %vm429_vm2 = vweird.f32 %v5974_v42 }
  0xfe   :  { %5975 = vrsqrt.f32 %v6607_v43  ;;  %v237_v48 = vmul.f32 %v6610_v45, %v6610_v45  ;;  %vm6632_vm4 = vmor %vm428_vm3, %vm429_vm2  ;;  %vm458_vm10 = vweird.f32 %v6607_v43 }
  0xff   :  { %v424_v50 = vmul.f32 %v5974_v42, %v423_v46  ;;  %5977 = vrsqrt.f32 %v391_v47  ;;  %vm438_vm5 = vweird.f32 %v391_v47 }
 0x100   :  { %v283_v51 = vsel %vm62_vm0, %v237_v48, 0.0 }
 0x101   :  { %v425_v52 = vmul.f32 0.5, %v424_v50  ;;  %284 = vadd.xlane.f32.xlu1 %v283_v51  ;;  %v89_v56 = vpop.xlane.xlu0 %88 }
 0x102   :  { %v270_v58 = vpop.xlane.xlu1 %269  ;;  %v174_v59 = vmul.f32 %v6458_v22, %v89_v56 }
 0x103   :  { %v426_v60 = vsub.f32 1.5, %v425_v52  ;;  %v360_v61 = vmul.f32 %v270_v58, %v6458_v22 }
 0x104   :  { %v6623_v62 = vpop.eup %5975  ;;  %v6630_v9 = vsub.f32 %v6491_v44, %v174_v59 }
 0x105   :  { %v5978_v63 = vpop.eup %5977  ;;  %v453_v0 = vmul.f32 %v6623_v62, %v6607_v43  ;;  %v392_v4 = vadd.f32 1e-05, %v360_v61  ;;  %v427_v6 = vmul.f32 %v5974_v42, %v426_v60  ;;  %vm459_vm11 = vweird.f32 %v6623_v62 }
 0x106   :  { %v433_v7 = vmul.f32 %v5978_v63, %v391_v47  ;;  %vm439_vm6 = vweird.f32 %v5978_v63  ;;  %v238_v44 = vmul.f32 %v6630_v9, %v6630_v9  ;;  %vm6671_vm13 = vmor %vm458_vm10, %vm459_vm11 }
 0x107   :  { %5979 = vrsqrt.f32 %v392_v4  ;;  %v454_v16 = vmul.f32 %v6623_v62, %v453_v0  ;;  %v431_v18 = vsel %vm6632_vm4, %v5974_v42, %v427_v6  ;;  %vm440_vm7 = vmor %vm438_vm5, %vm439_vm6  ;;  %vm448_vm8 = vweird.f32 %v392_v4 }
 0x108   :  { %v434_v11 = vmul.f32 %v5978_v63, %v433_v7  ;;  %v742_v31 = vmul.f32 %v431_v18, %v6461_v26  ;;  %v286_v37 = vsel %vm62_vm0, %v238_v44, 0.0 }
 0x109   :  { %106 = vadd.xlane.f32.xlu1 %v105_v5  ;;  %v95_v17 = vpop.xlane.xlu0 %94  ;;  %v455_v28 = vmul.f32 0.5, %v454_v16 }
 0x10a   :  { %v435_v21 = vmul.f32 0.5, %v434_v11  ;;  %v92_v23 = vpop.xlane.xlu1 %91  ;;  %v775_v48 = vmul.f32 %v6454_v15, %v742_v31  ;;  %v176_v50 = vmul.f32 %v6458_v22, %v95_v17 }
 0x10b   :  { %v175_v24 = vmul.f32 %v6458_v22, %v92_v23  ;;  %v456_v42 = vsub.f32 1.5, %v455_v28 }
 0x10c   :  { %v436_v25 = vsub.f32 1.5, %v435_v21  ;;  %v811_v0 = vadd.f32 %v6586_v20, %v775_v48  ;;  %v6676_v11 = vsub.f32 %v6510_v53, %v176_v50 }
 0x10d   :  { %v5980_v27 = vpop.eup %5979  ;;  %v6643_v29 = vsub.f32 %v6515_v54, %v175_v24  ;;  %v457_v61 = vmul.f32 %v6623_v62, %v456_v42 }
 0x10e   :  { %v437_v32 = vmul.f32 %v5978_v63, %v436_v25  ;;  %v443_v33 = vmul.f32 %v5980_v27, %v392_v4  ;;  %vm449_vm9 = vweird.f32 %v5980_v27  ;;  %v240_v23 = vmul.f32 %v6676_v11, %v6676_v11 }
 0x10f   :  { %v239_v38 = vmul.f32 %v6643_v29, %v6643_v29  ;;  %vm6665_vm12 = vmor %vm448_vm8, %vm449_vm9  ;;  %v461_v17 = vsel %vm6671_vm13, %v6623_v62, %v457_v61 }
 0x110   :  { %v441_v39 = vsel %vm440_vm7, %v5978_v63, %v437_v32  ;;  %v444_v40 = vmul.f32 %v5980_v27, %v443_v33  ;;  %v745_v62 = vmul.f32 %v461_v17, %v6474_v35 }
 0x111   :  { %v289_v46 = vsel %vm62_vm0, %v239_v38, 0.0  ;;  %287 = vadd.xlane.f32.xlu1 %v286_v37  ;;  %v276_v47 = vpop.xlane.xlu0 %275  ;;  %v743_v54 = vmul.f32 %v441_v39, %v6476_v36  ;;  %v6661_v36 = vld [vmem:[%s10013_s0 + $0x80] sm:$0xff]  ;;  %v292_v37 = vsel %vm62_vm0, %v240_v23, 0.0 }
 0x112   :  { %v445_v26 = vmul.f32 0.5, %v444_v40  ;;  %290 = vadd.xlane.f32.xlu0 %v289_v46  ;;  %v279_v51 = vpop.xlane.xlu1 %278  ;;  %v362_v52 = vmul.f32 %v276_v47, %v6458_v22  ;;  %v111_v4 = vsel %vm62_vm0, %v6661_v36, 0.0  ;;  %v101_v40 = vpop.xlane.xlu2 %100  ;;  %v778_v46 = vmul.f32 %v6454_v15, %v745_v62 }
 0x113   :  { %v363_v56 = vmul.f32 %v279_v51, %v6458_v22  ;;  %v776_v58 = vmul.f32 %v6454_v15, %v743_v54 }
 0x114   :  { %v446_v59 = vsub.f32 1.5, %v445_v26  ;;  %v394_v60 = vadd.f32 1e-05, %v362_v52  ;;  %v178_v26 = vmul.f32 %v6458_v22, %v101_v40  ;;  %v6712_v52 = vld [vmem:[%s10013_s0 + $0x98] sm:$0xff] }
 0x115   :  { %v395_v43 = vadd.f32 1e-05, %v363_v56  ;;  %v812_v5 = vadd.f32 %v6586_v20, %v776_v58 }
 0x116   :  { %v447_v7 = vmul.f32 %v5980_v27, %v446_v59  ;;  %5981 = vrsqrt.f32 %v394_v60  ;;  %vm468_vm14 = vweird.f32 %v394_v60  ;;  %v814_v59 = vadd.f32 %v6586_v20, %v778_v46 }
 0x117   :  { %5983 = vrsqrt.f32 %v395_v43  ;;  %v843_v13 = vpack.c.bf16 %v812_v5, %v811_v0  ;;  %vm478_vm1 = vweird.f32 %v395_v43  ;;  %v6717_v63 = vsub.f32 %v6501_v49, %v178_v26 }
 0x118   :  { %v451_v16 = vsel %vm6665_vm12, %v5980_v27, %v447_v7 }
 0x119   :  { %5442 = vmatmul.msk.bf16.vlgmr.msra.gmra.mxu0 %vm62_vm0, %v843_v13  ;;  %112 = vadd.xlane.f32.xlu1 %v111_v4  ;;  %v104_v18 = vpop.xlane.xlu0 %103  ;;  %v744_v24 = vmul.f32 %v451_v16, %v6484_v41  ;;  %v242_v4 = vmul.f32 %v6717_v63, %v6717_v63 }
 0x11a   :  { %v98_v21 = vpop.xlane.xlu1 %97  ;;  %v179_v53 = vmul.f32 %v6458_v22, %v104_v18 }
 0x11b   :  { %v177_v44 = vmul.f32 %v6458_v22, %v98_v21  ;;  %v298_v17 = vsel %vm62_vm0, %v242_v4, 0.0 }
 0x11c   :  { %v5982_v25 = vpop.eup %5981  ;;  %v6692_v27 = vsub.f32 %v6537_v1, %v179_v53  ;;  %v777_v1 = vmul.f32 %v6454_v15, %v744_v24  ;;  %v6742_v24 = vld [vmem:[%s10013_s0 + $0xa0] sm:$0xff] }
 0x11d   :  { %v5984_v28 = vpop.eup %5983  ;;  %v463_v31 = vmul.f32 %v5982_v25, %v394_v60  ;;  %v6696_v32 = vsub.f32 %v6542_v2, %v177_v44  ;;  %vm469_vm15 = vweird.f32 %v5982_v25 }
 0x11e   :  { %v473_v33 = vmul.f32 %v5984_v28, %v395_v43  ;;  %v243_v38 = vmul.f32 %v6692_v27, %v6692_v27  ;;  %vm479_vm2 = vweird.f32 %v5984_v28  ;;  %v813_v51 = vadd.f32 %v6586_v20, %v777_v1  ;;  %vm470_vm3 = vmor %vm468_vm14, %vm469_vm15  ;;  %v6763_v1 = vld [vmem:[%s10013_s0 + $0xc8] sm:$0xff] }
 0x11f   :  { %v464_v39 = vmul.f32 %v5982_v25, %v463_v31  ;;  %v241_v41 = vmul.f32 %v6696_v32, %v6696_v32  ;;  %vm480_vm4 = vmor %vm478_vm1, %vm479_vm2  ;;  %v120_v43 = vsel %vm62_vm0, %v6712_v52, 0.0  ;;  %v138_v40 = vsel %vm62_vm0, %v6763_v1, 0.0 }
 0x120   :  { %v474_v42 = vmul.f32 %v5984_v28, %v473_v33  ;;  %v301_v35 = vsel %vm62_vm0, %v243_v38, 0.0  ;;  %v844_v0 = vpack.c.bf16 %v814_v59, %v813_v51 }
 0x121   :  { %v465_v2 = vmul.f32 0.5, %v464_v39  ;;  %v295_v47 = vsel %vm62_vm0, %v241_v41, 0.0  ;;  %293 = vadd.xlane.f32.xlu1 %v292_v37  ;;  %302 = vadd.xlane.f32.xlu2 %v301_v35  ;;  %v282_v54 = vpop.xlane.xlu0 %281 }
 0x122   :  { %v475_v48 = vmul.f32 0.5, %v474_v42  ;;  %296 = vadd.xlane.f32.xlu0 %v295_v47  ;;  %v364_v42 = vmul.f32 %v282_v54, %v6458_v22 }
 0x123   :  { %v466_v50 = vsub.f32 1.5, %v465_v2 }
 0x124   :  { %v476_v56 = vsub.f32 1.5, %v475_v48 }
 0x125   :  { %v467_v58 = vmul.f32 %v5982_v25, %v466_v50 }
 0x126   :  { %v477_v61 = vmul.f32 %v5984_v28, %v476_v56 }
 0x127   :  { %v471_v6 = vsel %vm470_vm3, %v5982_v25, %v467_v58  ;;  %v123_v25 = vsel %vm62_vm0, %v6742_v24, 0.0 }
 0x128   :  { %v481_v5 = vsel %vm480_vm4, %v5984_v28, %v477_v61  ;;  %v746_v13 = vmul.f32 %v471_v6, %v6518_v55 }
 0x129   :  { %5443 = vmatmul.msk.bf16.gmra.mxu0 %vm62_vm0, %v844_v0  ;;  %121 = vadd.xlane.f32.xlu1 %v120_v43  ;;  %v110_v7 = vpop.xlane.xlu0 %109  ;;  %v747_v49 = vmul.f32 %v481_v5, %v6523_v57  ;;  %v6773_v0 = vpop.xlane.xlu2 %127 }
 0x12a   :  { %v181_v60 = vmul.f32 %v6458_v22, %v110_v7  ;;  %v779_v21 = vmul.f32 %v6454_v15, %v746_v13 }
 0x12b   :  { %v780_v53 = vmul.f32 %v6454_v15, %v747_v49 }
 0x12c   :  { %v6728_v16 = vsub.f32 %v6557_v8, %v181_v60  ;;  %v815_v57 = vadd.f32 %v6586_v20, %v779_v21 }
 0x12d   :  { %v816_v8 = vadd.f32 %v6586_v20, %v780_v53 }
 0x12e   :  { %v245_v18 = vmul.f32 %v6728_v16, %v6728_v16 }
 0x12f   :  { %v845_v28 = vpack.c.bf16 %v816_v8, %v815_v57 }
 0x130   :  { %v307_v23 = vsel %vm62_vm0, %v245_v18, 0.0 }
 0x131   :  { %299 = vadd.xlane.f32.xlu1 %v298_v17  ;;  %308 = vadd.xlane.f32.xlu0 %v307_v23  ;;  %v116_v44 = vpop.xlane.xlu0 %115  ;;  %v6781_v57 = vpop.xlane.xlu2 %130 }
 0x132   :  { %v183_v55 = vmul.f32 %v6458_v22, %v116_v44 }
 0x134   :  { %v6747_v62 = vsub.f32 %v6564_v10, %v183_v55 }
 0x136   :  { %v247_v33 = vmul.f32 %v6747_v62, %v6747_v62 }
 0x138   :  { %v313_v38 = vsel %vm62_vm0, %v247_v33, 0.0 }
 0x139   :  { %5444 = vmatmul.msk.bf16.gmra.mxu0 %vm62_vm0, %v845_v28  ;;  %124 = vadd.xlane.f32.xlu1 %v123_v25  ;;  %v119_v31 = vpop.xlane.xlu0 %118 }
 0x13a   :  { %v184_v37 = vmul.f32 %v6458_v22, %v119_v31 }
 0x13c   :  { %v6755_v39 = vsub.f32 %v6571_v12, %v184_v37  ;;  %v396_v12 = vadd.f32 1e-05, %v364_v42 }
 0x13e   :  { %v248_v10 = vmul.f32 %v6755_v39, %v6755_v39  ;;  %5985 = vrsqrt.f32 %v396_v12  ;;  %vm488_vm5 = vweird.f32 %v396_v12 }
 0x140   :  { %v316_v41 = vsel %vm62_vm0, %v248_v10, 0.0 }
 0x141   :  { %314 = vadd.xlane.f32.xlu1 %v313_v38 }
 0x144   :  { %v5986_v35 = vpop.eup %5985 }
 0x145   :  { %v483_v46 = vmul.f32 %v5986_v35, %v396_v12  ;;  %vm489_vm6 = vweird.f32 %v5986_v35 }
 0x146   :  { %vm490_vm7 = vmor %vm488_vm5, %vm489_vm6 }
 0x147   :  { %v484_v2 = vmul.f32 %v5986_v35, %v483_v46 }
 0x149   :  { %317 = vadd.xlane.f32.xlu1 %v316_v41  ;;  %v485_v50 = vmul.f32 0.5, %v484_v2 }
 0x14b   :  { %v486_v51 = vsub.f32 1.5, %v485_v50 }
 0x14d   :  { %v487_v61 = vmul.f32 %v5986_v35, %v486_v51 }
 0x14f   :  { %v491_v60 = vsel %vm490_vm7, %v5986_v35, %v487_v61 }
 0x150   :  { %v748_v53 = vmul.f32 %v491_v60, %v6545_v3 }
 0x151   :  { %139 = vadd.xlane.f32.xlu1 %v138_v40 }
 0x152   :  { %v781_v25 = vmul.f32 %v6454_v15, %v748_v53 }
 0x154   :  { %v817_v38 = vadd.f32 %v6586_v20, %v781_v25 }
 0x174   :  { %v285_v47 = vpop.xlane.xlu1 %284 }
 0x175   :  { %v365_v48 = vmul.f32 %v285_v47, %v6458_v22 }
 0x177   :  { %v397_v26 = vadd.f32 1e-05, %v365_v48 }
 0x179   :  { %5987 = vrsqrt.f32 %v397_v26  ;;  %vm498_vm9 = vweird.f32 %v397_v26 }
 0x17c   :  { %v107_v56 = vpop.xlane.xlu1 %106 }
 0x17d   :  { %v180_v58 = vmul.f32 %v6458_v22, %v107_v56 }
 0x17f   :  { %v5988_v59 = vpop.eup %5987  ;;  %v6771_v54 = vsub.f32 %v6620_v34, %v180_v58 }
 0x180   :  { %v493_v43 = vmul.f32 %v5988_v59, %v397_v26  ;;  %vm499_vm8 = vweird.f32 %v5988_v59  ;;  %v6797_v26 = vperm.slane %v6451_v14, 2 }
 0x181   :  { %v244_v5 = vmul.f32 %v6771_v54, %v6771_v54  ;;  %vm500_vm10 = vmor %vm498_vm9, %vm499_vm8 }
 0x182   :  { %v494_v6 = vmul.f32 %v5988_v59, %v493_v43 }
 0x183   :  { %v304_v7 = vsel %vm62_vm0, %v244_v5, 0.0  ;;  %v6805_v5 = vld [vmem:[%s10013_s0 + $0xb8] sm:$0xff] }
 0x184   :  { %v495_v4 = vmul.f32 0.5, %v494_v6  ;;  %v288_v13 = vpop.xlane.xlu1 %287  ;;  %305 = vadd.xlane.f32.xlu2 %v304_v7 }
 0x185   :  { %v366_v49 = vmul.f32 %v288_v13, %v6458_v22  ;;  %v291_v17 = vpop.xlane.xlu0 %290 }
 0x186   :  { %v496_v34 = vsub.f32 1.5, %v495_v4  ;;  %v367_v18 = vmul.f32 %v291_v17, %v6458_v22  ;;  %v132_v17 = vsel %vm62_vm0, %v6805_v5, 0.0 }
 0x187   :  { %v398_v21 = vadd.f32 1e-05, %v366_v49 }
 0x188   :  { %v497_v23 = vmul.f32 %v5988_v59, %v496_v34  ;;  %v399_v44 = vadd.f32 1e-05, %v367_v18 }
 0x189   :  { %5989 = vrsqrt.f32 %v398_v21  ;;  %vm508_vm14 = vweird.f32 %v398_v21 }
 0x18a   :  { %v501_v55 = vsel %vm500_vm10, %v5988_v59, %v497_v23  ;;  %5991 = vrsqrt.f32 %v399_v44  ;;  %vm518_vm11 = vweird.f32 %v399_v44 }
 0x18b   :  { %v749_v8 = vmul.f32 %v501_v55, %v6610_v45 }
 0x18c   :  { %v113_v28 = vpop.xlane.xlu1 %112 }
 0x18d   :  { %v182_v31 = vmul.f32 %v6458_v22, %v113_v28  ;;  %v782_v33 = vmul.f32 %v6454_v15, %v749_v8 }
 0x18f   :  { %v5990_v37 = vpop.eup %5989  ;;  %v6788_v3 = vsub.f32 %v6661_v36, %v182_v31  ;;  %v818_v10 = vadd.f32 %v6586_v20, %v782_v33 }
 0x190   :  { %v5992_v41 = vpop.eup %5991  ;;  %v503_v40 = vmul.f32 %v5990_v37, %v398_v21  ;;  %vm509_vm13 = vweird.f32 %v5990_v37 }
 0x191   :  { %v513_v42 = vmul.f32 %v5992_v41, %v399_v44  ;;  %v846_v12 = vpack.c.bf16 %v818_v10, %v817_v38  ;;  %v246_v45 = vmul.f32 %v6788_v3, %v6788_v3  ;;  %vm519_vm12 = vweird.f32 %v5992_v41  ;;  %vm510_vm1 = vmor %vm508_vm14, %vm509_vm13 }
 0x192   :  { %v504_v35 = vmul.f32 %v5990_v37, %v503_v40  ;;  %vm520_vm15 = vmor %vm518_vm11, %vm519_vm12 }
 0x193   :  { %v514_v46 = vmul.f32 %v5992_v41, %v513_v42  ;;  %5445 = vmatmul.msk.bf16.gmra.mxu0 %vm62_vm0, %v846_v12  ;;  %v310_v2 = vsel %vm62_vm0, %v246_v45, 0.0 }
 0x194   :  { %v505_v47 = vmul.f32 0.5, %v504_v35  ;;  %v294_v36 = vpop.xlane.xlu1 %293  ;;  %v303_v48 = vpop.xlane.xlu2 %302  ;;  %311 = vadd.xlane.f32.xlu0 %v310_v2 }
 0x195   :  { %v515_v50 = vmul.f32 0.5, %v514_v46  ;;  %v368_v51 = vmul.f32 %v294_v36, %v6458_v22  ;;  %v371_v56 = vmul.f32 %v303_v48, %v6458_v22  ;;  %v297_v58 = vpop.xlane.xlu0 %296  ;;  %v187_v36 = vmul.f32 %v6458_v22, %v6773_v0 }
 0x196   :  { %v506_v59 = vsub.f32 1.5, %v505_v47  ;;  %v369_v61 = vmul.f32 %v297_v58, %v6458_v22  ;;  %v929_v43 = vpop.f32.mrf.mxu0 }
 0x197   :  { %v516_v6 = vsub.f32 1.5, %v515_v50  ;;  %v6807_v14 = vadd.f32 1e-05, %v368_v51  ;;  %v6809_v7 = vadd.f32 1e-05, %v371_v56  ;;  %v930_v49 = vadd.f32 %v929_v43, %v6797_v26 }
 0x198   :  { %v507_v60 = vmul.f32 %v5990_v37, %v506_v59  ;;  %v6812_v4 = vadd.f32 1e-05, %v369_v61 }
 0x199   :  { %v517_v13 = vmul.f32 %v5992_v41, %v516_v6  ;;  %5993 = vrsqrt.f32 %v6807_v14  ;;  %v6822_v44 = vmul.f32 0.35355338, %v930_v49  ;;  %vm528_vm5 = vweird.f32 %v6807_v14 }
 0x19a   :  { %v511_v34 = vsel %vm510_vm1, %v5990_v37, %v507_v60  ;;  %5995 = vrsqrt.f32 %v6809_v7  ;;  %vm538_vm3 = vweird.f32 %v6812_v4  ;;  %vm558_vm8 = vweird.f32 %v6809_v7 }
 0x19b   :  { %v521_v18 = vsel %vm520_vm15, %v5992_v41, %v517_v13  ;;  %5997 = vrsqrt.f32 %v6812_v4  ;;  %v750_v21 = vmul.f32 %v511_v34, %v6630_v9  ;;  %v1622_v42 = vpack.c.bf16 %v6822_v44, %v6822_v44  ;;  %v6866_v13 = vld [vmem:[%s10013_s0 + $0xd0] sm:$0xff]  ;;  %v6876_v34 = vld [vmem:[%s10013_s0 + $0xd8] sm:$0xff] }
 0x19c   :  { %v122_v53 = vpop.xlane.xlu1 %121  ;;  %133 = vadd.xlane.f32.xlu0 %v132_v17  ;;  %v751_v23 = vmul.f32 %v521_v18, %v6643_v29  ;;  %v6835_v29 = vld [vmem:[%s10013_s0 + $0xc0] sm:$0xff] }
 0x19d   :  { %v185_v55 = vmul.f32 %v6458_v22, %v122_v53  ;;  %v783_v8 = vmul.f32 %v6454_v15, %v750_v21  ;;  %v135_v47 = vsel %vm62_vm0, %v6835_v29, 0.0  ;;  %v6861_v0 = vunpack.c.l.b16 %v1622_v42 }
 0x19e   :  { %v931_v25 = vpop.f32.mrf.mxu0  ;;  %v784_v28 = vmul.f32 %v6454_v15, %v751_v23 }
 0x19f   :  { %v5994_v31 = vpop.eup %5993  ;;  %v6828_v33 = vsub.f32 %v6712_v52, %v185_v55  ;;  %v932_v37 = vadd.f32 %v931_v25, %v6797_v26  ;;  %v819_v9 = vadd.f32 %v6586_v20, %v783_v8  ;;  %v6882_v55 = vsub.f32 %v6584_v19, %v187_v36 }
 0x1a0   :  { %v6837_v38 = vpop.eup %5995  ;;  %v523_v10 = vmul.f32 %v5994_v31, %v6807_v14  ;;  %v820_v41 = vadd.f32 %v6586_v20, %v784_v28  ;;  %vm529_vm2 = vweird.f32 %v5994_v31  ;;  %v141_v14 = vsel %vm62_vm0, %v6866_v13, 0.0 }
 0x1a1   :  { %v5998_v40 = vpop.eup %5997  ;;  %v553_v52 = vmul.f32 %v6837_v38, %v6809_v7  ;;  %v6845_v12 = vmul.f32 0.35355338, %v932_v37  ;;  %v249_v45 = vmul.f32 %v6828_v33, %v6828_v33  ;;  %vm530_vm6 = vmor %vm528_vm5, %vm529_vm2  ;;  %v144_v37 = vsel %vm62_vm0, %v6876_v34, 0.0 }
 0x1a2   :  { %v524_v35 = vmul.f32 %v5994_v31, %v523_v10  ;;  %v533_v46 = vmul.f32 %v5998_v40, %v6812_v4  ;;  %v847_v2 = vpack.c.bf16 %v820_v41, %v819_v9  ;;  %vm539_vm4 = vweird.f32 %v5998_v40 }
 0x1a3   :  { %v319_v48 = vsel %vm62_vm0, %v249_v45, 0.0  ;;  %v554_v51 = vmul.f32 %v6837_v38, %v553_v52  ;;  %v1623_v59 = vpack.c.bf16 %v6845_v12, %v6845_v12  ;;  %vm540_vm7 = vmor %vm538_vm3, %vm539_vm4  ;;  %v188_v19 = vmul.f32 %v6458_v22, %v6781_v57 }
 0x1a4   :  { %v525_v50 = vmul.f32 0.5, %v524_v35  ;;  %v534_v56 = vmul.f32 %v5998_v40, %v533_v46  ;;  %5446 = vmatmul.msk.bf16.gmra.mxu0 %vm62_vm0, %v847_v2  ;;  %v300_v58 = vpop.xlane.xlu1 %299  ;;  %320 = vadd.xlane.f32.xlu2 %v319_v48  ;;  %v251_v45 = vmul.f32 %v6882_v55, %v6882_v55  ;;  %vm559_vm9 = vweird.f32 %v6837_v38 }
 0x1a5   :  { %v370_v61 = vmul.f32 %v300_v58, %v6458_v22  ;;  %136 = vadd.xlane.f32.xlu0 %v135_v47  ;;  %v6868_v49 = vunpack.c.l.b16 %v1623_v59  ;;  %v555_v21 = vmul.f32 0.5, %v554_v51  ;;  %v6913_v47 = vld [vmem:[%s10013_s0 + $0xe0] sm:$0xff]  ;;  %v6918_v48 = vsub.f32 %v6600_v30, %v188_v19  ;;  %vm6920_vm10 = vmor %vm558_vm8, %vm559_vm9  ;;  %v6952_v19 = vld [vmem:[%s10013_s0 + $0xe8] sm:$0xff] }
 0x1a6   :  { %v526_v43 = vsub.f32 1.5, %v525_v50  ;;  %v535_v6 = vmul.f32 0.5, %v534_v56  ;;  %v934_v60 = vpop.f32.mrf.mxu0  ;;  %v325_v56 = vsel %vm62_vm0, %v251_v45, 0.0 }
 0x1a7   :  { %v6871_v17 = vadd.f32 1e-05, %v370_v61  ;;  %v935_v28 = vadd.f32 %v934_v60, %v6797_v26  ;;  %v556_v10 = vsub.f32 1.5, %v555_v21  ;;  %v147_v61 = vsel %vm62_vm0, %v6913_v47, 0.0 }
 0x1a8   :  { %v527_v18 = vmul.f32 %v5994_v31, %v526_v43  ;;  %v536_v53 = vsub.f32 1.5, %v535_v6 }
 0x1a9   :  { %5999 = vrsqrt.f32 %v6871_v17  ;;  %v557_v7 = vmul.f32 %v6837_v38, %v556_v10  ;;  %vm548_vm12 = vweird.f32 %v6871_v17 }
 0x1aa   :  { %v531_v8 = vsel %vm530_vm6, %v5994_v31, %v527_v18  ;;  %v537_v25 = vmul.f32 %v5998_v40, %v536_v53 }
 0x1ab   :  { %v752_v9 = vmul.f32 %v531_v8, %v6676_v11  ;;  %v6902_v11 = vmul.f32 0.35355338, %v935_v28  ;;  %v561_v6 = vsel %vm6920_vm10, %v6837_v38, %v557_v7  ;;  %v6976_v7 = vld [vmem:[%s10013_s0 + $0xf0] sm:$0xff] }
 0x1ac   :  { %v541_v4 = vsel %vm540_vm7, %v5998_v40, %v537_v25  ;;  %v125_v41 = vpop.xlane.xlu1 %124  ;;  %142 = vadd.xlane.f32.xlu2 %v141_v14  ;;  %v252_v14 = vmul.f32 %v6918_v48, %v6918_v48 }
 0x1ad   :  { %v186_v52 = vmul.f32 %v6458_v22, %v125_v41  ;;  %145 = vadd.xlane.f32.xlu0 %v144_v37  ;;  %v753_v31 = vmul.f32 %v541_v4, %v6696_v32  ;;  %v785_v42 = vmul.f32 %v6454_v15, %v752_v9  ;;  %v1624_v59 = vpack.c.bf16 %v6902_v11, %v6902_v11 }
 0x1ae   :  { %v936_v57 = vpop.f32.mrf.mxu0  ;;  %v755_v37 = vmul.f32 %v561_v6, %v6692_v27  ;;  %v328_v41 = vsel %vm62_vm0, %v252_v14, 0.0  ;;  %v150_v27 = vsel %vm62_vm0, %v6952_v19, 0.0 }
 0x1af   :  { %v6000_v40 = vpop.eup %5999  ;;  %v6905_v35 = vsub.f32 %v6742_v24, %v186_v52  ;;  %v937_v46 = vadd.f32 %v936_v57, %v6797_v26  ;;  %v786_v32 = vmul.f32 %v6454_v15, %v753_v31  ;;  %v821_v2 = vadd.f32 %v6586_v20, %v785_v42 }
 0x1b0   :  { %v543_v36 = vmul.f32 %v6000_v40, %v6871_v17  ;;  %vm549_vm11 = vweird.f32 %v6000_v40  ;;  %v6943_v28 = vunpack.c.l.b16 %v1624_v59  ;;  %v788_v17 = vmul.f32 %v6454_v15, %v755_v37 }
 0x1b1   :  { %v6924_v50 = vmul.f32 0.35355338, %v937_v46  ;;  %v822_v51 = vadd.f32 %v6586_v20, %v786_v32  ;;  %v250_v30 = vmul.f32 %v6905_v35, %v6905_v35  ;;  %vm550_vm13 = vmor %vm548_vm12, %vm549_vm11  ;;  %v6968_v32 = vld [vmem:[%s10013_s0 + $0xf8] sm:$0xff]  ;;  %v153_v59 = vsel %vm62_vm0, %v6976_v7, 0.0 }
 0x1b2   :  { %v544_v58 = vmul.f32 %v6000_v40, %v543_v36 }
 0x1b3   :  { %v848_v43 = vpack.c.bf16 %v822_v51, %v821_v2  ;;  %v322_v21 = vsel %vm62_vm0, %v250_v30, 0.0  ;;  %v1625_v53 = vpack.c.bf16 %v6924_v50, %v6924_v50 }
 0x1b4   :  { %v545_v60 = vmul.f32 0.5, %v544_v58  ;;  %326 = vadd.xlane.f32.xlu2 %v325_v56  ;;  %v315_v18 = vpop.xlane.xlu1 %314  ;;  %323 = vadd.xlane.f32.xlu1 %v322_v21  ;;  %v156_v56 = vsel %vm62_vm0, %v6968_v32, 0.0 }
 0x1b5   :  { %5447 = vmatmul.msk.bf16.gmra.mxu0 %vm62_vm0, %v848_v43  ;;  %148 = vadd.xlane.f32.xlu0 %v147_v61  ;;  %v6945_v38 = vunpack.c.l.b16 %v1625_v53 }
 0x1b6   :  { %v546_v8 = vsub.f32 1.5, %v545_v60  ;;  %v939_v25 = vpop.f32.mrf.mxu0 }
 0x1b7   :  { %v940_v4 = vadd.f32 %v939_v25, %v6797_v26 }
 0x1b8   :  { %v547_v9 = vmul.f32 %v6000_v40, %v546_v8  ;;  %v309_v8 = vpop.xlane.xlu0 %308 }
 0x1b9   :  { %v6962_v45 = vmul.f32 0.35355338, %v940_v4  ;;  %v373_v25 = vmul.f32 %v309_v8, %v6458_v22  ;;  %v375_v4 = vmul.f32 %v315_v18, %v6458_v22 }
 0x1ba   :  { %v551_v52 = vsel %vm550_vm13, %v6000_v40, %v547_v9 }
 0x1bb   :  { %v754_v31 = vmul.f32 %v551_v52, %v6717_v63  ;;  %v824_v63 = vadd.f32 %v6586_v20, %v788_v17  ;;  %v1626_v36 = vpack.c.bf16 %v6962_v45, %v6962_v45  ;;  %v405_v37 = vadd.f32 1e-05, %v373_v25 }
 0x1bc   :  { %329 = vadd.xlane.f32.xlu2 %v328_v41  ;;  %v318_v42 = vpop.xlane.xlu1 %317  ;;  %151 = vadd.xlane.f32.xlu1 %v150_v27 }
 0x1bd   :  { %v787_v57 = vmul.f32 %v6454_v15, %v754_v31  ;;  %v6988_v30 = vunpack.c.l.b16 %v1626_v36  ;;  %6001 = vrsqrt.f32 %v405_v37  ;;  %vm578_vm14 = vweird.f32 %v405_v37 }
 0x1be   :  { %v941_v46 = vpop.f32.mrf.mxu0 }
 0x1bf   :  { %v942_v40 = vadd.f32 %v941_v46, %v6797_v26  ;;  %v823_v2 = vadd.f32 %v6586_v20, %v787_v57 }
 0x1c1   :  { %v6980_v24 = vmul.f32 0.35355338, %v942_v40  ;;  %v849_v51 = vpack.c.bf16 %v824_v63, %v823_v2  ;;  %v376_v2 = vmul.f32 %v318_v42, %v6458_v22 }
 0x1c3   :  { %v1627_v58 = vpack.c.bf16 %v6980_v24, %v6980_v24  ;;  %v6002_v9 = vpop.eup %6001 }
 0x1c4   :  { %157 = vadd.xlane.f32.xlu2 %v156_v56  ;;  %v140_v61 = vpop.xlane.xlu1 %139  ;;  %154 = vadd.xlane.f32.xlu1 %v153_v59  ;;  %v573_v41 = vmul.f32 %v6002_v9, %v405_v37  ;;  %vm579_vm15 = vweird.f32 %v6002_v9  ;;  %v7009_v56 = vadd.f32 1e-05, %v376_v2 }
 0x1c5   :  { %v6990_v43 = vunpack.c.l.b16 %v1627_v58  ;;  %5448 = vmatmul.msk.bf16.gmra.mxu0 %vm62_vm0, %v849_v51  ;;  %v191_v6 = vmul.f32 %v6458_v22, %v140_v61  ;;  %vm580_vm1 = vmor %vm578_vm14, %vm579_vm15 }
 0x1c6   :  { %v574_v52 = vmul.f32 %v6002_v9, %v573_v41  ;;  %vm608_vm11 = vweird.f32 %v7009_v56 }
 0x1c7   :  { %v6995_v60 = vsub.f32 %v6763_v1, %v191_v6  ;;  %v407_v1 = vadd.f32 1e-05, %v375_v4 }
 0x1c8   :  { %v575_v57 = vmul.f32 0.5, %v574_v52 }
 0x1c9   :  { %v255_v53 = vmul.f32 %v6995_v60, %v6995_v60  ;;  %6003 = vrsqrt.f32 %v407_v1  ;;  %vm598_vm5 = vweird.f32 %v407_v1 }
 0x1ca   :  { %v576_v46 = vsub.f32 1.5, %v575_v57 }
 0x1cb   :  { %v337_v14 = vsel %vm62_vm0, %v255_v53, 0.0 }
 0x1cc   :  { %338 = vadd.xlane.f32.xlu1 %v337_v14  ;;  %v577_v36 = vmul.f32 %v6002_v9, %v576_v46 }
 0x1ce   :  { %v581_v59 = vsel %vm580_vm1, %v6002_v9, %v577_v36 }
 0x1cf   :  { %v7005_v40 = vpop.eup %6003  ;;  %v757_v25 = vmul.f32 %v581_v59, %v6728_v16 }
 0x1d0   :  { %v593_v18 = vmul.f32 %v7005_v40, %v407_v1  ;;  %vm599_vm6 = vweird.f32 %v7005_v40 }
 0x1d1   :  { %v790_v52 = vmul.f32 %v6454_v15, %v757_v25  ;;  %vm7031_vm7 = vmor %vm598_vm5, %vm599_vm6 }
 0x1d2   :  { %v594_v61 = vmul.f32 %v7005_v40, %v593_v18 }
 0x1d3   :  { %v826_v18 = vadd.f32 %v6586_v20, %v790_v52 }
 0x1d4   :  { %v595_v37 = vmul.f32 0.5, %v594_v61 }
 0x1f7   :  { %v306_v27 = vpop.xlane.xlu2 %305 }
 0x1f8   :  { %v372_v31 = vmul.f32 %v306_v27, %v6458_v22 }
 0x1fa   :  { %v404_v17 = vadd.f32 1e-05, %v372_v31  ;;  %v596_v31 = vsub.f32 1.5, %v595_v37 }
 0x1fc   :  { %6005 = vrsqrt.f32 %v404_v17  ;;  %vm568_vm3 = vweird.f32 %v404_v17 }
 0x1fd   :  { %6007 = vrsqrt.f32 %v7009_v56 }
 0x202   :  { %v6006_v63 = vpop.eup %6005 }
 0x203   :  { %v563_v51 = vmul.f32 %v6006_v63, %v404_v17  ;;  %vm569_vm2 = vweird.f32 %v6006_v63  ;;  %v7017_v27 = vpop.eup %6007 }
 0x204   :  { %vm570_vm4 = vmor %vm568_vm3, %vm569_vm2  ;;  %v603_v17 = vmul.f32 %v7017_v27, %v7009_v56  ;;  %vm609_vm12 = vweird.f32 %v7017_v27 }
 0x205   :  { %v564_v58 = vmul.f32 %v6006_v63, %v563_v51  ;;  %v597_v51 = vmul.f32 %v7005_v40, %v596_v31  ;;  %vm7087_vm13 = vmor %vm608_vm11, %vm609_vm12 }
 0x207   :  { %v565_v6 = vmul.f32 0.5, %v564_v58  ;;  %v312_v53 = vpop.xlane.xlu0 %311 }
 0x208   :  { %v374_v14 = vmul.f32 %v312_v53, %v6458_v22 }
 0x209   :  { %v566_v8 = vsub.f32 1.5, %v565_v6 }
 0x20a   :  { %v406_v42 = vadd.f32 1e-05, %v374_v14 }
 0x20b   :  { %v567_v4 = vmul.f32 %v6006_v63, %v566_v8  ;;  %v601_v8 = vsel %vm7031_vm7, %v7005_v40, %v597_v51 }
 0x20c   :  { %6009 = vrsqrt.f32 %v406_v42  ;;  %vm588_vm9 = vweird.f32 %v406_v42  ;;  %v759_v40 = vmul.f32 %v601_v8, %v6747_v62 }
 0x20d   :  { %v571_v41 = vsel %vm570_vm4, %v6006_v63, %v567_v4 }
 0x20e   :  { %v756_v9 = vmul.f32 %v571_v41, %v6771_v54  ;;  %v792_v1 = vmul.f32 %v6454_v15, %v759_v40 }
 0x20f   :  { %v134_v57 = vpop.xlane.xlu0 %133 }
 0x210   :  { %v189_v46 = vmul.f32 %v6458_v22, %v134_v57  ;;  %v944_v2 = vpop.f32.mrf.mxu0  ;;  %v789_v36 = vmul.f32 %v6454_v15, %v756_v9 }
 0x211   :  { %v945_v59 = vadd.f32 %v944_v2, %v6797_v26 }
 0x212   :  { %v6010_v16 = vpop.eup %6009  ;;  %v7025_v54 = vsub.f32 %v6805_v5, %v189_v46  ;;  %v825_v63 = vadd.f32 %v6586_v20, %v789_v36  ;;  %v604_v5 = vmul.f32 %v7017_v27, %v603_v17 }
 0x213   :  { %v583_v58 = vmul.f32 %v6010_v16, %v406_v42  ;;  %v7043_v37 = vmul.f32 0.35355338, %v945_v59  ;;  %vm589_vm8 = vweird.f32 %v6010_v16 }
 0x214   :  { %v850_v61 = vpack.c.bf16 %v826_v18, %v825_v63  ;;  %v253_v6 = vmul.f32 %v7025_v54, %v7025_v54  ;;  %v605_v2 = vmul.f32 0.5, %v604_v5  ;;  %vm590_vm10 = vmor %vm588_vm9, %vm589_vm8 }
 0x215   :  { %v584_v53 = vmul.f32 %v6010_v16, %v583_v58  ;;  %v1628_v63 = vpack.c.bf16 %v7043_v37, %v7043_v37 }
 0x216   :  { %5449 = vmatmul.msk.bf16.gmra.mxu0 %vm62_vm0, %v850_v61  ;;  %v331_v14 = vsel %vm62_vm0, %v253_v6, 0.0  ;;  %v606_v61 = vsub.f32 1.5, %v605_v2 }
 0x217   :  { %v585_v25 = vmul.f32 0.5, %v584_v53  ;;  %v321_v4 = vpop.xlane.xlu2 %320  ;;  %332 = vadd.xlane.f32.xlu0 %v331_v14  ;;  %v7065_v6 = vunpack.c.l.b16 %v1628_v63 }
 0x218   :  { %v377_v41 = vmul.f32 %v321_v4, %v6458_v22  ;;  %v137_v9 = vpop.xlane.xlu0 %136  ;;  %v946_v52 = vpop.f32.mrf.mxu0 }
 0x219   :  { %v586_v31 = vsub.f32 1.5, %v585_v25  ;;  %v190_v57 = vmul.f32 %v6458_v22, %v137_v9  ;;  %v947_v46 = vadd.f32 %v946_v52, %v6797_v26 }
 0x21a   :  { %v7048_v36 = vadd.f32 1e-05, %v377_v41 }
 0x21b   :  { %v587_v17 = vmul.f32 %v6010_v16, %v586_v31  ;;  %v7054_v18 = vsub.f32 %v6835_v29, %v190_v57  ;;  %v7056_v51 = vmul.f32 0.35355338, %v947_v46  ;;  %v828_v31 = vadd.f32 %v6586_v20, %v792_v1 }
 0x21c   :  { %6011 = vrsqrt.f32 %v7048_v36  ;;  %v607_v57 = vmul.f32 %v7017_v27, %v606_v61  ;;  %vm618_vm15 = vweird.f32 %v7048_v36 }
 0x21d   :  { %v591_v58 = vsel %vm590_vm10, %v6010_v16, %v587_v17  ;;  %v1629_v42 = vpack.c.bf16 %v7056_v51, %v7056_v51  ;;  %v254_v59 = vmul.f32 %v7054_v18, %v7054_v18 }
 0x21e   :  { %v758_v62 = vmul.f32 %v591_v58, %v6788_v3 }
 0x21f   :  { %v7067_v29 = vunpack.c.l.b16 %v1629_v42  ;;  %v143_v53 = vpop.xlane.xlu2 %142  ;;  %v334_v5 = vsel %vm62_vm0, %v254_v59, 0.0 }
 0x220   :  { %v192_v16 = vmul.f32 %v6458_v22, %v143_v53  ;;  %335 = vadd.xlane.f32.xlu0 %v334_v5  ;;  %v146_v14 = vpop.xlane.xlu0 %145  ;;  %v791_v8 = vmul.f32 %v6454_v15, %v758_v62 }
 0x221   :  { %v193_v3 = vmul.f32 %v6458_v22, %v146_v14  ;;  %v949_v25 = vpop.f32.mrf.mxu0 }
 0x222   :  { %v6012_v41 = vpop.eup %6011  ;;  %v7078_v9 = vsub.f32 %v6866_v13, %v192_v16  ;;  %v827_v52 = vadd.f32 %v6586_v20, %v791_v8  ;;  %v950_v40 = vadd.f32 %v949_v25, %v6797_v26 }
 0x223   :  { %v613_v56 = vmul.f32 %v6012_v41, %v7048_v36  ;;  %v7085_v46 = vsub.f32 %v6876_v34, %v193_v3  ;;  %v611_v34 = vsel %vm7087_vm13, %v7017_v27, %v607_v57  ;;  %vm619_vm14 = vweird.f32 %v6012_v41 }
 0x224   :  { %v851_v17 = vpack.c.bf16 %v828_v31, %v827_v52  ;;  %v256_v13 = vmul.f32 %v7078_v9, %v7078_v9  ;;  %v7102_v61 = vmul.f32 0.35355338, %v950_v40  ;;  %v760_v31 = vmul.f32 %v611_v34, %v6755_v39  ;;  %vm620_vm1 = vmor %vm618_vm15, %vm619_vm14 }
 0x225   :  { %v614_v63 = vmul.f32 %v6012_v41, %v613_v56  ;;  %v257_v58 = vmul.f32 %v7085_v46, %v7085_v46 }
 0x226   :  { %5450 = vmatmul.msk.bf16.gmra.mxu0 %vm62_vm0, %v851_v17  ;;  %v340_v42 = vsel %vm62_vm0, %v256_v13, 0.0  ;;  %v1630_v2 = vpack.c.bf16 %v7102_v61, %v7102_v61 }
 0x227   :  { %v615_v59 = vmul.f32 0.5, %v614_v63  ;;  %341 = vadd.xlane.f32.xlu2 %v340_v42  ;;  %v327_v62 = vpop.xlane.xlu2 %326  ;;  %v343_v1 = vsel %vm62_vm0, %v257_v58, 0.0  ;;  %v324_v14 = vpop.xlane.xlu1 %323 }
 0x228   :  { %v379_v53 = vmul.f32 %v327_v62, %v6458_v22  ;;  %344 = vadd.xlane.f32.xlu0 %v343_v1  ;;  %v149_v5 = vpop.xlane.xlu0 %148  ;;  %v378_v27 = vmul.f32 %v324_v14, %v6458_v22  ;;  %v7126_v34 = vunpack.c.l.b16 %v1630_v2 }
 0x229   :  { %v616_v16 = vsub.f32 1.5, %v615_v59  ;;  %v194_v8 = vmul.f32 %v6458_v22, %v149_v5  ;;  %v951_v3 = vpop.f32.mrf.mxu0 }
 0x22a   :  { %v411_v25 = vadd.f32 1e-05, %v379_v53  ;;  %v952_v52 = vadd.f32 %v951_v3, %v6797_v26  ;;  %v410_v40 = vadd.f32 1e-05, %v378_v27  ;;  %10111 = vst [vmem:[#allocation4_spill] sm:$0xff] %v7126_v34 }
 0x22b   :  { %v617_v57 = vmul.f32 %v6012_v41, %v616_v16  ;;  %v7111_v56 = vsub.f32 %v6913_v47, %v194_v8  ;;  %v793_v47 = vmul.f32 %v6454_v15, %v760_v31 }
 0x22c   :  { %6013 = vrsqrt.f32 %v411_v25  ;;  %v7115_v17 = vmul.f32 0.35355338, %v952_v52  ;;  %vm638_vm2 = vweird.f32 %v411_v25  ;;  %vm628_vm6 = vweird.f32 %v410_v40 }
 0x22d   :  { %v621_v13 = vsel %vm620_vm1, %v6012_v41, %v617_v57  ;;  %v258_v63 = vmul.f32 %v7111_v56, %v7111_v56  ;;  %6015 = vrsqrt.f32 %v410_v40 }
 0x22e   :  { %v1631_v39 = vpack.c.bf16 %v7115_v17, %v7115_v17  ;;  %v761_v36 = vmul.f32 %v621_v13, %v6828_v33  ;;  %v829_v33 = vadd.f32 %v6586_v20, %v793_v47 }
 0x22f   :  { %v7123_v58 = vpop.xlane.xlu2 %329  ;;  %v346_v42 = vsel %vm62_vm0, %v258_v63, 0.0  ;;  %v152_v62 = vpop.xlane.xlu1 %151 }
 0x230   :  { %v7128_v59 = vunpack.c.l.b16 %v1631_v39  ;;  %347 = vadd.xlane.f32.xlu1 %v346_v42  ;;  %v794_v41 = vmul.f32 %v6454_v15, %v761_v36  ;;  %v195_v53 = vmul.f32 %v6458_v22, %v152_v62 }
 0x232   :  { %v6014_v1 = vpop.eup %6013  ;;  %v954_v5 = vpop.f32.mrf.mxu0  ;;  %v830_v16 = vadd.f32 %v6586_v20, %v794_v41  ;;  %v7137_v27 = vsub.f32 %v6952_v19, %v195_v53 }
 0x233   :  { %v633_v8 = vmul.f32 %v6014_v1, %v411_v25  ;;  %v6016_v3 = vpop.eup %6015  ;;  %v955_v2 = vadd.f32 %v954_v5, %v6797_v26  ;;  %vm639_vm3 = vweird.f32 %v6014_v1 }
 0x234   :  { %v852_v52 = vpack.c.bf16 %v830_v16, %v829_v33  ;;  %v623_v57 = vmul.f32 %v6016_v3, %v410_v40  ;;  %v259_v13 = vmul.f32 %v7137_v27, %v7137_v27  ;;  %vm7147_vm4 = vmor %vm638_vm2, %vm639_vm3  ;;  %vm629_vm5 = vweird.f32 %v6016_v3 }
 0x235   :  { %v634_v31 = vmul.f32 %v6014_v1, %v633_v8  ;;  %v7145_v62 = vmul.f32 0.35355338, %v955_v2  ;;  %vm630_vm7 = vmor %vm628_vm6, %vm629_vm5 }
 0x236   :  { %5451 = vmatmul.msk.bf16.gmra.mxu0 %vm62_vm0, %v852_v52  ;;  %v624_v39 = vmul.f32 %v6016_v3, %v623_v57  ;;  %v349_v19 = vsel %vm62_vm0, %v259_v13, 0.0 }
 0x237   :  { %v635_v63 = vmul.f32 0.5, %v634_v31  ;;  %v158_v36 = vpop.xlane.xlu2 %157  ;;  %350 = vadd.xlane.f32.xlu2 %v349_v19  ;;  %v155_v53 = vpop.xlane.xlu1 %154 }
 0x238   :  { %v197_v47 = vmul.f32 %v6458_v22, %v158_v36  ;;  %v625_v41 = vmul.f32 0.5, %v624_v39  ;;  %v196_v25 = vmul.f32 %v6458_v22, %v155_v53 }
 0x239   :  { %v636_v42 = vsub.f32 1.5, %v635_v63 }
 0x23a   :  { %v7152_v33 = vsub.f32 %v6968_v32, %v197_v47  ;;  %v956_v16 = vpop.f32.mrf.mxu0  ;;  %v626_v52 = vsub.f32 1.5, %v625_v41  ;;  %v7156_v31 = vsub.f32 %v6976_v7, %v196_v25  ;;  %v1632_v32 = vpack.c.bf16 %v7145_v62, %v7145_v62 }
 0x23b   :  { %v637_v8 = vmul.f32 %v6014_v1, %v636_v42  ;;  %v957_v57 = vadd.f32 %v956_v16, %v6797_v26 }
 0x23c   :  { %v261_v2 = vmul.f32 %v7152_v33, %v7152_v33  ;;  %v627_v63 = vmul.f32 %v6016_v3, %v626_v52  ;;  %v260_v7 = vmul.f32 %v7156_v31, %v7156_v31  ;;  %v7176_v53 = vunpack.c.l.b16 %v1632_v32 }
 0x23d   :  { %v641_v13 = vsel %vm7147_vm4, %v6014_v1, %v637_v8  ;;  %v7165_v39 = vmul.f32 0.35355338, %v957_v57 }
 0x23e   :  { %v355_v36 = vsel %vm62_vm0, %v261_v2, 0.0  ;;  %v763_v47 = vmul.f32 %v641_v13, %v6882_v55  ;;  %v631_v19 = vsel %vm630_vm7, %v6016_v3, %v627_v63  ;;  %v352_v40 = vsel %vm62_vm0, %v260_v7, 0.0 }
 0x23f   :  { %356 = vadd.xlane.f32.xlu1 %v355_v36  ;;  %v1633_v1 = vpack.c.bf16 %v7165_v39, %v7165_v39  ;;  %v762_v42 = vmul.f32 %v631_v19, %v6905_v35  ;;  %353 = vadd.xlane.f32.xlu0 %v352_v40  ;;  %v5616_v36 = vpack.i.bf16 %v6845_v12, %v6822_v44  ;;  %v339_v12 = vpop.xlane.xlu1 %338 }
 0x240   :  { %v796_v41 = vmul.f32 %v6454_v15, %v763_v47  ;;  %v380_v40 = vmul.f32 %v7123_v58, %v6458_v22 }
 0x241   :  { %v7178_v5 = vunpack.c.l.b16 %v1633_v1  ;;  %v795_v16 = vmul.f32 %v6454_v15, %v762_v42 }
 0x242   :  { %v959_v25 = vpop.f32.mrf.mxu0  ;;  %v832_v55 = vadd.f32 %v6586_v20, %v796_v41  ;;  %v412_v44 = vadd.f32 1e-05, %v380_v40  ;;  %v383_v41 = vmul.f32 %v339_v12, %v6458_v22 }
 0x243   :  { %v831_v3 = vadd.f32 %v6586_v20, %v795_v16  ;;  %v960_v52 = vadd.f32 %v959_v25, %v6797_v26 }
 0x244   :  { %6017 = vrsqrt.f32 %v412_v44  ;;  %v7210_v16 = vadd.f32 1e-05, %v383_v41  ;;  %vm648_vm8 = vweird.f32 %v412_v44 }
 0x245   :  { %v853_v35 = vpack.c.bf16 %v832_v55, %v831_v3  ;;  %v7187_v57 = vmul.f32 0.35355338, %v960_v52 }
 0x246   :  { %6019 = vrsqrt.f32 %v7210_v16  ;;  %vm678_vm14 = vweird.f32 %v7210_v16 }
 0x247   :  { %5452 = vmatmul.msk.bf16.gmra.mxu0 %vm62_vm0, %v853_v35  ;;  %v1634_v63 = vpack.c.bf16 %v7187_v57, %v7187_v57 }
 0x249   :  { %v7198_v47 = vunpack.c.l.b16 %v1634_v63 }
 0x24a   :  { %v961_v2 = vpop.f32.mrf.mxu0  ;;  %v6018_v42 = vpop.eup %6017 }
 0x24b   :  { %v962_v13 = vadd.f32 %v961_v2, %v6797_v26  ;;  %10114 = vst [vmem:[#allocation5_spill] sm:$0xff] %v7198_v47  ;;  %v643_v25 = vmul.f32 %v6018_v42, %v412_v44  ;;  %vm649_vm9 = vweird.f32 %v6018_v42 }
 0x24c   :  { %vm7220_vm10 = vmor %vm648_vm8, %vm649_vm9 }
 0x24d   :  { %v7192_v32 = vmul.f32 0.35355338, %v962_v13  ;;  %v644_v55 = vmul.f32 %v6018_v42, %v643_v25  ;;  %v7214_v13 = vpop.eup %6019 }
 0x24e   :  { %v673_v12 = vmul.f32 %v7214_v13, %v7210_v16  ;;  %vm679_vm15 = vweird.f32 %v7214_v13 }
 0x24f   :  { %v1635_v7 = vpack.c.bf16 %v7192_v32, %v7192_v32  ;;  %5617 = vrot.lane.b32.xlu2 %v5616_v36, %s6376_s20  ;;  %v645_v2 = vmul.f32 0.5, %v644_v55  ;;  %vm7263_vm2 = vmor %vm678_vm14, %vm679_vm15 }
 0x250   :  { %v674_v44 = vmul.f32 %v7214_v13, %v673_v12 }
 0x251   :  { %v7200_v19 = vunpack.c.l.b16 %v1635_v7  ;;  %v646_v58 = vsub.f32 1.5, %v645_v2 }
 0x252   :  { %v675_v4 = vmul.f32 0.5, %v674_v44 }
 0x253   :  { %10115 = vst [vmem:[#allocation6_spill] sm:$0xff] %v7200_v19  ;;  %v647_v41 = vmul.f32 %v6018_v42, %v646_v58 }
 0x258   :  { %5612 = vrot.lane.b32.xlu1 %v5616_v36, %s6377_s21 }
 0x260   :  { %5622 = vrot.lane.b32.xlu1 %v5616_v36, %s6378_s22 }
 0x28a   :  { %v333_v3 = vpop.xlane.xlu0 %332 }
 0x28b   :  { %v381_v52 = vmul.f32 %v333_v3, %v6458_v22 }
 0x28d   :  { %v413_v35 = vadd.f32 1e-05, %v381_v52 }
 0x28f   :  { %6021 = vrsqrt.f32 %v413_v35  ;;  %vm658_vm12 = vweird.f32 %v413_v35 }
 0x293   :  { %v336_v63 = vpop.xlane.xlu0 %335  ;;  %v964_v7 = vpop.f32.mrf.mxu0 }
 0x294   :  { %v382_v36 = vmul.f32 %v336_v63, %v6458_v22  ;;  %v965_v52 = vadd.f32 %v964_v7, %v6797_v26  ;;  %v651_v63 = vsel %vm7220_vm10, %v6018_v42, %v647_v41 }
 0x295   :  { %v6022_v40 = vpop.eup %6021  ;;  %v764_v42 = vmul.f32 %v651_v63, %v6918_v48 }
 0x296   :  { %v653_v25 = vmul.f32 %v6022_v40, %v413_v35  ;;  %v414_v3 = vadd.f32 1e-05, %v382_v36  ;;  %v7227_v14 = vmul.f32 0.35355338, %v965_v52  ;;  %vm659_vm11 = vweird.f32 %v6022_v40 }
 0x297   :  { %vm660_vm13 = vmor %vm658_vm12, %vm659_vm11  ;;  %v797_v63 = vmul.f32 %v6454_v15, %v764_v42 }
 0x298   :  { %v654_v2 = vmul.f32 %v6022_v40, %v653_v25  ;;  %6023 = vrsqrt.f32 %v414_v3  ;;  %v1636_v55 = vpack.c.bf16 %v7227_v14, %v7227_v14  ;;  %vm668_vm3 = vweird.f32 %v414_v3 }
 0x29a   :  { %v655_v1 = vmul.f32 0.5, %v654_v2  ;;  %v342_v21 = vpop.xlane.xlu2 %341 }
 0x29b   :  { %v384_v58 = vmul.f32 %v342_v21, %v6458_v22  ;;  %v345_v36 = vpop.xlane.xlu0 %344  ;;  %v966_v23 = vpop.f32.mrf.mxu0 }
 0x29c   :  { %v656_v7 = vsub.f32 1.5, %v655_v1  ;;  %v385_v8 = vmul.f32 %v345_v36, %v6458_v22  ;;  %v967_v25 = vadd.f32 %v966_v23, %v6797_v26 }
 0x29d   :  { %v7232_v12 = vadd.f32 1e-05, %v384_v58  ;;  %v676_v58 = vsub.f32 1.5, %v675_v4 }
 0x29e   :  { %v6024_v41 = vpop.eup %6023  ;;  %v657_v52 = vmul.f32 %v6022_v40, %v656_v7  ;;  %v7237_v21 = vadd.f32 1e-05, %v385_v8  ;;  %v7239_v2 = vmul.f32 0.35355338, %v967_v25  ;;  %v7247_v8 = vunpack.c.l.b16 %v1636_v55 }
 0x29f   :  { %v663_v1 = vmul.f32 %v6024_v41, %v414_v3  ;;  %6025 = vrsqrt.f32 %v7232_v12  ;;  %vm669_vm1 = vweird.f32 %v6024_v41  ;;  %v833_v55 = vadd.f32 %v6586_v20, %v797_v63 }
 0x2a0   :  { %v661_v23 = vsel %vm660_vm13, %v6022_v40, %v657_v52  ;;  %6027 = vrsqrt.f32 %v7237_v21  ;;  %v1637_v35 = vpack.c.bf16 %v7239_v2, %v7239_v2  ;;  %vm670_vm4 = vmor %vm668_vm3, %vm669_vm1  ;;  %vm688_vm7 = vweird.f32 %v7232_v12 }
 0x2a1   :  { %v664_v48 = vmul.f32 %v6024_v41, %v663_v1  ;;  %v765_v44 = vmul.f32 %v661_v23, %v7025_v54  ;;  %vm698_vm8 = vweird.f32 %v7237_v21 }
 0x2a2   :  { %v7249_v36 = vunpack.c.l.b16 %v1637_v35  ;;  %v677_v35 = vmul.f32 %v7214_v13, %v676_v58 }
 0x2a3   :  { %v665_v7 = vmul.f32 0.5, %v664_v48  ;;  %v348_v25 = vpop.xlane.xlu1 %347  ;;  %v969_v10 = vpop.f32.mrf.mxu0  ;;  %v798_v40 = vmul.f32 %v6454_v15, %v765_v44 }
 0x2a4   :  { %v386_v52 = vmul.f32 %v348_v25, %v6458_v22  ;;  %v681_v58 = vsel %vm7263_vm2, %v7214_v13, %v677_v35 }
 0x2a5   :  { %v6026_v42 = vpop.eup %6025  ;;  %v666_v4 = vsub.f32 1.5, %v665_v7  ;;  %v834_v1 = vadd.f32 %v6586_v20, %v798_v40 }
 0x2a6   :  { %v6028_v23 = vpop.eup %6027  ;;  %v683_v48 = vmul.f32 %v6026_v42, %v7232_v12  ;;  %v7261_v16 = vadd.f32 1e-05, %v386_v52  ;;  %vm689_vm5 = vweird.f32 %v6026_v42 }
 0x2a7   :  { %v667_v25 = vmul.f32 %v6024_v41, %v666_v4  ;;  %v693_v7 = vmul.f32 %v6028_v23, %v7237_v21  ;;  %v854_v54 = vpack.c.bf16 %v834_v1, %v833_v55  ;;  %v7275_v55 = vadd.f32 %v969_v10, %v6797_v26  ;;  %vm690_vm9 = vmor %vm688_vm7, %vm689_vm5 }
 0x2a8   :  { %v684_v63 = vmul.f32 %v6026_v42, %v683_v48  ;;  %6029 = vrsqrt.f32 %v7261_v16  ;;  %vm699_vm6 = vweird.f32 %v6028_v23  ;;  %vm708_vm11 = vweird.f32 %v7261_v16 }
 0x2a9   :  { %v671_v40 = vsel %vm670_vm4, %v6024_v41, %v667_v25  ;;  %v694_v47 = vmul.f32 %v6028_v23, %v693_v7  ;;  %5453 = vmatmul.msk.bf16.gmra.mxu0 %vm62_vm0, %v854_v54  ;;  %v767_v41 = vmul.f32 %v681_v58, %v6995_v60  ;;  %vm700_vm10 = vmor %vm698_vm8, %vm699_vm6  ;;  %v1686_v7 = vpack.c.bf16 %v7275_v55, %v7275_v55 }
 0x2aa   :  { %v685_v52 = vmul.f32 0.5, %v684_v63  ;;  %v766_v19 = vmul.f32 %v671_v40, %v7054_v18  ;;  %v351_v1 = vpop.xlane.xlu2 %350  ;;  %vm1826_vm8 = vcmask 64512  }
 0x2ab   :  { %v695_v4 = vmul.f32 0.5, %v694_v47  ;;  %v971_v3 = vpop.f32.mrf.mxu0  ;;  %v387_v54 = vmul.f32 %v351_v1, %v6458_v22  ;;  %v800_v12 = vmul.f32 %v6454_v15, %v767_v41 }
 0x2ac   :  { %v686_v34 = vsub.f32 1.5, %v685_v52  ;;  %v7282_v18 = vadd.f32 %v971_v3, %v6797_v26  ;;  %v799_v60 = vmul.f32 %v6454_v15, %v766_v19 }
 0x2ad   :  { %v696_v48 = vsub.f32 1.5, %v695_v4  ;;  %v419_v13 = vadd.f32 1e-05, %v387_v54 }
 0x2ae   :  { %v6030_v25 = vpop.eup %6029  ;;  %v687_v44 = vmul.f32 %v6026_v42, %v686_v34  ;;  %v1687_v52 = vpack.c.bf16 %v7282_v18, %v7282_v18 }
 0x2af   :  { %v697_v47 = vmul.f32 %v6028_v23, %v696_v48  ;;  %v703_v10 = vmul.f32 %v6030_v25, %v7261_v16  ;;  %6031 = vrsqrt.f32 %v419_v13  ;;  %v7297_v48 = vunpack.c.l.b16 %v1686_v7 }
 0x2b0   :  { %v691_v35 = vsel %vm690_vm9, %v6026_v42, %v687_v44  ;;  %v835_v42 = vadd.f32 %v6586_v20, %v799_v60  ;;  %v7299_v41 = vunpack.c.l.b16 %v1687_v52  ;;  %vm709_vm12 = vweird.f32 %v6030_v25 }
 0x2b1   :  { %v701_v34 = vsel %vm700_vm10, %v6028_v23, %v697_v47  ;;  %v704_v63 = vmul.f32 %v6030_v25, %v703_v10  ;;  %v768_v40 = vmul.f32 %v691_v35, %v7078_v9  ;;  %vm710_vm13 = vmor %vm708_vm11, %vm709_vm12  ;;  %vm718_vm15 = vweird.f32 %v419_v13 }
 0x2b2   :  { %v357_v21 = vpop.xlane.xlu1 %356  ;;  %v769_v58 = vmul.f32 %v701_v34, %v7085_v46  ;;  %v354_v3 = vpop.xlane.xlu0 %353  ;;  %v836_v46 = vadd.f32 %v6586_v20, %v800_v12  ;;  %v1823_v60 = vpack.c.b16 %v7299_v41, %v7297_v48  ;;  %vm2839_vm9 = vcmask 130048  }
 0x2b3   :  { %v705_v4 = vmul.f32 0.5, %v704_v63  ;;  %v389_v19 = vmul.f32 %v357_v21, %v6458_v22  ;;  %v801_v23 = vmul.f32 %v6454_v15, %v768_v40  ;;  %v388_v44 = vmul.f32 %v354_v3, %v6458_v22 }
 0x2b4   :  { %v802_v1 = vmul.f32 %v6454_v15, %v769_v58  ;;  %v855_v7 = vpack.c.bf16 %v836_v46, %v835_v42 }
 0x2b5   :  { %v706_v9 = vsub.f32 1.5, %v705_v4  ;;  %v421_v54 = vadd.f32 1e-05, %v389_v19  ;;  %v837_v47 = vadd.f32 %v6586_v20, %v801_v23  ;;  %v6032_v35 = vpop.eup %6031  ;;  %v420_v21 = vadd.f32 1e-05, %v388_v44 }
 0x2b6   :  { %v838_v10 = vadd.f32 %v6586_v20, %v802_v1  ;;  %v713_v63 = vmul.f32 %v6032_v35, %v419_v13  ;;  %vm719_vm14 = vweird.f32 %v6032_v35 }
 0x2b7   :  { %6033 = vrsqrt.f32 %v421_v54  ;;  %v707_v34 = vmul.f32 %v6030_v25, %v706_v9  ;;  %vm720_vm1 = vmor %vm718_vm15, %vm719_vm14  ;;  %vm738_vm2 = vweird.f32 %v421_v54  ;;  %vm728_vm4 = vweird.f32 %v420_v21 }
 0x2b8   :  { %v856_v12 = vpack.c.bf16 %v838_v10, %v837_v47  ;;  %v714_v40 = vmul.f32 %v6032_v35, %v713_v63  ;;  %6035 = vrsqrt.f32 %v420_v21 }
 0x2b9   :  { %5454 = vmatmul.msk.bf16.gmra.mxu0 %vm62_vm0, %v855_v7  ;;  %v711_v58 = vsel %vm710_vm13, %v6030_v25, %v707_v34 }
 0x2ba   :  { %5455 = vmatmul.msk.bf16.vlgmr.msra.gmra.mxu3 %vm62_vm0, %v856_v12  ;;  %v715_v52 = vmul.f32 0.5, %v714_v40  ;;  %v770_v42 = vmul.f32 %v711_v58, %v7111_v56 }
 0x2bc   :  { %v716_v19 = vsub.f32 1.5, %v715_v52  ;;  %v803_v25 = vmul.f32 %v6454_v15, %v770_v42 }
 0x2bd   :  { %v6034_v4 = vpop.eup %6033 }
 0x2be   :  { %v733_v16 = vmul.f32 %v6034_v4, %v421_v54  ;;  %v6036_v3 = vpop.eup %6035  ;;  %v717_v23 = vmul.f32 %v6032_v35, %v716_v19  ;;  %vm739_vm3 = vweird.f32 %v6034_v4  ;;  %v839_v12 = vadd.f32 %v6586_v20, %v803_v25 }
 0x2bf   :  { %v723_v9 = vmul.f32 %v6036_v3, %v420_v21  ;;  %vm729_vm5 = vweird.f32 %v6036_v3  ;;  %vm740_vm6 = vmor %vm738_vm2, %vm739_vm3 }
 0x2c0   :  { %v734_v1 = vmul.f32 %v6034_v4, %v733_v16  ;;  %v721_v46 = vsel %vm720_vm1, %v6032_v35, %v717_v23  ;;  %vm730_vm7 = vmor %vm728_vm4, %vm729_vm5 }
 0x2c1   :  { %v724_v47 = vmul.f32 %v6036_v3, %v723_v9  ;;  %v771_v10 = vmul.f32 %v721_v46, %v7137_v27 }
 0x2c2   :  { %v735_v44 = vmul.f32 0.5, %v734_v1 }
 0x2c3   :  { %v725_v34 = vmul.f32 0.5, %v724_v47  ;;  %v804_v56 = vmul.f32 %v6454_v15, %v771_v10 }
 0x2c4   :  { %v736_v7 = vsub.f32 1.5, %v735_v44 }
 0x2c5   :  { %v726_v13 = vsub.f32 1.5, %v725_v34  ;;  %v840_v35 = vadd.f32 %v6586_v20, %v804_v56 }
 0x2c6   :  { %v737_v63 = vmul.f32 %v6034_v4, %v736_v7 }
 0x2c7   :  { %v727_v40 = vmul.f32 %v6036_v3, %v726_v13  ;;  %v857_v27 = vpack.c.bf16 %v840_v35, %v839_v12 }
 0x2c8   :  { %v741_v58 = vsel %vm740_vm6, %v6034_v4, %v737_v63 }
 0x2c9   :  { %v731_v52 = vsel %vm730_vm7, %v6036_v3, %v727_v40  ;;  %v773_v21 = vmul.f32 %v741_v58, %v7152_v33 }
 0x2ca   :  { %5456 = vmatmul.msk.bf16.gmra.mxu3 %vm62_vm0, %v857_v27  ;;  %v772_v54 = vmul.f32 %v731_v52, %v7156_v31 }
 0x2cb   :  { %v806_v16 = vmul.f32 %v6454_v15, %v773_v21 }
 0x2cc   :  { %v805_v19 = vmul.f32 %v6454_v15, %v772_v54 }
 0x2cd   :  { %v842_v23 = vadd.f32 %v6586_v20, %v806_v16 }
 0x2ce   :  { %v841_v42 = vadd.f32 %v6586_v20, %v805_v19  ;;  %v5641_v20 = vpack.i.bf16 %v6924_v50, %v6902_v11  ;;  %v5671_v50 = vpack.i.bf16 %v6980_v24, %v6962_v45 }
 0x2d0   :  { %v858_v1 = vpack.c.bf16 %v842_v23, %v841_v42 }
 0x2da   :  { %5457 = vmatmul.msk.bf16.gmra.mxu3 %vm62_vm0, %v858_v1 }
 0x33d   :  { %v994_v9 = vpop.f32.mrf.mxu3 }
 0x33e   :  { %v995_v3 = vadd.f32 %v994_v9, %v6797_v26 }
 0x340   :  { %v1696_v10 = vpack.c.bf16 %v995_v3, %v995_v3 }
 0x342   :  { %v1982_v63 = vunpack.c.l.b16 %v1696_v10 }
 0x345   :  { %v996_v4 = vpop.f32.mrf.mxu3 }
 0x346   :  { %v997_v46 = vadd.f32 %v996_v4, %v6797_v26 }
 0x348   :  { %v5636_v31 = vpack.i.bf16 %v997_v46, %v995_v3  ;;  %v1030_v44 = vpack.c.bf16 %v997_v46, %v995_v3  ;;  %v1697_v47 = vpack.c.bf16 %v997_v46, %v997_v46  ;;  %v5701_v3 = vpack.i.bf16 %v7056_v51, %v7043_v37 }
 0x349   :  { %v5726_v46 = vpack.i.bf16 %v7115_v17, %v7102_v61  ;;  %v5731_v37 = vpack.i.bf16 %v7165_v39, %v7145_v62  ;;  %v5766_v51 = vpack.i.bf16 %v7239_v2, %v7227_v14  ;;  %v7375_v61 = vpop.permute.xlu2 %5617  ;;  %v7379_v17 = vpack.i.bf16 %v7282_v18, %v7275_v55  ;;  %v7386_v14 = vpop.permute.xlu1 %5612 }
 0x34a   :  { %5637 = vrot.lane.b32.xlu2 %v5636_v31, %s6378_s22  ;;  %5627 = vrot.lane.b32.xlu1 %v5636_v31, %s6377_s21  ;;  %v1983_v25 = vunpack.c.l.b16 %v1697_v47  ;;  %v1025_v39 = vpack.c.bf16 %v7282_v18, %v7275_v55  ;;  %v974_v18 = vpop.f32.mrf.mxu0 }
 0x34b   :  { %1051 = vrot.lane.b32.xlu0 %v1030_v44, %s6379_s23 }
 0x34c   :  { %v1984_v13 = vpack.c.b16 %v1983_v25, %v1982_v63 }
 0x34d   :  { %v999_v33 = vpop.f32.mrf.mxu3 }
 0x34e   :  { %v1000_v34 = vadd.f32 %v999_v33, %v6797_v26 }
 0x350   :  { %v1698_v58 = vpack.c.bf16 %v1000_v34, %v1000_v34 }
 0x352   :  { %5642 = vrot.lane.b32.xlu2 %v5641_v20, %s6377_s21  ;;  %5632 = vrot.lane.b32.xlu1 %v5636_v31, %s6376_s20  ;;  %v2014_v19 = vunpack.c.l.b16 %v1698_v58  ;;  %v5746_v31 = vpack.i.bf16 %v7192_v32, %v7187_v57  ;;  %v7393_v32 = vpop.permute.xlu1 %5622  ;;  %v976_v58 = vpop.f32.mrf.mxu0 }
 0x355   :  { %v1001_v7 = vpop.f32.mrf.mxu3 }
 0x356   :  { %v1002_v56 = vadd.f32 %v1001_v7, %v6797_v26 }
 0x358   :  { %v5656_v12 = vpack.i.bf16 %v1002_v56, %v1000_v34  ;;  %v1031_v35 = vpack.c.bf16 %v1002_v56, %v1000_v34  ;;  %v1699_v40 = vpack.c.bf16 %v1002_v56, %v1002_v56 }
 0x35a   :  { %5647 = vrot.lane.b32.xlu2 %v5641_v20, %s6376_s20  ;;  %1985 = vrot.lane.b32.xlu1 %v1984_v13, %s6374_s9  ;;  %v2015_v54 = vunpack.c.l.b16 %v1699_v40 }
 0x35b   :  { %5657 = vrot.lane.b32.xlu0 %v5656_v12, %s6377_s21 }
 0x35c   :  { %v2016_v16 = vpack.c.b16 %v2015_v54, %v2014_v19 }
 0x35d   :  { %v1004_v11 = vpop.f32.mrf.mxu3 }
 0x35e   :  { %v1005_v21 = vadd.f32 %v1004_v11, %v6797_v26 }
 0x360   :  { %v1700_v24 = vpack.c.bf16 %v1005_v21, %v1005_v21 }
 0x362   :  { %5667 = vrot.lane.b32.xlu2 %v5656_v12, %s6378_s22  ;;  %5652 = vrot.lane.b32.xlu1 %v5641_v20, %s6378_s22  ;;  %v2046_v9 = vunpack.c.l.b16 %v1700_v24 }
 0x363   :  { %5662 = vrot.lane.b32.xlu0 %v5656_v12, %s6376_s20 }
 0x365   :  { %v1006_v27 = vpop.f32.mrf.mxu3 }
 0x366   :  { %v1007_v52 = vadd.f32 %v1006_v27, %v6797_v26 }
 0x368   :  { %v1032_v42 = vpack.c.bf16 %v1007_v52, %v1005_v21  ;;  %v1701_v23 = vpack.c.bf16 %v1007_v52, %v1007_v52  ;;  %v5696_v45 = vpack.i.bf16 %v1007_v52, %v1005_v21 }
 0x36a   :  { %5672 = vrot.lane.b32.xlu2 %v5671_v50, %s6377_s21  ;;  %1053 = vrot.lane.b32.xlu1 %v1031_v35, %s6379_s23  ;;  %v2047_v1 = vunpack.c.l.b16 %v1701_v23 }
 0x36b   :  { %5677 = vrot.lane.b32.xlu0 %v5671_v50, %s6376_s20 }
 0x36c   :  { %v2048_v4 = vpack.c.b16 %v2047_v1, %v2046_v9 }
 0x372   :  { %2017 = vrot.lane.b32.xlu1 %v2016_v16, %s6374_s9  ;;  %1055 = vrot.lane.b32.xlu2 %v1032_v42, %s6379_s23 }
 0x373   :  { %5697 = vrot.lane.b32.xlu0 %v5696_v45, %s6378_s22 }
 0x37a   :  { %5682 = vrot.lane.b32.xlu1 %v5671_v50, %s6378_s22  ;;  %2049 = vrot.lane.b32.xlu2 %v2048_v4, %s6374_s9 }
 0x37b   :  { %5702 = vrot.lane.b32.xlu0 %v5701_v3, %s6377_s21 }
 0x382   :  { %5687 = vrot.lane.b32.xlu1 %v5696_v45, %s6377_s21  ;;  %5727 = vrot.lane.b32.xlu2 %v5726_v46, %s6378_s22 }
 0x383   :  { %5747 = vrot.lane.b32.xlu0 %v5746_v31, %s6377_s21 }
 0x38a   :  { %5692 = vrot.lane.b32.xlu1 %v5696_v45, %s6376_s20  ;;  %5732 = vrot.lane.b32.xlu2 %v5731_v37, %s6377_s21 }
 0x38b   :  { %5752 = vrot.lane.b32.xlu0 %v5746_v31, %s6376_s20 }
 0x392   :  { %5707 = vrot.lane.b32.xlu1 %v5701_v3, %s6376_s20  ;;  %5737 = vrot.lane.b32.xlu2 %v5731_v37, %s6376_s20 }
 0x393   :  { %5757 = vrot.lane.b32.xlu0 %v5746_v31, %s6378_s22 }
 0x39a   :  { %5712 = vrot.lane.b32.xlu1 %v5701_v3, %s6378_s22  ;;  %5767 = vrot.lane.b32.xlu2 %v5766_v51, %s6376_s20 }
 0x3a2   :  { %5717 = vrot.lane.b32.xlu1 %v5726_v46, %s6377_s21  ;;  %5787 = vrot.lane.b32.xlu2 %v7379_v17, %s6378_s22 }
 0x3a4   :  { %v5638_v62 = vpop.permute.xlu2 %5637 }
 0x3a5   :  { %v5640_v50 = vunpack.i.h.bf16 %v5638_v62  ;;  %v5639_v35 = vunpack.i.l.bf16 %v5638_v62 }
 0x3a7   :  { %v1745_v21 = vpack.c.bf16 %v5640_v50, %v5640_v50  ;;  %v1744_v19 = vpack.c.bf16 %v5639_v35, %v5639_v35 }
 0x3a9   :  { %v2751_v9 = vunpack.c.l.b16 %v1745_v21  ;;  %v2750_v4 = vunpack.c.l.b16 %v1744_v19 }
 0x3aa   :  { %5722 = vrot.lane.b32.xlu1 %v5726_v46, %s6376_s20  ;;  %1041 = vrot.lane.b32.xlu2 %v1025_v39, %s6379_s23 }
 0x3ab   :  { %v2752_v62 = vpack.c.b16 %v2751_v9, %v2750_v4 }
 0x3ac   :  { %v7390_v57 = vpop.permute.xlu2 %5642 }
 0x3b2   :  { %5742 = vrot.lane.b32.xlu1 %v5731_v37, %s6378_s22 }
 0x3b4   :  { %v7395_v2 = vpop.permute.xlu2 %5647 }
 0x3b5   :  { %10120 = vst [vmem:[#allocation7_spill] sm:$0xff] %v7395_v2 }
 0x3ba   :  { %5762 = vrot.lane.b32.xlu1 %v5766_v51, %s6377_s21 }
 0x3bc   :  { %v5668_v44 = vpop.permute.xlu2 %5667  ;;  %v5628_v33 = vpop.permute.xlu1 %5627 }
 0x3bd   :  { %v5630_v20 = vunpack.i.h.bf16 %v5628_v33  ;;  %v5629_v55 = vunpack.i.l.bf16 %v5628_v33  ;;  %v7401_v13 = vpop.permute.xlu0 %1051 }
 0x3bf   :  { %v1713_v47 = vpack.c.bf16 %v5630_v20, %v5630_v20  ;;  %v1712_v10 = vpack.c.bf16 %v5629_v55, %v5629_v55 }
 0x3c1   :  { %v2239_v25 = vunpack.c.l.b16 %v1713_v47  ;;  %v2238_v7 = vunpack.c.l.b16 %v1712_v10 }
 0x3c2   :  { %5772 = vrot.lane.b32.xlu1 %v5766_v51, %s6378_s22  ;;  %v979_v51 = vpop.f32.mrf.mxu0 }
 0x3c3   :  { %v2240_v34 = vpack.c.b16 %v2239_v25, %v2238_v7  ;;  %v977_v25 = vadd.f32 %v976_v58, %v6797_v26  ;;  %v5670_v7 = vunpack.i.h.bf16 %v5668_v44 }
 0x3c4   :  { %v7399_v56 = vpop.permute.xlu2 %5672  ;;  %v5633_v63 = vpop.permute.xlu1 %5632 }
 0x3c5   :  { %v5635_v12 = vunpack.i.h.bf16 %v5633_v63  ;;  %v5634_v11 = vunpack.i.l.bf16 %v5633_v63  ;;  %2241 = vrot.lane.b32.xlu0 %v2240_v34, %s6374_s9  ;;  %v5669_v34 = vunpack.i.l.bf16 %v5668_v44  ;;  %v5464_v44 = vld [vmem:[%s10015_s2 + $0x18] sm:$0xf] }
 0x3c7   :  { %v1729_v40 = vpack.c.bf16 %v5635_v12, %v5635_v12  ;;  %v1728_v27 = vpack.c.bf16 %v5634_v11, %v5634_v11  ;;  %v975_v11 = vadd.f32 %v974_v18, %v6797_v26  ;;  %v5590_v18 = vld [vmem:[%s10015_s2 + $0x20] sm:$0xf0] }
 0x3c8   :  { %v5465_v58 = vor.u32 %v5590_v18, %v5464_v44 }
 0x3c9   :  { %v2495_v52 = vunpack.c.l.b16 %v1729_v40  ;;  %v2494_v54 = vunpack.c.l.b16 %v1728_v27  ;;  %v1747_v40 = vpack.c.bf16 %v5670_v7, %v5670_v7  ;;  %v1746_v27 = vpack.c.bf16 %v5669_v34, %v5669_v34 }
 0x3ca   :  { %5777 = vrot.lane.b32.xlu1 %v7379_v17, %s6377_s21  ;;  %v5796_v19 = vpack.i.bf16 %v977_v25, %v975_v11  ;;  %1099 = vmatpush.bf16.msra.mxu1 %v5465_v58 }
 0x3cb   :  { %v2496_v16 = vpack.c.b16 %v2495_v52, %v2494_v54  ;;  %5602 = vmatpush.bf16.msra.mxu2 %v5465_v58 }
 0x3cc   :  { %v7406_v42 = vpop.permute.xlu1 %1985  ;;  %v7408_v23 = vpop.permute.xlu2 %1055 }
 0x3cd   :  { %v5658_v45 = vpop.permute.xlu0 %5657  ;;  %2497 = vrot.lane.b32.xlu0 %v2496_v16, %s6374_s9  ;;  %v981_v16 = vpop.f32.mrf.mxu0 }
 0x3ce   :  { %v5660_v24 = vunpack.i.h.bf16 %v5658_v45  ;;  %v5659_v1 = vunpack.i.l.bf16 %v5658_v45  ;;  %v2783_v45 = vunpack.c.l.b16 %v1747_v40  ;;  %v7459_v48 = vadd.f32 %v981_v16, %v6797_v26 }
 0x3d0   :  { %v1715_v3 = vpack.c.bf16 %v5660_v24, %v5660_v24  ;;  %v1714_v46 = vpack.c.bf16 %v5659_v1, %v5659_v1  ;;  %v2782_v24 = vunpack.c.l.b16 %v1746_v27  ;;  %v5587_v1 = vld [vmem:[%s10015_s2 + $0x8] sm:$0xf0] }
 0x3d2   :  { %v2271_v31 = vunpack.c.l.b16 %v1715_v3  ;;  %v2270_v37 = vunpack.c.l.b16 %v1714_v46  ;;  %v2784_v46 = vpack.c.b16 %v2783_v45, %v2782_v24 }
 0x3d4   :  { %v7411_v39 = vpop.permute.xlu1 %5652  ;;  %v7413_v33 = vpop.permute.xlu2 %2049  ;;  %v2272_v20 = vpack.c.b16 %v2271_v31, %v2270_v37  ;;  %v1026_v31 = vpack.c.bf16 %v977_v25, %v975_v11  ;;  %v1689_v37 = vpack.c.bf16 %v977_v25, %v977_v25 }
 0x3d5   :  { %v5663_v55 = vpop.permute.xlu0 %5662  ;;  %2753 = vrot.lane.b32.xlu0 %v2752_v62, %s6374_s9  ;;  %v984_v62 = vpop.f32.mrf.mxu0 }
 0x3d6   :  { %v5665_v47 = vunpack.i.h.bf16 %v5663_v55  ;;  %v5664_v10 = vunpack.i.l.bf16 %v5663_v55  ;;  %2273 = vrot.lane.b32.xlu1 %v2272_v20, %s6374_s9  ;;  %v1688_v20 = vpack.c.bf16 %v975_v11, %v975_v11  ;;  %v1855_v55 = vunpack.c.l.b16 %v1689_v37 }
 0x3d8   :  { %v1731_v63 = vpack.c.bf16 %v5665_v47, %v5665_v47  ;;  %v1730_v12 = vpack.c.bf16 %v5664_v10, %v5664_v10  ;;  %v1854_v47 = vunpack.c.l.b16 %v1688_v20 }
 0x3da   :  { %v2527_v50 = vunpack.c.l.b16 %v1731_v63  ;;  %v2526_v35 = vunpack.c.l.b16 %v1730_v12  ;;  %v1856_v34 = vpack.c.b16 %v1855_v55, %v1854_v47 }
 0x3dc   :  { %v7419_v52 = vpop.permute.xlu1 %1053  ;;  %v7421_v54 = vpop.permute.xlu2 %5727  ;;  %v2528_v21 = vpack.c.b16 %v2527_v50, %v2526_v35 }
 0x3dd   :  { %5782 = vrot.lane.b32.xlu0 %v7379_v17, %s6376_s20  ;;  %v5460_v17 = vld [vmem:[%s10015_s2] sm:$0xf]  ;;  %v7449_v10 = vpop.permute.xlu0 %5677  ;;  %v986_v41 = vpop.f32.mrf.mxu0 }
 0x3de   :  { %2529 = vrot.lane.b32.xlu2 %v2528_v21, %s6374_s9  ;;  %5797 = vrot.lane.b32.xlu1 %v5796_v19, %s6376_s20  ;;  %v5461_v9 = vor.u32 %v5587_v1, %v5460_v17  ;;  %v7470_v27 = vadd.f32 %v986_v41, %v6797_v26 }
 0x3e0   :  { %1100 = vmatpush.bf16.msra.mxu1 %v5461_v9  ;;  %5603 = vmatpush.bf16.msra.mxu2 %v5461_v9  ;;  %v1693_v1 = vpack.c.bf16 %v7470_v27, %v7470_v27 }
 0x3e2   :  { %v1919_v41 = vunpack.c.l.b16 %v1693_v1 }
 0x3e4   :  { %v7439_v4 = vpop.permute.xlu1 %2017  ;;  %v7441_v3 = vpop.permute.xlu2 %5732 }
 0x3e5   :  { %1824 = vrot.lane.b32.xlu0 %v1823_v60, %s6374_s9  ;;  %v7462_v60 = vadd.f32 %v979_v51, %v6797_v26  ;;  %v5698_v50 = vpop.permute.xlu0 %5697  ;;  %v7473_v51 = vadd.f32 %v984_v62, %v6797_v26  ;;  %v989_v18 = vpop.f32.mrf.mxu0 }
 0x3e6   :  { %2785 = vrot.lane.b32.xlu2 %v2784_v46, %s6374_s9  ;;  %1043 = vrot.lane.b32.xlu1 %v1026_v31, %s6379_s23  ;;  %v5700_v16 = vunpack.i.h.bf16 %v5698_v50  ;;  %v5699_v44 = vunpack.i.l.bf16 %v5698_v50  ;;  %v990_v1 = vadd.f32 %v989_v18, %v6797_v26 }
 0x3e7   :  { %v1027_v63 = vpack.c.bf16 %v7459_v48, %v7462_v60  ;;  %v7477_v24 = vpack.i.bf16 %v7470_v27, %v7473_v51  ;;  %v1692_v62 = vpack.c.bf16 %v7473_v51, %v7473_v51 }
 0x3e8   :  { %v1749_v9 = vpack.c.bf16 %v5700_v16, %v5700_v16  ;;  %v1748_v46 = vpack.c.bf16 %v5699_v44, %v5699_v44  ;;  %v1694_v18 = vpack.c.bf16 %v990_v1, %v990_v1 }
 0x3ec   :  { %v7451_v7 = vpop.permute.xlu1 %5682  ;;  %v7453_v25 = vpop.permute.xlu2 %5737 }
 0x3ed   :  { %10121 = vst [vmem:[#allocation8_spill] sm:$0xff] %v7451_v7  ;;  %5802 = vrot.lane.b32.xlu0 %v5796_v19, %s6378_s22 }
 0x3ee   :  { %5792 = vrot.lane.b32.xlu2 %v5796_v19, %s6377_s21  ;;  %1857 = vrot.lane.b32.xlu1 %v1856_v34, %s6374_s9 }
 0x3f4   :  { %v5688_v12 = vpop.permute.xlu1 %5687  ;;  %v7466_v11 = vpop.permute.xlu2 %5767 }
 0x3f5   :  { %10122 = vst [vmem:[#allocation9_spill] sm:$0xff] %v7466_v11  ;;  %v5690_v35 = vunpack.i.h.bf16 %v5688_v12  ;;  %v5689_v40 = vunpack.i.l.bf16 %v5688_v12  ;;  %1045 = vrot.lane.b32.xlu0 %v1027_v63, %s6379_s23  ;;  %v2815_v63 = vunpack.c.l.b16 %v1749_v9  ;;  %v2814_v12 = vunpack.c.l.b16 %v1748_v46 }
 0x3f7   :  { %v1717_v21 = vpack.c.bf16 %v5690_v35, %v5690_v35  ;;  %v1716_v19 = vpack.c.bf16 %v5689_v40, %v5689_v40  ;;  %v1918_v40 = vunpack.c.l.b16 %v1692_v62 }
 0x3f9   :  { %v2303_v58 = vunpack.c.l.b16 %v1717_v21  ;;  %v2302_v45 = vunpack.c.l.b16 %v1716_v19  ;;  %v991_v21 = vpop.f32.mrf.mxu0  ;;  %v1920_v19 = vpack.c.b16 %v1919_v41, %v1918_v40 }
 0x3fb   :  { %v2304_v17 = vpack.c.b16 %v2303_v58, %v2302_v45  ;;  %v2816_v45 = vpack.c.b16 %v2815_v63, %v2814_v12 }
 0x3fc   :  { %v5693_v31 = vpop.permute.xlu1 %5692  ;;  %v5788_v37 = vpop.permute.xlu2 %5787 }
 0x3fd   :  { %v5695_v20 = vunpack.i.h.bf16 %v5693_v31  ;;  %v5694_v55 = vunpack.i.l.bf16 %v5693_v31  ;;  %5822 = vrot.lane.b32.xlu0 %v7477_v24, %s6377_s21  ;;  %2305 = vrot.lane.b32.xlu2 %v2304_v17, %s6374_s9  ;;  %v992_v17 = vadd.f32 %v991_v21, %v6797_v26  ;;  %v5806_v31 = vpack.i.bf16 %v7459_v48, %v7462_v60 }
 0x3fe   :  { %v1691_v26 = vpack.c.bf16 %v7459_v48, %v7459_v48  ;;  %v5789_v41 = vunpack.i.l.bf16 %v5788_v37 }
 0x3ff   :  { %v1733_v47 = vpack.c.bf16 %v5695_v20, %v5695_v20  ;;  %v1732_v34 = vpack.c.bf16 %v5694_v55, %v5694_v55  ;;  %v5836_v9 = vpack.i.bf16 %v992_v17, %v990_v1  ;;  %v7501_v20 = vpop.permute.xlu0 %5702  ;;  %v1695_v55 = vpack.c.bf16 %v992_v17, %v992_v17 }
 0x400   :  { %v1887_v12 = vunpack.c.l.b16 %v1691_v26 }
 0x401   :  { %v2559_v50 = vunpack.c.l.b16 %v1733_v47  ;;  %v2558_v35 = vunpack.c.l.b16 %v1732_v34  ;;  %v1690_v47 = vpack.c.bf16 %v7462_v60, %v7462_v60  ;;  %v5790_v34 = vunpack.i.h.bf16 %v5788_v37 }
 0x402   :  { %v1951_v63 = vunpack.c.l.b16 %v1695_v55 }
 0x403   :  { %v2560_v16 = vpack.c.b16 %v2559_v50, %v2558_v35  ;;  %v1950_v50 = vunpack.c.l.b16 %v1694_v18  ;;  %v1886_v35 = vunpack.c.l.b16 %v1690_v47  ;;  %v1735_v21 = vpack.c.bf16 %v5790_v34, %v5790_v34 }
 0x404   :  { %v7486_v44 = vpop.permute.xlu1 %5707  ;;  %v1042_v58 = vpop.permute.xlu2 %1041  ;;  %v1028_v34 = vpack.c.bf16 %v7470_v27, %v7473_v51 }
 0x405   :  { %1921 = vrot.lane.b32.xlu0 %v1920_v19, %s6374_s9  ;;  %5466 = vmatmul.msk.bf16.vlgmr.msra.gmra.mxu1 %vm62_vm0, %v1042_v58  ;;  %v1734_v19 = vpack.c.bf16 %v5789_v41, %v5789_v41  ;;  %v1888_v58 = vpack.c.b16 %v1887_v12, %v1886_v35 }
 0x406   :  { %2817 = vrot.lane.b32.xlu2 %v2816_v45, %s6374_s9  ;;  %2561 = vrot.lane.b32.xlu1 %v2560_v16, %s6374_s9  ;;  %v1952_v16 = vpack.c.b16 %v1951_v63, %v1950_v50  ;;  %v2591_v45 = vunpack.c.l.b16 %v1735_v21 }
 0x407   :  { %v7511_v40 = vpop.permute.xlu0 %5747  ;;  %v2590_v60 = vunpack.c.l.b16 %v1734_v19 }
 0x40c   :  { %v7494_v46 = vpop.permute.xlu1 %5712 }
 0x40d   :  { %5837 = vrot.lane.b32.xlu0 %v5836_v9, %s6377_s21 }
 0x40e   :  { %5807 = vrot.lane.b32.xlu2 %v5806_v31, %s6377_s21  ;;  %5817 = vrot.lane.b32.xlu1 %v5806_v31, %s6378_s22 }
 0x40f   :  { %v7519_v55 = vpop.permute.xlu0 %5752 }
 0x414   :  { %v7503_v62 = vpop.permute.xlu1 %5717 }
 0x415   :  { %5842 = vrot.lane.b32.xlu0 %v5836_v9, %s6376_s20 }
 0x416   :  { %5812 = vrot.lane.b32.xlu2 %v5806_v31, %s6376_s20  ;;  %v2592_v31 = vpack.c.b16 %v2591_v45, %v2590_v60 }
 0x417   :  { %v7528_v18 = vpop.permute.xlu0 %5757 }
 0x418   :  { %10125 = vst [vmem:[#allocation12_spill] sm:$0xff] %v7528_v18 }
 0x41c   :  { %v7513_v48 = vpop.permute.xlu1 %5722 }
 0x41d   :  { %10123 = vst [vmem:[#allocation10_spill] sm:$0xff] %v7513_v48  ;;  %1953 = vrot.lane.b32.xlu0 %v1952_v16, %s6374_s9 }
 0x41e   :  { %1889 = vrot.lane.b32.xlu2 %v1888_v58, %s6374_s9  ;;  %v1029_v58 = vpack.c.bf16 %v992_v17, %v990_v1 }
 0x424   :  { %v7517_v37 = vpop.permute.xlu1 %5742 }
 0x425   :  { %10124 = vst [vmem:[#allocation11_spill] sm:$0xff] %v7517_v37  ;;  %2593 = vrot.lane.b32.xlu0 %v2592_v31, %s6374_s9 }
 0x426   :  { %5827 = vrot.lane.b32.xlu2 %v7477_v24, %s6376_s20 }
 0x42c   :  { %v7524_v26 = vpop.permute.xlu1 %5762 }
 0x42e   :  { %5832 = vrot.lane.b32.xlu2 %v7477_v24, %s6378_s22 }
 0x434   :  { %v7530_v47 = vpop.permute.xlu1 %5772 }
 0x436   :  { %1047 = vrot.lane.b32.xlu2 %v1028_v34, %s6379_s23 }
 0x437   :  { %v7535_v41 = vpop.permute.xlu0 %2241 }
 0x438   :  { %v7537_v63 = vpop.permute.xlu2 %2529 }
 0x43c   :  { %v5778_v12 = vpop.permute.xlu1 %5777 }
 0x43d   :  { %v5780_v35 = vunpack.i.h.bf16 %v5778_v12  ;;  %v5779_v24 = vunpack.i.l.bf16 %v5778_v12 }
 0x43e   :  { %5847 = vrot.lane.b32.xlu2 %v5836_v9, %s6378_s22 }
 0x43f   :  { %v7540_v50 = vpop.permute.xlu0 %2497  ;;  %v1703_v19 = vpack.c.bf16 %v5780_v35, %v5780_v35  ;;  %v1702_v16 = vpack.c.bf16 %v5779_v24, %v5779_v24 }
 0x440   :  { %v7542_v21 = vpop.permute.xlu2 %2785 }
 0x441   :  { %v2079_v51 = vunpack.c.l.b16 %v1703_v19  ;;  %v2078_v45 = vunpack.c.l.b16 %v1702_v16 }
 0x443   :  { %v2080_v37 = vpack.c.b16 %v2079_v51, %v2078_v45 }
 0x446   :  { %1049 = vrot.lane.b32.xlu2 %v1029_v58, %s6379_s23 }
 0x447   :  { %v7545_v27 = vpop.permute.xlu0 %2753 }
 0x448   :  { %10126 = vst [vmem:[#allocation13_spill] sm:$0xff] %v7545_v27  ;;  %v5793_v60 = vpop.permute.xlu2 %5792  ;;  %v7547_v31 = vpop.permute.xlu1 %2273 }
 0x449   :  { %v5795_v34 = vunpack.i.h.bf16 %v5793_v60  ;;  %v5794_v9 = vunpack.i.l.bf16 %v5793_v60 }
 0x44b   :  { %v1705_v15 = vpack.c.bf16 %v5795_v34, %v5795_v34  ;;  %v1704_v22 = vpack.c.bf16 %v5794_v9, %v5794_v9 }
 0x44d   :  { %v2111_v12 = vunpack.c.l.b16 %v1705_v15  ;;  %v2110_v7 = vunpack.c.l.b16 %v1704_v22 }
 0x44e   :  { %2081 = vrot.lane.b32.xlu2 %v2080_v37, %s6374_s9 }
 0x44f   :  { %v5783_v35 = vpop.permute.xlu0 %5782  ;;  %v2112_v17 = vpack.c.b16 %v2111_v12, %v2110_v7 }
 0x450   :  { %v5785_v1 = vunpack.i.h.bf16 %v5783_v35  ;;  %v5784_v24 = vunpack.i.l.bf16 %v5783_v35  ;;  %v5798_v58 = vpop.permute.xlu1 %5797 }
 0x451   :  { %v5800_v27 = vunpack.i.h.bf16 %v5798_v58  ;;  %v5799_v19 = vunpack.i.l.bf16 %v5798_v58  ;;  %2113 = vrot.lane.b32.xlu0 %v2112_v17, %s6374_s9 }
 0x452   :  { %v1719_v16 = vpack.c.bf16 %v5785_v1, %v5785_v1  ;;  %v1718_v11 = vpack.c.bf16 %v5784_v24, %v5784_v24 }
 0x453   :  { %v1721_v48 = vpack.c.bf16 %v5800_v27, %v5800_v27  ;;  %v1720_v60 = vpack.c.bf16 %v5799_v19, %v5799_v19 }
 0x454   :  { %v2335_v34 = vunpack.c.l.b16 %v1719_v16  ;;  %v2334_v9 = vunpack.c.l.b16 %v1718_v11 }
 0x455   :  { %v2367_v51 = vunpack.c.l.b16 %v1721_v48  ;;  %v2366_v15 = vunpack.c.l.b16 %v1720_v60 }
 0x456   :  { %v2336_v22 = vpack.c.b16 %v2335_v34, %v2334_v9 }
 0x457   :  { %v1825_v37 = vpop.permute.xlu0 %1824  ;;  %v7551_v45 = vpop.permute.xlu2 %2305  ;;  %v2368_v7 = vpack.c.b16 %v2367_v51, %v2366_v15 }
 0x458   :  { %v1044_v12 = vpop.permute.xlu1 %1043  ;;  %2337 = vrot.lane.b32.xlu1 %v2336_v22, %s6374_s9  ;;  %v1831_v35 = vsel %vm1826_vm8, %v1825_v37, 0  ;;  %v10127_v37 = vpack.c.b16 %v6945_v38, %v6943_v28 }
 0x459   :  { %5467 = vmatmul.msk.bf16.gmra.mxu1 %vm62_vm0, %v1044_v12  ;;  %2369 = vrot.lane.b32.xlu0 %v2368_v7, %s6374_s9 }
 0x45a   :  { %1840 = vmatpush.bf16.xpose.msrb.mxu2 %v1831_v35 }
 0x45f   :  { %v5803_v27 = vpop.permute.xlu0 %5802 }
 0x460   :  { %v5805_v11 = vunpack.i.h.bf16 %v5803_v27  ;;  %v5804_v48 = vunpack.i.l.bf16 %v5803_v27  ;;  %v7557_v17 = vpop.permute.xlu2 %2817  ;;  %v1858_v1 = vpop.permute.xlu1 %1857 }
 0x461   :  { %v1863_v24 = vsel %vm1826_vm8, %v1858_v1, 0 }
 0x462   :  { %v1737_v58 = vpack.c.bf16 %v5805_v11, %v5805_v11  ;;  %v1736_v19 = vpack.c.bf16 %v5804_v48, %v5804_v48  ;;  %1872 = vmatpush.bf16.xpose.msrb.mxu3 %v1863_v24 }
 0x464   :  { %v2623_v16 = vunpack.c.l.b16 %v1737_v58  ;;  %v2622_v60 = vunpack.c.l.b16 %v1736_v19 }
 0x466   :  { %v2624_v34 = vpack.c.b16 %v2623_v16, %v2622_v60 }
 0x467   :  { %v1046_v9 = vpop.permute.xlu0 %1045 }
 0x468   :  { %v5808_v51 = vpop.permute.xlu2 %5807  ;;  %2625 = vrot.lane.b32.xlu0 %v2624_v34, %s6374_s9 }
 0x469   :  { %v5810_v15 = vunpack.i.h.bf16 %v5808_v51  ;;  %v5809_v22 = vunpack.i.l.bf16 %v5808_v51  ;;  %5468 = vmatmul.msk.bf16.gmra.mxu1 %vm62_vm0, %v1046_v9  ;;  %5475 = vmatmul.msk.bf16.vlgmr.msrb.gmra.mxu3 %vm1826_vm8, %v10127_v37 }
 0x46b   :  { %v1707_v7 = vpack.c.bf16 %v5810_v15, %v5810_v15  ;;  %v1706_v12 = vpack.c.bf16 %v5809_v22, %v5809_v22 }
 0x46d   :  { %v2143_v35 = vunpack.c.l.b16 %v1707_v7  ;;  %v2142_v27 = vunpack.c.l.b16 %v1706_v12 }
 0x46f   :  { %v2144_v11 = vpack.c.b16 %v2143_v35, %v2142_v27  ;;  %v5823_v48 = vpop.permute.xlu0 %5822  ;;  %v1991_v35 = vsel %vm1826_vm8, %v7406_v42, 0 }
 0x470   :  { %v5813_v1 = vpop.permute.xlu2 %5812  ;;  %v5825_v19 = vunpack.i.h.bf16 %v5823_v48  ;;  %v5824_v16 = vunpack.i.l.bf16 %v5823_v48 }
 0x471   :  { %v5815_v24 = vunpack.i.h.bf16 %v5813_v1  ;;  %v5814_v58 = vunpack.i.l.bf16 %v5813_v1  ;;  %2145 = vrot.lane.b32.xlu0 %v2144_v11, %s6374_s9 }
 0x472   :  { %v1709_v28 = vpack.c.bf16 %v5825_v19, %v5825_v19  ;;  %v1708_v38 = vpack.c.bf16 %v5824_v16, %v5824_v16 }
 0x473   :  { %v1723_v60 = vpack.c.bf16 %v5815_v24, %v5815_v24  ;;  %v1722_v34 = vpack.c.bf16 %v5814_v58, %v5814_v58  ;;  %v2055_v24 = vsel %vm1826_vm8, %v7413_v33, 0 }
 0x474   :  { %v2175_v27 = vunpack.c.l.b16 %v1709_v28  ;;  %v2174_v11 = vunpack.c.l.b16 %v1708_v38 }
 0x475   :  { %v2399_v9 = vunpack.c.l.b16 %v1723_v60  ;;  %v2398_v51 = vunpack.c.l.b16 %v1722_v34  ;;  %v10129_v34 = vpack.c.b16 %v7067_v29, %v7065_v6 }
 0x476   :  { %v2176_v48 = vpack.c.b16 %v2175_v27, %v2174_v11 }
 0x477   :  { %v2400_v37 = vpack.c.b16 %v2399_v9, %v2398_v51  ;;  %v1922_v15 = vpop.permute.xlu0 %1921 }
 0x478   :  { %v1927_v22 = vsel %vm1826_vm8, %v1922_v15, 0  ;;  %v7568_v7 = vpop.permute.xlu2 %1889  ;;  %v7570_v12 = vpop.permute.xlu1 %2561 }
 0x479   :  { %10128 = vst [vmem:[#allocation14_spill] sm:$0xff] %v7570_v12  ;;  %2401 = vrot.lane.b32.xlu1 %v2400_v37, %s6374_s9  ;;  %1936 = vmatpush.bf16.xpose.msra.mxu3 %v1927_v22 }
 0x47f   :  { %v5838_v1 = vpop.permute.xlu0 %5837 }
 0x480   :  { %v5840_v58 = vunpack.i.h.bf16 %v5838_v1  ;;  %v5839_v19 = vunpack.i.l.bf16 %v5838_v1  ;;  %v5828_v16 = vpop.permute.xlu2 %5827  ;;  %v5818_v60 = vpop.permute.xlu1 %5817  ;;  %5477 = vmatmul.msk.bf16.vlgmr.msra.gmra.mxu3 %vm1826_vm8, %v10129_v34 }
 0x481   :  { %2000 = vmatpush.bf16.xpose.msrb.mxu3 %v1991_v35  ;;  %v5820_v42 = vunpack.i.h.bf16 %v5818_v60  ;;  %v5819_v9 = vunpack.i.l.bf16 %v5818_v60  ;;  %2177 = vrot.lane.b32.xlu1 %v2176_v48, %s6374_s9  ;;  %v5830_v38 = vunpack.i.h.bf16 %v5828_v16  ;;  %v5829_v37 = vunpack.i.l.bf16 %v5828_v16 }
 0x482   :  { %v1711_v51 = vpack.c.bf16 %v5840_v58, %v5840_v58  ;;  %v1710_v28 = vpack.c.bf16 %v5839_v19, %v5839_v19  ;;  %v7583_v48 = vpop.f32.mrf.mxu1 }
 0x483   :  { %v1739_v15 = vpack.c.bf16 %v5820_v42, %v5820_v42  ;;  %v1738_v33 = vpack.c.bf16 %v5819_v9, %v5819_v9  ;;  %v1725_v12 = vpack.c.bf16 %v5830_v38, %v5830_v38  ;;  %v1724_v6 = vpack.c.bf16 %v5829_v37, %v5829_v37 }
 0x484   :  { %v2207_v22 = vunpack.c.l.b16 %v1711_v51  ;;  %v2206_v35 = vunpack.c.l.b16 %v1710_v28 }
 0x485   :  { %v2655_v27 = vunpack.c.l.b16 %v1739_v15  ;;  %v2654_v11 = vunpack.c.l.b16 %v1738_v33  ;;  %v2431_v19 = vunpack.c.l.b16 %v1725_v12  ;;  %v2430_v16 = vunpack.c.l.b16 %v1724_v6 }
 0x486   :  { %v2208_v1 = vpack.c.b16 %v2207_v22, %v2206_v35  ;;  %v10130_v35 = vpack.c.b16 %v7178_v5, %v7176_v53 }
 0x487   :  { %v2656_v29 = vpack.c.b16 %v2655_v27, %v2654_v11  ;;  %v5843_v34 = vpop.permute.xlu0 %5842  ;;  %v2432_v37 = vpack.c.b16 %v2431_v19, %v2430_v16  ;;  %v10131_v19 = vpack.c.b16 %v7249_v36, %v7247_v8  ;;  %v1895_v16 = vsel %vm1826_vm8, %v7568_v7, 0 }
 0x488   :  { %v5845_v18 = vunpack.i.h.bf16 %v5843_v34  ;;  %v5844_v60 = vunpack.i.l.bf16 %v5843_v34  ;;  %v5833_v2 = vpop.permute.xlu2 %5832  ;;  %2209 = vrot.lane.b32.xlu2 %v2208_v1, %s6374_s9  ;;  %v5645_v36 = vunpack.i.h.bf16 %v7390_v57  ;;  %v5644_v7 = vunpack.i.l.bf16 %v7390_v57 }
 0x489   :  { %2064 = vmatpush.bf16.xpose.msra.mxu3 %v2055_v24  ;;  %2657 = vrot.lane.b32.xlu0 %v2656_v29, %s6374_s9  ;;  %v5835_v42 = vunpack.i.h.bf16 %v5833_v2  ;;  %v5834_v9 = vunpack.i.l.bf16 %v5833_v2 }
 0x48a   :  { %v1727_v24 = vpack.c.bf16 %v5845_v18, %v5845_v18  ;;  %v1726_v58 = vpack.c.bf16 %v5844_v60, %v5844_v60  ;;  %v7593_v12 = vpop.f32.mrf.mxu1 }
 0x48b   :  { %v1741_v15 = vpack.c.bf16 %v5835_v42, %v5835_v42  ;;  %v1740_v33 = vpack.c.bf16 %v5834_v9, %v5834_v9  ;;  %v5856_v27 = vpack.i.bf16 %v7593_v12, %v7583_v48  ;;  %v1641_v9 = vpack.c.bf16 %v5645_v36, %v5645_v36 }
 0x48c   :  { %v2463_v51 = vunpack.c.l.b16 %v1727_v24  ;;  %v2462_v28 = vunpack.c.l.b16 %v1726_v58 }
 0x48d   :  { %v2687_v18 = vunpack.c.l.b16 %v1741_v15  ;;  %v2686_v2 = vunpack.c.l.b16 %v1740_v33  ;;  %v5619_v15 = vunpack.i.l.bf16 %v7375_v61 }
 0x48e   :  { %v2464_v38 = vpack.c.b16 %v2463_v51, %v2462_v28  ;;  %v1640_v51 = vpack.c.bf16 %v5644_v7, %v5644_v7 }
 0x48f   :  { %v2688_v11 = vpack.c.b16 %v2687_v18, %v2686_v2  ;;  %v1954_v42 = vpop.permute.xlu0 %1953 }
 0x490   :  { %v1048_v22 = vpop.permute.xlu2 %1047  ;;  %2465 = vrot.lane.b32.xlu2 %v2464_v38, %s6374_s9  ;;  %5479 = vmatmul.msk.bf16.vlgmr.msrb.gmra.mxu3 %vm1826_vm8, %v10130_v35  ;;  %v2105_v33 = vunpack.c.l.b16 %v1640_v51  ;;  %v1654_v35 = vpack.c.bf16 %v5619_v15, %v5619_v15  ;;  %v2247_v51 = vsel %vm1826_vm8, %v7535_v41, 0  ;;  %v5735_v15 = vunpack.i.h.bf16 %v7441_v3 }
 0x491   :  { %5469 = vmatmul.msk.bf16.gmra.mxu1 %vm62_vm0, %v1048_v22  ;;  %2433 = vrot.lane.b32.xlu0 %v2432_v37, %s6374_s9  ;;  %v5620_v37 = vunpack.i.h.bf16 %v7375_v61  ;;  %v5710_v41 = vunpack.i.h.bf16 %v7486_v44 }
 0x493   :  { %v1655_v22 = vpack.c.bf16 %v5620_v37, %v5620_v37  ;;  %v2311_v37 = vsel %vm1826_vm8, %v7551_v45, 0  ;;  %v1649_v45 = vpack.c.bf16 %v5735_v15, %v5735_v15  ;;  %v10137_v15 = vld [vmem:[#allocation5_spill] sm:$0xff] }
 0x497   :  { %v7611_v8 = vpop.permute.xlu0 %2593 }
 0x498   :  { %v5848_v1 = vpop.permute.xlu2 %5847  ;;  %5857 = vrot.lane.b32.xlu2 %v5856_v27, %s6379_s23 }
 0x499   :  { %v5850_v6 = vunpack.i.h.bf16 %v5848_v1  ;;  %v5849_v29 = vunpack.i.l.bf16 %v5848_v1  ;;  %2689 = vrot.lane.b32.xlu0 %v2688_v11, %s6374_s9 }
 0x49b   :  { %v1743_v53 = vpack.c.bf16 %v5850_v6, %v5850_v6  ;;  %v1742_v5 = vpack.c.bf16 %v5849_v29, %v5849_v29  ;;  %v1959_v29 = vsel %vm1826_vm8, %v1954_v42, 0 }
 0x49d   :  { %v2719_v34 = vunpack.c.l.b16 %v1743_v53  ;;  %v2718_v60 = vunpack.c.l.b16 %v1742_v5  ;;  %v10132_v5 = vpack.c.b16 %v6868_v49, %v6861_v0  ;;  %v2023_v49 = vsel %vm1826_vm8, %v7439_v4, 0 }
 0x49f   :  { %v2720_v24 = vpack.c.b16 %v2719_v34, %v2718_v60 }
 0x4a0   :  { %v1050_v58 = vpop.permute.xlu2 %1049  ;;  %5481 = vmatmul.msk.bf16.vlgmr.msra.gmra.mxu3 %vm1826_vm8, %v10131_v19 }
 0x4a1   :  { %5470 = vmatmul.msk.bf16.vlgmr.msra.gmra.mxu2 %vm62_vm0, %v1050_v58  ;;  %2721 = vrot.lane.b32.xlu1 %v2720_v24, %s6374_s9  ;;  %v5705_v24 = vunpack.i.h.bf16 %v7501_v20  ;;  %v5704_v58 = vunpack.i.l.bf16 %v7501_v20 }
 0x4a2   :  { %1904 = vmatpush.bf16.xpose.msra.mxu2 %v1895_v16  ;;  %5852 = vrot.lane.b32.xlu0 %v5856_v27, %s6374_s9  ;;  %v10133_v16 = vpack.c.b16 %v6990_v43, %v6988_v30 }
 0x4a3   :  { %v1645_v42 = vpack.c.bf16 %v5705_v24, %v5705_v24  ;;  %v1644_v36 = vpack.c.bf16 %v5704_v58, %v5704_v58 }
 0x4a5   :  { %v2170_v4 = vunpack.c.l.b16 %v1645_v42 }
 0x4aa   :  { %5862 = vrot.lane.b32.xlu0 %v5856_v27, %s6380_s7  ;;  %v2329_v27 = vunpack.c.l.b16 %v1654_v35 }
 0x4b1   :  { %5471 = vmatmul.msk.bf16.gmra.mxu2 %vm62_vm0, %v7401_v13  ;;  %v2106_v13 = vunpack.c.l.b16 %v1641_v9 }
 0x4b3   :  { %v2107_v18 = vpack.c.b16 %v2106_v13, %v2105_v33  ;;  %v5734_v13 = vunpack.i.l.bf16 %v7441_v3  ;;  %v5709_v33 = vunpack.i.l.bf16 %v7486_v44  ;;  %v1753_v3 = vld [vmem:[%s10016_s1 + $0x18] sm:$0xff] }
 0x4c1   :  { %5472 = vmatmul.msk.bf16.gmra.mxu2 %vm62_vm0, %v7419_v52  ;;  %v2330_v52 = vunpack.c.l.b16 %v1655_v22  ;;  %v2082_v22 = vpop.permute.xlu2 %2081 }
 0x4c2   :  { %v2087_v35 = vsel %vm1826_vm8, %v2082_v22, 0 }
 0x4c3   :  { %v2114_v28 = vpop.permute.xlu0 %2113  ;;  %v2331_v11 = vpack.c.b16 %v2330_v52, %v2329_v27  ;;  %v1661_v52 = vpack.c.bf16 %v5710_v41, %v5710_v41  ;;  %v1660_v27 = vpack.c.bf16 %v5709_v33, %v5709_v33 }
 0x4c4   :  { %v2119_v38 = vsel %vm1826_vm8, %v2114_v28, 0  ;;  %v2169_v28 = vunpack.c.l.b16 %v1644_v36 }
 0x4c5   :  { %2128 = vmatpush.bf16.xpose.msrb.mxu3 %v2119_v38  ;;  %v2426_v58 = vunpack.c.l.b16 %v1661_v52 }
 0x4c6   :  { %v2171_v43 = vpack.c.b16 %v2170_v4, %v2169_v28  ;;  %v5754_v4 = vunpack.i.l.bf16 %v7519_v55  ;;  %v5765_v28 = vunpack.i.h.bf16 %v7524_v26 }
 0x4c8   :  { %v1666_v33 = vpack.c.bf16 %v5754_v4, %v5754_v4  ;;  %v1653_v22 = vpack.c.bf16 %v5765_v28, %v5765_v28 }
 0x4ca   :  { %v2338_v2 = vpop.permute.xlu1 %2337 }
 0x4cb   :  { %v2343_v57 = vsel %vm1826_vm8, %v2338_v2, 0  ;;  %v7632_v53 = vpop.permute.xlu0 %2369 }
 0x4cc   :  { %5483 = vmatmul.msk.bf16.vlgmr.msrb.gmra.mxu3 %vm1826_vm8, %v2107_v18  ;;  %2352 = vmatpush.bf16.xpose.msrb.mxu1 %v2343_v57  ;;  %v10134_v18 = vld [vmem:[#allocation4_spill] sm:$0xff]  ;;  %v1648_v57 = vpack.c.bf16 %v5734_v13, %v5734_v13 }
 0x4cd   :  { %v10135_v2 = vpack.c.b16 %v7128_v59, %v10134_v18  ;;  %v2234_v59 = vunpack.c.l.b16 %v1649_v45  ;;  %v5614_v18 = vunpack.i.l.bf16 %v7386_v14  ;;  %v2298_v45 = vunpack.c.l.b16 %v1653_v22 }
 0x4ce   :  { %v2233_v24 = vunpack.c.l.b16 %v1648_v57 }
 0x4d0   :  { %v2235_v42 = vpack.c.b16 %v2234_v59, %v2233_v24  ;;  %v5655_v24 = vunpack.i.h.bf16 %v7411_v39 }
 0x4d1   :  { %5473 = vmatmul.msk.bf16.gmra.mxu2 %vm62_vm0, %v7408_v23 }
 0x4d3   :  { %5490 = vmatmul.msk.bf16.vlgmr.msrb.gmra.mxu1 %vm1826_vm8, %v2331_v11 }
 0x4d6   :  { %v7625_v61 = vpop.f32.mrf.mxu1 }
 0x4da   :  { %v2626_v34 = vpop.permute.xlu0 %2625 }
 0x4de   :  { %v7627_v1 = vpop.f32.mrf.mxu1 }
 0x4df   :  { %v5871_v6 = vpack.i.bf16 %v7627_v1, %v7625_v61 }
 0x4e1   :  { %5474 = vmatmul.msk.bf16.vlgmr.msrb.gmra.mxu2 %vm1826_vm8, %v10132_v5  ;;  %5872 = vrot.lane.b32.xlu2 %v5871_v6, %s6379_s23 }
 0x4e2   :  { %1968 = vmatpush.bf16.xpose.msrb.mxu2 %v1959_v29  ;;  %5867 = vrot.lane.b32.xlu0 %v5871_v6, %s6374_s9  ;;  %v2535_v29 = vsel %vm1826_vm8, %v7537_v63, 0  ;;  %v1752_v63 = vld [vmem:[%s10016_s1 + $0x10] sm:$0xff] }
 0x4e3   :  { %v2146_v20 = vpop.permute.xlu0 %2145 }
 0x4e6   :  { %v7640_v23 = vpop.f32.mrf.mxu1 }
 0x4ea   :  { %5877 = vrot.lane.b32.xlu0 %v5871_v6, %s6380_s7 }
 0x4eb   :  { %v2402_v60 = vpop.permute.xlu1 %2401 }
 0x4ec   :  { %v1874_v30 = vpop.f32.mrf.mxu3 }
 0x4ee   :  { %v7645_v19 = vpop.f32.mrf.mxu1 }
 0x4ef   :  { %v7649_v0 = vpack.i.bf16 %v7645_v19, %v7640_v23 }
 0x4f1   :  { %5476 = vmatmul.msk.bf16.vlgmr.msra.gmra.mxu2 %vm1826_vm8, %v10133_v16  ;;  %5882 = vrot.lane.b32.xlu1 %v7649_v0, %s6374_s9 }
 0x4f2   :  { %2032 = vmatpush.bf16.xpose.msra.mxu2 %v2023_v49  ;;  %v2425_v49 = vunpack.c.l.b16 %v1660_v27  ;;  %v1638_v27 = vpack.c.bf16 %v5614_v18, %v5614_v18 }
 0x4f3   :  { %v2178_v7 = vpop.permute.xlu1 %2177 }
 0x4f4   :  { %v2183_v9 = vsel %vm1826_vm8, %v2178_v7, 0  ;;  %v1876_v11 = vpop.f32.mrf.mxu3  ;;  %v2427_v36 = vpack.c.b16 %v2426_v58, %v2425_v49  ;;  %v2631_v7 = vsel %vm1826_vm8, %v2626_v34, 0  ;;  %v5764_v34 = vunpack.i.l.bf16 %v7524_v26 }
 0x4f5   :  { %2192 = vmatpush.bf16.xpose.msra.mxu3 %v2183_v9  ;;  %v7682_v5 = vadd.f32 %v1876_v11, %v1753_v3  ;;  %v2407_v9 = vsel %vm1826_vm8, %v2402_v60, 0  ;;  %v2151_v60 = vsel %vm1826_vm8, %v2146_v20, 0  ;;  %v5654_v49 = vunpack.i.l.bf16 %v7411_v39 }
 0x4f6   :  { %v5675_v39 = vunpack.i.h.bf16 %v7399_v56 }
 0x4f7   :  { %v2849_v16 = vsel %vm2839_vm9, %v7682_v5, -inf }
 0x4fb   :  { %v7662_v38 = vpop.permute.xlu0 %2657 }
 0x4fc   :  { %5485 = vmatmul.msk.bf16.vlgmr.msra.gmra.mxu3 %vm1826_vm8, %v2171_v43  ;;  %v7697_v43 = vadd.f32 %v1874_v30, %v1752_v63  ;;  %v2521_v30 = vunpack.c.l.b16 %v1666_v33 }
 0x4fd   :  { %2256 = vmatpush.bf16.xpose.msrb.mxu3 %v2247_v51  ;;  %v5755_v51 = vunpack.i.h.bf16 %v7519_v55  ;;  %v5615_v55 = vunpack.i.h.bf16 %v7386_v14  ;;  %v2503_v14 = vsel %vm1826_vm8, %v7540_v50, 0 }
 0x4fe   :  { %v2846_v26 = vsel %vm2839_vm9, %v7697_v43, -inf }
 0x4ff   :  { %v1667_v41 = vpack.c.bf16 %v5755_v51, %v5755_v51  ;;  %v1639_v52 = vpack.c.bf16 %v5615_v55, %v5615_v55  ;;  %v1672_v51 = vpack.c.bf16 %v5654_v49, %v5654_v49 }
 0x501   :  { %5478 = vmatmul.msk.bf16.vlgmr.msrb.gmra.mxu2 %vm1826_vm8, %v10135_v2  ;;  %v2522_v20 = vunpack.c.l.b16 %v1667_v41  ;;  %v1643_v41 = vpack.c.bf16 %v5675_v39, %v5675_v39 }
 0x502   :  { %2096 = vmatpush.bf16.xpose.msrb.mxu2 %v2087_v35  ;;  %v1652_v35 = vpack.c.bf16 %v5764_v34, %v5764_v34 }
 0x503   :  { %v2434_v6 = vpop.permute.xlu0 %2433  ;;  %v2523_v11 = vpack.c.b16 %v2522_v20, %v2521_v30  ;;  %v2138_v55 = vunpack.c.l.b16 %v1643_v41  ;;  %v5730_v30 = vunpack.i.h.bf16 %v7421_v54  ;;  %v5774_v41 = vunpack.i.l.bf16 %v7530_v47 }
 0x504   :  { %v2439_v44 = vsel %vm1826_vm8, %v2434_v6, 0  ;;  %v2297_v57 = vunpack.c.l.b16 %v1652_v35 }
 0x505   :  { %2320 = vmatpush.bf16.xpose.msra.mxu3 %v2311_v37  ;;  %2448 = vmatpush.bf16.xpose.msra.mxu1 %v2439_v44  ;;  %v10136_v37 = vld [vmem:[#allocation6_spill] sm:$0xff]  ;;  %v2074_v44 = vunpack.c.l.b16 %v1639_v52 }
 0x506   :  { %v10138_v13 = vpack.c.b16 %v10136_v37, %v10137_v15  ;;  %v2299_v6 = vpack.c.b16 %v2298_v45, %v2297_v57  ;;  %v2617_v37 = vunpack.c.l.b16 %v1672_v51  ;;  %v5729_v45 = vunpack.i.l.bf16 %v7421_v54 }
 0x507   :  { %v2279_v54 = vsel %vm1826_vm8, %v7547_v31, 0 }
 0x50a   :  { %2850 = vmax.xlane.f32.xlu2 %v2849_v16  ;;  %v5680_v16 = vunpack.i.h.bf16 %v7449_v10 }
 0x50b   :  { %v2690_v51 = vpop.permute.xlu0 %2689 }
 0x50c   :  { %5487 = vmatmul.msk.bf16.vlgmr.msrb.gmra.mxu3 %vm1826_vm8, %v2235_v42  ;;  %5493 = vmatmul.msk.bf16.vlgmr.msra.gmra.mxu1 %vm1826_vm8, %v2427_v36  ;;  %v5679_v42 = vunpack.i.l.bf16 %v7449_v10  ;;  %v2210_v36 = vpop.permute.xlu2 %2209  ;;  %v1659_v4 = vpack.c.bf16 %v5680_v16, %v5680_v16  ;;  %v5674_v10 = vunpack.i.l.bf16 %v7399_v56  ;;  %v2599_v56 = vsel %vm1826_vm8, %v7611_v8, 0 }
 0x50d   :  { %2544 = vmatpush.bf16.xpose.msrb.mxu1 %v2535_v29  ;;  %2416 = vmatpush.bf16.xpose.msrb.mxu3 %v2407_v9  ;;  %v2073_v29 = vunpack.c.l.b16 %v1638_v27  ;;  %v1673_v9 = vpack.c.bf16 %v5655_v24, %v5655_v24  ;;  %v2215_v63 = vsel %vm1826_vm8, %v2210_v36, 0  ;;  %v5739_v8 = vunpack.i.l.bf16 %v7453_v25 }
 0x50e   :  { %v7706_v2 = vpop.f32.mrf.mxu1  ;;  %v1658_v28 = vpack.c.bf16 %v5679_v42, %v5679_v42  ;;  %v2394_v15 = vunpack.c.l.b16 %v1659_v4  ;;  %v1642_v33 = vpack.c.bf16 %v5674_v10, %v5674_v10  ;;  %v1679_v27 = vpack.c.bf16 %v5730_v30, %v5730_v30  ;;  %v7764_v42 = vpop.f32.mrf.mxu3 }
 0x50f   :  { %v2075_v50 = vpack.c.b16 %v2074_v44, %v2073_v29  ;;  %v5720_v44 = vunpack.i.h.bf16 %v7503_v62  ;;  %v3613_v29 = vpack.c.bf16 %v7645_v19, %v7645_v19  ;;  %v2695_v10 = vsel %vm1826_vm8, %v2690_v51, 0 }
 0x510   :  { %v2137_v18 = vunpack.c.l.b16 %v1642_v33  ;;  %v2714_v24 = vunpack.c.l.b16 %v1679_v27 }
 0x511   :  { %5480 = vmatmul.msk.bf16.vlgmr.msra.gmra.mxu2 %vm1826_vm8, %v10138_v13  ;;  %v2393_v13 = vunpack.c.l.b16 %v1658_v28  ;;  %v1647_v36 = vpack.c.bf16 %v5720_v44, %v5720_v44 }
 0x512   :  { %2160 = vmatpush.bf16.xpose.msra.mxu2 %v2151_v60  ;;  %v2618_v60 = vunpack.c.l.b16 %v1673_v9  ;;  %v2139_v52 = vpack.c.b16 %v2138_v55, %v2137_v18  ;;  %v3736_v9 = vunpack.c.l.b16 %v3613_v29 }
 0x513   :  { %v2722_v3 = vpop.permute.xlu1 %2721  ;;  %v2395_v35 = vpack.c.b16 %v2394_v15, %v2393_v13  ;;  %v2202_v28 = vunpack.c.l.b16 %v1647_v36  ;;  %v5624_v15 = vunpack.i.l.bf16 %v7393_v32  ;;  %v5775_v13 = vunpack.i.h.bf16 %v7530_v47 }
 0x514   :  { %2847 = vmax.xlane.f32.xlu0 %v2846_v26  ;;  %v2727_v59 = vsel %vm1826_vm8, %v2722_v3, 0  ;;  %v2619_v22 = vpack.c.b16 %v2618_v60, %v2617_v37  ;;  %v2823_v26 = vsel %vm1826_vm8, %v7557_v17, 0  ;;  %v5740_v17 = vunpack.i.h.bf16 %v7453_v25 }
 0x515   :  { %2640 = vmatpush.bf16.xpose.msra.mxu1 %v2631_v7  ;;  %v1678_v3 = vpack.c.bf16 %v5729_v45, %v5729_v45  ;;  %v5719_v25 = vunpack.i.l.bf16 %v7503_v62  ;;  %v1670_v18 = vpack.c.bf16 %v5624_v15, %v5624_v15  ;;  %v5749_v47 = vunpack.i.l.bf16 %v7511_v40 }
 0x516   :  { %v7716_v58 = vpop.f32.mrf.mxu1  ;;  %v5715_v36 = vunpack.i.h.bf16 %v7494_v46 }
 0x517   :  { %v7723_v7 = vpack.i.bf16 %v7716_v58, %v7706_v2  ;;  %v2713_v31 = vunpack.c.l.b16 %v1678_v3 }
 0x519   :  { %10139 = vst [vmem:[#allocation4_spill] sm:$0xff] %v7723_v7  ;;  %v2715_v4 = vpack.c.b16 %v2714_v24, %v2713_v31 }
 0x51c   :  { %5489 = vmatmul.msk.bf16.vlgmr.msra.gmra.mxu3 %vm1826_vm8, %v2299_v6  ;;  %5496 = vmatmul.msk.bf16.vlgmr.msrb.gmra.mxu1 %vm1826_vm8, %v2523_v11  ;;  %v1665_v11 = vpack.c.bf16 %v5740_v17, %v5740_v17  ;;  %v1664_v6 = vpack.c.bf16 %v5739_v8, %v5739_v8 }
 0x51d   :  { %2512 = vmatpush.bf16.xpose.msra.mxu3 %v2503_v14  ;;  %2736 = vmatpush.bf16.xpose.msrb.mxu1 %v2727_v59  ;;  %v3612_v59 = vpack.c.bf16 %v7640_v23, %v7640_v23  ;;  %v5625_v23 = vunpack.i.h.bf16 %v7393_v32  ;;  %v5750_v32 = vunpack.i.h.bf16 %v7511_v40  ;;  %v2791_v40 = vsel %vm1826_vm8, %v7542_v21, 0 }
 0x51e   :  { %v2490_v49 = vunpack.c.l.b16 %v1665_v11  ;;  %v2489_v16 = vunpack.c.l.b16 %v1664_v6 }
 0x51f   :  { %v1671_v55 = vpack.c.bf16 %v5625_v23, %v5625_v23  ;;  %v1651_v3 = vpack.c.bf16 %v5750_v32, %v5750_v32 }
 0x520   :  { %v2491_v62 = vpack.c.b16 %v2490_v49, %v2489_v16 }
 0x521   :  { %5482 = vmatmul.msk.bf16.vlgmr.msrb.gmra.mxu2 %vm1826_vm8, %v2075_v50  ;;  %v1646_v50 = vpack.c.bf16 %v5719_v25, %v5719_v25  ;;  %v2586_v8 = vunpack.c.l.b16 %v1671_v55  ;;  %v3610_v55 = vpack.c.bf16 %v7625_v61, %v7625_v61  ;;  %v1757_v61 = vld [vmem:[%s10016_s1 + $0x38] sm:$0xff] }
 0x522   :  { %2224 = vmatpush.bf16.xpose.msrb.mxu2 %v2215_v63  ;;  %5897 = vrot.lane.b32.xlu2 %v7723_v7, %s6379_s23  ;;  %v3735_v63 = vunpack.c.l.b16 %v3612_v59  ;;  %v2266_v59 = vunpack.c.l.b16 %v1651_v3 }
 0x523   :  { %v2201_v39 = vunpack.c.l.b16 %v1646_v50  ;;  %v5714_v50 = vunpack.i.l.bf16 %v7494_v46  ;;  %v1677_v46 = vpack.c.bf16 %v5715_v36, %v5715_v36 }
 0x524   :  { %v7731_v34 = vpop.f32.mrf.mxu2  ;;  %v3737_v19 = vpack.c.b16 %v3736_v9, %v3735_v63  ;;  %v2466_v9 = vpop.permute.xlu2 %2465 }
 0x525   :  { %v2203_v33 = vpack.c.b16 %v2202_v28, %v2201_v39  ;;  %v2471_v21 = vsel %vm1826_vm8, %v2466_v9, 0  ;;  %v1760_v28 = vld [vmem:[%s10016_s1 + $0x50] sm:$0xff]  ;;  %v1763_v9 = vld [vmem:[%s10016_s1 + $0x68] sm:$0xff] }
 0x528   :  { %5887 = vrot.lane.b32.xlu0 %v7649_v0, %s6379_s23 }
 0x52c   :  { %v7739_v20 = vpop.f32.mrf.mxu2  ;;  %5492 = vmatmul.msk.bf16.vlgmr.msrb.gmra.mxu3 %vm1826_vm8, %v2395_v35  ;;  %5499 = vmatmul.msk.bf16.vlgmr.msra.gmra.mxu1 %vm1826_vm8, %v2619_v22  ;;  %v7777_v22 = vpop.f32.mrf.mxu3  ;;  %v2375_v35 = vsel %vm1826_vm8, %v7632_v53, 0  ;;  %v1650_v53 = vpack.c.bf16 %v5749_v47, %v5749_v47 }
 0x52d   :  { %2608 = vmatpush.bf16.xpose.msrb.mxu3 %v2599_v56  ;;  %2832 = vmatpush.bf16.xpose.msra.mxu1 %v2823_v26  ;;  %v7747_v57 = vpack.i.bf16 %v7739_v20, %v7731_v34  ;;  %v1685_v26 = vpack.c.bf16 %v5775_v13, %v5775_v13  ;;  %v1684_v56 = vpack.c.bf16 %v5774_v41, %v5774_v41 }
 0x52e   :  { %v2265_v24 = vunpack.c.l.b16 %v1650_v53  ;;  %v3611_v13 = vpack.c.bf16 %v7627_v1, %v7627_v1 }
 0x52f   :  { %10140 = vst [vmem:[#allocation6_spill] sm:$0xff] %v7747_v57  ;;  %5902 = vrot.lane.b32.xlu1 %v7747_v57, %s6374_s9  ;;  %v2809_v27 = vunpack.c.l.b16 %v1684_v56 }
 0x530   :  { %5892 = vrot.lane.b32.xlu0 %v7723_v7, %s6374_s9  ;;  %v2267_v51 = vpack.c.b16 %v2266_v59, %v2265_v24 }
 0x531   :  { %5484 = vmatmul.msk.bf16.vlgmr.msra.gmra.mxu2 %vm1826_vm8, %v2139_v52  ;;  %v2585_v52 = vunpack.c.l.b16 %v1670_v18 }
 0x532   :  { %2288 = vmatpush.bf16.xpose.msra.mxu2 %v2279_v54  ;;  %v2810_v54 = vunpack.c.l.b16 %v1685_v26  ;;  %v2682_v26 = vunpack.c.l.b16 %v1677_v46 }
 0x533   :  { %v2587_v44 = vpack.c.b16 %v2586_v8, %v2585_v52 }
 0x534   :  { %v1127_v14 = vpop.f32.mrf.mxu2  ;;  %v2811_v25 = vpack.c.b16 %v2810_v54, %v2809_v27  ;;  %v2002_v29 = vpop.f32.mrf.mxu3 }
 0x535   :  { %v3618_v17 = vpack.c.bf16 %v1127_v14, %v1127_v14  ;;  %v7810_v41 = vadd.f32 %v2002_v29, %v1760_v28  ;;  %v10149_v28 = vld [vmem:[#allocation10_spill] sm:$0xff] }
 0x536   :  { %v5725_v46 = vunpack.i.h.bf16 %v10149_v28 }
 0x537   :  { %v3819_v6 = vunpack.c.l.b16 %v3618_v17  ;;  %v2870_v1 = vsel %vm2839_vm9, %v7810_v41, -inf  ;;  %v3707_v17 = vunpack.c.l.b16 %v3610_v55 }
 0x538   :  { %v1663_v55 = vpack.c.bf16 %v5725_v46, %v5725_v46  ;;  %v10152_v46 = vld [vmem:[#allocation8_spill] sm:$0xff] }
 0x53c   :  { %v1129_v60 = vpop.f32.mrf.mxu2  ;;  %5495 = vmatmul.msk.bf16.vlgmr.msra.gmra.mxu3 %vm1826_vm8, %v2491_v62  ;;  %5502 = vmatmul.msk.bf16.vlgmr.msrb.gmra.mxu1 %vm1826_vm8, %v2715_v4 }
 0x53d   :  { %2704 = vmatpush.bf16.xpose.msra.mxu3 %v2695_v10  ;;  %3749 = vmatpush.bf16.msrb.mxu1 %v3737_v19  ;;  %v7770_v37 = vpack.i.bf16 %v1129_v60, %v1127_v14  ;;  %v3619_v30 = vpack.c.bf16 %v1129_v60, %v1129_v60  ;;  %v1676_v19 = vpack.c.bf16 %v5714_v50, %v5714_v50  ;;  %v1756_v10 = vld [vmem:[%s10016_s1 + $0x30] sm:$0xff]  ;;  %v10145_v60 = vld [vmem:[#allocation7_spill] sm:$0xff] }
 0x53e   :  { %v5650_v23 = vunpack.i.h.bf16 %v10145_v60  ;;  %v5649_v15 = vunpack.i.l.bf16 %v10145_v60  ;;  %v7817_v18 = vadd.f32 %v7764_v42, %v1756_v10  ;;  %v3617_v10 = vpack.c.bf16 %v7739_v20, %v7739_v20 }
 0x53f   :  { %10141 = vst [vmem:[#allocation5_spill] sm:$0xff] %v7770_v37  ;;  %5917 = vrot.lane.b32.xlu2 %v7770_v37, %s6379_s23  ;;  %v3820_v11 = vunpack.c.l.b16 %v3619_v30  ;;  %v2681_v56 = vunpack.c.l.b16 %v1676_v19  ;;  %v5724_v19 = vunpack.i.l.bf16 %v10149_v28 }
 0x540   :  { %v1657_v47 = vpack.c.bf16 %v5650_v23, %v5650_v23  ;;  %v1656_v30 = vpack.c.bf16 %v5649_v15, %v5649_v15  ;;  %v2858_v8 = vsel %vm2839_vm9, %v7817_v18, -inf  ;;  %v3616_v15 = vpack.c.bf16 %v7731_v34, %v7731_v34 }
 0x541   :  { %5486 = vmatmul.msk.bf16.vlgmr.msrb.gmra.mxu2 %vm1826_vm8, %v2203_v33  ;;  %v3821_v49 = vpack.c.b16 %v3820_v11, %v3819_v6  ;;  %v7812_v33 = vpop.f32.mrf.mxu3  ;;  %v2683_v52 = vpack.c.b16 %v2682_v26, %v2681_v56  ;;  %v7830_v11 = vadd.f32 %v7777_v22, %v1757_v61  ;;  %v1783_v22 = vld [vmem:[%s10016_s1 + $0x108] sm:$0xff]  ;;  %v1662_v26 = vpack.c.bf16 %v5724_v19, %v5724_v19 }
 0x542   :  { %2384 = vmatpush.bf16.xpose.msrb.mxu2 %v2375_v35  ;;  %v2362_v42 = vunpack.c.l.b16 %v1657_v47  ;;  %v2361_v54 = vunpack.c.l.b16 %v1656_v30  ;;  %v3792_v56 = vunpack.c.l.b16 %v3617_v10  ;;  %v5685_v19 = vunpack.i.h.bf16 %v10152_v46 }
 0x543   :  { %v2861_v50 = vsel %vm2839_vm9, %v7830_v11, -inf  ;;  %v5684_v10 = vunpack.i.l.bf16 %v10152_v46 }
 0x544   :  { %v1132_v45 = vpop.f32.mrf.mxu2 }
 0x545   :  { %v3620_v31 = vpack.c.bf16 %v1132_v45, %v1132_v45 }
 0x547   :  { %v7792_v4 = vunpack.c.l.b16 %v3620_v31  ;;  %v2363_v31 = vpack.c.b16 %v2362_v42, %v2361_v54 }
 0x549   :  { %10143 = vst [vmem:[#allocation16_spill] sm:$0xff] %v7792_v4  ;;  %v7834_v59 = vpop.f32.mrf.mxu3 }
 0x54c   :  { %v1134_v16 = vpop.f32.mrf.mxu2  ;;  %5498 = vmatmul.msk.bf16.vlgmr.msrb.gmra.mxu3 %vm1826_vm8, %v2587_v44  ;;  %5505 = vmatmul.msk.bf16.vlgmr.msra.gmra.mxu1 %vm1826_vm8, %v2811_v25  ;;  %v10146_v44 = vld [vmem:[#allocation12_spill] sm:$0xff] }
 0x54d   :  { %v3621_v14 = vpack.c.bf16 %v1134_v16, %v1134_v16  ;;  %2800 = vmatpush.bf16.xpose.msrb.mxu3 %v2791_v40  ;;  %3833 = vmatpush.bf16.msra.mxu1 %v3821_v49  ;;  %v7790_v63 = vpack.i.bf16 %v1134_v16, %v1132_v45  ;;  %v3708_v45 = vunpack.c.l.b16 %v3611_v13  ;;  %v5760_v25 = vunpack.i.h.bf16 %v10146_v44 }
 0x54e   :  { %v5759_v29 = vunpack.i.l.bf16 %v10146_v44 }
 0x54f   :  { %10142 = vst [vmem:[#allocation15_spill] sm:$0xff] %v7790_v63  ;;  %v7794_v62 = vunpack.c.l.b16 %v3621_v14  ;;  %v3709_v3 = vpack.c.b16 %v3708_v45, %v3707_v17  ;;  %v10148_v14 = vld [vmem:[#allocation14_spill] sm:$0xff]  ;;  %v3791_v45 = vunpack.c.l.b16 %v3616_v15  ;;  %v2458_v17 = vunpack.c.l.b16 %v1663_v55 }
 0x550   :  { %v7819_v32 = vpop.f32.mrf.mxu1  ;;  %v2567_v36 = vsel %vm1826_vm8, %v10148_v14, 0  ;;  %v1674_v55 = vpack.c.bf16 %v5684_v10, %v5684_v10  ;;  %v5858_v10 = vpop.permute.xlu2 %5857 }
 0x551   :  { %10144 = vst [vmem:[#allocation17_spill] sm:$0xff] %v7794_v62  ;;  %5488 = vmatmul.msk.bf16.vlgmr.msra.gmra.mxu2 %vm1826_vm8, %v2267_v51  ;;  %v1683_v51 = vpack.c.bf16 %v5760_v25, %v5760_v25  ;;  %v7864_v30 = vpop.f32.mrf.mxu3  ;;  %v3793_v34 = vpack.c.b16 %v3792_v56, %v3791_v45  ;;  %v3608_v56 = vpack.c.bf16 %v7583_v48, %v7583_v48  ;;  %v1759_v45 = vld [vmem:[%s10016_s1 + $0x48] sm:$0xff] }
 0x552   :  { %2480 = vmatpush.bf16.xpose.msra.mxu2 %v2471_v21  ;;  %v1682_v21 = vpack.c.bf16 %v5759_v29, %v5759_v29 }
 0x553   :  { %v2778_v13 = vunpack.c.l.b16 %v1683_v51 }
 0x554   :  { %v1137_v35 = vpop.f32.mrf.mxu2 }
 0x555   :  { %v3622_v27 = vpack.c.bf16 %v1137_v35, %v1137_v35 }
 0x557   :  { %v7838_v49 = vunpack.c.l.b16 %v3622_v27  ;;  %v1768_v27 = vld [vmem:[%s10016_s1 + $0x90] sm:$0xff] }
 0x558   :  { %v2356_v16 = vpop.f32.mrf.mxu1 }
 0x559   :  { %2871 = vmax.xlane.f32.xlu1 %v2870_v1  ;;  %v7856_v60 = vadd.f32 %v2356_v16, %v1783_v22  ;;  %v1751_v1 = vld [vmem:[%s10016_s1 + $0x8] sm:$0xff] }
 0x55a   :  { %2859 = vmax.xlane.f32.xlu0 %v2858_v8  ;;  %v2457_v8 = vunpack.c.l.b16 %v1662_v26  ;;  %v3609_v26 = vpack.c.bf16 %v7593_v12, %v7593_v12 }
 0x55b   :  { %v2939_v47 = vsel %vm2839_vm9, %v7856_v60, -inf }
 0x55c   :  { %v1139_v53 = vpop.f32.mrf.mxu2  ;;  %5501 = vmatmul.msk.bf16.vlgmr.msra.gmra.mxu3 %vm1826_vm8, %v2683_v52  ;;  %v2459_v42 = vpack.c.b16 %v2458_v17, %v2457_v8  ;;  %v3680_v17 = vunpack.c.l.b16 %v3609_v26 }
 0x55d   :  { %v3623_v6 = vpack.c.bf16 %v1139_v53, %v1139_v53  ;;  %3721 = vmatpush.bf16.msra.mxu3 %v3709_v3  ;;  %v7836_v24 = vpack.i.bf16 %v1139_v53, %v1137_v35  ;;  %v2777_v35 = vunpack.c.l.b16 %v1682_v21  ;;  %v2130_v3 = vpop.f32.mrf.mxu3  ;;  %v2663_v53 = vsel %vm1826_vm8, %v7662_v38, 0  ;;  %v10151_v21 = vld [vmem:[#allocation13_spill] sm:$0xff] }
 0x55e   :  { %v7884_v29 = vadd.f32 %v2130_v3, %v1768_v27  ;;  %v2759_v28 = vsel %vm1826_vm8, %v10151_v21, 0  ;;  %v1788_v27 = vld [vmem:[%s10016_s1 + $0x130] sm:$0xff]  ;;  %v1761_v21 = vld [vmem:[%s10016_s1 + $0x58] sm:$0xff] }
 0x55f   :  { %10147 = vst [vmem:[#allocation7_spill] sm:$0xff] %v7836_v24  ;;  %v7840_v40 = vunpack.c.l.b16 %v3623_v6  ;;  %v2779_v20 = vpack.c.b16 %v2778_v13, %v2777_v35  ;;  %v10150_v6 = vld [vmem:[#allocation9_spill] sm:$0xff]  ;;  %v1675_v35 = vpack.c.bf16 %v5685_v19, %v5685_v19 }
 0x560   :  { %v5770_v44 = vunpack.i.h.bf16 %v10150_v6  ;;  %v5769_v25 = vunpack.i.l.bf16 %v10150_v6  ;;  %v2894_v38 = vsel %vm2839_vm9, %v7884_v29, -inf }
 0x561   :  { %5491 = vmatmul.msk.bf16.vlgmr.msrb.gmra.mxu2 %vm1826_vm8, %v2363_v31 }
 0x562   :  { %2862 = vmax.xlane.f32.xlu0 %v2861_v50  ;;  %2576 = vmatpush.bf16.xpose.msrb.mxu2 %v2567_v36  ;;  %v1669_v22 = vpack.c.bf16 %v5770_v44, %v5770_v44  ;;  %v1668_v16 = vpack.c.bf16 %v5769_v25, %v5769_v25 }
 0x563   :  { %v7946_v19 = vpop.permute.xlu1 %5882 }
 0x564   :  { %v7858_v23 = vpop.f32.mrf.mxu2  ;;  %v2554_v14 = vunpack.c.l.b16 %v1669_v22  ;;  %v2553_v36 = vunpack.c.l.b16 %v1668_v16  ;;  %10156 = vst [vmem:[#allocation10_spill] sm:$0xff] %v7946_v19 }
 0x565   :  { %v7903_v15 = vpop.f32.mrf.mxu3 }
 0x566   :  { %v2555_v51 = vpack.c.b16 %v2554_v14, %v2553_v36 }
 0x568   :  { %2940 = vmax.xlane.f32.xlu2 %v2939_v47 }
 0x56c   :  { %v1844_v52 = vpop.f32.mrf.mxu2  ;;  %5504 = vmatmul.msk.bf16.vlgmr.msrb.gmra.mxu3 %vm1826_vm8, %v2779_v20  ;;  %v2650_v20 = vunpack.c.l.b16 %v1675_v35  ;;  %v3614_v35 = vpack.c.bf16 %v7706_v2, %v7706_v2 }
 0x56d   :  { %v7870_v61 = vadd.f32 %v1844_v52, %v1751_v1  ;;  %3805 = vmatpush.bf16.msrb.mxu3 %v3793_v34  ;;  %v2649_v1 = vunpack.c.l.b16 %v1674_v55 }
 0x56f   :  { %v2843_v54 = vsel %vm2839_vm9, %v7870_v61, -inf  ;;  %v2651_v12 = vpack.c.b16 %v2650_v20, %v2649_v1  ;;  %v5859_v20 = vunpack.i.l.bf16 %v5858_v10  ;;  %v3763_v1 = vunpack.c.l.b16 %v3614_v35 }
 0x570   :  { %2844 = vmax.xlane.f32.xlu2 %v2843_v54  ;;  %v7918_v54 = vpop.permute.xlu0 %5852 }
 0x571   :  { %5494 = vmatmul.msk.bf16.vlgmr.msra.gmra.mxu2 %vm1826_vm8, %v2459_v42  ;;  %v3679_v42 = vunpack.c.l.b16 %v3608_v56  ;;  %10153 = vst [vmem:[#allocation12_spill] sm:$0xff] %v7918_v54 }
 0x572   :  { %2672 = vmatpush.bf16.xpose.msra.mxu2 %v2663_v53  ;;  %5912 = vrot.lane.b32.xlu1 %v7770_v37, %s6374_s9  ;;  %v10154_v53 = vld [vmem:[#allocation11_spill] sm:$0xff] }
 0x573   :  { %v3681_v3 = vpack.c.b16 %v3680_v17, %v3679_v42  ;;  %v5745_v6 = vunpack.i.h.bf16 %v10154_v53  ;;  %v5744_v44 = vunpack.i.l.bf16 %v10154_v53 }
 0x574   :  { %v7886_v31 = vpop.f32.mrf.mxu2 }
 0x575   :  { %v1680_v14 = vpack.c.bf16 %v5744_v44, %v5744_v44 }
 0x576   :  { %5907 = vrot.lane.b32.xlu0 %v7747_v57, %s6379_s23 }
 0x577   :  { %v2745_v26 = vunpack.c.l.b16 %v1680_v14 }
 0x578   :  { %2895 = vmax.xlane.f32.xlu2 %v2894_v38  ;;  %v1681_v38 = vpack.c.bf16 %v5745_v6, %v5745_v6  ;;  %v7944_v46 = vpop.permute.xlu0 %5862 }
 0x579   :  { %10155 = vst [vmem:[#allocation14_spill] sm:$0xff] %v7944_v46 }
 0x57a   :  { %5922 = vrot.lane.b32.xlu1 %v7790_v63, %s6374_s9  ;;  %v2746_v55 = vunpack.c.l.b16 %v1681_v38 }
 0x57c   :  { %v7894_v50 = vpop.f32.mrf.mxu2 }
 0x57f   :  { %v2194_v8 = vpop.f32.mrf.mxu3 }
 0x580   :  { %v7967_v53 = vpop.permute.xlu0 %5867 }
 0x581   :  { %5497 = vmatmul.msk.bf16.vlgmr.msrb.gmra.mxu2 %vm1826_vm8, %v2555_v51  ;;  %v3615_v51 = vpack.c.bf16 %v7716_v58, %v7716_v58  ;;  %v7951_v58 = vadd.f32 %v7812_v33, %v1761_v21  ;;  %v1764_v33 = vld [vmem:[%s10016_s1 + $0x70] sm:$0xff]  ;;  %10157 = vst [vmem:[#allocation9_spill] sm:$0xff] %v7967_v53 }
 0x582   :  { %2768 = vmatpush.bf16.xpose.msrb.mxu2 %v2759_v28  ;;  %5927 = vrot.lane.b32.xlu1 %v7790_v63, %s6379_s23  ;;  %v1772_v28 = vld [vmem:[%s10016_s1 + $0xb0] sm:$0xff]  ;;  %v7971_v14 = vadd.f32 %v7834_v59, %v1764_v33  ;;  %v1795_v59 = vld [vmem:[%s10016_s1 + $0x168] sm:$0xff] }
 0x583   :  { %v7953_v56 = vadd.f32 %v2194_v8, %v1772_v28  ;;  %v2873_v42 = vsel %vm2839_vm9, %v7951_v58, -inf  ;;  %v1776_v8 = vld [vmem:[%s10016_s1 + $0xd0] sm:$0xff] }
 0x584   :  { %v7905_v13 = vpop.f32.mrf.mxu2 }
 0x585   :  { %v2906_v2 = vsel %vm2839_vm9, %v7953_v56, -inf }
 0x587   :  { %v7932_v16 = vpop.f32.mrf.mxu3 }
 0x589   :  { %v2450_v47 = vpop.f32.mrf.mxu1 }
 0x58a   :  { %5932 = vrot.lane.b32.xlu1 %v7836_v24, %s6374_s9  ;;  %v7928_v25 = vadd.f32 %v2450_v47, %v1788_v27  ;;  %v3764_v47 = vunpack.c.l.b16 %v3615_v51 }
 0x58c   :  { %v1972_v34 = vpop.f32.mrf.mxu2  ;;  %v2954_v36 = vsel %vm2839_vm9, %v7928_v25, -inf }
 0x58d   :  { %v7916_v52 = vadd.f32 %v1972_v34, %v1759_v45  ;;  %v5860_v45 = vunpack.i.h.bf16 %v5858_v10  ;;  %v2747_v34 = vpack.c.b16 %v2746_v55, %v2745_v26  ;;  %v2882_v26 = vsel %vm2839_vm9, %v7971_v14, -inf }
 0x58f   :  { %v2867_v48 = vsel %vm2839_vm9, %v7916_v52, -inf  ;;  %v3641_v27 = vpack.c.bf16 %v5860_v45, %v5860_v45  ;;  %v1765_v45 = vld [vmem:[%s10016_s1 + $0x78] sm:$0xff] }
 0x590   :  { %2868 = vmax.xlane.f32.xlu2 %v2867_v48  ;;  %v3765_v48 = vpack.c.b16 %v3764_v47, %v3763_v1 }
 0x591   :  { %5500 = vmatmul.msk.bf16.vlgmr.msra.gmra.mxu2 %vm1826_vm8, %v2651_v12  ;;  %v7930_v22 = vpop.f32.mrf.mxu1  ;;  %v2258_v12 = vpop.f32.mrf.mxu3  ;;  %v4128_v28 = vunpack.c.l.b16 %v3641_v27 }
 0x592   :  { %3693 = vmatpush.bf16.msra.mxu2 %v3681_v3  ;;  %v3640_v3 = vpack.c.bf16 %v5859_v20, %v5859_v20 }
 0x594   :  { %v4127_v10 = vunpack.c.l.b16 %v3640_v3  ;;  %v1769_v3 = vld [vmem:[%s10016_s1 + $0x98] sm:$0xff] }
 0x598   :  { %2955 = vmax.xlane.f32.xlu2 %v2954_v36  ;;  %v7973_v36 = vadd.f32 %v2258_v12, %v1776_v8  ;;  %v1782_v8 = vld [vmem:[%s10016_s1 + $0x100] sm:$0xff]  ;;  %v7995_v12 = vpop.permute.xlu2 %5872 }
 0x599   :  { %v7955_v17 = vpop.f32.mrf.mxu1  ;;  %10159 = vst [vmem:[#allocation8_spill] sm:$0xff] %v7995_v12 }
 0x59a   :  { %v2918_v47 = vsel %vm2839_vm9, %v7973_v36, -inf }
 0x5a0   :  { %2874 = vmax.xlane.f32.xlu0 %v2873_v42  ;;  %2907 = vmax.xlane.f32.xlu2 %v2906_v2  ;;  %v7986_v42 = vadd.f32 %v7864_v30, %v1765_v45  ;;  %v7988_v2 = vpop.permute.xlu0 %5877 }
 0x5a1   :  { %v5903_v6 = vpop.permute.xlu1 %5902  ;;  %5503 = vmatmul.msk.bf16.vlgmr.msrb.gmra.mxu2 %vm1826_vm8, %v2747_v34  ;;  %v2548_v20 = vpop.f32.mrf.mxu1  ;;  %v4129_v34 = vpack.c.b16 %v4128_v28, %v4127_v10  ;;  %10158 = vst [vmem:[#allocation13_spill] sm:$0xff] %v7988_v2 }
 0x5a2   :  { %v5905_v44 = vunpack.i.h.bf16 %v5903_v6  ;;  %v5904_v38 = vunpack.i.l.bf16 %v5903_v6  ;;  %3777 = vmatpush.bf16.msrb.mxu2 %v3765_v48  ;;  %v7990_v33 = vadd.f32 %v2548_v20, %v1795_v59  ;;  %v7998_v48 = vadd.f32 %v7819_v32, %v1782_v8  ;;  %v2034_v6 = vpop.f32.mrf.mxu2  ;;  %v2851_v10 = vpop.xlane.xlu2 %2850  ;;  %v1754_v59 = vld [vmem:[%s10016_s1 + $0x20] sm:$0xff] }
 0x5a3   :  { %v2885_v27 = vsel %vm2839_vm9, %v7986_v42, -inf }
 0x5a4   :  { %v3632_v51 = vpack.c.bf16 %v5904_v38, %v5904_v38  ;;  %v3633_v21 = vpack.c.bf16 %v5905_v44, %v5905_v44  ;;  %v2975_v30 = vsel %vm2839_vm9, %v7990_v33, -inf  ;;  %v8008_v44 = vadd.f32 %v7903_v15, %v1769_v3  ;;  %v1755_v15 = vld [vmem:[%s10016_s1 + $0x28] sm:$0xff]  ;;  %v1758_v3 = vld [vmem:[%s10016_s1 + $0x40] sm:$0xff] }
 0x5a5   :  { %v2936_v32 = vsel %vm2839_vm9, %v7998_v48, -inf }
 0x5a6   :  { %v4015_v35 = vunpack.c.l.b16 %v3632_v51  ;;  %v4016_v55 = vunpack.c.l.b16 %v3633_v21  ;;  %v1750_v51 = vld [vmem:[%s10016_s1] sm:$0xff] }
 0x5a7   :  { %v8017_v28 = vadd.f32 %v7858_v23, %v1750_v51  ;;  %v1794_v51 = vld [vmem:[%s10016_s1 + $0x160] sm:$0xff] }
 0x5a8   :  { %2883 = vmax.xlane.f32.xlu0 %v2882_v26  ;;  %2919 = vmax.xlane.f32.xlu2 %v2918_v47  ;;  %v4017_v1 = vpack.c.b16 %v4016_v55, %v4015_v35  ;;  %v2848_v38 = vpop.xlane.xlu0 %2847  ;;  %v2897_v35 = vsel %vm2839_vm9, %v8008_v44, -inf  ;;  %v3035_v55 = vsub.f32 %v7682_v5, %v2851_v10  ;;  %v8026_v47 = vadd.f32 %v7894_v50, %v1755_v15 }
 0x5a9   :  { %v3034_v21 = vsub.f32 %v7697_v43, %v2848_v38  ;;  %v2840_v23 = vsel %vm2839_vm9, %v8017_v28, -inf  ;;  %v8038_v5 = vadd.f32 %v7886_v31, %v1754_v59  ;;  %v8058_v38 = vadd.f32 %v7905_v13, %v1758_v3 }
 0x5aa   :  { %4029 = vmatpush.bf16.msrb.mxu0 %v4017_v1  ;;  %v8030_v43 = vpop.f32.mrf.mxu2  ;;  %v3102_v20 = vmul.f32 1.442695, %v3035_v55  ;;  %v2855_v50 = vsel %vm2839_vm9, %v8026_v47, -inf  ;;  %v8067_v15 = vadd.f32 %v7955_v17, %v1794_v51  ;;  %v8078_v17 = vpop.f32.mrf.mxu3 }
 0x5ab   :  { %v3100_v26 = vmul.f32 1.442695, %v3034_v21  ;;  %v2852_v1 = vsel %vm2839_vm9, %v8038_v5, -inf  ;;  %v2864_v13 = vsel %vm2839_vm9, %v8058_v38, -inf }
 0x5ad   :  { %6037 = vpow2.f32 %v3100_v26 }
 0x5ae   :  { %4141 = vmatpush.bf16.msra.mxu0 %v4129_v34  ;;  %6039 = vpow2.f32 %v3102_v20  ;;  %v2642_v20 = vpop.f32.mrf.mxu1 }
 0x5b0   :  { %2886 = vmax.xlane.f32.xlu0 %v2885_v27  ;;  %2976 = vmax.xlane.f32.xlu2 %v2975_v30  ;;  %v8028_v45 = vpop.permute.xlu0 %5887 }
 0x5b1   :  { %10160 = vst [vmem:[#allocation11_spill] sm:$0xff] %v8028_v45 }
 0x5b2   :  { %v8048_v27 = vpop.f32.mrf.mxu2 }
 0x5b3   :  { %v8044_v34 = vpop.eup %6037 }
 0x5b4   :  { %2937 = vmax.xlane.f32.xlu1 %v2936_v32  ;;  %v3230_v30 = vsel %vm2839_vm9, %v8044_v34, 0.0  ;;  %v8052_v31 = vpop.eup %6039 }
 0x5b5   :  { %v3233_v32 = vsel %vm2839_vm9, %v8052_v31, 0.0 }
 0x5b8   :  { %2898 = vmax.xlane.f32.xlu0 %v2897_v35  ;;  %v8046_v8 = vpop.permute.xlu0 %5892 }
 0x5b9   :  { %10161 = vst [vmem:[#allocation18_spill] sm:$0xff] %v8046_v8 }
 0x5ba   :  { %v2100_v55 = vpop.f32.mrf.mxu2 }
 0x5bc   :  { %2841 = vmax.xlane.f32.xlu1 %v2840_v23  ;;  %v1762_v23 = vld [vmem:[%s10016_s1 + $0x60] sm:$0xff] }
 0x5bd   :  { %v8074_v59 = vadd.f32 %v2034_v6, %v1762_v23  ;;  %v1789_v6 = vld [vmem:[%s10016_s1 + $0x138] sm:$0xff]  ;;  %v2322_v23 = vpop.f32.mrf.mxu3 }
 0x5bf   :  { %v2876_v3 = vsel %vm2839_vm9, %v8074_v59, -inf }
 0x5c0   :  { %2856 = vmax.xlane.f32.xlu0 %v2855_v50 }
 0x5c4   :  { %2853 = vmax.xlane.f32.xlu1 %v2852_v1 }
 0x5c8   :  { %3231 = vadd.xlane.f32.xlu0 %v3230_v30 }
 0x5cc   :  { %3234 = vadd.xlane.f32.xlu1 %v3233_v32  ;;  %v2872_v21 = vpop.xlane.xlu1 %2871 }
 0x5cd   :  { %v3042_v10 = vsub.f32 %v7810_v41, %v2872_v21  ;;  %v2860_v35 = vpop.xlane.xlu0 %2859  ;;  %v2972_v41 = vsel %vm2839_vm9, %v8067_v15, -inf  ;;  %v1770_v21 = vld [vmem:[%s10016_s1 + $0xa0] sm:$0xff] }
 0x5cf   :  { %v3116_v26 = vmul.f32 1.442695, %v3042_v10  ;;  %v2162_v10 = vpop.f32.mrf.mxu2 }
 0x5d0   :  { %2865 = vmax.xlane.f32.xlu0 %v2864_v13  ;;  %v2644_v13 = vpop.f32.mrf.mxu1 }
 0x5d1   :  { %6041 = vpow2.f32 %v3116_v26  ;;  %v8096_v26 = vadd.f32 %v2162_v10, %v1770_v21 }
 0x5d4   :  { %2973 = vmax.xlane.f32.xlu1 %v2972_v41 }
 0x5d5   :  { %v2863_v50 = vpop.xlane.xlu0 %2862 }
 0x5d6   :  { %v3039_v1 = vsub.f32 %v7830_v11, %v2863_v50  ;;  %v8094_v11 = vadd.f32 %v7930_v22, %v1789_v6  ;;  %v1801_v22 = vld [vmem:[%s10016_s1 + $0x198] sm:$0xff] }
 0x5d7   :  { %v8081_v30 = vpop.eup %6041  ;;  %v8118_v21 = vadd.f32 %v2644_v13, %v1801_v22  ;;  %v2324_v13 = vpop.f32.mrf.mxu3  ;;  %v8141_v22 = vadd.f32 %v8030_v43, %v1763_v9  ;;  %v1780_v43 = vld [vmem:[%s10016_s1 + $0xf0] sm:$0xff] }
 0x5d8   :  { %10162 = vst [vmem:[#allocation19_spill] sm:$0xff] %v8081_v30  ;;  %v3110_v32 = vmul.f32 1.442695, %v3039_v1  ;;  %2877 = vmax.xlane.f32.xlu0 %v2876_v3  ;;  %v3254_v51 = vsel %vm2839_vm9, %v8081_v30, 0.0  ;;  %v2957_v41 = vsel %vm2839_vm9, %v8094_v11, -inf  ;;  %v1773_v1 = vld [vmem:[%s10016_s1 + $0xb8] sm:$0xff]  ;;  %v8123_v39 = vpop.f32.mrf.mxu1 }
 0x5d9   :  { %3255 = vadd.xlane.f32.xlu2 %v3254_v51  ;;  %v2900_v3 = vsel %vm2839_vm9, %v8096_v26, -inf  ;;  %v8116_v51 = vadd.f32 %v7932_v16, %v1773_v1  ;;  %v2993_v16 = vsel %vm2839_vm9, %v8118_v21, -inf }
 0x5da   :  { %6043 = vpow2.f32 %v3110_v32  ;;  %v1767_v32 = vld [vmem:[%s10016_s1 + $0x88] sm:$0xff] }
 0x5db   :  { %v8120_v10 = vadd.f32 %v2100_v55, %v1767_v32  ;;  %v1781_v55 = vld [vmem:[%s10016_s1 + $0xf8] sm:$0xff] }
 0x5dd   :  { %10163 = vst [vmem:[#allocation20_spill] sm:$0xff] %v8120_v10 }
 0x5df   :  { %v2418_v37 = vpop.f32.mrf.mxu3 }
 0x5e0   :  { %v8100_v50 = vpop.eup %6043  ;;  %2958 = vmax.xlane.f32.xlu0 %v2957_v41  ;;  %v3038_v41 = vsub.f32 %v7817_v18, %v2860_v35  ;;  %v2891_v18 = vsel %vm2839_vm9, %v8120_v10, -inf  ;;  %v1800_v35 = vld [vmem:[%s10016_s1 + $0x190] sm:$0xff] }
 0x5e1   :  { %2901 = vmax.xlane.f32.xlu2 %v2900_v3  ;;  %v3245_v6 = vsel %vm2839_vm9, %v8100_v50, 0.0  ;;  %v2909_v3 = vsel %vm2839_vm9, %v8116_v51, -inf  ;;  %v8145_v32 = vadd.f32 %v2642_v20, %v1800_v35  ;;  %v2164_v20 = vpop.f32.mrf.mxu2  ;;  %v8163_v35 = vadd.f32 %v2322_v23, %v1780_v43  ;;  %v1777_v43 = vld [vmem:[%s10016_s1 + $0xd8] sm:$0xff] }
 0x5e2   :  { %3246 = vadd.xlane.f32.xlu1 %v3245_v6  ;;  %v3108_v1 = vmul.f32 1.442695, %v3038_v41  ;;  %v8143_v6 = vadd.f32 %v2324_v13, %v1781_v55  ;;  %v1807_v41 = vld [vmem:[%s10016_s1 + $0x1c8] sm:$0xff] }
 0x5e3   :  { %v2990_v9 = vsel %vm2839_vm9, %v8145_v32, -inf }
 0x5e4   :  { %6045 = vpow2.f32 %v3108_v1 }
 0x5e7   :  { %v2420_v7 = vpop.f32.mrf.mxu3 }
 0x5e8   :  { %2910 = vmax.xlane.f32.xlu0 %v2909_v3  ;;  %v2879_v3 = vsel %vm2839_vm9, %v8141_v22, -inf }
 0x5e9   :  { %2994 = vmax.xlane.f32.xlu2 %v2993_v16  ;;  %v2933_v16 = vsel %vm2839_vm9, %v8143_v6, -inf  ;;  %v2226_v23 = vpop.f32.mrf.mxu2 }
 0x5ea   :  { %2892 = vmax.xlane.f32.xlu1 %v2891_v18  ;;  %v2740_v18 = vpop.f32.mrf.mxu1  ;;  %v8159_v55 = vpop.eup %6045 }
 0x5eb   :  { %v8161_v13 = vadd.f32 %v2740_v18, %v1807_v41  ;;  %v3242_v1 = vsel %vm2839_vm9, %v8159_v55, 0.0 }
 0x5ed   :  { %10164 = vst [vmem:[#allocation21_spill] sm:$0xff] %v8161_v13 }
 0x5f0   :  { %2880 = vmax.xlane.f32.xlu0 %v2879_v3  ;;  %v1766_v3 = vld [vmem:[%s10016_s1 + $0x80] sm:$0xff] }
 0x5f1   :  { %2934 = vmax.xlane.f32.xlu2 %v2933_v16  ;;  %v3011_v16 = vsel %vm2839_vm9, %v8161_v13, -inf  ;;  %v8175_v41 = vadd.f32 %v8048_v27, %v1766_v3  ;;  %v2228_v2 = vpop.f32.mrf.mxu2  ;;  %v8189_v27 = vpop.permute.xlu2 %5897 }
 0x5f2   :  { %2991 = vmax.xlane.f32.xlu1 %v2990_v9  ;;  %v2930_v9 = vsel %vm2839_vm9, %v8163_v35, -inf  ;;  %10167 = vst [vmem:[#allocation24_spill] sm:$0xff] %v8189_v27  ;;  %v8191_v3 = vpop.permute.xlu0 %5907 }
 0x5f3   :  { %v2888_v18 = vsel %vm2839_vm9, %v8175_v41, -inf  ;;  %10168 = vst [vmem:[#allocation25_spill] sm:$0xff] %v8191_v3 }
 0x5f8   :  { %3243 = vadd.xlane.f32.xlu0 %v3242_v1  ;;  %v8182_v1 = vpop.permute.xlu1 %5912 }
 0x5f9   :  { %3012 = vmax.xlane.f32.xlu2 %v3011_v16  ;;  %10165 = vst [vmem:[#allocation22_spill] sm:$0xff] %v8182_v1  ;;  %v8185_v16 = vadd.f32 %v8078_v17, %v1777_v43  ;;  %v8195_v46 = vpop.permute.xlu2 %5917 }
 0x5fa   :  { %2931 = vmax.xlane.f32.xlu1 %v2930_v9  ;;  %10170 = vst [vmem:[#allocation27_spill] sm:$0xff] %v8195_v46 }
 0x5fb   :  { %10166 = vst [vmem:[#allocation23_spill] sm:$0xff] %v8185_v16  ;;  %v2921_v9 = vsel %vm2839_vm9, %v8185_v16, -inf }
 0x600   :  { %2889 = vmax.xlane.f32.xlu0 %v2888_v18  ;;  %v8193_v63 = vpop.permute.xlu1 %5922  ;;  %v8197_v18 = vpop.f32.mrf.mxu2 }
 0x601   :  { %10169 = vst [vmem:[#allocation26_spill] sm:$0xff] %v8193_v63  ;;  %v8202_v8 = vpop.xlane.xlu2 %2940 }
 0x608   :  { %2922 = vmax.xlane.f32.xlu0 %v2921_v9  ;;  %v8200_v43 = vpop.permute.xlu1 %5927  ;;  %v8204_v9 = vpop.f32.mrf.mxu2 }
 0x609   :  { %10171 = vst [vmem:[#allocation28_spill] sm:$0xff] %v8200_v43 }
 0x610   :  { %v8209_v13 = vpop.permute.xlu1 %5932 }
 0x611   :  { %10173 = vst [vmem:[#allocation30_spill] sm:$0xff] %v8209_v13 }
 0x613   :  { %v2875_v45 = vpop.xlane.xlu0 %2874 }
 0x614   :  { %v3043_v17 = vsub.f32 %v7951_v58, %v2875_v45  ;;  %v1771_v45 = vld [vmem:[%s10016_s1 + $0xa8] sm:$0xff] }
 0x615   :  { %v8218_v43 = vadd.f32 %v2164_v20, %v1771_v45  ;;  %v1806_v20 = vld [vmem:[%s10016_s1 + $0x1c0] sm:$0xff] }
 0x616   :  { %v3118_v57 = vmul.f32 1.442695, %v3043_v17  ;;  %v8216_v17 = vpop.xlane.xlu2 %2844 }
 0x617   :  { %10174 = vst [vmem:[#allocation31_spill] sm:$0xff] %v8218_v43  ;;  %v2903_v24 = vsel %vm2839_vm9, %v8218_v43, -inf }
 0x618   :  { %6047 = vpow2.f32 %v3118_v57  ;;  %v2514_v57 = vpop.f32.mrf.mxu3 }
 0x61b   :  { %v2884_v27 = vpop.xlane.xlu0 %2883 }
 0x61c   :  { %v3046_v3 = vsub.f32 %v7971_v14, %v2884_v27  ;;  %v8220_v27 = vpop.f32.mrf.mxu2 }
 0x61e   :  { %v8207_v63 = vpop.eup %6047  ;;  %v3124_v46 = vmul.f32 1.442695, %v3046_v3  ;;  %v8242_v30 = vpop.xlane.xlu2 %2895 }
 0x61f   :  { %10172 = vst [vmem:[#allocation29_spill] sm:$0xff] %v8207_v63  ;;  %v3257_v58 = vsel %vm2839_vm9, %v8207_v63, 0.0 }
 0x620   :  { %6049 = vpow2.f32 %v3124_v46  ;;  %3258 = vadd.xlane.f32.xlu0 %v3257_v58  ;;  %v1774_v58 = vld [vmem:[%s10016_s1 + $0xc0] sm:$0xff] }
 0x621   :  { %v8238_v45 = vadd.f32 %v2226_v23, %v1774_v58  ;;  %v1786_v23 = vld [vmem:[%s10016_s1 + $0x120] sm:$0xff] }
 0x622   :  { %v8263_v58 = vadd.f32 %v2418_v37, %v1786_v23 }
 0x623   :  { %v2887_v14 = vpop.xlane.xlu0 %2886  ;;  %10176 = vst [vmem:[#allocation33_spill] sm:$0xff] %v8238_v45 }
 0x624   :  { %v3047_v3 = vsub.f32 %v7986_v42, %v2887_v14  ;;  %v8236_v42 = vadd.f32 %v8123_v39, %v1806_v20  ;;  %v8246_v63 = vpop.f32.mrf.mxu2  ;;  %v1775_v20 = vld [vmem:[%s10016_s1 + $0xc8] sm:$0xff]  ;;  %10177 = vst [vmem:[#allocation34_spill] sm:$0xff] %v8263_v58  ;;  %v2948_v10 = vsel %vm2839_vm9, %v8263_v58, -inf }
 0x625   :  { %v8269_v62 = vadd.f32 %v2228_v2, %v1775_v20  ;;  %v1778_v2 = vld [vmem:[%s10016_s1 + $0xe0] sm:$0xff] }
 0x626   :  { %v8223_v13 = vpop.eup %6049  ;;  %v3126_v54 = vmul.f32 1.442695, %v3047_v3  ;;  %10175 = vst [vmem:[#allocation32_spill] sm:$0xff] %v8236_v42  ;;  %v2516_v3 = vpop.f32.mrf.mxu3 }
 0x627   :  { %v2938_v12 = vpop.xlane.xlu1 %2937  ;;  %v3266_v46 = vsel %vm2839_vm9, %v8223_v13, 0.0  ;;  %v8271_v53 = vpop.xlane.xlu2 %2868 }
 0x628   :  { %6051 = vpow2.f32 %v3126_v54  ;;  %2904 = vmax.xlane.f32.xlu0 %v2903_v24  ;;  %3267 = vadd.xlane.f32.xlu1 %v3266_v46  ;;  %v3008_v54 = vsel %vm2839_vm9, %v8236_v42, -inf  ;;  %v2912_v24 = vsel %vm2839_vm9, %v8238_v45, -inf  ;;  %v1787_v46 = vld [vmem:[%s10016_s1 + $0x128] sm:$0xff] }
 0x629   :  { %v8265_v42 = vadd.f32 %v2420_v7, %v1787_v46  ;;  %v1792_v7 = vld [vmem:[%s10016_s1 + $0x150] sm:$0xff]  ;;  %v8296_v46 = vadd.f32 %v8197_v18, %v1778_v2 }
 0x62a   :  { %v8293_v23 = vadd.f32 %v2514_v57, %v1792_v7  ;;  %v1793_v57 = vld [vmem:[%s10016_s1 + $0x158] sm:$0xff] }
 0x62b   :  { %v8240_v14 = vpop.xlane.xlu0 %2898  ;;  %v2951_v37 = vsel %vm2839_vm9, %v8265_v42, -inf  ;;  %10178 = vst [vmem:[#allocation35_spill] sm:$0xff] %v8296_v46 }
 0x62c   :  { %v2966_v18 = vsel %vm2839_vm9, %v8293_v23, -inf }
 0x62e   :  { %v8244_v1 = vpop.eup %6051  ;;  %v8273_v43 = vpop.f32.mrf.mxu3 }
 0x62f   :  { %v2842_v19 = vpop.xlane.xlu1 %2841  ;;  %v3269_v39 = vsel %vm2839_vm9, %v8244_v1, 0.0 }
 0x630   :  { %3009 = vmax.xlane.f32.xlu0 %v3008_v54  ;;  %2913 = vmax.xlane.f32.xlu1 %v2912_v24  ;;  %v3064_v54 = vsub.f32 %v7998_v48, %v2938_v12  ;;  %v2915_v12 = vsel %vm2839_vm9, %v8269_v62, -inf  ;;  %v1779_v48 = vld [vmem:[%s10016_s1 + $0xe8] sm:$0xff] }
 0x631   :  { %3270 = vadd.xlane.f32.xlu2 %v3269_v39  ;;  %v8286_v39 = vpop.f32.mrf.mxu2  ;;  %v8299_v45 = vadd.f32 %v8204_v9, %v1779_v48  ;;  %v2924_v9 = vsel %vm2839_vm9, %v8296_v46, -inf }
 0x632   :  { %v3160_v20 = vmul.f32 1.442695, %v3064_v54  ;;  %v8317_v54 = vadd.f32 %v2516_v3, %v1793_v57  ;;  %v3065_v3 = vsub.f32 %v7856_v60, %v8202_v8 }
 0x633   :  { %v8267_v4 = vpop.xlane.xlu0 %2856 }
 0x634   :  { %v3162_v8 = vmul.f32 1.442695, %v3065_v3  ;;  %v3033_v3 = vsub.f32 %v7870_v61, %v8216_v17 }
 0x637   :  { %v2854_v24 = vpop.xlane.xlu1 %2853 }
 0x638   :  { %2949 = vmax.xlane.f32.xlu0 %v2948_v10  ;;  %2952 = vmax.xlane.f32.xlu1 %v2951_v37  ;;  %v3032_v10 = vsub.f32 %v8017_v28, %v2842_v19  ;;  %v8302_v37 = vpop.xlane.xlu2 %2955  ;;  %v3036_v16 = vsub.f32 %v8038_v5, %v2854_v24  ;;  %v1799_v19 = vld [vmem:[%s10016_s1 + $0x188] sm:$0xff]  ;;  %v2612_v28 = vpop.f32.mrf.mxu3  ;;  %v2927_v5 = vsel %vm2839_vm9, %v8299_v45, -inf }
 0x639   :  { %2916 = vmax.xlane.f32.xlu2 %v2915_v12  ;;  %v8319_v24 = vpop.f32.mrf.mxu2  ;;  %v8321_v48 = vadd.f32 %v2612_v28, %v1799_v19  ;;  %v1798_v28 = vld [vmem:[%s10016_s1 + $0x180] sm:$0xff] }
 0x63a   :  { %v3104_v2 = vmul.f32 1.442695, %v3036_v16 }
 0x63b   :  { %v3232_v58 = vpop.xlane.xlu0 %3231  ;;  %10179 = vst [vmem:[#allocation36_spill] sm:$0xff] %v8321_v48 }
 0x63c   :  { %6053 = vrcp.f32 %v3232_v58  ;;  %v3096_v58 = vmul.f32 1.442695, %v3032_v10  ;;  %v2969_v10 = vsel %vm2839_vm9, %v8317_v54, -inf }
 0x63d   :  { %6055 = vpow2.f32 %v3160_v20 }
 0x63f   :  { %v3235_v7 = vpop.xlane.xlu1 %3234 }
 0x640   :  { %6057 = vrcp.f32 %v3235_v7  ;;  %2967 = vmax.xlane.f32.xlu0 %v2966_v18  ;;  %2925 = vmax.xlane.f32.xlu1 %v2924_v9  ;;  %v2987_v9 = vsel %vm2839_vm9, %v8321_v48, -inf  ;;  %v8335_v19 = vpop.xlane.xlu2 %2907 }
 0x641   :  { %2928 = vmax.xlane.f32.xlu2 %v2927_v5  ;;  %6059 = vpow2.f32 %v3096_v58 }
 0x642   :  { %v6054_v12 = vpop.eup %6053  ;;  %6061 = vpow2.f32 %v3104_v2 }
 0x643   :  { %v8323_v20 = vpop.xlane.xlu0 %2865  ;;  %v3482_v46 = vmul.f32 %v6054_v12, %v8044_v34  ;;  %v8326_v7 = vpop.eup %6055  ;;  %v8349_v12 = vadd.f32 %v8273_v43, %v1798_v28  ;;  %6063 = vpow2.f32 %v3162_v8  ;;  %v3098_v28 = vmul.f32 1.442695, %v3033_v3 }
 0x644   :  { %v3320_v34 = vsel %vm2839_vm9, %v8326_v7, 0.0 }
 0x645   :  { %v3546_v57 = vpack.c.bf16 %v3482_v46, %v3482_v46  ;;  %v2984_v61 = vsel %vm2839_vm9, %v8349_v12, -inf }
 0x646   :  { %v6058_v18 = vpop.eup %6057 }
 0x647   :  { %v3483_v16 = vmul.f32 %v6058_v18, %v8052_v31  ;;  %v8342_v60 = vpop.eup %6059  ;;  %v3702_v31 = vunpack.c.l.b16 %v3546_v57  ;;  %v8351_v18 = vpop.f32.mrf.mxu2 }
 0x648   :  { %2988 = vmax.xlane.f32.xlu0 %v2987_v9  ;;  %2970 = vmax.xlane.f32.xlu1 %v2969_v10  ;;  %v8346_v2 = vpop.eup %6061  ;;  %v3050_v10 = vsub.f32 %v7884_v29, %v8242_v30  ;;  %v3224_v43 = vsel %vm2839_vm9, %v8342_v60, 0.0  ;;  %v1784_v29 = vld [vmem:[%s10016_s1 + $0x110] sm:$0xff]  ;;  %v10180_v30 = vpack.c.b16 %v7840_v40, %v7838_v49  ;;  %v3037_v49 = vsub.f32 %v8026_v47, %v8267_v4 }
 0x649   :  { %v3547_v5 = vpack.c.bf16 %v3483_v16, %v3483_v16  ;;  %3321 = vadd.xlane.f32.xlu2 %v3320_v34  ;;  %v3041_v16 = vsub.f32 %v7916_v52, %v8271_v53  ;;  %v3236_v57 = vsel %vm2839_vm9, %v8346_v2, 0.0  ;;  %v1790_v52 = vld [vmem:[%s10016_s1 + $0x140] sm:$0xff]  ;;  %v8375_v34 = vpop.xlane.xlu2 %2919 }
 0x64a   :  { %v3132_v53 = vmul.f32 1.442695, %v3050_v10  ;;  %v8381_v8 = vadd.f32 %v8286_v39, %v1790_v52 }
 0x64b   :  { %v3703_v46 = vunpack.c.l.b16 %v3547_v5  ;;  %v8344_v58 = vpop.xlane.xlu0 %2877  ;;  %v3114_v17 = vmul.f32 1.442695, %v3041_v16  ;;  %v8378_v5 = vadd.f32 %v8220_v27, %v1784_v29  ;;  %v8395_v16 = vpop.xlane.xlu1 %2973 }
 0x64c   :  { %6065 = vpow2.f32 %v3132_v53  ;;  %v2960_v40 = vsel %vm2839_vm9, %v8381_v8, -inf  ;;  %v1802_v53 = vld [vmem:[%s10016_s1 + $0x1a0] sm:$0xff] }
 0x64d   :  { %v3704_v9 = vpack.c.b16 %v3703_v46, %v3702_v31  ;;  %v8383_v46 = vpop.eup %6063  ;;  %6067 = vpow2.f32 %v3114_v17  ;;  %v2942_v27 = vsel %vm2839_vm9, %v8378_v5, -inf }
 0x64e   :  { %6069 = vpow2.f32 %v3098_v28  ;;  %v3323_v39 = vsel %vm2839_vm9, %v8383_v46, 0.0 }
 0x64f   :  { %5507 = vmatmul.msk.bf16.vlgmr.msra.gmra.mxu3 %vm2839_vm9, %v3704_v9  ;;  %v8385_v10 = vpop.f32.mrf.mxu2  ;;  %v3106_v9 = vmul.f32 1.442695, %v3037_v49 }
 0x650   :  { %3237 = vadd.xlane.f32.xlu0 %v3236_v57  ;;  %3225 = vadd.xlane.f32.xlu1 %v3224_v43 }
 0x651   :  { %2985 = vmax.xlane.f32.xlu2 %v2984_v61  ;;  %3889 = vmatpush.bf16.msra.mxu3 %v10180_v30  ;;  %v8403_v47 = vpop.xlane.xlu2 %2976  ;;  %6071 = vpow2.f32 %v3106_v9 }
 0x652   :  { %v8397_v3 = vpop.eup %6065 }
 0x653   :  { %v2959_v31 = vpop.xlane.xlu0 %2958  ;;  %v8401_v4 = vpop.eup %6067  ;;  %v3278_v61 = vsel %vm2839_vm9, %v8397_v3, 0.0 }
 0x654   :  { %v8405_v43 = vpop.eup %6069  ;;  %v3071_v29 = vsub.f32 %v8094_v11, %v2959_v31  ;;  %v3251_v52 = vsel %vm2839_vm9, %v8401_v4, 0.0  ;;  %v1785_v11 = vld [vmem:[%s10016_s1 + $0x118] sm:$0xff] }
 0x655   :  { %v3227_v17 = vsel %vm2839_vm9, %v8405_v43, 0.0  ;;  %v3247_v31 = vpop.xlane.xlu1 %3246 }
 0x656   :  { %v3174_v28 = vmul.f32 1.442695, %v3071_v29  ;;  %6073 = vrcp.f32 %v3247_v31  ;;  %v3051_v29 = vsub.f32 %v8008_v44, %v8240_v14  ;;  %v2706_v44 = vpop.f32.mrf.mxu3 }
 0x657   :  { %v2674_v30 = vpop.f32.mrf.mxu2 }
 0x658   :  { %2961 = vmax.xlane.f32.xlu0 %v2960_v40  ;;  %2943 = vmax.xlane.f32.xlu1 %v2942_v27  ;;  %v8420_v49 = vadd.f32 %v2674_v30, %v1802_v53  ;;  %v8422_v27 = vpop.eup %6071  ;;  %6075 = vpow2.f32 %v3174_v28  ;;  %v3134_v28 = vmul.f32 1.442695, %v3051_v29 }
 0x659   :  { %3324 = vadd.xlane.f32.xlu2 %v3323_v39  ;;  %v8425_v39 = vadd.f32 %v8246_v63, %v1785_v11  ;;  %v8427_v9 = vpop.xlane.xlu2 %3255  ;;  %v3239_v30 = vsel %vm2839_vm9, %v8422_v27, 0.0  ;;  %v1791_v63 = vld [vmem:[%s10016_s1 + $0x148] sm:$0xff] }
 0x65a   :  { %v2996_v53 = vsel %vm2839_vm9, %v8420_v49, -inf  ;;  %v8447_v11 = vadd.f32 %v8319_v24, %v1791_v63 }
 0x65b   :  { %v8399_v57 = vpop.xlane.xlu0 %2910 }
 0x65c   :  { %v2963_v24 = vsel %vm2839_vm9, %v8447_v11, -inf }
 0x65f   :  { %v8455_v48 = vpop.f32.mrf.mxu2 }
 0x660   :  { %3252 = vadd.xlane.f32.xlu0 %v3251_v52  ;;  %3279 = vadd.xlane.f32.xlu1 %v3278_v61  ;;  %v3070_v52 = vsub.f32 %v7928_v25, %v8302_v37  ;;  %v2945_v25 = vsel %vm2839_vm9, %v8425_v39, -inf }
 0x661   :  { %3228 = vadd.xlane.f32.xlu2 %v3227_v17  ;;  %v6074_v17 = vpop.eup %6073 }
 0x662   :  { %v3172_v14 = vmul.f32 1.442695, %v3070_v52  ;;  %v2902_v52 = vpop.xlane.xlu2 %2901 }
 0x663   :  { %v2881_v40 = vpop.xlane.xlu0 %2880 }
 0x664   :  { %v3045_v61 = vsub.f32 %v8141_v22, %v2881_v40  ;;  %v1804_v22 = vld [vmem:[%s10016_s1 + $0x1b0] sm:$0xff]  ;;  %v8449_v40 = vpop.eup %6075 }
 0x665   :  { %v3341_v29 = vsel %vm2839_vm9, %v8449_v40, 0.0 }
 0x666   :  { %v3122_v37 = vmul.f32 1.442695, %v3045_v61  ;;  %v3487_v61 = vmul.f32 %v6074_v17, %v8100_v50 }
 0x668   :  { %2997 = vmax.xlane.f32.xlu0 %v2996_v53  ;;  %3240 = vadd.xlane.f32.xlu1 %v3239_v30  ;;  %v8451_v53 = vadd.f32 %v2706_v44, %v1804_v22  ;;  %v3054_v30 = vsub.f32 %v7953_v56, %v8335_v19  ;;  %v3551_v22 = vpack.c.bf16 %v3487_v61, %v3487_v61 }
 0x669   :  { %2946 = vmax.xlane.f32.xlu2 %v2945_v25 }
 0x66a   :  { %v3002_v63 = vsel %vm2839_vm9, %v8451_v53, -inf  ;;  %v3140_v19 = vmul.f32 1.442695, %v3054_v30  ;;  %v3040_v30 = vsub.f32 %v8058_v38, %v8323_v20  ;;  %v8478_v61 = vunpack.c.l.b16 %v3551_v22  ;;  %v1805_v38 = vld [vmem:[%s10016_s1 + $0x1b8] sm:$0xff]  ;;  %v2708_v20 = vpop.f32.mrf.mxu3 }
 0x66b   :  { %v3244_v31 = vpop.xlane.xlu0 %3243 }
 0x66c   :  { %6077 = vrcp.f32 %v3244_v31 }
 0x66d   :  { %6079 = vpow2.f32 %v3172_v14 }
 0x66e   :  { %6081 = vpow2.f32 %v3122_v37  ;;  %v3077_v37 = vsub.f32 %v7990_v33, %v8403_v47  ;;  %v1808_v33 = vld [vmem:[%s10016_s1 + $0x1d0] sm:$0xff]  ;;  %v2995_v47 = vpop.xlane.xlu2 %2994 }
 0x66f   :  { %6083 = vpow2.f32 %v3134_v28  ;;  %v3052_v28 = vsub.f32 %v8096_v26, %v2902_v52  ;;  %v2770_v26 = vpop.f32.mrf.mxu2 }
 0x670   :  { %2964 = vmax.xlane.f32.xlu1 %v2963_v24  ;;  %3342 = vadd.xlane.f32.xlu0 %v3341_v29  ;;  %6085 = vpow2.f32 %v3140_v19  ;;  %v8496_v22 = vadd.f32 %v2770_v26, %v1808_v33 }
 0x671   :  { %3003 = vmax.xlane.f32.xlu2 %v3002_v63  ;;  %v3186_v63 = vmul.f32 1.442695, %v3077_v37  ;;  %v3136_v19 = vmul.f32 1.442695, %v3052_v28 }
 0x672   :  { %v6078_v56 = vpop.eup %6077  ;;  %10182 = vst [vmem:[#allocation38_spill] sm:$0xff] %v8496_v22 }
 0x673   :  { %v8464_v25 = vpop.eup %6079  ;;  %v3486_v44 = vmul.f32 %v6078_v56, %v8159_v55  ;;  %v8480_v55 = vpop.xlane.xlu1 %2892  ;;  %6087 = vpow2.f32 %v3186_v63 }
 0x674   :  { %v8467_v50 = vpop.eup %6081  ;;  %v3338_v31 = vsel %vm2839_vm9, %v8464_v25, 0.0  ;;  %6089 = vpow2.f32 %v3136_v19  ;;  %v8509_v33 = vpop.xlane.xlu0 %2889 }
 0x675   :  { %10181 = vst [vmem:[#allocation37_spill] sm:$0xff] %v8467_v50  ;;  %v8469_v14 = vpop.eup %6083  ;;  %v3550_v17 = vpack.c.bf16 %v3486_v44, %v3486_v44  ;;  %v3263_v29 = vsel %vm2839_vm9, %v8467_v50, 0.0  ;;  %v3112_v44 = vmul.f32 1.442695, %v3040_v30  ;;  %v8500_v50 = vadd.f32 %v2708_v20, %v1805_v38 }
 0x676   :  { %v3281_v52 = vsel %vm2839_vm9, %v8469_v14, 0.0 }
 0x677   :  { %v8482_v24 = vunpack.c.l.b16 %v3550_v17  ;;  %v8498_v17 = vpop.eup %6085  ;;  %6091 = vpow2.f32 %v3112_v44  ;;  %v3005_v28 = vsel %vm2839_vm9, %v8500_v50, -inf }
 0x678   :  { %3339 = vadd.xlane.f32.xlu1 %v3338_v31  ;;  %3264 = vadd.xlane.f32.xlu0 %v3263_v29  ;;  %v3083_v31 = vsub.f32 %v8118_v21, %v2995_v47  ;;  %v3290_v37 = vsel %vm2839_vm9, %v8498_v17, 0.0  ;;  %v3014_v29 = vsel %vm2839_vm9, %v8496_v22, -inf }
 0x679   :  { %3282 = vadd.xlane.f32.xlu2 %v3281_v52  ;;  %v2935_v52 = vpop.xlane.xlu2 %2934  ;;  %v8511_v38 = vpop.eup %6087 }
 0x67a   :  { %v3198_v26 = vmul.f32 1.442695, %v3083_v31  ;;  %10183 = vst [vmem:[#allocation39_spill] sm:$0xff] %v8511_v38  ;;  %v8513_v21 = vpop.eup %6089  ;;  %v3063_v20 = vsub.f32 %v8143_v6, %v2935_v52  ;;  %v3359_v19 = vsel %vm2839_vm9, %v8511_v38, 0.0  ;;  %v1809_v31 = vld [vmem:[%s10016_s1 + $0x1d8] sm:$0xff]  ;;  %v1796_v6 = vld [vmem:[%s10016_s1 + $0x170] sm:$0xff] }
 0x67b   :  { %v2992_v30 = vpop.xlane.xlu1 %2991  ;;  %10184 = vst [vmem:[#allocation40_spill] sm:$0xff] %v8513_v21  ;;  %v3284_v44 = vsel %vm2839_vm9, %v8513_v21, 0.0  ;;  %v3044_v21 = vsub.f32 %v8074_v59, %v8344_v58 }
 0x67c   :  { %6093 = vpow2.f32 %v3198_v26  ;;  %v3082_v63 = vsub.f32 %v8145_v32, %v2992_v30  ;;  %v3158_v32 = vmul.f32 1.442695, %v3063_v20  ;;  %v8533_v52 = vpop.xlane.xlu0 %2922 }
 0x67d   :  { %v8515_v47 = vpop.eup %6091  ;;  %v3120_v59 = vmul.f32 1.442695, %v3044_v21 }
 0x67e   :  { %6095 = vpow2.f32 %v3158_v32  ;;  %v3055_v32 = vsub.f32 %v8116_v51, %v8399_v57 }
 0x680   :  { %3291 = vadd.xlane.f32.xlu1 %v3290_v37  ;;  %3015 = vmax.xlane.f32.xlu0 %v3014_v29  ;;  %v2772_v37 = vpop.f32.mrf.mxu2  ;;  %v3248_v29 = vsel %vm2839_vm9, %v8515_v47, 0.0 }
 0x681   :  { %3006 = vmax.xlane.f32.xlu2 %v3005_v28  ;;  %v3196_v28 = vmul.f32 1.442695, %v3082_v63  ;;  %v8531_v30 = vadd.f32 %v2772_v37, %v1809_v31  ;;  %v8573_v51 = vpop.xlane.xlu2 %3012 }
 0x682   :  { %v8535_v56 = vpop.eup %6093 }
 0x683   :  { %10185 = vst [vmem:[#allocation41_spill] sm:$0xff] %v8531_v30  ;;  %v2932_v26 = vpop.xlane.xlu1 %2931  ;;  %6097 = vpow2.f32 %v3196_v28  ;;  %v3017_v20 = vsel %vm2839_vm9, %v8531_v30, -inf  ;;  %v3377_v63 = vsel %vm2839_vm9, %v8535_v56, 0.0 }
 0x684   :  { %v8552_v37 = vpop.eup %6095 }
 0x685   :  { %10187 = vst [vmem:[#allocation43_spill] sm:$0xff] %v8552_v37 }
 0x688   :  { %3360 = vadd.xlane.f32.xlu1 %v3359_v19  ;;  %3285 = vadd.xlane.f32.xlu0 %v3284_v44  ;;  %v8538_v19 = vadd.f32 %v8351_v18, %v1796_v6  ;;  %v3062_v44 = vsub.f32 %v8163_v35, %v2932_v26  ;;  %v1797_v18 = vld [vmem:[%s10016_s1 + $0x178] sm:$0xff]  ;;  %v3317_v26 = vsel %vm2839_vm9, %v8552_v37, 0.0  ;;  %v3076_v37 = vsub.f32 %v8067_v15, %v8395_v16 }
 0x689   :  { %3249 = vadd.xlane.f32.xlu2 %v3248_v29  ;;  %v8556_v29 = vpop.eup %6097  ;;  %v8559_v6 = vadd.f32 %v8385_v10, %v1797_v18 }
 0x68a   :  { %10186 = vst [vmem:[#allocation42_spill] sm:$0xff] %v8538_v19  ;;  %v2978_v31 = vsel %vm2839_vm9, %v8538_v19, -inf  ;;  %v3156_v35 = vmul.f32 1.442695, %v3062_v44  ;;  %v3374_v28 = vsel %vm2839_vm9, %v8556_v29, 0.0 }
 0x68b   :  { %v2981_v21 = vsel %vm2839_vm9, %v8559_v6, -inf  ;;  %v3142_v44 = vmul.f32 1.442695, %v3055_v32 }
 0x68c   :  { %6099 = vpow2.f32 %v3156_v35  ;;  %v1810_v35 = vld [vmem:[%s10016_s1 + $0x1e0] sm:$0xff] }
 0x68d   :  { %6101 = vpow2.f32 %v3120_v59 }
 0x68e   :  { %6103 = vpow2.f32 %v3142_v44 }
 0x690   :  { %3018 = vmax.xlane.f32.xlu1 %v3017_v20  ;;  %3378 = vadd.xlane.f32.xlu0 %v3377_v63 }
 0x691   :  { %2979 = vmax.xlane.f32.xlu2 %v2978_v31  ;;  %v2802_v31 = vpop.f32.mrf.mxu3 }
 0x692   :  { %v8571_v63 = vpop.eup %6099  ;;  %v8584_v32 = vadd.f32 %v2802_v31, %v1810_v35  ;;  %v1811_v31 = vld [vmem:[%s10016_s1 + $0x1e8] sm:$0xff] }
 0x693   :  { %v8554_v58 = vpop.xlane.xlu0 %3258  ;;  %10188 = vst [vmem:[#allocation44_spill] sm:$0xff] %v8571_v63  ;;  %v8575_v57 = vpop.eup %6101  ;;  %v3314_v18 = vsel %vm2839_vm9, %v8571_v63, 0.0 }
 0x694   :  { %v3260_v59 = vsel %vm2839_vm9, %v8575_v57, 0.0  ;;  %10189 = vst [vmem:[#allocation45_spill] sm:$0xff] %v8584_v32 }
 0x698   :  { %3375 = vadd.xlane.f32.xlu1 %v3374_v28  ;;  %3318 = vadd.xlane.f32.xlu0 %v3317_v26 }
 0x699   :  { %2982 = vmax.xlane.f32.xlu2 %v2981_v21  ;;  %v8590_v21 = vpop.eup %6103  ;;  %v2804_v35 = vpop.f32.mrf.mxu3 }
 0x69a   :  { %10190 = vst [vmem:[#allocation46_spill] sm:$0xff] %v8590_v21  ;;  %v3293_v63 = vsel %vm2839_vm9, %v8590_v21, 0.0  ;;  %v8605_v16 = vadd.f32 %v2804_v35, %v1811_v31 }
 0x69b   :  { %v3268_v10 = vpop.xlane.xlu1 %3267  ;;  %v8569_v20 = vpop.xlane.xlu0 %2904 }
 0x69c   :  { %6105 = vrcp.f32 %v3268_v10 }
 0x6a0   :  { %3315 = vadd.xlane.f32.xlu1 %v3314_v18  ;;  %v3020_v18 = vsel %vm2839_vm9, %v8584_v32, -inf  ;;  %v3184_v32 = vmul.f32 1.442695, %v3076_v37  ;;  %v3058_v37 = vsub.f32 %v7973_v36, %v8375_v34 }
 0x6a1   :  { %3261 = vadd.xlane.f32.xlu2 %v3260_v59 }
 0x6a2   :  { %v6106_v10 = vpop.eup %6105 }
 0x6a3   :  { %v8586_v28 = vpop.xlane.xlu1 %2913  ;;  %v8588_v26 = vpop.xlane.xlu0 %3009  ;;  %v3494_v59 = vmul.f32 %v6106_v10, %v8223_v13 }
 0x6a4   :  { %v3271_v44 = vpop.xlane.xlu2 %3270 }
 0x6a5   :  { %6107 = vrcp.f32 %v3271_v44  ;;  %v1803_v44 = vld [vmem:[%s10016_s1 + $0x1a8] sm:$0xff]  ;;  %v3558_v13 = vpack.c.bf16 %v3494_v59, %v3494_v59 }
 0x6a6   :  { %v8610_v38 = vadd.f32 %v8455_v48, %v1803_v44  ;;  %6109 = vpow2.f32 %v3184_v32  ;;  %v3023_v48 = vsel %vm2839_vm9, %v8605_v16, -inf }
 0x6a7   :  { %v8621_v35 = vunpack.c.l.b16 %v3558_v13 }
 0x6a8   :  { %3021 = vmax.xlane.f32.xlu1 %v3020_v18 }
 0x6a9   :  { %3294 = vadd.xlane.f32.xlu2 %v3293_v63 }
 0x6ab   :  { %v6108_v15 = vpop.eup %6107  ;;  %v2953_v30 = vpop.xlane.xlu1 %2952 }
 0x6ac   :  { %v8607_v22 = vpop.xlane.xlu0 %2949  ;;  %v3495_v10 = vmul.f32 %v6108_v15, %v8244_v1  ;;  %v3069_v18 = vsub.f32 %v8265_v42, %v2953_v30  ;;  %v2917_v19 = vpop.xlane.xlu2 %2916  ;;  %5942 = vrot.lane.b32.xlu0 %v7649_v0, %s6380_s7  ;;  %v2999_v0 = vsel %vm2839_vm9, %v8610_v38, -inf  ;;  %v3148_v30 = vmul.f32 1.442695, %v3058_v37 }
 0x6ad   :  { %v3057_v31 = vsub.f32 %v8269_v62, %v2917_v19  ;;  %v8633_v32 = vpop.eup %6109 }
 0x6ae   :  { %v3559_v63 = vpack.c.bf16 %v3495_v10, %v3495_v10  ;;  %v3170_v21 = vmul.f32 1.442695, %v3069_v18  ;;  %v3356_v15 = vsel %vm2839_vm9, %v8633_v32, 0.0 }
 0x6af   :  { %v3146_v42 = vmul.f32 1.442695, %v3057_v31 }
 0x6b0   :  { %v8623_v1 = vunpack.c.l.b16 %v3559_v63  ;;  %6111 = vpow2.f32 %v3170_v21  ;;  %3024 = vmax.xlane.f32.xlu1 %v3023_v48  ;;  %v3048_v21 = vsub.f32 %v8175_v41, %v8509_v33  ;;  %v10193_v41 = vld [vmem:[#allocation23_spill] sm:$0xff] }
 0x6b1   :  { %3000 = vmax.xlane.f32.xlu2 %v2999_v0  ;;  %6113 = vpow2.f32 %v3146_v42  ;;  %v3059_v33 = vsub.f32 %v10193_v41, %v8533_v52 }
 0x6b2   :  { %6115 = vpow2.f32 %v3148_v30  ;;  %v3128_v13 = vmul.f32 1.442695, %v3048_v21 }
 0x6b3   :  { %v8629_v36 = vpop.xlane.xlu1 %2925  ;;  %v3150_v21 = vmul.f32 1.442695, %v3059_v33 }
 0x6b4   :  { %v2968_v34 = vpop.xlane.xlu0 %2967  ;;  %v8631_v19 = vpop.xlane.xlu2 %2928  ;;  %6117 = vpow2.f32 %v3128_v13 }
 0x6b6   :  { %v8635_v59 = vpop.eup %6111 }
 0x6b7   :  { %10191 = vst [vmem:[#allocation47_spill] sm:$0xff] %v8635_v59  ;;  %v3335_v44 = vsel %vm2839_vm9, %v8635_v59, 0.0  ;;  %v8645_v63 = vpop.eup %6113 }
 0x6b8   :  { %3336 = vadd.xlane.f32.xlu1 %v3335_v44  ;;  %10192 = vst [vmem:[#allocation48_spill] sm:$0xff] %v8645_v63  ;;  %v8648_v48 = vpop.eup %6115  ;;  %v3299_v42 = vsel %vm2839_vm9, %v8645_v63, 0.0 }
 0x6b9   :  { %3357 = vadd.xlane.f32.xlu2 %v3356_v15  ;;  %v3302_v30 = vsel %vm2839_vm9, %v8648_v48, 0.0  ;;  %v10194_v15 = vld [vmem:[#allocation33_spill] sm:$0xff] }
 0x6ba   :  { %v8660_v52 = vpop.eup %6117 }
 0x6bb   :  { %v2971_v10 = vpop.xlane.xlu1 %2970  ;;  %10195 = vst [vmem:[#allocation23_spill] sm:$0xff] %v8660_v52 }
 0x6bc   :  { %v8643_v18 = vpop.xlane.xlu0 %2988  ;;  %v3075_v31 = vsub.f32 %v8317_v54, %v2971_v10  ;;  %v3322_v37 = vpop.xlane.xlu2 %3321  ;;  %v3056_v10 = vsub.f32 %v10194_v15, %v8586_v28 }
 0x6be   :  { %v3182_v0 = vmul.f32 1.442695, %v3075_v31  ;;  %v10197_v31 = vld [vmem:[#allocation20_spill] sm:$0xff]  ;;  %v3144_v33 = vmul.f32 1.442695, %v3056_v10  ;;  %v10198_v10 = vld [vmem:[#allocation31_spill] sm:$0xff] }
 0x6bf   :  { %v3049_v41 = vsub.f32 %v10197_v31, %v8480_v55  ;;  %v3074_v55 = vsub.f32 %v8293_v23, %v2968_v34  ;;  %v3053_v31 = vsub.f32 %v10198_v10, %v8569_v20  ;;  %v10200_v23 = vld [vmem:[#allocation35_spill] sm:$0xff] }
 0x6c0   :  { %6119 = vpow2.f32 %v3182_v0  ;;  %3300 = vadd.xlane.f32.xlu1 %v3299_v42  ;;  %v3272_v42 = vsel %vm2839_vm9, %v8660_v52, 0.0  ;;  %v3060_v34 = vsub.f32 %v10200_v23, %v8629_v36 }
 0x6c1   :  { %3303 = vadd.xlane.f32.xlu2 %v3302_v30  ;;  %6121 = vpow2.f32 %v3150_v21  ;;  %v3130_v28 = vmul.f32 1.442695, %v3049_v41  ;;  %v3138_v52 = vmul.f32 1.442695, %v3053_v31 }
 0x6c2   :  { %6123 = vrcp.f32 %v3322_v37  ;;  %v3152_v36 = vmul.f32 1.442695, %v3060_v34 }
 0x6c3   :  { %v3226_v44 = vpop.xlane.xlu1 %3225  ;;  %6125 = vpow2.f32 %v3144_v33 }
 0x6c4   :  { %v3238_v54 = vpop.xlane.xlu0 %3237  ;;  %v8658_v62 = vpop.xlane.xlu2 %2985 }
 0x6c6   :  { %v8662_v13 = vpop.eup %6119 }
 0x6c7   :  { %10196 = vst [vmem:[#allocation33_spill] sm:$0xff] %v8662_v13  ;;  %v3353_v0 = vsel %vm2839_vm9, %v8662_v13, 0.0  ;;  %v8674_v59 = vpop.eup %6121 }
 0x6c8   :  { %3354 = vadd.xlane.f32.xlu1 %v3353_v0  ;;  %v6124_v21 = vpop.eup %6123  ;;  %v3180_v0 = vmul.f32 1.442695, %v3074_v55 }
 0x6c9   :  { %3273 = vadd.xlane.f32.xlu2 %v3272_v42  ;;  %v3512_v41 = vmul.f32 %v6124_v21, %v8326_v7  ;;  %v3305_v42 = vsel %vm2839_vm9, %v8674_v59, 0.0  ;;  %v8682_v13 = vpop.eup %6125 }
 0x6ca   :  { %10199 = vst [vmem:[#allocation20_spill] sm:$0xff] %v8682_v13  ;;  %v3296_v10 = vsel %vm2839_vm9, %v8682_v13, 0.0 }
 0x6cb   :  { %v8670_v30 = vpop.xlane.xlu1 %2943 }
 0x6cc   :  { %v8672_v15 = vpop.xlane.xlu0 %2961  ;;  %v3325_v37 = vpop.xlane.xlu2 %3324 }
 0x6cd   :  { %6127 = vrcp.f32 %v3325_v37 }
 0x6ce   :  { %6129 = vpow2.f32 %v3130_v28 }
 0x6cf   :  { %6131 = vrcp.f32 %v3226_v44  ;;  %v3576_v44 = vpack.c.bf16 %v3512_v41, %v3512_v41 }
 0x6d0   :  { %6133 = vpow2.f32 %v3180_v0 }
 0x6d1   :  { %3306 = vadd.xlane.f32.xlu2 %v3305_v42  ;;  %v8695_v42 = vunpack.c.l.b16 %v3576_v44 }
 0x6d3   :  { %v6128_v33 = vpop.eup %6127  ;;  %v8686_v37 = vpop.xlane.xlu1 %3279  ;;  %10202 = vst [vmem:[#allocation35_spill] sm:$0xff] %v8695_v42 }
 0x6d4   :  { %v8688_v28 = vpop.xlane.xlu0 %3252  ;;  %v8690_v20 = vpop.eup %6129  ;;  %v3513_v7 = vmul.f32 %v6128_v33, %v8383_v46  ;;  %v10204_v33 = vld [vmem:[#allocation9_spill] sm:$0xff] }
 0x6d5   :  { %10201 = vst [vmem:[#allocation31_spill] sm:$0xff] %v8690_v20  ;;  %v3229_v55 = vpop.xlane.xlu2 %3228  ;;  %v6132_v21 = vpop.eup %6131  ;;  %v3275_v46 = vsel %vm2839_vm9, %v8690_v20, 0.0 }
 0x6d6   :  { %6135 = vrcp.f32 %v3229_v55  ;;  %v3577_v31 = vpack.c.bf16 %v3513_v7, %v3513_v7  ;;  %3297 = vadd.xlane.f32.xlu0 %v3296_v10  ;;  %v3480_v23 = vmul.f32 %v6132_v21, %v8342_v60  ;;  %v8702_v0 = vpop.eup %6133  ;;  %v5870_v7 = vunpack.i.h.bf16 %v10204_v33 }
 0x6d7   :  { %6137 = vrcp.f32 %v3238_v54  ;;  %v3061_v55 = vsub.f32 %v8299_v45, %v8631_v19 }
 0x6d8   :  { %6139 = vpow2.f32 %v3138_v52  ;;  %v8698_v63 = vunpack.c.l.b16 %v3577_v31  ;;  %v5869_v52 = vunpack.i.l.bf16 %v10204_v33  ;;  %v3544_v21 = vpack.c.bf16 %v3480_v23, %v3480_v23 }
 0x6d9   :  { %3276 = vadd.xlane.f32.xlu2 %v3275_v46  ;;  %6141 = vpow2.f32 %v3152_v36  ;;  %v3350_v33 = vsel %vm2839_vm9, %v8702_v0, 0.0  ;;  %v3627_v42 = vpack.c.bf16 %v5870_v7, %v5870_v7  ;;  %v3154_v45 = vmul.f32 1.442695, %v3061_v55 }
 0x6da   :  { %10203 = vst [vmem:[#allocation49_spill] sm:$0xff] %v8698_v63  ;;  %v3626_v63 = vpack.c.bf16 %v5869_v52, %v5869_v52  ;;  %v3674_v19 = vunpack.c.l.b16 %v3544_v21 }
 0x6db   :  { %v3241_v34 = vpop.xlane.xlu1 %3240 }
 0x6dc   :  { %v6136_v54 = vpop.eup %6135  ;;  %v8708_v44 = vpop.xlane.xlu0 %2997  ;;  %6143 = vrcp.f32 %v3241_v34  ;;  %v3080_v34 = vsub.f32 %v8349_v12, %v8658_v62  ;;  %v3931_v55 = vunpack.c.l.b16 %v3626_v63  ;;  %v10208_v62 = vld [vmem:[#allocation10_spill] sm:$0xff] }
 0x6dd   :  { %v6138_v60 = vpop.eup %6137  ;;  %v3481_v10 = vmul.f32 %v6136_v54, %v8405_v43  ;;  %v2947_v31 = vpop.xlane.xlu2 %2946  ;;  %v5884_v63 = vunpack.i.l.bf16 %v10208_v62 }
 0x6de   :  { %v8713_v46 = vpop.eup %6139  ;;  %v3067_v41 = vsub.f32 %v8425_v39, %v2947_v31  ;;  %3351 = vadd.xlane.f32.xlu0 %v3350_v33  ;;  %v3484_v20 = vmul.f32 %v6138_v60, %v8346_v2  ;;  %v3932_v60 = vunpack.c.l.b16 %v3627_v42  ;;  %v10205_v31 = vld [vmem:[#allocation17_spill] sm:$0xff]  ;;  %v10206_v33 = vld [vmem:[#allocation16_spill] sm:$0xff]  ;;  %v3192_v42 = vmul.f32 1.442695, %v3080_v34 }
 0x6df   :  { %v3545_v36 = vpack.c.bf16 %v3481_v10, %v3481_v10  ;;  %v3287_v43 = vsel %vm2839_vm9, %v8713_v46, 0.0  ;;  %v8721_v54 = vpop.eup %6141  ;;  %v10207_v12 = vpack.c.b16 %v10205_v31, %v10206_v33 }
 0x6e0   :  { %v3166_v13 = vmul.f32 1.442695, %v3067_v41  ;;  %v3548_v7 = vpack.c.bf16 %v3484_v20, %v3484_v20  ;;  %v5885_v20 = vunpack.i.h.bf16 %v10208_v62 }
 0x6e1   :  { %v3675_v23 = vunpack.c.l.b16 %v3545_v36  ;;  %3288 = vadd.xlane.f32.xlu2 %v3287_v43 }
 0x6e2   :  { %6145 = vpow2.f32 %v3166_v13  ;;  %v6144_v39 = vpop.eup %6143  ;;  %v3629_v34 = vpack.c.bf16 %v5885_v20, %v5885_v20 }
 0x6e3   :  { %v3676_v10 = vpack.c.b16 %v3675_v23, %v3674_v19  ;;  %6147 = vrcp.f32 %v8554_v58  ;;  %v3485_v2 = vmul.f32 %v6144_v39, %v8422_v27  ;;  %v2965_v41 = vpop.xlane.xlu1 %2964  ;;  %v3308_v27 = vsel %vm2839_vm9, %v8721_v54, 0.0 }
 0x6e4   :  { %v3343_v52 = vpop.xlane.xlu0 %3342  ;;  %6149 = vpow2.f32 %v3154_v45  ;;  %v3073_v23 = vsub.f32 %v8447_v11, %v2965_v41 }
 0x6e5   :  { %5506 = vmatmul.msk.bf16.vlgmr.msra.gmra.mxu2 %vm2839_vm9, %v3676_v10  ;;  %v3004_v21 = vpop.xlane.xlu2 %3003  ;;  %6151 = vrcp.f32 %v8427_v9  ;;  %v3549_v13 = vpack.c.bf16 %v3485_v2, %v3485_v2  ;;  %v3730_v9 = vunpack.c.l.b16 %v3548_v7  ;;  %v3933_v2 = vpack.c.b16 %v3932_v60, %v3931_v55 }
 0x6e6   :  { %3861 = vmatpush.bf16.msra.mxu2 %v10207_v12  ;;  %v3086_v58 = vsub.f32 %v8451_v53, %v3004_v21  ;;  %6153 = vrcp.f32 %v3343_v52  ;;  %3309 = vadd.xlane.f32.xlu0 %v3308_v27  ;;  %v3628_v21 = vpack.c.bf16 %v5884_v63, %v5884_v63  ;;  %v3066_v7 = vsub.f32 %v8378_v5, %v8670_v30  ;;  %v10209_v12 = vld [vmem:[#allocation29_spill] sm:$0xff]  ;;  %v10210_v27 = vld [vmem:[#allocation22_spill] sm:$0xff]  ;;  %v10211_v30 = vld [vmem:[#allocation19_spill] sm:$0xff] }
 0x6e7   :  { %v3731_v45 = vunpack.c.l.b16 %v3549_v13  ;;  %v3178_v13 = vmul.f32 1.442695, %v3073_v23  ;;  %v3960_v55 = vunpack.c.l.b16 %v3629_v34  ;;  %v5915_v62 = vunpack.i.h.bf16 %v10210_v27 }
 0x6e8   :  { %v8737_v36 = vpop.eup %6145  ;;  %v3204_v19 = vmul.f32 1.442695, %v3086_v58  ;;  %v5914_v5 = vunpack.i.l.bf16 %v10210_v27 }
 0x6e9   :  { %v3329_v53 = vsel %vm2839_vm9, %v8737_v36, 0.0  ;;  %v6148_v43 = vpop.eup %6147  ;;  %v3732_v39 = vpack.c.b16 %v3731_v45, %v3730_v9  ;;  %v3164_v9 = vmul.f32 1.442695, %v3066_v7 }
 0x6ea   :  { %6155 = vpow2.f32 %v3204_v19  ;;  %3330 = vadd.xlane.f32.xlu1 %v3329_v53  ;;  %v8742_v10 = vpop.eup %6149  ;;  %v3491_v58 = vmul.f32 %v6148_v43, %v10209_v12  ;;  %v10213_v12 = vpack.c.b16 %v8478_v61, %v8482_v24 }
 0x6eb   :  { %v6152_v52 = vpop.eup %6151  ;;  %6157 = vpow2.f32 %v3192_v42  ;;  %v3340_v31 = vpop.xlane.xlu1 %3339  ;;  %5508 = vmatmul.msk.bf16.vlgmr.msrb.gmra.mxu1 %vm2839_vm9, %v3732_v39  ;;  %v3311_v60 = vsel %vm2839_vm9, %v8742_v10, 0.0  ;;  %v3959_v42 = vunpack.c.l.b16 %v3628_v21  ;;  %v3635_v39 = vpack.c.bf16 %v5915_v62, %v5915_v62 }
 0x6ec   :  { %v8747_v11 = vpop.xlane.xlu0 %3264  ;;  %v6154_v41 = vpop.eup %6153  ;;  %6159 = vrcp.f32 %v3340_v31  ;;  %3945 = vmatpush.bf16.msrb.mxu1 %v3933_v2  ;;  %v3490_v20 = vmul.f32 %v6152_v52, %v10211_v30  ;;  %v3555_v53 = vpack.c.bf16 %v3491_v58, %v3491_v58  ;;  %v3634_v2 = vpack.c.bf16 %v5914_v5, %v5914_v5 }
 0x6ed   :  { %v3283_v33 = vpop.xlane.xlu2 %3282  ;;  %6161 = vpow2.f32 %v3178_v13  ;;  %v3519_v45 = vmul.f32 %v6154_v41, %v8449_v40  ;;  %v3961_v52 = vpack.c.b16 %v3960_v55, %v3959_v42  ;;  %v3072_v40 = vsub.f32 %v8381_v8, %v8672_v15  ;;  %v10214_v8 = vld [vmem:[#allocation32_spill] sm:$0xff]  ;;  %v2834_v42 = vpop.f32.mrf.mxu1 }
 0x6ee   :  { %3312 = vadd.xlane.f32.xlu0 %v3311_v60  ;;  %v3554_v34 = vpack.c.bf16 %v3490_v20, %v3490_v20  ;;  %6163 = vpow2.f32 %v3164_v9  ;;  %v3815_v60 = vunpack.c.l.b16 %v3555_v53  ;;  %v4044_v27 = vunpack.c.l.b16 %v3635_v39 }
 0x6ef   :  { %v3583_v31 = vpack.c.bf16 %v3519_v45, %v3519_v45  ;;  %6165 = vrcp.f32 %v3283_v33  ;;  %v4043_v62 = vunpack.c.l.b16 %v3634_v2  ;;  %v3088_v15 = vsub.f32 %v10214_v8, %v8588_v26 }
 0x6f0   :  { %v8755_v63 = vpop.eup %6155  ;;  %v3814_v5 = vunpack.c.l.b16 %v3554_v34  ;;  %6167 = vrcp.f32 %v8686_v37  ;;  %v3176_v33 = vmul.f32 1.442695, %v3072_v40  ;;  %v1812_v37 = vld [vmem:[%s10016_s1 + $0x1f0] sm:$0xff] }
 0x6f1   :  { %10212 = vst [vmem:[#allocation9_spill] sm:$0xff] %v8755_v63  ;;  %v3386_v19 = vsel %vm2839_vm9, %v8755_v63, 0.0  ;;  %v8760_v23 = vpop.eup %6157  ;;  %6169 = vrcp.f32 %v8688_v28  ;;  %v8783_v61 = vunpack.c.l.b16 %v3583_v31  ;;  %v10215_v28 = vld [vmem:[#allocation7_spill] sm:$0xff]  ;;  %v3208_v53 = vmul.f32 1.442695, %v3088_v15 }
 0x6f2   :  { %3387 = vadd.xlane.f32.xlu1 %v3386_v19  ;;  %v6160_v43 = vpop.eup %6159  ;;  %v3816_v9 = vpack.c.b16 %v3815_v60, %v3814_v5  ;;  %v4045_v19 = vpack.c.b16 %v4044_v27, %v4043_v62  ;;  %v8803_v34 = vadd.f32 %v2834_v42, %v1812_v37  ;;  %6171 = vpow2.f32 %v3176_v33  ;;  %v10218_v5 = vld [vmem:[#allocation21_spill] sm:$0xff] }
 0x6f3   :  { %v3518_v21 = vmul.f32 %v6160_v43, %v8464_v25  ;;  %v8763_v7 = vpop.xlane.xlu1 %3291  ;;  %v8775_v58 = vpop.eup %6161  ;;  %v3368_v25 = vsel %vm2839_vm9, %v8760_v23, 0.0  ;;  %v3089_v8 = vsub.f32 %v10218_v5, %v8573_v51 }
 0x6f4   :  { %v8765_v13 = vpop.xlane.xlu0 %3015  ;;  %v3347_v30 = vsel %vm2839_vm9, %v8775_v58, 0.0  ;;  %v8789_v20 = vpop.eup %6163 }
 0x6f5   :  { %v8769_v41 = vpop.xlane.xlu2 %3006  ;;  %5509 = vmatmul.msk.bf16.vlgmr.msrb.gmra.mxu2 %vm2839_vm9, %v10213_v12  ;;  %v3582_v55 = vpack.c.bf16 %v3518_v21, %v3518_v21  ;;  %v6166_v45 = vpop.eup %6165  ;;  %v10216_v21 = vld [vmem:[#allocation8_spill] sm:$0xff]  ;;  %v3326_v60 = vsel %vm2839_vm9, %v8789_v20, 0.0 }
 0x6f6   :  { %3973 = vmatpush.bf16.msrb.mxu2 %v3961_v52  ;;  %3369 = vadd.xlane.f32.xlu0 %v3368_v25  ;;  %v6168_v2 = vpop.eup %6167  ;;  %v5875_v40 = vunpack.i.h.bf16 %v10216_v21  ;;  %v3499_v12 = vmul.f32 %v6166_v45, %v8469_v14  ;;  %v5874_v27 = vunpack.i.l.bf16 %v10216_v21  ;;  %v3026_v14 = vsel %vm2839_vm9, %v8803_v34, -inf }
 0x6f7   :  { %v8785_v24 = vunpack.c.l.b16 %v3582_v55  ;;  %v6170_v31 = vpop.eup %6169  ;;  %v10217_v55 = vld [vmem:[#allocation12_spill] sm:$0xff]  ;;  %v3498_v15 = vmul.f32 %v6168_v2, %v8397_v3  ;;  %v3210_v21 = vmul.f32 1.442695, %v3089_v8 }
 0x6f8   :  { %v5855_v25 = vunpack.i.h.bf16 %v10217_v55  ;;  %v5854_v62 = vunpack.i.l.bf16 %v10217_v55  ;;  %v3489_v33 = vmul.f32 %v6170_v31, %v8401_v4  ;;  %v3563_v37 = vpack.c.bf16 %v3499_v12, %v3499_v12  ;;  %v8818_v42 = vpop.eup %6171 }
 0x6f9   :  { %5937 = vrot.lane.b32.xlu2 %v10215_v28, %s6379_s23  ;;  %v3344_v55 = vsel %vm2839_vm9, %v8818_v42, 0.0 }
 0x6fa   :  { %3348 = vadd.xlane.f32.xlu1 %v3347_v30  ;;  %v3643_v30 = vpack.c.bf16 %v5875_v40, %v5875_v40  ;;  %v3553_v3 = vpack.c.bf16 %v3489_v33, %v3489_v33  ;;  %v3927_v12 = vunpack.c.l.b16 %v3563_v37 }
 0x6fb   :  { %v8798_v43 = vpop.xlane.xlu1 %3360  ;;  %5511 = vmatmul.msk.bf16.vlgmr.msra.gmra.mxu1 %vm2839_vm9, %v3816_v9  ;;  %v3642_v9 = vpack.c.bf16 %v5874_v27, %v5874_v27 }
 0x6fc   :  { %v8801_v39 = vpop.xlane.xlu0 %3285  ;;  %4057 = vmatpush.bf16.msra.mxu1 %v4045_v19  ;;  %v3625_v19 = vpack.c.bf16 %v5855_v25, %v5855_v25  ;;  %v4156_v40 = vunpack.c.l.b16 %v3643_v30  ;;  %v3084_v25 = vsub.f32 %v8420_v49, %v8708_v44 }
 0x6fd   :  { %v3250_v52 = vpop.xlane.xlu2 %3249  ;;  %v4155_v27 = vunpack.c.l.b16 %v3642_v9 }
 0x6fe   :  { %6173 = vrcp.f32 %v3250_v52  ;;  %3327 = vadd.xlane.f32.xlu0 %v3326_v60  ;;  %v3624_v52 = vpack.c.bf16 %v5854_v62, %v5854_v62  ;;  %v3562_v60 = vpack.c.bf16 %v3498_v15, %v3498_v15  ;;  %v3904_v5 = vunpack.c.l.b16 %v3625_v19 }
 0x6ff   :  { %6175 = vpow2.f32 %v3208_v53  ;;  %v3787_v15 = vunpack.c.l.b16 %v3553_v3  ;;  %v4157_v37 = vpack.c.b16 %v4156_v40, %v4155_v27 }
 0x700   :  { %v3903_v8 = vunpack.c.l.b16 %v3624_v52 }
 0x702   :  { %3027 = vmax.xlane.f32.xlu1 %v3026_v14  ;;  %v3905_v26 = vpack.c.b16 %v3904_v5, %v3903_v8 }
 0x703   :  { %v8820_v51 = vpop.xlane.xlu1 %3018 }
 0x704   :  { %v6174_v45 = vpop.eup %6173  ;;  %v3379_v53 = vpop.xlane.xlu0 %3378 }
 0x705   :  { %v3488_v4 = vmul.f32 %v6174_v45, %v8515_v47  ;;  %v8823_v2 = vpop.xlane.xlu2 %2979  ;;  %v8825_v31 = vpop.eup %6175  ;;  %6177 = vrcp.f32 %v3379_v53  ;;  %v3926_v47 = vunpack.c.l.b16 %v3562_v60  ;;  %v3200_v45 = vmul.f32 1.442695, %v3084_v25 }
 0x706   :  { %3345 = vadd.xlane.f32.xlu0 %v3344_v55  ;;  %6179 = vpow2.f32 %v3210_v21  ;;  %v3392_v14 = vsel %vm2839_vm9, %v8825_v31, 0.0  ;;  %v10219_v21 = vld [vmem:[#allocation18_spill] sm:$0xff] }
 0x707   :  { %v3552_v62 = vpack.c.bf16 %v3488_v4, %v3488_v4  ;;  %v3928_v30 = vpack.c.b16 %v3927_v12, %v3926_v47  ;;  %v5895_v60 = vunpack.i.h.bf16 %v10219_v21  ;;  %v5894_v53 = vunpack.i.l.bf16 %v10219_v21 }
 0x709   :  { %v3786_v33 = vunpack.c.l.b16 %v3552_v62  ;;  %v3630_v55 = vpack.c.bf16 %v5894_v53, %v5894_v53 }
 0x70a   :  { %3393 = vadd.xlane.f32.xlu1 %v3392_v14 }
 0x70b   :  { %v3788_v9 = vpack.c.b16 %v3787_v15, %v3786_v33  ;;  %v3376_v63 = vpop.xlane.xlu1 %3375  ;;  %5515 = vmatmul.msk.bf16.vlgmr.msrb.gmra.mxu1 %vm2839_vm9, %v3928_v30  ;;  %v6178_v49 = vpop.eup %6177  ;;  %v10221_v15 = vld [vmem:[#allocation26_spill] sm:$0xff] }
 0x70c   :  { %6181 = vrcp.f32 %v3376_v63  ;;  %4169 = vmatpush.bf16.msrb.mxu1 %v4157_v37  ;;  %v8835_v19 = vpop.eup %6179  ;;  %v3531_v3 = vmul.f32 %v6178_v49, %v8535_v56  ;;  %v10220_v63 = vld [vmem:[#allocation34_spill] sm:$0xff]  ;;  %v5925_v33 = vunpack.i.h.bf16 %v10221_v15  ;;  %v5924_v14 = vunpack.i.l.bf16 %v10221_v15  ;;  %v10222_v37 = vld [vmem:[#allocation36_spill] sm:$0xff]  ;;  %v10223_v49 = vld [vmem:[#allocation37_spill] sm:$0xff] }
 0x70d   :  { %v2983_v44 = vpop.xlane.xlu2 %2982  ;;  %5510 = vmatmul.msk.bf16.vlgmr.msrb.gmra.mxu3 %vm2839_vm9, %v3788_v9  ;;  %6183 = vpow2.f32 %v3200_v45  ;;  %v3068_v40 = vsub.f32 %v10220_v63, %v8607_v22  ;;  %v3395_v12 = vsel %vm2839_vm9, %v8835_v19, 0.0  ;;  %v3987_v22 = vunpack.c.l.b16 %v3630_v55 }
 0x70e   :  { %v3079_v52 = vsub.f32 %v8559_v6, %v2983_v44  ;;  %3917 = vmatpush.bf16.msrb.mxu3 %v3905_v26  ;;  %6185 = vrcp.f32 %v8747_v11  ;;  %v3631_v26 = vpack.c.bf16 %v5895_v60, %v5895_v60  ;;  %v3595_v27 = vpack.c.bf16 %v3531_v3, %v3531_v3 }
 0x70f   :  { %v3168_v11 = vmul.f32 1.442695, %v3068_v40  ;;  %v3081_v45 = vsub.f32 %v10222_v37, %v8643_v18  ;;  %v3637_v3 = vpack.c.bf16 %v5925_v33, %v5925_v33 }
 0x710   :  { %v3190_v4 = vmul.f32 1.442695, %v3079_v52  ;;  %v3988_v47 = vunpack.c.l.b16 %v3631_v26  ;;  %v10224_v26 = vpack.c.b16 %v8623_v1, %v8621_v35 }
 0x711   :  { %v3194_v63 = vmul.f32 1.442695, %v3081_v45  ;;  %v10225_v45 = vld [vmem:[#allocation46_spill] sm:$0xff] }
 0x712   :  { %6187 = vpow2.f32 %v3190_v4  ;;  %3396 = vadd.xlane.f32.xlu1 %v3395_v12  ;;  %v6182_v6 = vpop.eup %6181  ;;  %v3636_v4 = vpack.c.bf16 %v5924_v14, %v5924_v14 }
 0x713   :  { %v3530_v25 = vmul.f32 %v6182_v6, %v8556_v29  ;;  %v8847_v62 = vpop.eup %6183  ;;  %v8856_v29 = vunpack.c.l.b16 %v3595_v27  ;;  %v8867_v53 = vpop.xlane.xlu1 %3315 }
 0x714   :  { %v6186_v56 = vpop.eup %6185  ;;  %v3380_v21 = vsel %vm2839_vm9, %v8847_v62, 0.0 }
 0x715   :  { %v3262_v5 = vpop.xlane.xlu2 %3261  ;;  %v3594_v8 = vpack.c.bf16 %v3530_v25, %v3530_v25  ;;  %v3493_v44 = vmul.f32 %v6186_v56, %v10223_v49 }
 0x716   :  { %6189 = vrcp.f32 %v3262_v5  ;;  %v4071_v5 = vunpack.c.l.b16 %v3636_v4 }
 0x717   :  { %6191 = vrcp.f32 %v8763_v7  ;;  %v8858_v9 = vunpack.c.l.b16 %v3594_v8  ;;  %v3989_v7 = vpack.c.b16 %v3988_v47, %v3987_v22  ;;  %v3557_v40 = vpack.c.bf16 %v3493_v44, %v3493_v44 }
 0x718   :  { %v8851_v30 = vpop.eup %6187  ;;  %6193 = vpow2.f32 %v3168_v11  ;;  %v4072_v11 = vunpack.c.l.b16 %v3637_v3  ;;  %v3087_v8 = vsub.f32 %v8500_v50, %v8769_v41 }
 0x719   :  { %v3365_v52 = vsel %vm2839_vm9, %v8851_v30, 0.0  ;;  %v3843_v56 = vunpack.c.l.b16 %v3557_v40 }
 0x71a   :  { %3366 = vadd.xlane.f32.xlu0 %v3365_v52  ;;  %3381 = vadd.xlane.f32.xlu1 %v3380_v21  ;;  %v4073_v15 = vpack.c.b16 %v4072_v11, %v4071_v5  ;;  %v3206_v14 = vmul.f32 1.442695, %v3087_v8  ;;  %v10226_v52 = vld [vmem:[#allocation42_spill] sm:$0xff] }
 0x71b   :  { %v8881_v33 = vpop.xlane.xlu1 %3021  ;;  %v3078_v21 = vsub.f32 %v10226_v52, %v8823_v2  ;;  %v10228_v2 = vld [vmem:[#allocation39_spill] sm:$0xff]  ;;  %v10229_v11 = vld [vmem:[#allocation6_spill] sm:$0xff] }
 0x71c   :  { %v6190_v18 = vpop.eup %6189 }
 0x71d   :  { %v3492_v12 = vmul.f32 %v6190_v18, %v8575_v57  ;;  %v3295_v6 = vpop.xlane.xlu2 %3294  ;;  %5513 = vmatmul.msk.bf16.vlgmr.msra.gmra.mxu3 %vm2839_vm9, %v10224_v26  ;;  %v6192_v55 = vpop.eup %6191  ;;  %v3188_v4 = vmul.f32 1.442695, %v3078_v21  ;;  %v10230_v21 = vld [vmem:[#allocation38_spill] sm:$0xff] }
 0x71e   :  { %6195 = vrcp.f32 %v3295_v6  ;;  %4001 = vmatpush.bf16.msra.mxu3 %v3989_v7  ;;  %v8874_v27 = vpop.eup %6193  ;;  %v3502_v57 = vmul.f32 %v6192_v55, %v8498_v17 }
 0x71f   :  { %v3556_v25 = vpack.c.bf16 %v3492_v12, %v3492_v12  ;;  %6197 = vpow2.f32 %v3194_v63  ;;  %v3332_v35 = vsel %vm2839_vm9, %v8874_v27, 0.0 }
 0x720   :  { %v3566_v37 = vpack.c.bf16 %v3502_v57, %v3502_v57  ;;  %6199 = vrcp.f32 %v8798_v43  ;;  %v10227_v43 = vld [vmem:[#allocation4_spill] sm:$0xff] }
 0x721   :  { %v3842_v47 = vunpack.c.l.b16 %v3556_v25  ;;  %6201 = vpow2.f32 %v3206_v14 }
 0x722   :  { %3333 = vadd.xlane.f32.xlu2 %v3332_v35  ;;  %v8888_v41 = vunpack.c.l.b16 %v3566_v37  ;;  %v8918_v37 = vpop.xlane.xlu0 %3318 }
 0x723   :  { %v3844_v1 = vpack.c.b16 %v3843_v56, %v3842_v47  ;;  %v3025_v12 = vpop.xlane.xlu1 %3024 }
 0x724   :  { %v6196_v22 = vpop.eup %6195  ;;  %v3093_v55 = vsub.f32 %v8605_v16, %v3025_v12 }
 0x725   :  { %v3503_v49 = vmul.f32 %v6196_v22, %v10225_v45  ;;  %v3001_v44 = vpop.xlane.xlu2 %3000  ;;  %5512 = vmatmul.msk.bf16.vlgmr.msra.gmra.mxu2 %vm2839_vm9, %v3844_v1  ;;  %v8885_v50 = vpop.eup %6197 }
 0x726   :  { %4085 = vmatpush.bf16.msra.mxu2 %v4073_v15  ;;  %v3371_v7 = vsel %vm2839_vm9, %v8885_v50, 0.0  ;;  %v6200_v40 = vpop.eup %6199  ;;  %v3218_v8 = vmul.f32 1.442695, %v3093_v55  ;;  %v3085_v16 = vsub.f32 %v8610_v38, %v3001_v44 }
 0x727   :  { %v3567_v17 = vpack.c.bf16 %v3503_v49, %v3503_v49  ;;  %v8900_v6 = vpop.eup %6201  ;;  %v3525_v26 = vmul.f32 %v6200_v40, %v10228_v2 }
 0x728   :  { %v3389_v25 = vsel %vm2839_vm9, %v8900_v6, 0.0  ;;  %v3202_v49 = vmul.f32 1.442695, %v3085_v16 }
 0x729   :  { %v8892_v18 = vunpack.c.l.b16 %v3567_v17  ;;  %v3589_v56 = vpack.c.bf16 %v3525_v26, %v3525_v26 }
 0x72a   :  { %3372 = vadd.xlane.f32.xlu2 %v3371_v7  ;;  %v3090_v7 = vsub.f32 %v10230_v21, %v8765_v13  ;;  %v8928_v38 = vpop.permute.xlu0 %5942  ;;  %v10232_v13 = vld [vmem:[#allocation41_spill] sm:$0xff] }
 0x72b   :  { %v8911_v22 = vpop.xlane.xlu1 %3336  ;;  %v8913_v15 = vunpack.c.l.b16 %v3589_v56 }
 0x72d   :  { %v3358_v63 = vpop.xlane.xlu2 %3357 }
 0x72e   :  { %6203 = vrcp.f32 %v3358_v63  ;;  %5947 = vrot.lane.b32.xlu0 %v10227_v43, %s6380_s7  ;;  %v3212_v63 = vmul.f32 1.442695, %v3090_v7  ;;  %v10231_v43 = vld [vmem:[#allocation27_spill] sm:$0xff] }
 0x72f   :  { %6205 = vpow2.f32 %v3188_v4  ;;  %v5920_v2 = vunpack.i.h.bf16 %v10231_v43  ;;  %v5919_v55 = vunpack.i.l.bf16 %v10231_v43 }
 0x730   :  { %6207 = vpow2.f32 %v3218_v8 }
 0x732   :  { %3390 = vadd.xlane.f32.xlu2 %v3389_v25  ;;  %v3091_v25 = vsub.f32 %v10232_v13, %v8820_v51 }
 0x733   :  { %5952 = vrot.lane.b32.xlu1 %v10229_v11, %s6380_s7  ;;  %v3301_v44 = vpop.xlane.xlu1 %3300 }
 0x734   :  { %v6204_v5 = vpop.eup %6203  ;;  %v3214_v51 = vmul.f32 1.442695, %v3091_v25  ;;  %v2836_v25 = vpop.f32.mrf.mxu1 }
 0x735   :  { %v3524_v57 = vmul.f32 %v6204_v5, %v8633_v32  ;;  %v3304_v47 = vpop.xlane.xlu2 %3303  ;;  %v8909_v35 = vpop.eup %6205  ;;  %v3651_v5 = vpack.c.bf16 %v5920_v2, %v5920_v2 }
 0x736   :  { %v3362_v45 = vsel %vm2839_vm9, %v8909_v35, 0.0  ;;  %v8924_v52 = vpop.eup %6207  ;;  %6209 = vrcp.f32 %v3304_v47  ;;  %v3650_v47 = vpack.c.bf16 %v5919_v55, %v5919_v55 }
 0x737   :  { %v3588_v1 = vpack.c.bf16 %v3524_v57, %v3524_v57  ;;  %6211 = vpow2.f32 %v3202_v49  ;;  %v3407_v4 = vsel %vm2839_vm9, %v8924_v52, 0.0 }
 0x738   :  { %6213 = vrcp.f32 %v3301_v44  ;;  %v4267_v2 = vunpack.c.l.b16 %v3650_v47 }
 0x739   :  { %v8916_v14 = vunpack.c.l.b16 %v3588_v1  ;;  %v10233_v1 = vld [vmem:[#allocation25_spill] sm:$0xff] }
 0x73a   :  { %3363 = vadd.xlane.f32.xlu2 %v3362_v45  ;;  %v5910_v16 = vunpack.i.h.bf16 %v10233_v1  ;;  %v10234_v45 = vld [vmem:[#allocation45_spill] sm:$0xff]  ;;  %v5909_v21 = vunpack.i.l.bf16 %v10233_v1 }
 0x73b   :  { %v3092_v49 = vsub.f32 %v10234_v45, %v8881_v33  ;;  %v10238_v45 = vld [vmem:[#allocation23_spill] sm:$0xff] }
 0x73c   :  { %v6210_v12 = vpop.eup %6209  ;;  %v3649_v55 = vpack.c.bf16 %v5910_v16, %v5910_v16 }
 0x73d   :  { %v3274_v17 = vpop.xlane.xlu2 %3273  ;;  %v8933_v26 = vpop.eup %6211  ;;  %v3506_v11 = vmul.f32 %v6210_v12, %v8648_v48  ;;  %v3216_v33 = vmul.f32 1.442695, %v3092_v49 }
 0x73e   :  { %v3383_v56 = vsel %vm2839_vm9, %v8933_v26, 0.0  ;;  %v6214_v57 = vpop.eup %6213 }
 0x73f   :  { %v3570_v7 = vpack.c.bf16 %v3506_v11, %v3506_v11  ;;  %v3648_v11 = vpack.c.bf16 %v5909_v21, %v5909_v21 }
 0x742   :  { %3408 = vadd.xlane.f32.xlu2 %v3407_v4 }
 0x745   :  { %v3307_v40 = vpop.xlane.xlu2 %3306 }
 0x746   :  { %6215 = vrcp.f32 %v3307_v40  ;;  %v10235_v40 = vld [vmem:[#allocation48_spill] sm:$0xff] }
 0x747   :  { %6217 = vrcp.f32 %v3274_v17  ;;  %v3505_v12 = vmul.f32 %v6214_v57, %v10235_v40  ;;  %v4038_v57 = vunpack.c.l.b16 %v3570_v7 }
 0x748   :  { %6219 = vpow2.f32 %v3212_v63  ;;  %v4268_v63 = vunpack.c.l.b16 %v3651_v5 }
 0x749   :  { %v3298_v8 = vpop.xlane.xlu0 %3297  ;;  %v3569_v49 = vpack.c.bf16 %v3505_v12, %v3505_v12 }
 0x74a   :  { %3384 = vadd.xlane.f32.xlu2 %v3383_v56  ;;  %6221 = vrcp.f32 %v3298_v8  ;;  %v1813_v56 = vld [vmem:[%s10016_s1 + $0x1f8] sm:$0xff]  ;;  %v10237_v8 = vld [vmem:[#allocation30_spill] sm:$0xff]  ;;  %v4269_v32 = vpack.c.b16 %v4268_v63, %v4267_v2  ;;  %v10241_v63 = vld [vmem:[#allocation11_spill] sm:$0xff] }
 0x74b   :  { %v5934_v1 = vunpack.i.l.bf16 %v10237_v8  ;;  %v8961_v21 = vadd.f32 %v2836_v25, %v1813_v56  ;;  %v8965_v56 = vpop.xlane.xlu1 %3354  ;;  %v5890_v2 = vunpack.i.h.bf16 %v10241_v63 }
 0x74c   :  { %v6216_v17 = vpop.eup %6215 }
 0x74d   :  { %v3507_v48 = vmul.f32 %v6216_v17, %v8674_v59  ;;  %v3277_v44 = vpop.xlane.xlu2 %3276  ;;  %v6218_v4 = vpop.eup %6217  ;;  %v5935_v59 = vunpack.i.h.bf16 %v10237_v8  ;;  %v10239_v17 = vld [vmem:[#allocation20_spill] sm:$0xff]  ;;  %v3638_v7 = vpack.c.bf16 %v5934_v1, %v5934_v1 }
 0x74e   :  { %6223 = vrcp.f32 %v3277_v44  ;;  %v8947_v43 = vpop.eup %6219  ;;  %v3496_v47 = vmul.f32 %v6218_v4, %v10238_v45  ;;  %v4240_v4 = vunpack.c.l.b16 %v3649_v55  ;;  %v10240_v45 = vld [vmem:[#allocation31_spill] sm:$0xff]  ;;  %v3029_v55 = vsel %vm2839_vm9, %v8961_v21, -inf }
 0x74f   :  { %10236 = vst [vmem:[#allocation17_spill] sm:$0xff] %v8947_v43  ;;  %v3571_v13 = vpack.c.bf16 %v3507_v48, %v3507_v48  ;;  %6225 = vrcp.f32 %v8801_v39  ;;  %v3398_v44 = vsel %vm2839_vm9, %v8947_v43, 0.0  ;;  %v4011_v43 = vunpack.c.l.b16 %v3569_v49 }
 0x750   :  { %v6222_v5 = vpop.eup %6221  ;;  %6227 = vpow2.f32 %v3214_v51  ;;  %v3639_v51 = vpack.c.bf16 %v5935_v59, %v5935_v59  ;;  %v3560_v12 = vpack.c.bf16 %v3496_v47, %v3496_v47 }
 0x751   :  { %v4039_v16 = vunpack.c.l.b16 %v3571_v13  ;;  %v3504_v48 = vmul.f32 %v6222_v5, %v10239_v17  ;;  %v8959_v40 = vpop.xlane.xlu0 %3351  ;;  %6229 = vpow2.f32 %v3216_v33  ;;  %v4239_v13 = vunpack.c.l.b16 %v3648_v11 }
 0x752   :  { %3399 = vadd.xlane.f32.xlu2 %v3398_v44  ;;  %v5889_v11 = vunpack.i.l.bf16 %v10241_v63  ;;  %v4100_v1 = vunpack.c.l.b16 %v3639_v51 }
 0x753   :  { %v4040_v8 = vpack.c.b16 %v4039_v16, %v4038_v57  ;;  %v3568_v60 = vpack.c.bf16 %v3504_v48, %v3504_v48  ;;  %v4099_v57 = vunpack.c.l.b16 %v3638_v7  ;;  %v4241_v49 = vpack.c.b16 %v4240_v4, %v4239_v13  ;;  %v10243_v13 = vld [vmem:[#allocation14_spill] sm:$0xff] }
 0x754   :  { %v6224_v39 = vpop.eup %6223  ;;  %v3645_v7 = vpack.c.bf16 %v5890_v2, %v5890_v2 }
 0x755   :  { %v3497_v5 = vmul.f32 %v6224_v39, %v10240_v45  ;;  %v3289_v17 = vpop.xlane.xlu2 %3288  ;;  %5519 = vmatmul.msk.bf16.vlgmr.msra.gmra.mxu1 %vm2839_vm9, %v4040_v8  ;;  %v6226_v3 = vpop.eup %6225  ;;  %v4010_v33 = vunpack.c.l.b16 %v3568_v60  ;;  %v10242_v60 = vld [vmem:[#allocation40_spill] sm:$0xff] }
 0x756   :  { %6231 = vrcp.f32 %v3289_v17  ;;  %4281 = vmatpush.bf16.msra.mxu1 %v4269_v32  ;;  %v8967_v25 = vpop.eup %6227  ;;  %v3500_v48 = vmul.f32 %v6226_v3, %v10242_v60  ;;  %v3898_v32 = vunpack.c.l.b16 %v3560_v12  ;;  %v5865_v3 = vunpack.i.h.bf16 %v10243_v13 }
 0x757   :  { %v3561_v59 = vpack.c.bf16 %v3497_v5, %v3497_v5  ;;  %v4012_v47 = vpack.c.b16 %v4011_v43, %v4010_v33  ;;  %v8973_v16 = vpop.eup %6229  ;;  %v3401_v8 = vsel %vm2839_vm9, %v8967_v25, 0.0  ;;  %v3644_v43 = vpack.c.bf16 %v5889_v11, %v5889_v11 }
 0x758   :  { %3030 = vmax.xlane.f32.xlu0 %v3029_v55  ;;  %v4101_v5 = vpack.c.b16 %v4100_v1, %v4099_v57  ;;  %v3404_v4 = vsel %vm2839_vm9, %v8973_v16, 0.0  ;;  %v5864_v12 = vunpack.i.l.bf16 %v10243_v13  ;;  %v3564_v17 = vpack.c.bf16 %v3500_v48, %v3500_v48 }
 0x759   :  { %v3899_v44 = vunpack.c.l.b16 %v3561_v59  ;;  %5518 = vmatmul.msk.bf16.vlgmr.msrb.gmra.mxu0 %vm2839_vm9, %v4012_v47  ;;  %v3310_v39 = vpop.xlane.xlu0 %3309  ;;  %v10244_v59 = vld [vmem:[#allocation24_spill] sm:$0xff]  ;;  %v4184_v1 = vunpack.c.l.b16 %v3645_v7  ;;  %v4183_v57 = vunpack.c.l.b16 %v3644_v43  ;;  %v3657_v47 = vpack.c.bf16 %v5865_v3, %v5865_v3 }
 0x75a   :  { %3402 = vadd.xlane.f32.xlu2 %v3401_v8  ;;  %4253 = vmatpush.bf16.msrb.mxu0 %v4241_v49  ;;  %v5900_v55 = vunpack.i.h.bf16 %v10244_v59  ;;  %v5899_v11 = vunpack.i.l.bf16 %v10244_v59  ;;  %6233 = vrcp.f32 %v3310_v39  ;;  %v3656_v49 = vpack.c.bf16 %v5864_v12, %v5864_v12  ;;  %v10245_v43 = vld [vmem:[#allocation28_spill] sm:$0xff] }
 0x75b   :  { %v3900_v45 = vpack.c.b16 %v3899_v44, %v3898_v32  ;;  %v3954_v60 = vunpack.c.l.b16 %v3564_v17  ;;  %v5930_v13 = vunpack.i.h.bf16 %v10245_v43  ;;  %v5929_v3 = vunpack.i.l.bf16 %v10245_v43 }
 0x75c   :  { %v6232_v51 = vpop.eup %6231  ;;  %v3647_v44 = vpack.c.bf16 %v5900_v55, %v5900_v55  ;;  %v3646_v8 = vpack.c.bf16 %v5899_v11, %v5899_v11  ;;  %v10247_v11 = vld [vmem:[#allocation35_spill] sm:$0xff] }
 0x75d   :  { %v3501_v33 = vmul.f32 %v6232_v51, %v8713_v46  ;;  %3405 = vadd.xlane.f32.xlu1 %v3404_v4  ;;  %5514 = vmatmul.msk.bf16.vlgmr.msrb.gmra.mxu3 %vm2839_vm9, %v3900_v45  ;;  %v3331_v63 = vpop.xlane.xlu1 %3330  ;;  %v4185_v45 = vpack.c.b16 %v4184_v1, %v4183_v57  ;;  %v4352_v51 = vunpack.c.l.b16 %v3657_v47 }
 0x75e   :  { %4113 = vmatpush.bf16.msrb.mxu3 %v4101_v5  ;;  %v4351_v5 = vunpack.c.l.b16 %v3656_v49  ;;  %v4212_v7 = vunpack.c.l.b16 %v3647_v44  ;;  %v4211_v39 = vunpack.c.l.b16 %v3646_v8  ;;  %v3653_v49 = vpack.c.bf16 %v5930_v13, %v5930_v13 }
 0x75f   :  { %v3565_v2 = vpack.c.bf16 %v3501_v33, %v3501_v33 }
 0x760   :  { %v6234_v4 = vpop.eup %6233  ;;  %v4353_v33 = vpack.c.b16 %v4352_v51, %v4351_v5  ;;  %v4213_v47 = vpack.c.b16 %v4212_v7, %v4211_v39  ;;  %v4296_v51 = vunpack.c.l.b16 %v3653_v49  ;;  %v10252_v39 = vld [vmem:[#allocation43_spill] sm:$0xff] }
 0x761   :  { %v3955_v32 = vunpack.c.l.b16 %v3565_v2  ;;  %v3313_v48 = vpop.xlane.xlu0 %3312  ;;  %v3508_v59 = vmul.f32 %v6234_v4, %v8721_v54  ;;  %v10246_v2 = vld [vmem:[#allocation49_spill] sm:$0xff]  ;;  %v5938_v54 = vpop.permute.xlu2 %5937 }
 0x762   :  { %6235 = vrcp.f32 %v3313_v48  ;;  %v5940_v4 = vunpack.i.h.bf16 %v5938_v54  ;;  %v5939_v7 = vunpack.i.l.bf16 %v5938_v54 }
 0x763   :  { %v3956_v46 = vpack.c.b16 %v3955_v32, %v3954_v60  ;;  %6237 = vrcp.f32 %v8867_v53  ;;  %v10248_v53 = vpack.c.b16 %v10246_v2, %v10247_v11  ;;  %v10249_v32 = vld [vmem:[#allocation5_spill] sm:$0xff]  ;;  %v3572_v48 = vpack.c.bf16 %v3508_v59, %v3508_v59 }
 0x764   :  { %6239 = vrcp.f32 %v8918_v37  ;;  %v3652_v37 = vpack.c.bf16 %v5929_v3, %v5929_v3  ;;  %v3654_v2 = vpack.c.bf16 %v5939_v7, %v5939_v7  ;;  %v10254_v11 = vld [vmem:[#allocation13_spill] sm:$0xff] }
 0x765   :  { %5516 = vmatmul.msk.bf16.vlgmr.msrb.gmra.mxu2 %vm2839_vm9, %v3956_v46  ;;  %v8992_v12 = vpop.xlane.xlu1 %3387  ;;  %6241 = vrcp.f32 %v3331_v63  ;;  %v10251_v46 = vld [vmem:[#allocation44_spill] sm:$0xff]  ;;  %v4066_v13 = vunpack.c.l.b16 %v3572_v48 }
 0x766   :  { %4197 = vmatpush.bf16.msrb.mxu2 %v4185_v45  ;;  %v4295_v5 = vunpack.c.l.b16 %v3652_v37 }
 0x768   :  { %v6236_v17 = vpop.eup %6235 }
 0x769   :  { %v3509_v55 = vmul.f32 %v6236_v17, %v8742_v10  ;;  %5522 = vmatmul.msk.bf16.vlgmr.msra.gmra.mxu0 %vm2839_vm9, %v10248_v53  ;;  %v9000_v1 = vpop.xlane.xlu0 %3369  ;;  %v6238_v57 = vpop.eup %6237  ;;  %v10250_v10 = vpack.c.b16 %v8892_v18, %v8888_v41  ;;  %v10253_v41 = vld [vmem:[#allocation15_spill] sm:$0xff]  ;;  %v4297_v18 = vpack.c.b16 %v4296_v51, %v4295_v5  ;;  %v5880_v53 = vunpack.i.h.bf16 %v10254_v11 }
 0x76a   :  { %4365 = vmatpush.bf16.msra.mxu0 %v4353_v33  ;;  %v6240_v44 = vpop.eup %6239  ;;  %v3510_v8 = vmul.f32 %v6238_v57, %v10251_v46  ;;  %v5879_v57 = vunpack.i.l.bf16 %v10254_v11 }
 0x76b   :  { %v3573_v60 = vpack.c.bf16 %v3509_v55, %v3509_v55  ;;  %v3511_v43 = vmul.f32 %v6240_v44, %v10252_v39  ;;  %v6242_v17 = vpop.eup %6241  ;;  %v3655_v55 = vpack.c.bf16 %v5940_v4, %v5940_v4  ;;  %v3659_v54 = vpack.c.bf16 %v5880_v53, %v5880_v53 }
 0x76c   :  { %5957 = vrot.lane.b32.xlu0 %v10249_v32, %s6380_s7  ;;  %v3574_v33 = vpack.c.bf16 %v3510_v8, %v3510_v8  ;;  %v3515_v49 = vmul.f32 %v6242_v17, %v8737_v36  ;;  %v4323_v32 = vunpack.c.l.b16 %v3654_v2 }
 0x76d   :  { %5517 = vmatmul.msk.bf16.vlgmr.msra.gmra.mxu3 %vm2839_vm9, %v10250_v10  ;;  %v4067_v45 = vunpack.c.l.b16 %v3573_v60  ;;  %v3349_v3 = vpop.xlane.xlu1 %3348  ;;  %v4324_v60 = vunpack.c.l.b16 %v3655_v55  ;;  %v3658_v10 = vpack.c.bf16 %v5879_v57, %v5879_v57  ;;  %v4380_v7 = vunpack.c.l.b16 %v3659_v54 }
 0x76e   :  { %4225 = vmatpush.bf16.msra.mxu3 %v4213_v47  ;;  %v3575_v47 = vpack.c.bf16 %v3511_v43, %v3511_v43  ;;  %v4094_v37 = vunpack.c.l.b16 %v3574_v33  ;;  %v3579_v46 = vpack.c.bf16 %v3515_v49, %v3515_v49 }
 0x76f   :  { %v4068_v59 = vpack.c.b16 %v4067_v45, %v4066_v13  ;;  %v4325_v36 = vpack.c.b16 %v4324_v60, %v4323_v32  ;;  %v10256_v32 = vpack.c.b16 %v8783_v61, %v8785_v24  ;;  %v5945_v61 = vunpack.i.h.bf16 %v8928_v38 }
 0x770   :  { %v4095_v44 = vunpack.c.l.b16 %v3575_v47  ;;  %v4151_v39 = vunpack.c.l.b16 %v3579_v46  ;;  %v5944_v24 = vunpack.i.l.bf16 %v8928_v38 }
 0x771   :  { %v3328_v63 = vpop.xlane.xlu0 %3327 }
 0x772   :  { %5962 = vrot.lane.b32.xlu2 %v10253_v41, %s6380_s7  ;;  %6243 = vrcp.f32 %v3328_v63  ;;  %v4096_v5 = vpack.c.b16 %v4095_v44, %v4094_v37 }
 0x773   :  { %6245 = vrcp.f32 %v3349_v3 }
 0x774   :  { %6247 = vrcp.f32 %v8959_v40 }
 0x775   :  { %5520 = vmatmul.msk.bf16.vlgmr.msra.gmra.mxu2 %vm2839_vm9, %v4068_v59  ;;  %v3028_v40 = vpop.xlane.xlu1 %3027 }
 0x776   :  { %4309 = vmatpush.bf16.msra.mxu2 %v4297_v18  ;;  %5967 = vrot.lane.b32.xlu1 %v10215_v28, %s6380_s7  ;;  %v4379_v28 = vunpack.c.l.b16 %v3658_v10  ;;  %v3094_v18 = vsub.f32 %v8803_v34, %v3028_v40 }
 0x778   :  { %v6244_v48 = vpop.eup %6243  ;;  %v4381_v17 = vpack.c.b16 %v4380_v7, %v4379_v28  ;;  %v3220_v47 = vmul.f32 1.442695, %v3094_v18 }
 0x779   :  { %v3514_v8 = vmul.f32 %v6244_v48, %v8789_v20  ;;  %v3346_v45 = vpop.xlane.xlu0 %3345  ;;  %v6246_v51 = vpop.eup %6245 }
 0x77a   :  { %6249 = vrcp.f32 %v3346_v45  ;;  %v3521_v43 = vmul.f32 %v6246_v51, %v8775_v58  ;;  %v6248_v3 = vpop.eup %6247  ;;  %v10255_v58 = vld [vmem:[#allocation33_spill] sm:$0xff] }
 0x77b   :  { %v3578_v4 = vpack.c.bf16 %v3514_v8, %v3514_v8  ;;  %6251 = vrcp.f32 %v8965_v56  ;;  %v3522_v56 = vmul.f32 %v6248_v3, %v8702_v0 }
 0x77c   :  { %v3585_v33 = vpack.c.bf16 %v3521_v43, %v3521_v43  ;;  %6253 = vpow2.f32 %v3220_v47 }
 0x77d   :  { %5521 = vmatmul.msk.bf16.vlgmr.msrb.gmra.mxu3 %vm2839_vm9, %v4096_v5  ;;  %v4150_v13 = vunpack.c.l.b16 %v3578_v4  ;;  %v3586_v57 = vpack.c.bf16 %v3522_v56, %v3522_v56  ;;  %v3394_v37 = vpop.xlane.xlu1 %3393  ;;  %6255 = vrcp.f32 %v8911_v22  ;;  %v10257_v22 = vld [vmem:[#allocation47_spill] sm:$0xff]  ;;  %v3661_v5 = vpack.c.bf16 %v5945_v61, %v5945_v61 }
 0x77e   :  { %4337 = vmatpush.bf16.msrb.mxu3 %v4325_v36  ;;  %v4235_v11 = vunpack.c.l.b16 %v3585_v33  ;;  %v3660_v36 = vpack.c.bf16 %v5944_v24, %v5944_v24 }
 0x77f   :  { %v4152_v20 = vpack.c.b16 %v4151_v39, %v4150_v13  ;;  %v4408_v3 = vunpack.c.l.b16 %v3661_v5 }
 0x780   :  { %v6250_v63 = vpop.eup %6249 }
 0x781   :  { %v3520_v59 = vmul.f32 %v6250_v63, %v8818_v42  ;;  %5523 = vmatmul.msk.bf16.vlgmr.msrb.gmra.mxu1 %vm2839_vm9, %v4152_v20  ;;  %v6252_v41 = vpop.eup %6251  ;;  %v4262_v42 = vunpack.c.l.b16 %v3586_v57  ;;  %v4407_v20 = vunpack.c.l.b16 %v3660_v36  ;;  %v9063_v36 = vpop.f32.mrf.mxu1 }
 0x782   :  { %4393 = vmatpush.bf16.msrb.mxu1 %v4381_v17  ;;  %v3523_v2 = vmul.f32 %v6252_v41, %v10255_v58  ;;  %v9034_v48 = vpop.eup %6253 }
 0x783   :  { %v3584_v55 = vpack.c.bf16 %v3520_v59, %v3520_v59  ;;  %v3410_v10 = vsel %vm2839_vm9, %v9034_v48, 0.0  ;;  %v6256_v46 = vpop.eup %6255  ;;  %v10258_v59 = vpack.c.b16 %v8856_v29, %v8858_v9  ;;  %v9053_v9 = vpop.f32.mrf.mxu3 }
 0x784   :  { %v3587_v60 = vpack.c.bf16 %v3523_v2, %v3523_v2  ;;  %v3517_v45 = vmul.f32 %v6256_v46, %v10257_v22 }
 0x785   :  { %v4234_v53 = vunpack.c.l.b16 %v3584_v55  ;;  %v3397_v54 = vpop.xlane.xlu1 %3396  ;;  %v4409_v55 = vpack.c.b16 %v4408_v3, %v4407_v20 }
 0x786   :  { %v4263_v0 = vunpack.c.l.b16 %v3587_v60  ;;  %v3581_v7 = vpack.c.bf16 %v3517_v45, %v3517_v45  ;;  %v9057_v45 = vpop.f32.mrf.mxu2 }
 0x787   :  { %v4236_v49 = vpack.c.b16 %v4235_v11, %v4234_v53 }
 0x788   :  { %v4264_v34 = vpack.c.b16 %v4263_v0, %v4262_v42 }
 0x789   :  { %5526 = vmatmul.msk.bf16.vlgmr.msrb.gmra.mxu0 %vm2839_vm9, %v4236_v49 }
 0x78d   :  { %5525 = vmatmul.msk.bf16.vlgmr.msra.gmra.mxu3 %vm2839_vm9, %v10256_v32  ;;  %v3367_v8 = vpop.xlane.xlu0 %3366  ;;  %v9043_v4 = vpop.xlane.xlu1 %3381 }
 0x791   :  { %5527 = vmatmul.msk.bf16.vlgmr.msra.gmra.mxu1 %vm2839_vm9, %v4264_v34 }
 0x795   :  { %v3334_v44 = vpop.xlane.xlu2 %3333 }
 0x796   :  { %3411 = vadd.xlane.f32.xlu0 %v3410_v10  ;;  %6257 = vrcp.f32 %v3334_v44 }
 0x797   :  { %6259 = vrcp.f32 %v9000_v1  ;;  %v4179_v1 = vunpack.c.l.b16 %v3581_v7 }
 0x79c   :  { %v6258_v51 = vpop.eup %6257 }
 0x79d   :  { %v3516_v28 = vmul.f32 %v6258_v51, %v8874_v27  ;;  %v3373_v39 = vpop.xlane.xlu2 %3372  ;;  %v6260_v43 = vpop.eup %6259 }
 0x79e   :  { %6261 = vrcp.f32 %v3373_v39  ;;  %v3528_v17 = vmul.f32 %v6260_v43, %v8760_v23 }
 0x79f   :  { %v3580_v13 = vpack.c.bf16 %v3516_v28, %v3516_v28  ;;  %6263 = vrcp.f32 %v3397_v54 }
 0x7a0   :  { %v5948_v40 = vpop.permute.xlu0 %5947  ;;  %v3592_v53 = vpack.c.bf16 %v3528_v17, %v3528_v17  ;;  %6265 = vrcp.f32 %v3394_v37 }
 0x7a1   :  { %v5950_v38 = vunpack.i.h.bf16 %v5948_v40  ;;  %v5949_v63 = vunpack.i.l.bf16 %v5948_v40  ;;  %v4178_v33 = vunpack.c.l.b16 %v3580_v13  ;;  %5531 = vmatmul.msk.bf16.vlgmr.msrb.gmra.mxu1 %vm2839_vm9, %v10258_v59  ;;  %6267 = vrcp.f32 %v3367_v8  ;;  %v9059_v8 = vpop.f32.mrf.mxu3  ;;  %v9074_v59 = vpop.f32.mrf.mxu1 }
 0x7a2   :  { %v4346_v0 = vunpack.c.l.b16 %v3592_v53 }
 0x7a3   :  { %v3663_v41 = vpack.c.bf16 %v5950_v38, %v5950_v38  ;;  %v3662_v27 = vpack.c.bf16 %v5949_v63, %v5949_v63  ;;  %v4180_v56 = vpack.c.b16 %v4179_v1, %v4178_v33  ;;  %v9072_v1 = vpop.f32.mrf.mxu2 }
 0x7a4   :  { %v6262_v18 = vpop.eup %6261 }
 0x7a5   :  { %v4436_v58 = vunpack.c.l.b16 %v3663_v41  ;;  %v4435_v2 = vunpack.c.l.b16 %v3662_v27  ;;  %v5953_v11 = vpop.permute.xlu1 %5952  ;;  %v3529_v57 = vmul.f32 %v6262_v18, %v8885_v50  ;;  %v3391_v23 = vpop.xlane.xlu2 %3390  ;;  %5524 = vmatmul.msk.bf16.vlgmr.msrb.gmra.mxu2 %vm2839_vm9, %v4180_v56  ;;  %v10260_v41 = vld [vmem:[#allocation9_spill] sm:$0xff] }
 0x7a6   :  { %v5955_v47 = vunpack.i.h.bf16 %v5953_v11  ;;  %v5954_v49 = vunpack.i.l.bf16 %v5953_v11  ;;  %4421 = vmatpush.bf16.msrb.mxu2 %v4409_v55  ;;  %v6264_v61 = vpop.eup %6263 }
 0x7a7   :  { %v4437_v29 = vpack.c.b16 %v4436_v58, %v4435_v2  ;;  %v3593_v60 = vpack.c.bf16 %v3529_v57, %v3529_v57  ;;  %v6266_v24 = vpop.eup %6265  ;;  %v3537_v37 = vmul.f32 %v6264_v61, %v8835_v19  ;;  %v10259_v19 = vpack.c.b16 %v8913_v15, %v8916_v14 }
 0x7a8   :  { %v3665_v42 = vpack.c.bf16 %v5955_v47, %v5955_v47  ;;  %v3664_v32 = vpack.c.bf16 %v5954_v49, %v5954_v49  ;;  %v6268_v54 = vpop.eup %6267  ;;  %v3536_v51 = vmul.f32 %v6266_v24, %v8825_v31 }
 0x7a9   :  { %4449 = vmatpush.bf16.msra.mxu3 %v4437_v29  ;;  %v4347_v34 = vunpack.c.l.b16 %v3593_v60  ;;  %v3527_v5 = vmul.f32 %v6268_v54, %v8851_v30  ;;  %v3601_v7 = vpack.c.bf16 %v3537_v37, %v3537_v37  ;;  %v3807_v38 = vpop.f32.mrf.mxu3  ;;  %v9086_v49 = vpop.f32.mrf.mxu1 }
 0x7aa   :  { %v4464_v10 = vunpack.c.l.b16 %v3665_v42  ;;  %v4463_v50 = vunpack.c.l.b16 %v3664_v32  ;;  %v3600_v39 = vpack.c.bf16 %v3536_v51, %v3536_v51 }
 0x7ab   :  { %v4348_v44 = vpack.c.b16 %v4347_v34, %v4346_v0  ;;  %v3591_v43 = vpack.c.bf16 %v3527_v5, %v3527_v5  ;;  %v4459_v31 = vunpack.c.l.b16 %v3601_v7  ;;  %v9083_v2 = vpop.f32.mrf.mxu2 }
 0x7ac   :  { %v4465_v46 = vpack.c.b16 %v4464_v10, %v4463_v50  ;;  %v4458_v30 = vunpack.c.l.b16 %v3600_v39 }
 0x7ad   :  { %v3364_v22 = vpop.xlane.xlu2 %3363  ;;  %5530 = vmatmul.msk.bf16.vlgmr.msra.gmra.mxu0 %vm2839_vm9, %v4348_v44  ;;  %v4319_v20 = vunpack.c.l.b16 %v3591_v43 }
 0x7ae   :  { %6269 = vrcp.f32 %v3364_v22  ;;  %4477 = vmatpush.bf16.msrb.mxu0 %v4465_v46 }
 0x7af   :  { %6271 = vrcp.f32 %v3391_v23 }
 0x7b0   :  { %6273 = vrcp.f32 %v8992_v12 }
 0x7b1   :  { %6275 = vrcp.f32 %v9043_v4  ;;  %v9081_v18 = vpop.f32.mrf.mxu3  ;;  %v9095_v61 = vpop.f32.mrf.mxu1 }
 0x7b4   :  { %v6270_v28 = vpop.eup %6269 }
 0x7b5   :  { %v3526_v13 = vmul.f32 %v6270_v28, %v8909_v35  ;;  %v3409_v40 = vpop.xlane.xlu2 %3408  ;;  %5528 = vmatmul.msk.bf16.vlgmr.msra.gmra.mxu2 %vm2839_vm9, %v10259_v19  ;;  %v4460_v35 = vpack.c.b16 %v4459_v31, %v4458_v30  ;;  %v6272_v33 = vpop.eup %6271 }
 0x7b6   :  { %v6274_v15 = vpop.eup %6273  ;;  %v3535_v4 = vmul.f32 %v6272_v33, %v8900_v6 }
 0x7b7   :  { %v3590_v3 = vpack.c.bf16 %v3526_v13, %v3526_v13  ;;  %v6276_v12 = vpop.eup %6275  ;;  %v3534_v27 = vmul.f32 %v6274_v15, %v10260_v41 }
 0x7b8   :  { %v3532_v56 = vmul.f32 %v6276_v12, %v8847_v62  ;;  %v3599_v55 = vpack.c.bf16 %v3535_v4, %v3535_v4  ;;  %v10261_v4 = vld [vmem:[#allocation17_spill] sm:$0xff] }
 0x7b9   :  { %v4318_v63 = vunpack.c.l.b16 %v3590_v3  ;;  %v3598_v11 = vpack.c.bf16 %v3534_v27, %v3534_v27  ;;  %v9089_v10 = vpop.f32.mrf.mxu3 }
 0x7ba   :  { %v3596_v53 = vpack.c.bf16 %v3532_v56, %v3532_v56  ;;  %v4431_v23 = vunpack.c.l.b16 %v3599_v55 }
 0x7bb   :  { %v4320_v17 = vpack.c.b16 %v4319_v20, %v4318_v63  ;;  %v4430_v6 = vunpack.c.l.b16 %v3598_v11  ;;  %v9109_v63 = vpop.f32.mrf.mxu1 }
 0x7bc   :  { %v4402_v60 = vunpack.c.l.b16 %v3596_v53 }
 0x7bd   :  { %v3385_v14 = vpop.xlane.xlu2 %3384  ;;  %5529 = vmatmul.msk.bf16.vlgmr.msrb.gmra.mxu3 %vm2839_vm9, %v4320_v17  ;;  %5534 = vmatmul.msk.bf16.vlgmr.msrb.gmra.mxu0 %vm2839_vm9, %v4460_v35  ;;  %v4432_v62 = vpack.c.b16 %v4431_v23, %v4430_v6 }
 0x7be   :  { %6277 = vrcp.f32 %v3385_v14 }
 0x7bf   :  { %6279 = vrcp.f32 %v3409_v40 }
 0x7c1   :  { %v9104_v43 = vpop.f32.mrf.mxu3 }
 0x7c3   :  { %v9116_v6 = vpop.f32.mrf.mxu1 }
 0x7c4   :  { %v6278_v58 = vpop.eup %6277 }
 0x7c5   :  { %v3533_v57 = vmul.f32 %v6278_v58, %v8933_v26  ;;  %v3400_v47 = vpop.xlane.xlu2 %3399  ;;  %v9093_v26 = vpop.f32.mrf.mxu2 }
 0x7c6   :  { %v6280_v24 = vpop.eup %6279 }
 0x7c7   :  { %v3597_v29 = vpack.c.bf16 %v3533_v57, %v3533_v57  ;;  %v3541_v22 = vmul.f32 %v6280_v24, %v8924_v52 }
 0x7c9   :  { %v4403_v42 = vunpack.c.l.b16 %v3597_v29  ;;  %v3605_v3 = vpack.c.bf16 %v3541_v22, %v3541_v22 }
 0x7cb   :  { %v3031_v32 = vpop.xlane.xlu0 %3030  ;;  %v4404_v0 = vpack.c.b16 %v4403_v42, %v4402_v60  ;;  %v4515_v12 = vunpack.c.l.b16 %v3605_v3 }
 0x7cc   :  { %v3095_v34 = vsub.f32 %v8961_v21, %v3031_v32 }
 0x7cd   :  { %v3403_v44 = vpop.xlane.xlu2 %3402  ;;  %5532 = vmatmul.msk.bf16.vlgmr.msrb.gmra.mxu2 %vm2839_vm9, %v4404_v0  ;;  %5533 = vmatmul.msk.bf16.vlgmr.msra.gmra.mxu3 %vm2839_vm9, %v4432_v62  ;;  %v9100_v51 = vpop.f32.mrf.mxu2 }
 0x7ce   :  { %v3222_v50 = vmul.f32 1.442695, %v3095_v34 }
 0x7d0   :  { %6281 = vpow2.f32 %v3222_v50  ;;  %v3406_v46 = vpop.xlane.xlu1 %3405 }
 0x7d1   :  { %6283 = vrcp.f32 %v3406_v46 }
 0x7d2   :  { %6285 = vrcp.f32 %v3403_v44 }
 0x7d3   :  { %6287 = vrcp.f32 %v3400_v47 }
 0x7d5   :  { %v5963_v54 = vpop.permute.xlu2 %5962  ;;  %v3865_v11 = vpop.f32.mrf.mxu2 }
 0x7d6   :  { %v9097_v21 = vpop.eup %6281  ;;  %v5965_v5 = vunpack.i.h.bf16 %v5963_v54  ;;  %v5964_v7 = vunpack.i.l.bf16 %v5963_v54  ;;  %v4031_v28 = vpop.f32.mrf.mxu0 }
 0x7d7   :  { %v6284_v37 = vpop.eup %6283  ;;  %v3413_v39 = vsel %vm2839_vm9, %v9097_v21, 0.0  ;;  %v9107_v40 = vadd.f32 %v4031_v28, %v3807_v38  ;;  %v4059_v54 = vpop.f32.mrf.mxu1 }
 0x7d8   :  { %v3540_v13 = vmul.f32 %v6284_v37, %v8973_v16  ;;  %3414 = vadd.xlane.f32.xlu2 %v3413_v39  ;;  %v6286_v19 = vpop.eup %6285  ;;  %v3669_v31 = vpack.c.bf16 %v5965_v5, %v5965_v5  ;;  %v3668_v52 = vpack.c.bf16 %v5964_v7, %v5964_v7 }
 0x7d9   :  { %v6288_v20 = vpop.eup %6287  ;;  %v3539_v33 = vmul.f32 %v6286_v19, %v8967_v25 }
 0x7da   :  { %v3604_v30 = vpack.c.bf16 %v3540_v13, %v3540_v13  ;;  %v4520_v35 = vunpack.c.l.b16 %v3669_v31  ;;  %v4519_v17 = vunpack.c.l.b16 %v3668_v52  ;;  %v3538_v16 = vmul.f32 %v6288_v20, %v10261_v4 }
 0x7db   :  { %v3603_v56 = vpack.c.bf16 %v3539_v33, %v3539_v33  ;;  %v9132_v33 = vld [vmem:[%s10014_s4] sm:$0xf] }
 0x7dc   :  { %v4514_v15 = vunpack.c.l.b16 %v3604_v30  ;;  %v4521_v14 = vpack.c.b16 %v4520_v35, %v4519_v17  ;;  %v3602_v47 = vpack.c.bf16 %v3538_v16, %v3538_v16 }
 0x7dd   :  { %v4487_v29 = vunpack.c.l.b16 %v3603_v56 }
 0x7de   :  { %v5958_v38 = vpop.permute.xlu0 %5957  ;;  %4533 = vmatpush.bf16.msra.mxu2 %v4521_v14  ;;  %v4516_v55 = vpack.c.b16 %v4515_v12, %v4514_v15  ;;  %v4486_v42 = vunpack.c.l.b16 %v3602_v47  ;;  %v4033_v46 = vpop.f32.mrf.mxu0  ;;  %v9135_v15 = vperm.slane %v9132_v33, 1 }
 0x7df   :  { %v5960_v41 = vunpack.i.h.bf16 %v5958_v38  ;;  %v5959_v27 = vunpack.i.l.bf16 %v5958_v38  ;;  %v9125_v19 = vpop.f32.mrf.mxu1 }
 0x7e0   :  { %v9113_v58 = vpop.f32.mrf.mxu3  ;;  %v4488_v32 = vpack.c.b16 %v4487_v29, %v4486_v42  ;;  %4956 = vrot.lane.b32.xlu0 %v9135_v15, %s6374_s9 }
 0x7e1   :  { %v3667_v53 = vpack.c.bf16 %v5960_v41, %v5960_v41  ;;  %v3666_v57 = vpack.c.bf16 %v5959_v27, %v5959_v27  ;;  %5536 = vmatmul.msk.bf16.vlgmr.msra.gmra.mxu2 %vm2839_vm9, %v4516_v55  ;;  %v4578_v41 = vadd.f32 %v4059_v54, %v9086_v49  ;;  %v4577_v27 = vadd.f32 %v4033_v46, %v9081_v18  ;;  %v5586_v18 = vld [vmem:[%s10015_s2 + $0x4] sm:$0xf]  ;;  %v5538_v49 = vld [vmem:[%s10015_s2 + $0xc] sm:$0xf0] }
 0x7e2   :  { %v6358_v54 = vld [vmem:[%s10013_s0] sm:$0xff] }
 0x7e3   :  { %v4492_v25 = vunpack.c.l.b16 %v3667_v53  ;;  %v4491_v23 = vunpack.c.l.b16 %v3666_v57  ;;  %v5589_v57 = vld [vmem:[%s10015_s2 + $0x1c] sm:$0xf] }
 0x7e5   :  { %v4493_v60 = vpack.c.b16 %v4492_v25, %v4491_v23 }
 0x7e6   :  { %v4143_v13 = vpop.f32.mrf.mxu0 }
 0x7e7   :  { %4505 = vmatpush.bf16.msra.mxu1 %v4493_v60  ;;  %v4568_v60 = vadd.f32 %v9113_v58, %v9057_v45  ;;  %v6359_v45 = vld [vmem:[%s10013_s0 + $0x8] sm:$0xff] }
 0x7e8   :  { %v5968_v62 = vpop.permute.xlu1 %5967  ;;  %v3921_v0 = vpop.f32.mrf.mxu3 }
 0x7e9   :  { %v5970_v34 = vunpack.i.h.bf16 %v5968_v62  ;;  %v5969_v50 = vunpack.i.l.bf16 %v5968_v62  ;;  %v9118_v44 = vpop.f32.mrf.mxu2  ;;  %v4584_v42 = vadd.f32 %v4568_v60, %v4143_v13  ;;  %v4569_v62 = vadd.f32 %v3921_v0, %v9072_v1 }
 0x7ea   :  { %5535 = vmatmul.msk.bf16.vlgmr.msra.gmra.mxu1 %vm2839_vm9, %v4488_v32 }
 0x7eb   :  { %v3671_v24 = vpack.c.bf16 %v5970_v34, %v5970_v34  ;;  %v3670_v22 = vpack.c.bf16 %v5969_v50, %v5969_v50 }
 0x7ed   :  { %v4548_v37 = vunpack.c.l.b16 %v3671_v24  ;;  %v4547_v5 = vunpack.c.l.b16 %v3670_v22 }
 0x7ee   :  { %v4145_v3 = vpop.f32.mrf.mxu0 }
 0x7ef   :  { %v4549_v7 = vpack.c.b16 %v4548_v37, %v4547_v5  ;;  %v4585_v24 = vadd.f32 %v4569_v62, %v4145_v3 }
 0x7f0   :  { %v9121_v28 = vpop.f32.mrf.mxu3 }
 0x7f1   :  { %v9123_v39 = vpop.f32.mrf.mxu2  ;;  %4561 = vmatpush.bf16.msrb.mxu3 %v4549_v7 }
 0x7f8   :  { %v9127_v31 = vpop.f32.mrf.mxu3 }
 0x7f9   :  { %v4087_v52 = vpop.f32.mrf.mxu2 }
 0x7fa   :  { %v4580_v7 = vadd.f32 %v4087_v52, %v9100_v51  ;;  %v4570_v51 = vadd.f32 %v9109_v63, %v9053_v9  ;;  %v6361_v63 = vld [vmem:[%s10013_s0 + $0x10] sm:$0xff] }
 0x7fe   :  { %v4171_v30 = vpop.f32.mrf.mxu1 }
 0x800   :  { %v4115_v20 = vpop.f32.mrf.mxu3 }
 0x801   :  { %v4089_v35 = vpop.f32.mrf.mxu2 }
 0x802   :  { %v4581_v17 = vadd.f32 %v4089_v35, %v3865_v11  ;;  %v4571_v35 = vadd.f32 %v9116_v6, %v9059_v8  ;;  %v6360_v8 = vld [vmem:[%s10013_s0 + $0x18] sm:$0xff] }
 0x806   :  { %v4173_v14 = vpop.f32.mrf.mxu1  ;;  %v4255_v12 = vpop.f32.mrf.mxu0 }
 0x807   :  { %v9140_v16 = vadd.f32 %v9107_v40, %v4255_v12  ;;  %v5542_v40 = vld [vmem:[%s10015_s2 + $0x24] sm:$0xf0]  ;;  %v4587_v52 = vadd.f32 %v4571_v35, %v4173_v14 }
 0x808   :  { %v4117_v4 = vpop.f32.mrf.mxu3  ;;  %v5545_v47 = vor.u32 %v5589_v57, %v5542_v40 }
 0x809   :  { %v4583_v38 = vadd.f32 %v4117_v4, %v9104_v43  ;;  %v5541_v43 = vor.u32 %v5586_v18, %v5538_v49  ;;  %v3412_v9 = vpop.xlane.xlu0 %3411 }
 0x80a   :  { %4696 = vmatpush.bf16.msra.mxu0 %v5545_v47  ;;  %6289 = vrcp.f32 %v3412_v9 }
 0x80e   :  { %v4257_v56 = vpop.f32.mrf.mxu0  ;;  %v4283_v55 = vpop.f32.mrf.mxu1  ;;  %4697 = vmatpush.bf16.msra.mxu0 %v5541_v43 }
 0x80f   :  { %v9145_v11 = vadd.f32 %v4577_v27, %v4257_v56  ;;  %v9147_v53 = vadd.f32 %v4578_v41, %v4283_v55  ;;  %v4586_v27 = vadd.f32 %v4570_v51, %v4171_v30  ;;  %v4582_v55 = vadd.f32 %v4115_v20, %v9089_v10 }
 0x810   :  { %v9165_v32 = vpop.f32.mrf.mxu3  ;;  %v6290_v60 = vpop.eup %6289 }
 0x816   :  { %v9161_v25 = vpop.f32.mrf.mxu1 }
 0x818   :  { %v4229_v13 = vpop.f32.mrf.mxu3 }
 0x81e   :  { %v4395_v50 = vpop.f32.mrf.mxu1 }
 0x81f   :  { %v4602_v57 = vadd.f32 %v4586_v27, %v4395_v50  ;;  %v4572_v50 = vadd.f32 %v9118_v44, %v9063_v36 }
 0x821   :  { %v4618_v30 = vadd.f32 %v6361_v63, %v4602_v57 }
 0x823   :  { %v9205_v20 = vadd.f32 %v9135_v15, %v4618_v30  ;;  %v6366_v30 = vld [vmem:[%s10013_s0 + $0x48] sm:$0xff] }
 0x826   :  { %v4397_v41 = vpop.f32.mrf.mxu1 }
 0x827   :  { %v4603_v56 = vadd.f32 %v4587_v52, %v4397_v41  ;;  %v4574_v52 = vadd.f32 %v9121_v28, %v9083_v2 }
 0x828   :  { %v4199_v23 = vpop.f32.mrf.mxu2 }
 0x829   :  { %v4619_v6 = vadd.f32 %v6360_v8, %v4603_v56  ;;  %v4590_v56 = vadd.f32 %v4574_v52, %v9165_v32  ;;  %v9329_v52 = vperm.slane %v9132_v33, 3 }
 0x82a   :  { %v4367_v29 = vpop.f32.mrf.mxu0 }
 0x82b   :  { %v4600_v34 = vadd.f32 %v4584_v42, %v4367_v29  ;;  %v9202_v10 = vadd.f32 %v9135_v15, %v4619_v6  ;;  %v3542_v42 = vmul.f32 %v6290_v60, %v9034_v48 }
 0x82d   :  { %v4616_v37 = vadd.f32 %v6358_v54, %v4600_v34  ;;  %v4588_v54 = vadd.f32 %v4572_v50, %v4199_v23 }
 0x82f   :  { %v9176_v1 = vadd.f32 %v9135_v15, %v4616_v37 }
 0x830   :  { %v4201_v46 = vpop.f32.mrf.mxu2 }
 0x832   :  { %v4369_v22 = vpop.f32.mrf.mxu0 }
 0x833   :  { %v4601_v5 = vadd.f32 %v4585_v24, %v4369_v22  ;;  %v3606_v24 = vpack.c.bf16 %v3542_v42, %v3542_v42 }
 0x835   :  { %v4617_v58 = vadd.f32 %v6359_v45, %v4601_v5  ;;  %v4542_v45 = vunpack.c.l.b16 %v3606_v24 }
 0x837   :  { %v9179_v0 = vadd.f32 %v9135_v15, %v4617_v58 }
 0x838   :  { %v4311_v3 = vpop.f32.mrf.mxu2 }
 0x839   :  { %v4649_v12 = vpack.c.bf16 %v9179_v0, %v9176_v1  ;;  %v9185_v4 = vadd.f32 %v4580_v7, %v4311_v3 }
 0x83b   :  { %5546 = vmatmul.msk.bf16.vlgmr.msra.gmra.mxu0 %vm62_vm0, %v4649_v12  ;;  %v6362_v12 = vld [vmem:[%s10013_s0 + $0x20] sm:$0xff] }
 0x840   :  { %v4313_v40 = vpop.f32.mrf.mxu2  ;;  %v4339_v47 = vpop.f32.mrf.mxu3 }
 0x841   :  { %v9194_v18 = vadd.f32 %v4581_v17, %v4313_v40  ;;  %v9196_v49 = vadd.f32 %v4582_v55, %v4339_v47  ;;  %v4650_v17 = vpack.c.bf16 %v9202_v10, %v9205_v20  ;;  %v4479_v40 = vpop.f32.mrf.mxu0  ;;  %v6364_v47 = vld [vmem:[%s10013_s0 + $0x38] sm:$0xff] }
 0x842   :  { %v4608_v9 = vadd.f32 %v9140_v16, %v4479_v40  ;;  %v4579_v16 = vadd.f32 %v9125_v19, %v9095_v61  ;;  %v6369_v61 = vld [vmem:[%s10013_s0 + $0x50] sm:$0xff] }
 0x848   :  { %v4341_v14 = vpop.f32.mrf.mxu3 }
 0x849   :  { %v9209_v43 = vadd.f32 %v4583_v38, %v4341_v14  ;;  %v4573_v38 = vadd.f32 %v9123_v39, %v9074_v59 }
 0x84b   :  { %v3415_v29 = vpop.xlane.xlu2 %3414  ;;  %5547 = vmatmul.msk.bf16.gmra.mxu0 %vm62_vm0, %v4650_v17  ;;  %v4589_v3 = vadd.f32 %v4573_v38, %v4201_v46  ;;  %v4575_v46 = vadd.f32 %v9127_v31, %v9093_v26  ;;  %v6365_v31 = vld [vmem:[%s10013_s0 + $0x30] sm:$0xff]  ;;  %v6367_v17 = vld [vmem:[%s10013_s0 + $0x40] sm:$0xff] }
 0x84c   :  { %6291 = vrcp.f32 %v3415_v29  ;;  %v4624_v29 = vadd.f32 %v6367_v17, %v4608_v9 }
 0x84d   :  { %v4591_v27 = vadd.f32 %v4575_v46, %v4229_v13  ;;  %v4481_v13 = vpop.f32.mrf.mxu0  ;;  %v5595_v46 = vld [vmem:[%s10017_s3 + $0x18] sm:$0xff] }
 0x84e   :  { %v4609_v6 = vadd.f32 %v9145_v11, %v4481_v13  ;;  %v9266_v42 = vadd.f32 %v9135_v15, %v4624_v29 }
 0x850   :  { %v4423_v62 = vpop.f32.mrf.mxu2  ;;  %v4451_v7 = vpop.f32.mrf.mxu3  ;;  %v4625_v14 = vadd.f32 %v6366_v30, %v4609_v6  ;;  %10266 = vst [vmem:[#allocation19_spill] sm:$0xff] %v9266_v42 }
 0x851   :  { %v4604_v5 = vadd.f32 %v4588_v54, %v4423_v62  ;;  %v4606_v57 = vadd.f32 %v4590_v56, %v4451_v7  ;;  %v6368_v54 = vld [vmem:[%s10013_s0 + $0x58] sm:$0xff]  ;;  %v6370_v7 = vld [vmem:[%s10013_s0 + $0x68] sm:$0xff]  ;;  %v5592_v56 = vld [vmem:[%s10017_s3] sm:$0xff] }
 0x852   :  { %v6292_v34 = vpop.eup %6291  ;;  %v9263_v60 = vadd.f32 %v9135_v15, %v4625_v14 }
 0x853   :  { %v3543_v22 = vmul.f32 %v6292_v34, %v9097_v21  ;;  %v4620_v36 = vadd.f32 %v6362_v12, %v4604_v5  ;;  %v6363_v21 = vld [vmem:[%s10013_s0 + $0x28] sm:$0xff]  ;;  %v4622_v8 = vadd.f32 %v6365_v31, %v4606_v57  ;;  %v4595_v34 = vadd.f32 %v4579_v16, %v9161_v25 }
 0x854   :  { %10265 = vst [vmem:[#allocation22_spill] sm:$0xff] %v9263_v60  ;;  %v4653_v11 = vpack.c.bf16 %v9263_v60, %v9266_v42 }
 0x855   :  { %v3607_v37 = vpack.c.bf16 %v3543_v22, %v3543_v22  ;;  %v9226_v39 = vadd.f32 %v9135_v15, %v4620_v36  ;;  %v9249_v28 = vadd.f32 %v9135_v15, %v4622_v8  ;;  %v5599_v36 = vld [vmem:[%s10017_s3 + $0x38] sm:$0xff] }
 0x856   :  { %4959 = vmatpush.bf16.msrb.mxu1 %v5599_v36 }
 0x857   :  { %v4543_v58 = vunpack.c.l.b16 %v3607_v37  ;;  %10264 = vst [vmem:[#allocation29_spill] sm:$0xff] %v9249_v28 }
 0x858   :  { %v4425_v48 = vpop.f32.mrf.mxu2  ;;  %v4453_v51 = vpop.f32.mrf.mxu3 }
 0x859   :  { %v4544_v35 = vpack.c.b16 %v4543_v58, %v4542_v45  ;;  %v4605_v44 = vadd.f32 %v4589_v3, %v4425_v48  ;;  %v4607_v55 = vadd.f32 %v4591_v27, %v4453_v51  ;;  %v5593_v51 = vld [vmem:[%s10017_s3 + $0x8] sm:$0xff] }
 0x85b   :  { %5537 = vmatmul.msk.bf16.vlgmr.msrb.gmra.mxu3 %vm2839_vm9, %v4544_v35  ;;  %v4621_v59 = vadd.f32 %v6363_v21, %v4605_v44  ;;  %v4623_v26 = vadd.f32 %v6364_v47, %v4607_v55  ;;  %v6371_v35 = vld [vmem:[%s10013_s0 + $0x60] sm:$0xff]  ;;  %v5598_v44 = vld [vmem:[%s10017_s3 + $0x30] sm:$0xff]  ;;  %v5597_v21 = vld [vmem:[%s10017_s3 + $0x28] sm:$0xff] }
 0x85c   :  { %4960 = vmatpush.bf16.msrb.mxu1 %v5598_v44 }
 0x85d   :  { %v9229_v23 = vadd.f32 %v9135_v15, %v4621_v59  ;;  %v9246_v2 = vadd.f32 %v9135_v15, %v4623_v26  ;;  %v5596_v59 = vld [vmem:[%s10017_s3 + $0x20] sm:$0xff] }
 0x85f   :  { %10262 = vst [vmem:[#allocation16_spill] sm:$0xff] %v9229_v23  ;;  %v4651_v41 = vpack.c.bf16 %v9229_v23, %v9226_v39  ;;  %v4652_v32 = vpack.c.bf16 %v9246_v2, %v9249_v28 }
 0x860   :  { %10263 = vst [vmem:[#allocation10_spill] sm:$0xff] %v9246_v2  ;;  %4961 = vmatpush.bf16.msrb.mxu1 %v5597_v21 }
 0x861   :  { %5548 = vmatmul.msk.bf16.gmra.mxu0 %vm62_vm0, %v4651_v41  ;;  %v5594_v41 = vld [vmem:[%s10017_s3 + $0x10] sm:$0xff] }
 0x864   :  { %v4535_v22 = vpop.f32.mrf.mxu2  ;;  %4962 = vmatpush.bf16.msrb.mxu1 %v5596_v59 }
 0x865   :  { %v4612_v58 = vadd.f32 %v9185_v4, %v4535_v22 }
 0x867   :  { %v4507_v63 = vpop.f32.mrf.mxu1  ;;  %v4628_v48 = vadd.f32 %v6371_v35, %v4612_v58 }
 0x868   :  { %v4610_v24 = vadd.f32 %v9147_v53, %v4507_v63  ;;  %4963 = vmatpush.bf16.msrb.mxu1 %v5595_v46 }
 0x86a   :  { %v4626_v19 = vadd.f32 %v6369_v61, %v4610_v24 }
 0x86c   :  { %v9285_v25 = vadd.f32 %v9135_v15, %v4626_v19  ;;  %v4537_v5 = vpop.f32.mrf.mxu2  ;;  %4964 = vmatpush.bf16.msrb.mxu1 %v5594_v41 }
 0x86d   :  { %v4613_v45 = vadd.f32 %v9194_v18, %v4537_v5  ;;  %v9305_v18 = vadd.f32 %v9135_v15, %v4628_v48 }
 0x86e   :  { %10268 = vst [vmem:[#allocation7_spill] sm:$0xff] %v9285_v25 }
 0x86f   :  { %v4509_v62 = vpop.f32.mrf.mxu1  ;;  %v4629_v3 = vadd.f32 %v6370_v7, %v4613_v45  ;;  %10270 = vst [vmem:[#allocation12_spill] sm:$0xff] %v9305_v18 }
 0x870   :  { %v4611_v50 = vadd.f32 %v4595_v34, %v4509_v62  ;;  %4965 = vmatpush.bf16.msrb.mxu1 %v5593_v51 }
 0x871   :  { %5549 = vmatmul.msk.bf16.gmra.mxu0 %vm62_vm0, %v4652_v32  ;;  %v9299_v12 = vadd.f32 %v9135_v15, %v4629_v3 }
 0x872   :  { %v4627_v37 = vadd.f32 %v6368_v54, %v4611_v50 }
 0x873   :  { %10269 = vst [vmem:[#allocation8_spill] sm:$0xff] %v9299_v12  ;;  %v4655_v4 = vpack.c.bf16 %v9299_v12, %v9305_v18 }
 0x874   :  { %v9282_v38 = vadd.f32 %v9135_v15, %v4627_v37  ;;  %4966 = vmatpush.bf16.msrb.mxu1 %v5592_v56 }
 0x876   :  { %10267 = vst [vmem:[#allocation32_spill] sm:$0xff] %v9282_v38  ;;  %v4654_v53 = vpack.c.bf16 %v9282_v38, %v9285_v25 }
 0x881   :  { %5550 = vmatmul.msk.bf16.gmra.mxu0 %vm62_vm0, %v4653_v11 }
 0x891   :  { %5551 = vmatmul.msk.bf16.gmra.mxu0 %vm62_vm0, %v4654_v53 }
 0x8a1   :  { %5552 = vmatmul.msk.bf16.gmra.mxu0 %vm62_vm0, %v4655_v4 }
 0x8b8   :  { %v4699_v27 = vpop.f32.mrf.mxu0 }
 0x8b9   :  { %v4700_v55 = vadd.f32 %v4699_v27, %v9329_v52 }
 0x8bb   :  { %v4739_v57 = vmul.f32 %v4700_v55, %v4700_v55 }
 0x8bd   :  { %v4755_v40 = vmul.f32 %v4739_v57, %v4700_v55 }
 0x8bf   :  { %v4771_v47 = vmul.f32 0.044715, %v4755_v40 }
 0x8c0   :  { %v4701_v26 = vpop.f32.mrf.mxu0 }
 0x8c1   :  { %v4787_v31 = vadd.f32 %v4771_v47, %v4700_v55  ;;  %v4702_v8 = vadd.f32 %v4701_v26, %v9329_v52  ;;  %v6372_v47 = vld [vmem:[%s10013_s0 + $0x70] sm:$0xff] }
 0x8c3   :  { %v4803_v32 = vmul.f32 0.7978846, %v4787_v31  ;;  %v4740_v13 = vmul.f32 %v4702_v8, %v4702_v8 }
 0x8c5   :  { %v4756_v33 = vmul.f32 %v4740_v13, %v4702_v8  ;;  %6293 = vtanh.f32 %v4803_v32 }
 0x8c7   :  { %v4772_v6 = vmul.f32 0.044715, %v4756_v33 }
 0x8c8   :  { %v4704_v9 = vpop.f32.mrf.mxu0 }
 0x8c9   :  { %v4788_v63 = vadd.f32 %v4772_v6, %v4702_v8  ;;  %v4705_v30 = vadd.f32 %v4704_v9, %v9329_v52 }
 0x8cb   :  { %v4804_v14 = vmul.f32 0.7978846, %v4788_v63  ;;  %v4741_v17 = vmul.f32 %v4705_v30, %v4705_v30  ;;  %v6294_v29 = vpop.eup %6293 }
 0x8cc   :  { %v4835_v62 = vadd.f32 1.0, %v6294_v29 }
 0x8cd   :  { %6295 = vtanh.f32 %v4804_v14  ;;  %v4757_v16 = vmul.f32 %v4741_v17, %v4705_v30 }
 0x8ce   :  { %v4851_v61 = vmul.f32 0.5, %v4835_v62 }
 0x8cf   :  { %v4773_v11 = vmul.f32 0.044715, %v4757_v16 }
 0x8d0   :  { %v4706_v34 = vpop.f32.mrf.mxu0  ;;  %v4867_v58 = vmul.f32 %v4851_v61, %v4700_v55 }
 0x8d1   :  { %v4789_v50 = vadd.f32 %v4773_v11, %v4705_v30  ;;  %v4707_v24 = vadd.f32 %v4706_v34, %v9329_v52 }
 0x8d3   :  { %v6296_v22 = vpop.eup %6295  ;;  %v4805_v54 = vmul.f32 0.7978846, %v4789_v50  ;;  %v4742_v37 = vmul.f32 %v4707_v24, %v4707_v24 }
 0x8d4   :  { %v4836_v19 = vadd.f32 1.0, %v6296_v22 }
 0x8d5   :  { %v4758_v53 = vmul.f32 %v4742_v37, %v4707_v24  ;;  %6297 = vtanh.f32 %v4805_v54 }
 0x8d6   :  { %v4852_v5 = vmul.f32 0.5, %v4836_v19 }
 0x8d7   :  { %v4774_v45 = vmul.f32 0.044715, %v4758_v53 }
 0x8d8   :  { %v4868_v7 = vmul.f32 %v4852_v5, %v4702_v8 }
 0x8d9   :  { %v4790_v3 = vadd.f32 %v4774_v45, %v4707_v24 }
 0x8da   :  { %v4883_v35 = vpack.c.bf16 %v4868_v7, %v4867_v58 }
 0x8db   :  { %v4806_v48 = vmul.f32 0.7978846, %v4790_v3  ;;  %v6298_v36 = vpop.eup %6297 }
 0x8dc   :  { %4967 = vmatmul.bf16.vlgmr.msrb.gmra.mxu1 %v4883_v35  ;;  %v4837_v59 = vadd.f32 1.0, %v6298_v36 }
 0x8dd   :  { %6299 = vtanh.f32 %v4806_v48 }
 0x8de   :  { %v4563_v4 = vpop.f32.mrf.mxu3  ;;  %v4709_v44 = vpop.f32.mrf.mxu0  ;;  %v4853_v57 = vmul.f32 0.5, %v4837_v59 }
 0x8df   :  { %v4710_v21 = vadd.f32 %v4709_v44, %v9329_v52  ;;  %v4614_v41 = vadd.f32 %v9196_v49, %v4563_v4  ;;  %v6373_v49 = vld [vmem:[%s10013_s0 + $0x78] sm:$0xff] }
 0x8e0   :  { %v4869_v9 = vmul.f32 %v4853_v57, %v4705_v30 }
 0x8e1   :  { %v4743_v46 = vmul.f32 %v4710_v21, %v4710_v21  ;;  %v4630_v26 = vadd.f32 %v6372_v47, %v4614_v41 }
 0x8e3   :  { %v6300_v51 = vpop.eup %6299  ;;  %v4759_v27 = vmul.f32 %v4743_v46, %v4710_v21  ;;  %v9349_v29 = vadd.f32 %v9135_v15, %v4630_v26 }
 0x8e4   :  { %v4838_v56 = vadd.f32 1.0, %v6300_v51 }
 0x8e5   :  { %v4775_v55 = vmul.f32 0.044715, %v4759_v27  ;;  %10271 = vst [vmem:[#allocation21_spill] sm:$0xff] %v9349_v29 }
 0x8e6   :  { %v4565_v40 = vpop.f32.mrf.mxu3  ;;  %v4711_v8 = vpop.f32.mrf.mxu0  ;;  %v4854_v32 = vmul.f32 0.5, %v4838_v56 }
 0x8e7   :  { %v4615_v31 = vadd.f32 %v9209_v43, %v4565_v40  ;;  %v4791_v13 = vadd.f32 %v4775_v55, %v4710_v21  ;;  %v4712_v33 = vadd.f32 %v4711_v8, %v9329_v52 }
 0x8e8   :  { %v4870_v63 = vmul.f32 %v4854_v32, %v4707_v24 }
 0x8e9   :  { %v4631_v6 = vadd.f32 %v6373_v49, %v4615_v31  ;;  %v4807_v14 = vmul.f32 0.7978846, %v4791_v13  ;;  %v4744_v17 = vmul.f32 %v4712_v33, %v4712_v33 }
 0x8ea   :  { %v4884_v43 = vpack.c.bf16 %v4870_v63, %v4869_v9 }
 0x8eb   :  { %v9352_v16 = vadd.f32 %v9135_v15, %v4631_v6  ;;  %v4760_v11 = vmul.f32 %v4744_v17, %v4712_v33  ;;  %6301 = vtanh.f32 %v4807_v14 }
 0x8ec   :  { %4972 = vmatmul.bf16.gmra.mxu1 %v4884_v43 }
 0x8ed   :  { %10272 = vst [vmem:[#allocation18_spill] sm:$0xff] %v9352_v16  ;;  %v4656_v62 = vpack.c.bf16 %v9352_v16, %v9349_v29  ;;  %v4776_v34 = vmul.f32 0.044715, %v4760_v11 }
 0x8ee   :  { %v4714_v50 = vpop.f32.mrf.mxu0 }
 0x8ef   :  { %5553 = vmatmul.msk.bf16.gmra.mxu0 %vm62_vm0, %v4656_v62  ;;  %v4792_v30 = vadd.f32 %v4776_v34, %v4712_v33  ;;  %v4715_v24 = vadd.f32 %v4714_v50, %v9329_v52 }
 0x8f1   :  { %v4808_v22 = vmul.f32 0.7978846, %v4792_v30  ;;  %v4745_v54 = vmul.f32 %v4715_v24, %v4715_v24  ;;  %v6302_v37 = vpop.eup %6301 }
 0x8f2   :  { %v4839_v53 = vadd.f32 1.0, %v6302_v37 }
 0x8f3   :  { %6303 = vtanh.f32 %v4808_v22  ;;  %v4761_v15 = vmul.f32 %v4745_v54, %v4715_v24 }
 0x8f4   :  { %v4855_v48 = vmul.f32 0.5, %v4839_v53 }
 0x8f5   :  { %v4777_v61 = vmul.f32 0.044715, %v4761_v15 }
 0x8f6   :  { %v4716_v19 = vpop.f32.mrf.mxu0  ;;  %v4871_v46 = vmul.f32 %v4855_v48, %v4710_v21 }
 0x8f7   :  { %v4793_v5 = vadd.f32 %v4777_v61, %v4715_v24  ;;  %v4717_v45 = vadd.f32 %v4716_v19, %v9329_v52 }
 0x8f9   :  { %v6304_v58 = vpop.eup %6303  ;;  %v4809_v7 = vmul.f32 0.7978846, %v4793_v5  ;;  %v4746_v3 = vmul.f32 %v4717_v45, %v4717_v45 }
 0x8fa   :  { %v4840_v35 = vadd.f32 1.0, %v6304_v58 }
 0x8fb   :  { %v4762_v36 = vmul.f32 %v4746_v3, %v4717_v45  ;;  %6305 = vtanh.f32 %v4809_v7 }
 0x8fc   :  { %v4856_v4 = vmul.f32 0.5, %v4840_v35 }
 0x8fd   :  { %v4778_v44 = vmul.f32 0.044715, %v4762_v36 }
 0x8fe   :  { %v4719_v59 = vpop.f32.mrf.mxu0  ;;  %v4872_v41 = vmul.f32 %v4856_v4, %v4712_v33 }
 0x8ff   :  { %v4794_v51 = vadd.f32 %v4778_v44, %v4717_v45  ;;  %v4720_v27 = vadd.f32 %v4719_v59, %v9329_v52 }
 0x900   :  { %v4885_v56 = vpack.c.bf16 %v4872_v41, %v4871_v46 }
 0x901   :  { %v4810_v57 = vmul.f32 0.7978846, %v4794_v51  ;;  %v4747_v55 = vmul.f32 %v4720_v27, %v4720_v27  ;;  %v6306_v40 = vpop.eup %6305 }
 0x902   :  { %4977 = vmatmul.bf16.gmra.mxu1 %v4885_v56  ;;  %v4841_v8 = vadd.f32 1.0, %v6306_v40 }
 0x903   :  { %6307 = vtanh.f32 %v4810_v57  ;;  %v4763_v47 = vmul.f32 %v4747_v55, %v4720_v27 }
 0x904   :  { %v4857_v9 = vmul.f32 0.5, %v4841_v8 }
 0x905   :  { %v4779_v26 = vmul.f32 0.044715, %v4763_v47 }
 0x906   :  { %v4721_v31 = vpop.f32.mrf.mxu0  ;;  %v4873_v11 = vmul.f32 %v4857_v9, %v4715_v24 }
 0x907   :  { %v4795_v32 = vadd.f32 %v4779_v26, %v4720_v27  ;;  %v4722_v13 = vadd.f32 %v4721_v31, %v9329_v52 }
 0x909   :  { %v6308_v49 = vpop.eup %6307  ;;  %v4811_v6 = vmul.f32 0.7978846, %v4795_v32  ;;  %v4748_v21 = vmul.f32 %v4722_v13, %v4722_v13 }
 0x90a   :  { %v4842_v33 = vadd.f32 1.0, %v6308_v49 }
 0x90b   :  { %v4764_v63 = vmul.f32 %v4748_v21, %v4722_v13  ;;  %6309 = vtanh.f32 %v4811_v6 }
 0x90c   :  { %v4858_v14 = vmul.f32 0.5, %v4842_v33 }
 0x90d   :  { %v4780_v17 = vmul.f32 0.044715, %v4764_v63 }
 0x90e   :  { %v4724_v43 = vpop.f32.mrf.mxu0  ;;  %v4874_v62 = vmul.f32 %v4858_v14, %v4717_v45 }
 0x90f   :  { %v4796_v34 = vadd.f32 %v4780_v17, %v4722_v13  ;;  %v4725_v50 = vadd.f32 %v4724_v43, %v9329_v52 }
 0x910   :  { %v4886_v30 = vpack.c.bf16 %v4874_v62, %v4873_v11 }
 0x911   :  { %v4812_v22 = vmul.f32 0.7978846, %v4796_v34  ;;  %v4749_v54 = vmul.f32 %v4725_v50, %v4725_v50  ;;  %v6310_v37 = vpop.eup %6309 }
 0x912   :  { %4982 = vmatmul.bf16.gmra.mxu1 %v4886_v30  ;;  %v4843_v53 = vadd.f32 1.0, %v6310_v37 }
 0x913   :  { %6311 = vtanh.f32 %v4812_v22  ;;  %v4765_v15 = vmul.f32 %v4749_v54, %v4725_v50 }
 0x914   :  { %v4859_v35 = vmul.f32 0.5, %v4843_v53 }
 0x915   :  { %v4781_v61 = vmul.f32 0.044715, %v4765_v15 }
 0x916   :  { %v4726_v19 = vpop.f32.mrf.mxu0  ;;  %v4875_v59 = vmul.f32 %v4859_v35, %v4720_v27 }
 0x917   :  { %v4797_v5 = vadd.f32 %v4781_v61, %v4725_v50  ;;  %v4727_v58 = vadd.f32 %v4726_v19, %v9329_v52 }
 0x919   :  { %v6312_v7 = vpop.eup %6311  ;;  %v4813_v3 = vmul.f32 0.7978846, %v4797_v5  ;;  %v4750_v24 = vmul.f32 %v4727_v58, %v4727_v58 }
 0x91a   :  { %v4844_v45 = vadd.f32 1.0, %v6312_v7  ;;  %v9365_v7 = vpop.permute.xlu0 %4956 }
 0x91b   :  { %v4766_v48 = vmul.f32 %v4750_v24, %v4727_v58  ;;  %6313 = vtanh.f32 %v4813_v3 }
 0x91c   :  { %v4860_v36 = vmul.f32 0.5, %v4844_v45 }
 0x91d   :  { %v4782_v4 = vmul.f32 0.044715, %v4766_v48 }
 0x91e   :  { %v4729_v44 = vpop.f32.mrf.mxu0  ;;  %v4876_v46 = vmul.f32 %v4860_v36, %v4722_v13 }
 0x91f   :  { %v4798_v41 = vadd.f32 %v4782_v4, %v4727_v58  ;;  %v4730_v51 = vadd.f32 %v4729_v44, %v9329_v52 }
 0x920   :  { %v4887_v56 = vpack.c.bf16 %v4876_v46, %v4875_v59 }
 0x921   :  { %v4814_v57 = vmul.f32 0.7978846, %v4798_v41  ;;  %v4751_v55 = vmul.f32 %v4730_v51, %v4730_v51  ;;  %v6314_v40 = vpop.eup %6313 }
 0x922   :  { %4987 = vmatmul.bf16.gmra.mxu1 %v4887_v56  ;;  %v4845_v8 = vadd.f32 1.0, %v6314_v40 }
 0x923   :  { %6315 = vtanh.f32 %v4814_v57  ;;  %v4767_v47 = vmul.f32 %v4751_v55, %v4730_v51 }
 0x924   :  { %v4861_v33 = vmul.f32 0.5, %v4845_v8 }
 0x925   :  { %v4783_v26 = vmul.f32 0.044715, %v4767_v47 }
 0x926   :  { %v4731_v31 = vpop.f32.mrf.mxu0  ;;  %v4877_v17 = vmul.f32 %v4861_v33, %v4725_v50 }
 0x927   :  { %v4799_v32 = vadd.f32 %v4783_v26, %v4730_v51  ;;  %v4732_v49 = vadd.f32 %v4731_v31, %v9329_v52 }
 0x929   :  { %v6316_v6 = vpop.eup %6315  ;;  %v4815_v21 = vmul.f32 0.7978846, %v4799_v32  ;;  %v4752_v27 = vmul.f32 %v4732_v49, %v4732_v49 }
 0x92a   :  { %v4846_v13 = vadd.f32 1.0, %v6316_v6 }
 0x92b   :  { %v4768_v9 = vmul.f32 %v4752_v27, %v4732_v49  ;;  %6317 = vtanh.f32 %v4815_v21 }
 0x92c   :  { %v4862_v63 = vmul.f32 0.5, %v4846_v13 }
 0x92d   :  { %v4784_v14 = vmul.f32 0.044715, %v4768_v9 }
 0x92e   :  { %v4878_v43 = vmul.f32 %v4862_v63, %v4727_v58 }
 0x92f   :  { %v4800_v11 = vadd.f32 %v4784_v14, %v4732_v49 }
 0x930   :  { %v4888_v62 = vpack.c.bf16 %v4878_v43, %v4877_v17 }
 0x931   :  { %v4816_v34 = vmul.f32 0.7978846, %v4800_v11  ;;  %v6318_v30 = vpop.eup %6317 }
 0x932   :  { %4992 = vmatmul.bf16.gmra.mxu1 %v4888_v62  ;;  %v4847_v22 = vadd.f32 1.0, %v6318_v30 }
 0x933   :  { %6319 = vtanh.f32 %v4816_v34 }
 0x934   :  { %v4863_v15 = vmul.f32 0.5, %v4847_v22 }
 0x936   :  { %v4879_v19 = vmul.f32 %v4863_v15, %v4730_v51 }
 0x939   :  { %v6320_v54 = vpop.eup %6319 }
 0x93a   :  { %v4848_v37 = vadd.f32 1.0, %v6320_v54 }
 0x93c   :  { %v4864_v61 = vmul.f32 0.5, %v4848_v37 }
 0x93e   :  { %v4880_v53 = vmul.f32 %v4864_v61, %v4732_v49 }
 0x940   :  { %v4889_v5 = vpack.c.bf16 %v4880_v53, %v4879_v19 }
 0x942   :  { %4997 = vmatmul.bf16.gmra.mxu1 %v4889_v5 }
 0x959   :  { %v4968_v3 = vpop.f32.mrf.mxu1 }
 0x95a   :  { %v9368_v50 = vadd.f32 %v4968_v3, %v9365_v7 }
 0x95c   :  { %v5008_v58 = vsel %vm62_vm0, %v9368_v50, 0.0 }
 0x95d   :  { %5009 = vadd.xlane.f32.xlu1 %v5008_v58 }
 0x961   :  { %v4970_v24 = vpop.f32.mrf.mxu1 }
 0x962   :  { %v9373_v45 = vadd.f32 %v4970_v24, %v9365_v7 }
 0x964   :  { %v5011_v35 = vsel %vm62_vm0, %v9373_v45, 0.0 }
 0x965   :  { %5012 = vadd.xlane.f32.xlu2 %v5011_v35 }
 0x969   :  { %v4973_v48 = vpop.f32.mrf.mxu1 }
 0x96a   :  { %v9378_v36 = vadd.f32 %v4973_v48, %v9365_v7 }
 0x96c   :  { %v4734_v4 = vpop.f32.mrf.mxu0  ;;  %v5014_v59 = vsel %vm62_vm0, %v9378_v36, 0.0 }
 0x96d   :  { %v4735_v44 = vadd.f32 %v4734_v4, %v9329_v52  ;;  %5015 = vadd.xlane.f32.xlu0 %v5014_v59 }
 0x96f   :  { %v4753_v46 = vmul.f32 %v4735_v44, %v4735_v44 }
 0x971   :  { %v4769_v41 = vmul.f32 %v4753_v46, %v4735_v44  ;;  %v4975_v51 = vpop.f32.mrf.mxu1 }
 0x972   :  { %v9384_v57 = vadd.f32 %v4975_v51, %v9365_v7 }
 0x973   :  { %v4785_v56 = vmul.f32 0.044715, %v4769_v41 }
 0x974   :  { %v4736_v55 = vpop.f32.mrf.mxu0  ;;  %v5017_v26 = vsel %vm62_vm0, %v9384_v57, 0.0 }
 0x975   :  { %v4801_v40 = vadd.f32 %v4785_v56, %v4735_v44  ;;  %v4737_v47 = vadd.f32 %v4736_v55, %v9329_v52  ;;  %5018 = vadd.xlane.f32.xlu2 %v5017_v26 }
 0x977   :  { %v4817_v31 = vmul.f32 0.7978846, %v4801_v40  ;;  %v4754_v8 = vmul.f32 %v4737_v47, %v4737_v47 }
 0x979   :  { %v4770_v32 = vmul.f32 %v4754_v8, %v4737_v47  ;;  %6321 = vtanh.f32 %v4817_v31 }
 0x97b   :  { %v4786_v49 = vmul.f32 0.044715, %v4770_v32 }
 0x97d   :  { %v4802_v6 = vadd.f32 %v4786_v49, %v4737_v47  ;;  %v10273_v49 = vld [vmem:[#allocation3_spill] sm:$0xff] }
 0x97f   :  { %v4818_v21 = vmul.f32 0.7978846, %v4802_v6  ;;  %v4978_v27 = vpop.f32.mrf.mxu1  ;;  %v6322_v13 = vpop.eup %6321 }
 0x980   :  { %v9390_v33 = vadd.f32 %v4978_v27, %v9365_v7  ;;  %v4849_v9 = vadd.f32 1.0, %v6322_v13 }
 0x981   :  { %6323 = vtanh.f32 %v4818_v21 }
 0x982   :  { %v5020_v52 = vsel %vm62_vm0, %v9390_v33, 0.0  ;;  %v4865_v43 = vmul.f32 0.5, %v4849_v9 }
 0x983   :  { %5021 = vadd.xlane.f32.xlu2 %v5020_v52 }
 0x984   :  { %v4881_v30 = vmul.f32 %v4865_v43, %v4735_v44 }
 0x987   :  { %v6324_v63 = vpop.eup %6323  ;;  %v4980_v14 = vpop.f32.mrf.mxu1 }
 0x988   :  { %v4850_v17 = vadd.f32 1.0, %v6324_v63  ;;  %v9395_v11 = vadd.f32 %v4980_v14, %v9365_v7 }
 0x98a   :  { %v4866_v62 = vmul.f32 0.5, %v4850_v17  ;;  %v5023_v34 = vsel %vm62_vm0, %v9395_v11, 0.0 }
 0x98b   :  { %5024 = vadd.xlane.f32.xlu2 %v5023_v34 }
 0x98c   :  { %v4882_v22 = vmul.f32 %v4866_v62, %v4737_v47 }
 0x98e   :  { %v4890_v54 = vpack.c.bf16 %v4882_v22, %v4881_v30 }
 0x98f   :  { %v4983_v37 = vpop.f32.mrf.mxu1 }
 0x990   :  { %5002 = vmatmul.bf16.gmra.mxu1 %v4890_v54  ;;  %v4984_v15 = vadd.f32 %v4983_v37, %v9365_v7 }
 0x992   :  { %v5026_v61 = vsel %vm62_vm0, %v4984_v15, 0.0 }
 0x993   :  { %5027 = vadd.xlane.f32.xlu2 %v5026_v61 }
 0x997   :  { %v4985_v19 = vpop.f32.mrf.mxu1 }
 0x998   :  { %v9402_v53 = vadd.f32 %v4985_v19, %v9365_v7 }
 0x99a   :  { %v5029_v5 = vsel %vm62_vm0, %v9402_v53, 0.0 }
 0x99b   :  { %5030 = vadd.xlane.f32.xlu1 %v5029_v5 }
 0x99f   :  { %v4988_v3 = vpop.f32.mrf.mxu1 }
 0x9a0   :  { %v9407_v58 = vadd.f32 %v4988_v3, %v9365_v7 }
 0x9a2   :  { %v5032_v24 = vsel %vm62_vm0, %v9407_v58, 0.0 }
 0x9a3   :  { %5033 = vadd.xlane.f32.xlu2 %v5032_v24 }
 0x9a7   :  { %v4990_v35 = vpop.f32.mrf.mxu1 }
 0x9a8   :  { %v9412_v48 = vadd.f32 %v4990_v35, %v9365_v7 }
 0x9aa   :  { %v5035_v4 = vsel %vm62_vm0, %v9412_v48, 0.0 }
 0x9ab   :  { %5036 = vadd.xlane.f32.xlu1 %v5035_v4 }
 0x9af   :  { %v4993_v44 = vpop.f32.mrf.mxu1 }
 0x9b0   :  { %v9417_v59 = vadd.f32 %v4993_v44, %v9365_v7 }
 0x9b2   :  { %v5038_v46 = vsel %vm62_vm0, %v9417_v59, 0.0 }
 0x9b3   :  { %5039 = vadd.xlane.f32.xlu0 %v5038_v46 }
 0x9b7   :  { %v4995_v41 = vpop.f32.mrf.mxu1 }
 0x9b8   :  { %v9422_v51 = vadd.f32 %v4995_v41, %v9365_v7 }
 0x9ba   :  { %v5041_v56 = vsel %vm62_vm0, %v9422_v51, 0.0 }
 0x9bb   :  { %5042 = vadd.xlane.f32.xlu2 %v5041_v56 }
 0x9bf   :  { %v4998_v55 = vpop.f32.mrf.mxu1 }
 0x9c0   :  { %v9427_v40 = vadd.f32 %v4998_v55, %v9365_v7 }
 0x9c2   :  { %v5044_v47 = vsel %vm62_vm0, %v9427_v40, 0.0 }
 0x9c3   :  { %5045 = vadd.xlane.f32.xlu1 %v5044_v47 }
 0x9c7   :  { %v5000_v26 = vpop.f32.mrf.mxu1 }
 0x9c8   :  { %v9432_v31 = vadd.f32 %v5000_v26, %v9365_v7 }
 0x9ca   :  { %v5047_v8 = vsel %vm62_vm0, %v9432_v31, 0.0 }
 0x9cb   :  { %5048 = vadd.xlane.f32.xlu0 %v5047_v8 }
 0x9d0   :  { %v5010_v32 = vpop.xlane.xlu1 %5009 }
 0x9d1   :  { %v5056_v6 = vmul.f32 %v5010_v32, %v10273_v49 }
 0x9d3   :  { %v9438_v21 = vsub.f32 %v9368_v50, %v5056_v6 }
 0x9d5   :  { %v5088_v27 = vmul.f32 %v9438_v21, %v9438_v21 }
 0x9d7   :  { %v5104_v13 = vsel %vm62_vm0, %v5088_v27, 0.0 }
 0x9d8   :  { %5105 = vadd.xlane.f32.xlu0 %v5104_v13  ;;  %v5013_v52 = vpop.xlane.xlu2 %5012 }
 0x9d9   :  { %v5057_v54 = vmul.f32 %v5013_v52, %v10273_v49 }
 0x9db   :  { %v9461_v5 = vsub.f32 %v9373_v45, %v5057_v54 }
 0x9dd   :  { %v5089_v4 = vmul.f32 %v9461_v5, %v9461_v5 }
 0x9df   :  { %v5107_v47 = vsel %vm62_vm0, %v5089_v4, 0.0 }
 0x9e0   :  { %v5016_v3 = vpop.xlane.xlu0 %5015 }
 0x9e1   :  { %v5058_v24 = vmul.f32 %v5016_v3, %v10273_v49 }
 0x9e3   :  { %v9473_v41 = vsub.f32 %v9378_v36, %v5058_v24 }
 0x9e5   :  { %v5090_v26 = vmul.f32 %v9473_v41, %v9473_v41 }
 0x9e8   :  { %v5019_v9 = vpop.xlane.xlu2 %5018 }
 0x9e9   :  { %v5059_v63 = vmul.f32 %v5019_v9, %v10273_v49 }
 0x9eb   :  { %v9445_v14 = vsub.f32 %v9384_v57, %v5059_v63 }
 0x9ed   :  { %v5091_v17 = vmul.f32 %v9445_v14, %v9445_v14 }
 0x9ef   :  { %v5113_v43 = vsel %vm62_vm0, %v5091_v17, 0.0 }
 0x9f0   :  { %5114 = vadd.xlane.f32.xlu0 %v5113_v43 }
 0x9f6   :  { %v5022_v50 = vpop.xlane.xlu2 %5021 }
 0x9f7   :  { %v5060_v35 = vmul.f32 %v5022_v50, %v10273_v49 }
 0x9f9   :  { %v9476_v56 = vsub.f32 %v9390_v33, %v5060_v35  ;;  %v5110_v33 = vsel %vm62_vm0, %v5090_v26, 0.0 }
 0x9fb   :  { %v5092_v36 = vmul.f32 %v9476_v56, %v9476_v56 }
 0x9fd   :  { %v5116_v52 = vsel %vm62_vm0, %v5092_v36, 0.0 }
 0x9fe   :  { %v5025_v62 = vpop.xlane.xlu2 %5024 }
 0xa06   :  { %v5028_v34 = vpop.xlane.xlu2 %5027 }
 0xa07   :  { %v5062_v30 = vmul.f32 %v5028_v34, %v10273_v49 }
 0xa09   :  { %v9451_v22 = vsub.f32 %v4984_v15, %v5062_v30 }
 0xa0b   :  { %v5094_v37 = vmul.f32 %v9451_v22, %v9451_v22 }
 0xa0d   :  { %v5003_v57 = vpop.f32.mrf.mxu1  ;;  %v5122_v19 = vsel %vm62_vm0, %v5094_v37, 0.0 }
 0xa0e   :  { %v9457_v61 = vadd.f32 %v5003_v57, %v9365_v7  ;;  %5123 = vadd.xlane.f32.xlu0 %v5122_v19  ;;  %v5031_v45 = vpop.xlane.xlu1 %5030 }
 0xa0f   :  { %v5063_v8 = vmul.f32 %v5031_v45, %v10273_v49 }
 0xa10   :  { %v5050_v15 = vsel %vm62_vm0, %v9457_v61, 0.0 }
 0xa11   :  { %5051 = vadd.xlane.f32.xlu2 %v5050_v15  ;;  %v9492_v27 = vsub.f32 %v9402_v53, %v5063_v8 }
 0xa13   :  { %v5095_v53 = vmul.f32 %v9492_v27, %v9492_v27 }
 0xa15   :  { %v5005_v44 = vpop.f32.mrf.mxu1  ;;  %v5125_v54 = vsel %vm62_vm0, %v5095_v53, 0.0 }
 0xa16   :  { %v9470_v46 = vadd.f32 %v5005_v44, %v9365_v7  ;;  %v5061_v7 = vmul.f32 %v5025_v62, %v10273_v49  ;;  %v5034_v9 = vpop.xlane.xlu2 %5033 }
 0xa17   :  { %v5064_v17 = vmul.f32 %v5034_v9, %v10273_v49 }
 0xa18   :  { %v5053_v55 = vsel %vm62_vm0, %v9470_v46, 0.0  ;;  %v9489_v6 = vsub.f32 %v9395_v11, %v5061_v7 }
 0xa19   :  { %5054 = vadd.xlane.f32.xlu1 %v5053_v55  ;;  %5108 = vadd.xlane.f32.xlu2 %v5107_v47  ;;  %v9508_v34 = vsub.f32 %v9407_v58, %v5064_v17 }
 0xa1a   :  { %v5093_v11 = vmul.f32 %v9489_v6, %v9489_v6 }
 0xa1b   :  { %v5096_v57 = vmul.f32 %v9508_v34, %v9508_v34 }
 0xa1c   :  { %v5119_v30 = vsel %vm62_vm0, %v5093_v11, 0.0 }
 0xa1d   :  { %v5128_v15 = vsel %vm62_vm0, %v5096_v57, 0.0 }
 0xa1e   :  { %v5037_v32 = vpop.xlane.xlu1 %5036 }
 0xa1f   :  { %v5065_v13 = vmul.f32 %v5037_v32, %v10273_v49 }
 0xa21   :  { %5111 = vadd.xlane.f32.xlu1 %v5110_v33  ;;  %5117 = vadd.xlane.f32.xlu2 %v5116_v52  ;;  %v9497_v63 = vsub.f32 %v9412_v48, %v5065_v13 }
 0xa23   :  { %v5097_v43 = vmul.f32 %v9497_v63, %v9497_v63 }
 0xa25   :  { %v5131_v50 = vsel %vm62_vm0, %v5097_v43, 0.0 }
 0xa26   :  { %v5040_v62 = vpop.xlane.xlu0 %5039  ;;  %5132 = vadd.xlane.f32.xlu0 %v5131_v50 }
 0xa27   :  { %v5066_v48 = vmul.f32 %v5040_v62, %v10273_v49 }
 0xa29   :  { %5120 = vadd.xlane.f32.xlu1 %v5119_v30  ;;  %5126 = vadd.xlane.f32.xlu2 %v5125_v54  ;;  %v9514_v37 = vsub.f32 %v9417_v59, %v5066_v48 }
 0xa2b   :  { %v5098_v19 = vmul.f32 %v9514_v37, %v9514_v37 }
 0xa2d   :  { %v5134_v24 = vsel %vm62_vm0, %v5098_v19, 0.0 }
 0xa2e   :  { %v5043_v3 = vpop.xlane.xlu2 %5042 }
 0xa2f   :  { %v5067_v58 = vmul.f32 %v5043_v3, %v10273_v49 }
 0xa31   :  { %5129 = vadd.xlane.f32.xlu1 %v5128_v15  ;;  %5135 = vadd.xlane.f32.xlu2 %v5134_v24  ;;  %v9524_v35 = vsub.f32 %v9422_v51, %v5067_v58 }
 0xa33   :  { %v5099_v59 = vmul.f32 %v9524_v35, %v9524_v35 }
 0xa35   :  { %v5137_v45 = vsel %vm62_vm0, %v5099_v59, 0.0 }
 0xa36   :  { %v5046_v4 = vpop.xlane.xlu1 %5045 }
 0xa37   :  { %v5068_v44 = vmul.f32 %v5046_v4, %v10273_v49 }
 0xa39   :  { %5138 = vadd.xlane.f32.xlu1 %v5137_v45  ;;  %v9531_v55 = vsub.f32 %v9427_v40, %v5068_v44  ;;  %v10274_v40 = vld [vmem:[#allocation2_spill] sm:$0xff] }
 0xa3b   :  { %v5100_v47 = vmul.f32 %v9531_v55, %v9531_v55 }
 0xa3d   :  { %v5140_v26 = vsel %vm62_vm0, %v5100_v47, 0.0 }
 0xa3e   :  { %v5049_v7 = vpop.xlane.xlu0 %5048  ;;  %5141 = vadd.xlane.f32.xlu0 %v5140_v26 }
 0xa3f   :  { %v5069_v51 = vmul.f32 %v5049_v7, %v10273_v49 }
 0xa41   :  { %v9538_v8 = vsub.f32 %v9432_v31, %v5069_v51 }
 0xa43   :  { %v5101_v36 = vmul.f32 %v9538_v8, %v9538_v8 }
 0xa45   :  { %v5143_v32 = vsel %vm62_vm0, %v5101_v36, 0.0 }
 0xa46   :  { %5144 = vadd.xlane.f32.xlu2 %v5143_v32 }
 0xa5e   :  { %5360 = vrot.lane.b32.xlu2 %v10274_v40, %s6379_s23 }
 0xa84   :  { %v5052_v33 = vpop.xlane.xlu2 %5051 }
 0xa85   :  { %v5070_v13 = vmul.f32 %v5052_v33, %v10273_v49 }
 0xa87   :  { %v9547_v52 = vsub.f32 %v9457_v61, %v5070_v13  ;;  %v5106_v61 = vpop.xlane.xlu0 %5105 }
 0xa88   :  { %v5152_v57 = vmul.f32 %v5106_v61, %v10273_v49 }
 0xa89   :  { %v5102_v9 = vmul.f32 %v9547_v52, %v9547_v52 }
 0xa8a   :  { %v9564_v15 = vadd.f32 1e-05, %v5152_v57 }
 0xa8b   :  { %v5146_v31 = vsel %vm62_vm0, %v5102_v9, 0.0 }
 0xa8c   :  { %v5055_v17 = vpop.xlane.xlu1 %5054  ;;  %5147 = vadd.xlane.f32.xlu1 %v5146_v31  ;;  %v5109_v62 = vpop.xlane.xlu2 %5108  ;;  %6325 = vrsqrt.f32 %v9564_v15  ;;  %vm5190_vm11 = vweird.f32 %v9564_v15 }
 0xa8d   :  { %v5071_v43 = vmul.f32 %v5055_v17, %v10273_v49  ;;  %v5153_v44 = vmul.f32 %v5109_v62, %v10273_v49 }
 0xa8f   :  { %v9554_v11 = vsub.f32 %v9470_v46, %v5071_v43  ;;  %v5115_v48 = vpop.xlane.xlu0 %5114  ;;  %v9578_v7 = vadd.f32 1e-05, %v5153_v44 }
 0xa90   :  { %v5155_v46 = vmul.f32 %v5115_v48, %v10273_v49 }
 0xa91   :  { %v5103_v53 = vmul.f32 %v9554_v11, %v9554_v11  ;;  %vm5200_vm4 = vweird.f32 %v9578_v7 }
 0xa92   :  { %v9566_v24 = vadd.f32 1e-05, %v5155_v46  ;;  %v9574_v47 = vpop.eup %6325 }
 0xa93   :  { %v5149_v50 = vsel %vm62_vm0, %v5103_v53, 0.0  ;;  %vm5191_vm10 = vweird.f32 %v9574_v47 }
 0xa94   :  { %5150 = vadd.xlane.f32.xlu0 %v5149_v50  ;;  %v5112_v30 = vpop.xlane.xlu1 %5111  ;;  %v5118_v19 = vpop.xlane.xlu2 %5117  ;;  %6327 = vrsqrt.f32 %v9566_v24  ;;  %vm9654_vm14 = vmor %vm5190_vm11, %vm5191_vm10  ;;  %vm5220_vm15 = vweird.f32 %v9566_v24 }
 0xa95   :  { %v5154_v32 = vmul.f32 %v5112_v30, %v10273_v49  ;;  %v5156_v13 = vmul.f32 %v5118_v19, %v10273_v49 }
 0xa97   :  { %v5124_v54 = vpop.xlane.xlu0 %5123  ;;  %v9593_v53 = vadd.f32 1e-05, %v5154_v32  ;;  %v9598_v30 = vadd.f32 1e-05, %v5156_v13 }
 0xa98   :  { %v5158_v58 = vmul.f32 %v5124_v54, %v10273_v49 }
 0xa99   :  { %vm5210_vm6 = vweird.f32 %v9593_v53  ;;  %vm5230_vm7 = vweird.f32 %v9598_v30 }
 0xa9a   :  { %v9568_v59 = vadd.f32 1e-05, %v5158_v58  ;;  %v9576_v26 = vpop.eup %6327 }
 0xa9b   :  { %v5215_v33 = vmul.f32 %v9576_v26, %v9566_v24  ;;  %vm5221_vm12 = vweird.f32 %v9576_v26 }
 0xa9c   :  { %v5121_v3 = vpop.xlane.xlu1 %5120  ;;  %6329 = vrsqrt.f32 %v9568_v59  ;;  %v5127_v4 = vpop.xlane.xlu2 %5126  ;;  %vm9663_vm1 = vmor %vm5220_vm15, %vm5221_vm12  ;;  %vm5250_vm2 = vweird.f32 %v9568_v59 }
 0xa9d   :  { %6331 = vrsqrt.f32 %v9578_v7  ;;  %v5157_v17 = vmul.f32 %v5121_v3, %v10273_v49  ;;  %v5159_v50 = vmul.f32 %v5127_v4, %v10273_v49  ;;  %v5216_v48 = vmul.f32 %v9576_v26, %v5215_v33 }
 0xa9e   :  { %6333 = vrsqrt.f32 %v9593_v53 }
 0xa9f   :  { %v5133_v36 = vpop.xlane.xlu0 %5132  ;;  %v9605_v3 = vadd.f32 1e-05, %v5157_v17  ;;  %v9611_v44 = vadd.f32 1e-05, %v5159_v50  ;;  %v5217_v32 = vmul.f32 0.5, %v5216_v48  ;;  %6335 = vrsqrt.f32 %v9598_v30 }
 0xaa0   :  { %v5161_v31 = vmul.f32 %v5133_v36, %v10273_v49 }
 0xaa1   :  { %v5218_v50 = vsub.f32 1.5, %v5217_v32  ;;  %vm5240_vm12 = vweird.f32 %v9605_v3 }
 0xaa2   :  { %v9580_v51 = vpop.eup %6329  ;;  %v9602_v19 = vadd.f32 1e-05, %v5161_v31 }
 0xaa3   :  { %v5245_v9 = vmul.f32 %v9580_v51, %v9568_v59  ;;  %v9608_v4 = vpop.eup %6331  ;;  %vm5251_vm13 = vweird.f32 %v9580_v51 }
 0xaa4   :  { %v5130_v45 = vpop.xlane.xlu1 %5129  ;;  %v5136_v43 = vpop.xlane.xlu2 %5135  ;;  %6337 = vrsqrt.f32 %v9602_v19  ;;  %v5195_v13 = vmul.f32 %v9608_v4, %v9578_v7  ;;  %vm9680_vm3 = vmor %vm5250_vm2, %vm5251_vm13  ;;  %vm5201_vm5 = vweird.f32 %v9608_v4  ;;  %vm5280_vm9 = vweird.f32 %v9602_v19 }
 0xaa5   :  { %5379 = vrot.lane.b32.xlu1 %v10274_v40, %s6380_s7  ;;  %v5185_v40 = vmul.f32 %v9574_v47, %v9564_v15  ;;  %v5160_v54 = vmul.f32 %v5130_v45, %v10273_v49  ;;  %v5246_v57 = vmul.f32 %v9580_v51, %v5245_v9  ;;  %v5162_v46 = vmul.f32 %v5136_v43, %v10273_v49  ;;  %vm9734_vm10 = vmor %vm5200_vm4, %vm5201_vm5 }
 0xaa6   :  { %6339 = vrsqrt.f32 %v9605_v3  ;;  %vm5260_vm13 = vweird.f32 %v9611_v44 }
 0xaa7   :  { %v5186_v62 = vmul.f32 %v9574_v47, %v5185_v40  ;;  %v9614_v45 = vadd.f32 1e-05, %v5160_v54  ;;  %v5247_v40 = vmul.f32 0.5, %v5246_v57  ;;  %v9617_v33 = vadd.f32 1e-05, %v5162_v46 }
 0xaa8   :  { %6341 = vrsqrt.f32 %v9611_v44  ;;  %v5196_v57 = vmul.f32 %v9608_v4, %v5195_v13 }
 0xaa9   :  { %v5187_v36 = vmul.f32 0.5, %v5186_v62  ;;  %6343 = vrsqrt.f32 %v9614_v45  ;;  %v5248_v62 = vsub.f32 1.5, %v5247_v40  ;;  %v5219_v40 = vmul.f32 %v9576_v26, %v5218_v50 }
 0xaaa   :  { %6345 = vrsqrt.f32 %v9617_v33  ;;  %v5197_v15 = vmul.f32 0.5, %v5196_v57  ;;  %vm5270_vm4 = vweird.f32 %v9614_v45 }
 0xaab   :  { %v5188_v43 = vsub.f32 1.5, %v5187_v36  ;;  %v5249_v13 = vmul.f32 %v9580_v51, %v5248_v62  ;;  %v5223_v57 = vsel %vm9663_vm1, %v9576_v26, %v5219_v40 }
 0xaac   :  { %v5139_v61 = vpop.xlane.xlu1 %5138  ;;  %v5198_v40 = vsub.f32 1.5, %v5197_v15 }
 0xaad   :  { %v5163_v58 = vmul.f32 %v5139_v61, %v10273_v49  ;;  %v9626_v61 = vpop.eup %6333  ;;  %v5189_v32 = vmul.f32 %v9574_v47, %v5188_v43 }
 0xaae   :  { %v9630_v54 = vpop.eup %6335  ;;  %vm5211_vm8 = vweird.f32 %v9626_v61 }
 0xaaf   :  { %v9622_v9 = vadd.f32 1e-05, %v5163_v58  ;;  %v9635_v58 = vpop.eup %6337  ;;  %v5193_v24 = vsel %vm9654_vm14, %v9574_v47, %v5189_v32  ;;  %v5253_v47 = vsel %vm9680_vm3, %v9580_v51, %v5249_v13  ;;  %vm5231_vm11 = vweird.f32 %v9630_v54  ;;  %vm9762_vm1 = vmor %vm5210_vm6, %vm5211_vm8 }
 0xab0   :  { %v9638_v36 = vpop.eup %6339  ;;  %v5275_v59 = vmul.f32 %v9635_v58, %v9602_v19  ;;  %v9701_v25 = vmul.f32 %v5193_v24, %v9438_v21  ;;  %v9713_v60 = vmul.f32 %v5253_v47, %v9451_v22  ;;  %v5199_v24 = vmul.f32 %v9608_v4, %v5198_v40  ;;  %vm9773_vm2 = vmor %vm5230_vm7, %vm5231_vm11 }
 0xab1   :  { %v5142_v31 = vpop.xlane.xlu0 %5141  ;;  %6347 = vrsqrt.f32 %v9622_v9  ;;  %v5235_v38 = vmul.f32 %v9638_v36, %v9605_v3  ;;  %vm5281_vm14 = vweird.f32 %v9635_v58  ;;  %vm5241_vm15 = vweird.f32 %v9638_v36 }
 0xab2   :  { %v5164_v48 = vmul.f32 %v5142_v31, %v10273_v49  ;;  %v9644_v31 = vpop.eup %6341  ;;  %v5276_v15 = vmul.f32 %v9635_v58, %v5275_v59  ;;  %vm9787_vm5 = vmor %vm5280_vm9, %vm5281_vm14  ;;  %vm5300_vm14 = vweird.f32 %v9622_v9 }
 0xab3   :  { %v9652_v29 = vpop.eup %6343  ;;  %v5255_v26 = vmul.f32 %v9644_v31, %v9611_v44  ;;  %vm5261_vm3 = vweird.f32 %v9644_v31  ;;  %vm9800_vm8 = vmor %vm5240_vm12, %vm5241_vm15  ;;  %vm5290_vm12 = vweird.f32 %v9617_v33 }
 0xab4   :  { %v9650_v16 = vadd.f32 1e-05, %v5164_v48  ;;  %v9661_v12 = vpop.eup %6345  ;;  %v5225_v48 = vmul.f32 %v9630_v54, %v9598_v30  ;;  %v5265_v43 = vmul.f32 %v9652_v29, %v9614_v45  ;;  %vm5271_vm6 = vweird.f32 %v9652_v29  ;;  %vm9810_vm9 = vmor %vm5260_vm13, %vm5261_vm3 }
 0xab5   :  { %v5285_v62 = vmul.f32 %v9661_v12, %v9617_v33  ;;  %vm5291_vm7 = vweird.f32 %v9661_v12  ;;  %vm9827_vm11 = vmor %vm5270_vm4, %vm5271_vm6 }
 0xab6   :  { %6349 = vrsqrt.f32 %v9650_v16  ;;  %v5226_v51 = vmul.f32 %v9630_v54, %v5225_v48  ;;  %v5256_v48 = vmul.f32 %v9644_v31, %v5255_v26  ;;  %v5277_v26 = vmul.f32 0.5, %v5276_v15  ;;  %vm9844_vm13 = vmor %vm5290_vm12, %vm5291_vm7 }
 0xab7   :  { %v9670_v18 = vpop.eup %6347 }
 0xab8   :  { %v5295_v13 = vmul.f32 %v9670_v18, %v9622_v9 }
 0xab9   :  { %v5145_v17 = vpop.xlane.xlu2 %5144 }
 0xaba   :  { %v5165_v46 = vmul.f32 %v5145_v17, %v10273_v49  ;;  %v5205_v17 = vmul.f32 %v9626_v61, %v9593_v53  ;;  %v5296_v22 = vmul.f32 %v9670_v18, %v5295_v13  ;;  %v5203_v13 = vsel %vm9734_vm10, %v9608_v4, %v5199_v24 }
 0xabb   :  { %v9752_v4 = vmul.f32 %v5203_v13, %v9461_v5  ;;  %vm5301_vm10 = vweird.f32 %v9670_v18 }
 0xabc   :  { %v9659_v50 = vadd.f32 1e-05, %v5165_v46  ;;  %v5206_v32 = vmul.f32 %v9626_v61, %v5205_v17  ;;  %v9707_v17 = vmul.f32 %v5223_v57, %v9445_v14  ;;  %v5236_v46 = vmul.f32 %v9638_v36, %v5235_v38  ;;  %v9721_v59 = vpop.eup %6349  ;;  %vm9857_vm15 = vmor %vm5300_vm14, %vm5301_vm10 }
 0xabd   :  { %v5266_v14 = vmul.f32 %v9652_v29, %v5265_v43  ;;  %v5286_v57 = vmul.f32 %v9661_v12, %v5285_v62  ;;  %v5227_v38 = vmul.f32 0.5, %v5226_v51  ;;  %v5305_v2 = vmul.f32 %v9721_v59, %v9650_v16 }
 0xabe   :  { %6351 = vrsqrt.f32 %v9659_v50  ;;  %v5207_v21 = vmul.f32 0.5, %v5206_v32  ;;  %v5237_v40 = vmul.f32 0.5, %v5236_v46  ;;  %v5297_v28 = vmul.f32 0.5, %v5296_v22 }
 0xabf   :  { %v5267_v15 = vmul.f32 0.5, %v5266_v14  ;;  %v5287_v46 = vmul.f32 0.5, %v5286_v57  ;;  %v5228_v7 = vsub.f32 1.5, %v5227_v38  ;;  %v5306_v22 = vmul.f32 %v9721_v59, %v5305_v2 }
 0xac0   :  { %v5208_v62 = vsub.f32 1.5, %v5207_v21  ;;  %v5278_v21 = vsub.f32 1.5, %v5277_v26  ;;  %vm5320_vm3 = vweird.f32 %v9659_v50 }
 0xac1   :  { %v5268_v57 = vsub.f32 1.5, %v5267_v15  ;;  %v5288_v38 = vsub.f32 1.5, %v5287_v46  ;;  %v5229_v5 = vmul.f32 %v9630_v54, %v5228_v7  ;;  %v5307_v46 = vmul.f32 0.5, %v5306_v22 }
 0xac2   :  { %v5209_v24 = vmul.f32 %v9626_v61, %v5208_v62  ;;  %v5279_v53 = vmul.f32 %v9635_v58, %v5278_v21 }
 0xac3   :  { %v5269_v19 = vmul.f32 %v9652_v29, %v5268_v57  ;;  %v5289_v15 = vmul.f32 %v9661_v12, %v5288_v38  ;;  %v5233_v57 = vsel %vm9773_vm2, %v9630_v54, %v5229_v5  ;;  %vm5311_vm2 = vweird.f32 %v9721_v59 }
 0xac4   :  { %v9726_v32 = vpop.eup %6351  ;;  %v5348_v9 = vmul.f32 %v5233_v57, %v9476_v56 }
 0xac5   :  { %v5315_v23 = vmul.f32 %v9726_v32, %v9659_v50  ;;  %v5273_v33 = vsel %vm9827_vm11, %v9652_v29, %v5269_v19  ;;  %vm5321_vm4 = vweird.f32 %v9726_v32 }
 0xac6   :  { %vm9903_vm7 = vmor %vm5320_vm3, %vm5321_vm4 }
 0xac7   :  { %v5316_v43 = vmul.f32 %v9726_v32, %v5315_v23 }
 0xaff   :  { %v5148_v42 = vpop.xlane.xlu1 %5147 }
 0xb00   :  { %v5166_v47 = vmul.f32 %v5148_v42, %v10273_v49  ;;  %v5257_v42 = vmul.f32 0.5, %v5256_v48  ;;  %v5238_v48 = vsub.f32 1.5, %v5237_v40  ;;  %v5298_v40 = vsub.f32 1.5, %v5297_v28 }
 0xb02   :  { %v9739_v51 = vadd.f32 1e-05, %v5166_v47  ;;  %v5258_v14 = vsub.f32 1.5, %v5257_v42  ;;  %v5239_v42 = vmul.f32 %v9638_v36, %v5238_v48  ;;  %v5299_v3 = vmul.f32 %v9670_v18, %v5298_v40 }
 0xb03   :  { %v5317_v48 = vmul.f32 0.5, %v5316_v43  ;;  %v9869_v43 = vpop.permute.xlu2 %5360 }
 0xb04   :  { %6353 = vrsqrt.f32 %v9739_v51  ;;  %v5243_v54 = vsel %vm9800_vm8, %v9638_v36, %v5239_v42  ;;  %v5303_v29 = vsel %vm9857_vm15, %v9670_v18, %v5299_v3  ;;  %v5366_v23 = vmul.f32 %v9869_v43, %v9707_v17 }
 0xb05   :  { %v5318_v26 = vsub.f32 1.5, %v5317_v48  ;;  %v5355_v18 = vmul.f32 %v5303_v29, %v9524_v35  ;;  %vm5330_vm8 = vweird.f32 %v9739_v51 }
 0xb07   :  { %v5151_v47 = vpop.xlane.xlu0 %5150 }
 0xb08   :  { %v5167_v62 = vmul.f32 %v5151_v47, %v10273_v49  ;;  %v5259_v49 = vmul.f32 %v9644_v31, %v5258_v14  ;;  %v5213_v14 = vsel %vm9762_vm1, %v9626_v61, %v5209_v24  ;;  %v5283_v61 = vsel %vm9787_vm5, %v9635_v58, %v5279_v53 }
 0xb09   :  { %v5293_v58 = vsel %vm9844_vm13, %v9661_v12, %v5289_v15  ;;  %v5346_v47 = vmul.f32 %v5213_v14, %v9473_v41  ;;  %v5353_v5 = vmul.f32 %v5283_v61, %v9497_v63  ;;  %v5349_v12 = vmul.f32 %v5243_v54, %v9489_v6 }
 0xb0a   :  { %v9781_v28 = vpop.eup %6353  ;;  %v9794_v30 = vadd.f32 1e-05, %v5167_v62  ;;  %v5263_v45 = vsel %vm9810_vm9, %v9644_v31, %v5259_v49  ;;  %v5308_v31 = vsub.f32 1.5, %v5307_v46  ;;  %v5352_v53 = vmul.f32 %v5273_v33, %v9508_v34 }
 0xb0b   :  { %v5325_v7 = vmul.f32 %v9781_v28, %v9739_v51  ;;  %v5351_v40 = vmul.f32 %v5263_v45, %v9492_v27  ;;  %v5354_v41 = vmul.f32 %v5293_v58, %v9514_v37  ;;  %vm5310_vm1 = vweird.f32 %v9650_v16 }
 0xb0c   :  { %6355 = vrsqrt.f32 %v9794_v30  ;;  %v5309_v56 = vmul.f32 %v9721_v59, %v5308_v31  ;;  %v5319_v27 = vmul.f32 %v9726_v32, %v5318_v26  ;;  %v5363_v63 = vmul.f32 %v9869_v43, %v9701_v25  ;;  %vm9888_vm6 = vmor %vm5310_vm1, %vm5311_vm2 }
 0xb0d   :  { %v5326_v38 = vmul.f32 %v9781_v28, %v5325_v7  ;;  %v5364_v16 = vmul.f32 %v9869_v43, %v9752_v4  ;;  %v5365_v34 = vmul.f32 %v9869_v43, %v5346_v47  ;;  %vm5331_vm5 = vweird.f32 %v9781_v28  ;;  %v10305_v47 = vld [vmem:[#allocation16_spill] sm:$0xff] }
 0xb0e   :  { %v5367_v49 = vmul.f32 %v9869_v43, %v5348_v9  ;;  %v5368_v25 = vmul.f32 %v9869_v43, %v5349_v12  ;;  %v5369_v4 = vmul.f32 %v9869_v43, %v9713_v60  ;;  %v5313_v13 = vsel %vm9888_vm6, %v9721_v59, %v5309_v56  ;;  %vm9912_vm9 = vmor %vm5330_vm8, %vm5331_vm5  ;;  %v10309_v56 = vld [vmem:[#allocation22_spill] sm:$0xff] }
 0xb0f   :  { %v5327_v22 = vmul.f32 0.5, %v5326_v38  ;;  %v5370_v15 = vmul.f32 %v9869_v43, %v5351_v40  ;;  %v5323_v60 = vsel %vm9903_vm7, %v9726_v32, %v5319_v27  ;;  %v5356_v14 = vmul.f32 %v5313_v13, %v9531_v55  ;;  %v10307_v40 = vld [vmem:[#allocation10_spill] sm:$0xff]  ;;  %v10310_v27 = vld [vmem:[#allocation7_spill] sm:$0xff] }
 0xb10   :  { %v5371_v57 = vmul.f32 %v9869_v43, %v5352_v53  ;;  %v5372_v32 = vmul.f32 %v9869_v43, %v5353_v5  ;;  %v5357_v38 = vmul.f32 %v5323_v60, %v9538_v8  ;;  %vm5340_vm11 = vweird.f32 %v9794_v30  ;;  %v10308_v53 = vld [vmem:[#allocation19_spill] sm:$0xff]  ;;  %v10315_v13 = vld [vmem:[#allocation18_spill] sm:$0xff] }
 0xb11   :  { %v5328_v62 = vsub.f32 1.5, %v5327_v22  ;;  %v5373_v8 = vmul.f32 %v9869_v43, %v5354_v41 }
 0xb12   :  { %v6356_v2 = vpop.eup %6355  ;;  %v5376_v26 = vmul.f32 %v9869_v43, %v5357_v38 }
 0xb13   :  { %v5335_v6 = vmul.f32 %v6356_v2, %v9794_v30  ;;  %v5329_v37 = vmul.f32 %v9781_v28, %v5328_v62  ;;  %vm5341_vm10 = vweird.f32 %v6356_v2 }
 0xb14   :  { %vm5342_vm12 = vmor %vm5340_vm11, %vm5341_vm10 }
 0xb15   :  { %v5336_v35 = vmul.f32 %v6356_v2, %v5335_v6  ;;  %v5333_v21 = vsel %vm9912_vm9, %v9781_v28, %v5329_v37 }
 0xb16   :  { %v5358_v45 = vmul.f32 %v5333_v21, %v9547_v52 }
 0xb17   :  { %v5337_v17 = vmul.f32 0.5, %v5336_v35  ;;  %v5380_v46 = vpop.permute.xlu1 %5379  ;;  %v10312_v35 = vld [vmem:[#allocation12_spill] sm:$0xff] }
 0xb18   :  { %v5382_v50 = vadd.f32 %v5380_v46, %v5363_v63  ;;  %v5383_v59 = vadd.f32 %v5380_v46, %v5364_v16  ;;  %v5384_v48 = vadd.f32 %v5380_v46, %v5365_v34  ;;  %v5385_v51 = vadd.f32 %v5380_v46, %v5366_v23  ;;  %v10311_v34 = vld [vmem:[#allocation32_spill] sm:$0xff] }
 0xb19   :  { %v5338_v3 = vsub.f32 1.5, %v5337_v17  ;;  %v5386_v44 = vadd.f32 %v5380_v46, %v5367_v49  ;;  %v5387_v54 = vadd.f32 %v5380_v46, %v5368_v25  ;;  %v5388_v28 = vadd.f32 %v5380_v46, %v5369_v4  ;;  %v10313_v23 = vld [vmem:[#allocation8_spill] sm:$0xff]  ;;  %v10314_v25 = vld [vmem:[#allocation21_spill] sm:$0xff] }
 0xb1a   :  { %v5398_v24 = vadd.f32 %v5382_v50, %v9176_v1  ;;  %v5399_v55 = vadd.f32 %v5383_v59, %v9179_v0  ;;  %v5389_v58 = vadd.f32 %v5380_v46, %v5370_v15  ;;  %v5400_v36 = vadd.f32 %v5384_v48, %v9205_v20 }
 0xb1b   :  { %v5339_v61 = vmul.f32 %v6356_v2, %v5338_v3  ;;  %v5401_v31 = vadd.f32 %v5385_v51, %v9202_v10  ;;  %v5390_v22 = vadd.f32 %v5380_v46, %v5371_v57  ;;  %v5402_v52 = vadd.f32 %v5386_v44, %v9226_v39 }
 0xb1c   :  { %5414 = vst.msk [vmem:[%s10018_s5] sm:$0xff] %vm62_vm0, %v5398_v24  ;;  %v5374_v1 = vmul.f32 %v9869_v43, %v5355_v18  ;;  %v5391_v0 = vadd.f32 %v5380_v46, %v5372_v32  ;;  %v5403_v9 = vadd.f32 %v5387_v54, %v10305_v47  ;;  %v5375_v10 = vmul.f32 %v9869_v43, %v5356_v14 }
 0xb1d   :  { %v5343_v33 = vsel %vm5342_vm12, %v6356_v2, %v5339_v61  ;;  %5415 = vst.msk [vmem:[%s10018_s5 + $0x8] sm:$0xff] %vm62_vm0, %v5399_v55  ;;  %v5377_v20 = vmul.f32 %v9869_v43, %v5358_v45  ;;  %v5392_v39 = vadd.f32 %v5380_v46, %v5373_v8  ;;  %v5405_v62 = vadd.f32 %v5389_v58, %v10307_v40 }
 0xb1e   :  { %v5359_v30 = vmul.f32 %v5343_v33, %v9554_v11  ;;  %v10306_v11 = vld [vmem:[#allocation29_spill] sm:$0xff]  ;;  %5416 = vst.msk [vmem:[%s10018_s5 + $0x10] sm:$0xff] %vm62_vm0, %v5400_v36  ;;  %v5393_v12 = vadd.f32 %v5380_v46, %v5374_v1  ;;  %v5394_v2 = vadd.f32 %v5380_v46, %v5375_v10  ;;  %v5406_v41 = vadd.f32 %v5390_v22, %v10308_v53 }
 0xb1f   :  { %v5404_v29 = vadd.f32 %v5388_v28, %v10306_v11  ;;  %5417 = vst.msk [vmem:[%s10018_s5 + $0x18] sm:$0xff] %vm62_vm0, %v5401_v31  ;;  %v5395_v18 = vadd.f32 %v5380_v46, %v5376_v26  ;;  %v5407_v6 = vadd.f32 %v5391_v0, %v10309_v56  ;;  %v5408_v63 = vadd.f32 %v5392_v39, %v10310_v27 }
 0xb20   :  { %v5378_v5 = vmul.f32 %v9869_v43, %v5359_v30  ;;  %5418 = vst.msk [vmem:[%s10018_s5 + $0x20] sm:$0xff] %vm62_vm0, %v5402_v52  ;;  %v5396_v43 = vadd.f32 %v5380_v46, %v5377_v20  ;;  %v5409_v37 = vadd.f32 %v5393_v12, %v10311_v34  ;;  %v5410_v42 = vadd.f32 %v5394_v2, %v10312_v35 }
 0xb21   :  { %5419 = vst.msk [vmem:[%s10018_s5 + $0x28] sm:$0xff] %vm62_vm0, %v5403_v9  ;;  %v5411_v49 = vadd.f32 %v5395_v18, %v10313_v23 }
 0xb22   :  { %5420 = vst.msk [vmem:[%s10018_s5 + $0x30] sm:$0xff] %vm62_vm0, %v5404_v29  ;;  %v5397_v16 = vadd.f32 %v5380_v46, %v5378_v5  ;;  %v5412_v4 = vadd.f32 %v5396_v43, %v10314_v25 }
 0xb23   :  { %5421 = vst.msk [vmem:[%s10018_s5 + $0x38] sm:$0xff] %vm62_vm0, %v5405_v62 }
 0xb24   :  { %5422 = vst.msk [vmem:[%s10018_s5 + $0x40] sm:$0xff] %vm62_vm0, %v5406_v41  ;;  %v5413_v19 = vadd.f32 %v5397_v16, %v10315_v13 }
 0xb25   :  { %5423 = vst.msk [vmem:[%s10018_s5 + $0x48] sm:$0xff] %vm62_vm0, %v5407_v6 }
 0xb26   :  { %5424 = vst.msk [vmem:[%s10018_s5 + $0x50] sm:$0xff] %vm62_vm0, %v5408_v63 }
 0xb27   :  { %5425 = vst.msk [vmem:[%s10018_s5 + $0x58] sm:$0xff] %vm62_vm0, %v5409_v37 }
 0xb28   :  { %5426 = vst.msk [vmem:[%s10018_s5 + $0x60] sm:$0xff] %vm62_vm0, %v5410_v42 }
 0xb29   :  { %5427 = vst.msk [vmem:[%s10018_s5 + $0x68] sm:$0xff] %vm62_vm0, %v5411_v49 }
 0xb2a   :  { %5428 = vst.msk [vmem:[%s10018_s5 + $0x70] sm:$0xff] %vm62_vm0, %v5412_v4 }
 0xb2b   :  { %5429 = vst.msk [vmem:[%s10018_s5 + $0x78] sm:$0xff] %vm62_vm0, %v5413_v19 }

</bundles_post_ra>
